<compile_context>
chip_gen: v6e
topology: v6e:2x2x1
jax: 0.10.0
libtpu: 0.0.40
codegen_flags: <defaults>
</compile_context>

<pallas_src>
import functools
import numpy as np
import jax
import jax.numpy as jnp
from jax.experimental import pallas as pl
from jax.experimental.pallas import tpu as pltpu

VMEM_LIMIT = 48 * 1024 * 1024   # explicit scoped-VMEM ceiling; safe on v5e/v6e/v7x


def _round_up(x, m):
    return ((x + m - 1) // m) * m


# ------------------------------------------------------------------ Pallas GEMM kernels
def _gemm_kernel(a_ref, b_ref, bias_ref, o_ref, *, activation):
    # Single-shot: whole K resident, fused bias+activation, write straight to o_ref.
    r = jnp.dot(a_ref[...], b_ref[...], preferred_element_type=jnp.float32)
    r = r + bias_ref[...]
    if activation == "relu":
        r = jnp.maximum(r, 0.0)
    elif activation == "sigmoid":
        r = jax.nn.sigmoid(r)
    o_ref[...] = r


def _gemm_acc_kernel(a_ref, b_ref, bias_ref, o_ref, acc_ref, *, activation):
    # K-blocked reduction with f32 VMEM accumulator (used only for the 32768-K linear).
    k = pl.program_id(2)

    @pl.when(k == 0)
    def _init():
        acc_ref[...] = jnp.zeros_like(acc_ref)

    acc_ref[...] += jnp.dot(a_ref[...], b_ref[...], preferred_element_type=jnp.float32)

    @pl.when(k == pl.num_programs(2) - 1)
    def _fin():
        r = acc_ref[...] + bias_ref[...]
        if activation == "relu":
            r = jnp.maximum(r, 0.0)
        elif activation == "sigmoid":
            r = jax.nn.sigmoid(r)
        o_ref[...] = r.astype(o_ref.dtype)


def _pick_tiles(M, K, N):
    tm = 128 if M >= 128 else 16                     # 16-row min: bf16 sublane packing
    tk = 8192 if K > 8192 else _round_up(K, 128)     # single K block whenever it fits
    if N <= 256:
        tn = _round_up(N, 128)
    elif N <= 4096:
        tn = 256                                     # >=2 parallel N tiles (v7x megacore)
    else:
        tn = 2048                                    # lane-dense stores for the big linear
    return tm, tk, tn


def pallas_gemm(a, w, bias, activation="none"):
    """act(a @ w + bias); a:(M,K), w:(K,N), bias:(N,). bf16 inputs, f32 accumulate."""
    M, K = a.shape
    K2, N = w.shape
    assert K == K2
    tm, tk, tn = _pick_tiles(M, K, N)
    Mp, Kp, Np = _round_up(M, tm), _round_up(K, tk), _round_up(N, tn)

    a_p = a.astype(jnp.bfloat16)
    w_p = w.astype(jnp.bfloat16)
    if (Mp, Kp) != (M, K):
        a_p = jnp.pad(a_p, ((0, Mp - M), (0, Kp - K)))
    if (Kp, Np) != (K, N):
        w_p = jnp.pad(w_p, ((0, Kp - K), (0, Np - N)))
    b_p = bias.astype(jnp.float32)
    if Np != N:
        b_p = jnp.pad(b_p, (0, Np - N))
    b_p = b_p.reshape(1, Np)

    nk = Kp // tk
    if nk == 1:
        out = pl.pallas_call(
            functools.partial(_gemm_kernel, activation=activation),
            out_shape=jax.ShapeDtypeStruct((Mp, Np), jnp.float32),
            grid_spec=pltpu.PrefetchScalarGridSpec(
                num_scalar_prefetch=0,
                grid=(Mp // tm, Np // tn),
                in_specs=[
                    pl.BlockSpec((tm, Kp), lambda i, j: (i, 0)),
                    pl.BlockSpec((Kp, tn), lambda i, j: (0, j)),
                    pl.BlockSpec((1, tn), lambda i, j: (0, j)),
                ],
                out_specs=pl.BlockSpec((tm, tn), lambda i, j: (i, j)),
            ),
            compiler_params=pltpu.CompilerParams(
                dimension_semantics=("parallel", "parallel"),
                vmem_limit_bytes=VMEM_LIMIT),
        )(a_p, w_p, b_p)
    else:
        out = pl.pallas_call(
            functools.partial(_gemm_acc_kernel, activation=activation),
            out_shape=jax.ShapeDtypeStruct((Mp, Np), jnp.float32),
            grid_spec=pltpu.PrefetchScalarGridSpec(
                num_scalar_prefetch=0,
                grid=(Mp // tm, Np // tn, nk),
                in_specs=[
                    pl.BlockSpec((tm, tk), lambda i, j, k: (i, k)),
                    pl.BlockSpec((tk, tn), lambda i, j, k: (k, j)),
                    pl.BlockSpec((1, tn), lambda i, j, k: (0, j)),
                ],
                out_specs=pl.BlockSpec((tm, tn), lambda i, j, k: (i, j)),
                scratch_shapes=[pltpu.VMEM((tm, tn), jnp.float32)],
            ),
            compiler_params=pltpu.CompilerParams(
                dimension_semantics=("parallel", "parallel", "arbitrary"),
                vmem_limit_bytes=VMEM_LIMIT),
        )(a_p, w_p, b_p)
    if (Mp, Np) != (M, N):
        out = out[:M, :N]
    return out


# ------------------------------------------------------------------ fused bottleneck (el2 + dl1)
def _bottleneck_kernel(z_ref, w1_ref, b1_ref, w2_ref, b2_ref, o_ref):
    e = jnp.dot(z_ref[...], w1_ref[...], preferred_element_type=jnp.float32) + b1_ref[...]
    d = jnp.dot(e.astype(jnp.bfloat16), w2_ref[...],
                preferred_element_type=jnp.float32) + b2_ref[...]
    o_ref[...] = jnp.maximum(d, 0.0)


def pallas_bottleneck(z, w1, b1, w2, b2):
    """relu((z @ w1 + b1) @ w2 + b2); everything resident in VMEM (tiny shapes)."""
    M, K1 = z.shape
    N1 = w1.shape[1]
    N2 = w2.shape[1]
    Mp = _round_up(M, 16)
    z_p = z.astype(jnp.bfloat16)
    if Mp != M:
        z_p = jnp.pad(z_p, ((0, Mp - M), (0, 0)))
    out = pl.pallas_call(
        _bottleneck_kernel,
        out_shape=jax.ShapeDtypeStruct((Mp, N2), jnp.float32),
        grid_spec=pltpu.PrefetchScalarGridSpec(
            num_scalar_prefetch=0,
            grid=(1,),
            in_specs=[
                pl.BlockSpec((Mp, K1), lambda i: (0, 0)),
                pl.BlockSpec((K1, N1), lambda i: (0, 0)),
                pl.BlockSpec((1, N1), lambda i: (0, 0)),
                pl.BlockSpec((N1, N2), lambda i: (0, 0)),
                pl.BlockSpec((1, N2), lambda i: (0, 0)),
            ],
            out_specs=pl.BlockSpec((Mp, N2), lambda i: (0, 0)),
        ),
        compiler_params=pltpu.CompilerParams(
            dimension_semantics=("arbitrary",),
            vmem_limit_bytes=VMEM_LIMIT),
    )(z_p, w1.astype(jnp.bfloat16), b1.astype(jnp.float32).reshape(1, -1),
      w2.astype(jnp.bfloat16), b2.astype(jnp.float32).reshape(1, -1))
    return out[:M]


# ------------------------------------------------------------------ conv lowering (glue)
def _im2col(x, k, stride, pad, k_align=128):
    n, h, w, c = x.shape
    xp = jnp.pad(x, ((0, 0), (pad, pad), (pad, pad), (0, 0)))
    ho = (h + 2 * pad - k) // stride + 1
    wo = (w + 2 * pad - k) // stride + 1
    cols = [xp[:, dy:dy + stride * ho:stride, dx:dx + stride * wo:stride, :]
            for dy in range(k) for dx in range(k)]
    kk = k * k * c
    kp = _round_up(kk, k_align)
    if kp > kk:                      # fold K alignment into the concat (no extra pad pass)
        cols.append(jnp.zeros((n, ho, wo, kp - kk), x.dtype))
    patches = jnp.concatenate(cols, axis=-1)          # (N, Ho, Wo, Kp)
    return patches.reshape(n * ho * wo, kp), (n, ho, wo), kk


def conv3x3(x, w_hwio, b, stride=1, pad=1, activation="none"):
    x = x.astype(jnp.bfloat16)                        # halves im2col patch HBM bytes
    patches, (n, ho, wo), kk = _im2col(x, 3, stride, pad)
    cout = w_hwio.shape[-1]
    w2d = w_hwio.astype(jnp.bfloat16).reshape(kk, cout)
    if patches.shape[1] != kk:
        w2d = jnp.pad(w2d, ((0, patches.shape[1] - kk), (0, 0)))
    y = pallas_gemm(patches, w2d, b, activation)
    return y.reshape(n, ho, wo, cout)


def conv_transpose3x3_s1(x, w_hwio_flip, b, padding, activation="none"):
    # stride-1 ConvTranspose2d == forward conv, pad = k-1-padding, spatially-flipped kernel.
    # Weights are stored pre-flipped (we initialize them ourselves).
    return conv3x3(x, w_hwio_flip, b, stride=1, pad=2 - padding, activation=activation)


def conv_transpose3x3_s2(x, w_hwio, b):
    # ConvTranspose2d(k=3, stride=2, padding=0):
    #   out[2*iy+ky, 2*ix+kx, co] += sum_ci x[iy,ix,ci] * W[ky,kx,ci,co]
    # Lowered as one dense GEMM over ci (no dilated zeros -> ~4x fewer MACs / bytes than the
    # dilate+3x3-conv lowering) followed by a zero-free parity interleave (dense ops only).
    n, h, w, c = x.shape
    cout = w_hwio.shape[-1]
    x2d = x.astype(jnp.bfloat16).reshape(n * h * w, c)
    wr = jnp.transpose(w_hwio.astype(jnp.bfloat16), (2, 0, 1, 3)).reshape(c, 9 * cout)
    y = pallas_gemm(x2d, wr, jnp.zeros((9 * cout,), jnp.float32), "none")
    y = y.reshape(n, h, w, 3, 3, cout)                # (n, iy, ix, ky, kx, co)

    # rows: oy = 2*iy + ky   (even rows mix ky in {0,2}; odd rows are ky == 1)
    ev = (jnp.pad(y[:, :, :, 0], ((0, 0), (0, 1), (0, 0), (0, 0), (0, 0)))
          + jnp.pad(y[:, :, :, 2], ((0, 0), (1, 0), (0, 0), (0, 0), (0, 0))))  # (n,h+1,w,3,co)
    od = y[:, :, :, 1]                                                          # (n,h,  w,3,co)
    rows = jnp.concatenate(
        [jnp.stack([ev[:, :h], od], axis=2).reshape(n, 2 * h, w, 3, cout),
         ev[:, h:]], axis=1)                                                    # (n,2h+1,w,3,co)

    # cols: ox = 2*ix + kx
    evc = (jnp.pad(rows[:, :, :, 0], ((0, 0), (0, 0), (0, 1), (0, 0)))
           + jnp.pad(rows[:, :, :, 2], ((0, 0), (0, 0), (1, 0), (0, 0))))       # (n,2h+1,w+1,co)
    odc = rows[:, :, :, 1]                                                      # (n,2h+1,w,  co)
    out = jnp.concatenate(
        [jnp.stack([evc[:, :, :w], odc], axis=3).reshape(n, 2 * h + 1, 2 * w, cout),
         evc[:, :, w:]], axis=2)                                                # (n,2h+1,2w+1,co)
    return out + b


# ------------------------------------------------------------------ small elementwise glue
def batchnorm_relu(x, gamma, beta, eps=1e-5):
    # PyTorch default (training-mode) BatchNorm2d: per-channel batch mean / biased variance.
    mean = jnp.mean(x, axis=(0, 1, 2), keepdims=True)
    var = jnp.mean((x - mean) ** 2, axis=(0, 1, 2), keepdims=True)
    y = (x - mean) * jax.lax.rsqrt(var + eps) * gamma + beta
    return jnp.maximum(y, 0.0)


def resize_nearest(x, out_h, out_w):
    # F.interpolate(..., mode='nearest'): src = floor(dst * in/out)
    n, h, w, c = x.shape
    hi = jnp.floor(jnp.arange(out_h) * (h / out_h)).astype(jnp.int32)
    wi = jnp.floor(jnp.arange(out_w) * (w / out_w)).astype(jnp.int32)
    return x[:, hi][:, :, wi]


# ------------------------------------------------------------------ params + forward
def init_params(key, in_shape, enc_dim):
    c_in = in_shape[0]
    ks = jax.random.split(key, 11)

    def w_init(k, shape, fan_in):
        # Weights stored in bf16 so Pallas GEMMs stream half the HBM bytes; biases/BN stay f32.
        w = jax.random.normal(k, shape, jnp.float32) * np.sqrt(2.0 / fan_in)
        return w.astype(jnp.bfloat16)

    z = lambda *s: jnp.zeros(s, jnp.float32)
    o = lambda *s: jnp.ones(s, jnp.float32)
    p = {}
    # encoder convs (HWIO)
    p["ec1_w"], p["ec1_b"] = w_init(ks[0], (3, 3, c_in, 16), 9 * c_in), z(16)
    p["ec2_w"], p["ec2_b"] = w_init(ks[1], (3, 3, 16, 32), 9 * 16), z(32)
    p["ec3_w"], p["ec3_b"] = w_init(ks[2], (3, 3, 32, 64), 9 * 32), z(64)
    p["ec4_w"], p["ec4_b"] = w_init(ks[3], (3, 3, 64, 128), 9 * 64), z(128)
    p["ebn2_g"], p["ebn2_b"] = o(32), z(32)
    p["ebn3_g"], p["ebn3_b"] = o(64), z(64)
    # encoder linears
    p["el1_w"], p["el1_b"] = w_init(ks[4], (128 * 16 * 16, 512), 128 * 16 * 16), z(512)
    p["el2_w"], p["el2_b"] = w_init(ks[5], (512, enc_dim), 512), z(enc_dim)
    # decoder linears
    p["dl1_w"], p["dl1_b"] = w_init(ks[6], (enc_dim, 256), enc_dim), z(256)
    p["dl2_w"], p["dl2_b"] = w_init(ks[7], (256, 128 * 16 * 16), 256), z(128 * 16 * 16)
    # decoder conv-transposes: dc1 stored as ConvTranspose HWIO; dc2/dc3 stored as the
    # spatially-flipped equivalent forward-conv HWIO weights (internal convention).
    p["dc1_w"], p["dc1_b"] = w_init(ks[8], (3, 3, 128, 64), 9 * 128), z(64)
    p["dc2_w"], p["dc2_b"] = w_init(ks[9], (3, 3, 64, 32), 9 * 64), z(32)
    p["dc3_w"], p["dc3_b"] = w_init(ks[10], (3, 3, 32, c_in), 9 * 32), z(c_in)
    p["dbn1_g"], p["dbn1_b"] = o(64), z(64)
    p["dbn2_g"], p["dbn2_b"] = o(32), z(32)
    return p


def forward(params, x_nchw):
    p = params
    x = jnp.transpose(x_nchw, (0, 2, 3, 1)).astype(jnp.float32)     # NCHW -> NHWC
    n, h_in, w_in = x.shape[0], x.shape[1], x.shape[2]

    # ---------------- encoder ----------------
    x = conv3x3(x, p["ec1_w"], p["ec1_b"], stride=2, pad=1, activation="relu")
    x = conv3x3(x, p["ec2_w"], p["ec2_b"], stride=1, pad=1)
    x = batchnorm_relu(x, p["ebn2_g"], p["ebn2_b"])
    x = conv3x3(x, p["ec3_w"], p["ec3_b"], stride=1, pad=1)
    x = batchnorm_relu(x, p["ebn3_g"], p["ebn3_b"])
    x = conv3x3(x, p["ec4_w"], p["ec4_b"], stride=1, pad=1, activation="relu")
    z = x.reshape(n, -1)                                            # flatten (NHWC ordering)
    z = pallas_gemm(z, p["el1_w"], p["el1_b"], "relu")              # 32768 -> 512

    # ---------------- bottleneck + decoder ----------------
    # encoder-out linear (no act) fused with the first decoder linear (ReLU)
    d = pallas_bottleneck(z, p["el2_w"], p["el2_b"], p["dl1_w"], p["dl1_b"])
    d = pallas_gemm(d, p["dl2_w"], p["dl2_b"], "relu")              # 256 -> 32768
    d = d.reshape(n, 16, 16, 128)                                   # unflatten (NHWC ordering)
    d = conv_transpose3x3_s2(d, p["dc1_w"], p["dc1_b"])             # 16x16 -> 33x33
    d = batchnorm_relu(d, p["dbn1_g"], p["dbn1_b"])
    d = conv_transpose3x3_s1(d, p["dc2_w"], p["dc2_b"], padding=1)
    d = batchnorm_relu(d, p["dbn2_g"], p["dbn2_b"])
    d = conv_transpose3x3_s1(d, p["dc3_w"], p["dc3_b"], padding=1,
                             activation="sigmoid")                  # sigmoid fused in GEMM
    d = resize_nearest(d, h_in, w_in)                               # F.interpolate nearest
    return jnp.transpose(d, (0, 3, 1, 2))                           # NHWC -> NCHW


if __name__ == "__main__":
    # The module hardcodes a 128*16*16 flatten, which forces 32x32 spatial input.
    in_shape = (3, 32, 32)
    encoded_space_dim = 32
    key = jax.random.PRNGKey(0)
    pkey, xkey = jax.random.split(key)
    params = init_params(pkey, in_shape, encoded_space_dim)
    x = jax.random.normal(xkey, (2,) + in_shape, dtype=jnp.float32)

    y = jax.jit(forward)(params, x)
    jax.block_until_ready(y)
    assert y.shape == (2,) + in_shape, y.shape
    assert bool(jnp.all(jnp.isfinite(y)))
    print("KERNEL_OK")
</pallas_src>

<mosaic_0001>
module attributes {stable_mosaic.version = 11 : i64} {
  func.func @_gemm_kernel(%arg0: i32, %arg1: i32, %arg2: memref<128x128xbf16, #tpu.memory_space<vmem>>, %arg3: memref<128x128xbf16, #tpu.memory_space<vmem>>, %arg4: memref<1x128xf32, #tpu.memory_space<vmem>>, %arg5: memref<128x128xf32, #tpu.memory_space<vmem>>) attributes {dimension_semantics = [#tpu.dimension_semantics<parallel>, #tpu.dimension_semantics<parallel>], iteration_bounds = array<i64: 4, 1>, scalar_prefetch = 0 : i64, scratch_operands = 0 : i64, tpu.core_type = #tpu.core_type<tc>, window_params = [{transform_indices = @transform_0, window_bounds = array<i64: 128, 128>}, {transform_indices = @transform_1, window_bounds = array<i64: 128, 128>}, {transform_indices = @transform_2, window_bounds = array<i64: 1, 128>}, {transform_indices = @transform_3, window_bounds = array<i64: 128, 128>}]} {
    %c0 = arith.constant 0 : index
    %c0_0 = arith.constant 0 : index
    %0 = vector.load %arg2[%c0, %c0_0] : memref<128x128xbf16, #tpu.memory_space<vmem>>, vector<128x128xbf16>
    %c0_1 = arith.constant 0 : index
    %c0_2 = arith.constant 0 : index
    %1 = vector.load %arg3[%c0_1, %c0_2] : memref<128x128xbf16, #tpu.memory_space<vmem>>, vector<128x128xbf16>
    %cst = arith.constant dense<0.000000e+00> : vector<128x128xf32>
    %2 = tpu.matmul %0, %1, %cst {dimension_numbers = #tpu.dot_dimension_numbers<[1], [0], [0], [1], [0, 0, 1, 1], [], []>} : vector<128x128xbf16>, vector<128x128xbf16>, vector<128x128xf32> -> vector<128x128xf32>
    %c0_3 = arith.constant 0 : index
    %c0_4 = arith.constant 0 : index
    %3 = vector.load %arg4[%c0_3, %c0_4] : memref<1x128xf32, #tpu.memory_space<vmem>>, vector<1x128xf32>
    %4 = vector.broadcast %3 : vector<1x128xf32> to vector<128x128xf32>
    %5 = arith.addf %2, %4 : vector<128x128xf32>
    %cst_5 = arith.constant 0.000000e+00 : f32
    %6 = vector.broadcast %cst_5 : f32 to vector<128x128xf32>
    %7 = arith.maximumf %5, %6 : vector<128x128xf32>
    %c0_6 = arith.constant 0 : index
    %c0_7 = arith.constant 0 : index
    %8 = vector.load %arg5[%c0_6, %c0_7] : memref<128x128xf32, #tpu.memory_space<vmem>>, vector<128x128xf32>
    tpu.vector_store %arg5[%c0_6, %c0_7], %7 {strides = array<i32>} : memref<128x128xf32, #tpu.memory_space<vmem>>, vector<128x128xf32>,
    return
  }
  func.func @transform_0(%arg0: i32, %arg1: i32) -> (i32, i32) {
    %c0_i32 = arith.constant 0 : i32
    %c0_i32_0 = arith.constant 0 : i32
    return %arg0, %c0_i32 : i32, i32
  }
  func.func @transform_1(%arg0: i32, %arg1: i32) -> (i32, i32) {
    %c0_i32 = arith.constant 0 : i32
    %c0_i32_0 = arith.constant 0 : i32
    return %c0_i32, %arg1 : i32, i32
  }
  func.func @transform_2(%arg0: i32, %arg1: i32) -> (i32, i32) {
    %c0_i32 = arith.constant 0 : i32
    %c0_i32_0 = arith.constant 0 : i32
    return %c0_i32, %arg1 : i32, i32
  }
  func.func @transform_3(%arg0: i32, %arg1: i32) -> (i32, i32) {
    %c0_i32 = arith.constant 0 : i32
    return %arg0, %arg1 : i32, i32
  }
}

module attributes {stable_mosaic.version = 11 : i64} {
  func.func @_gemm_kernel(%arg0: i32, %arg1: i32, %arg2: memref<128x256xbf16, #tpu.memory_space<vmem>>, %arg3: memref<256x128xbf16, #tpu.memory_space<vmem>>, %arg4: memref<1x128xf32, #tpu.memory_space<vmem>>, %arg5: memref<128x128xf32, #tpu.memory_space<vmem>>) attributes {dimension_semantics = [#tpu.dimension_semantics<parallel>, #tpu.dimension_semantics<parallel>], iteration_bounds = array<i64: 4, 1>, scalar_prefetch = 0 : i64, scratch_operands = 0 : i64, tpu.core_type = #tpu.core_type<tc>, window_params = [{transform_indices = @transform_0, window_bounds = array<i64: 128, 256>}, {transform_indices = @transform_1, window_bounds = array<i64: 256, 128>}, {transform_indices = @transform_2, window_bounds = array<i64: 1, 128>}, {transform_indices = @transform_3, window_bounds = array<i64: 128, 128>}]} {
    %c0 = arith.constant 0 : index
    %c0_0 = arith.constant 0 : index
    %0 = vector.load %arg2[%c0, %c0_0] : memref<128x256xbf16, #tpu.memory_space<vmem>>, vector<128x256xbf16>
    %c0_1 = arith.constant 0 : index
    %c0_2 = arith.constant 0 : index
    %1 = vector.load %arg3[%c0_1, %c0_2] : memref<256x128xbf16, #tpu.memory_space<vmem>>, vector<256x128xbf16>
    %cst = arith.constant dense<0.000000e+00> : vector<128x128xf32>
    %2 = tpu.matmul %0, %1, %cst {dimension_numbers = #tpu.dot_dimension_numbers<[1], [0], [0], [1], [0, 0, 1, 1], [], []>} : vector<128x256xbf16>, vector<256x128xbf16>, vector<128x128xf32> -> vector<128x128xf32>
    %c0_3 = arith.constant 0 : index
    %c0_4 = arith.constant 0 : index
    %3 = vector.load %arg4[%c0_3, %c0_4] : memref<1x128xf32, #tpu.memory_space<vmem>>, vector<1x128xf32>
    %4 = vector.broadcast %3 : vector<1x128xf32> to vector<128x128xf32>
    %5 = arith.addf %2, %4 : vector<128x128xf32>
    %c0_5 = arith.constant 0 : index
    %c0_6 = arith.constant 0 : index
    %6 = vector.load %arg5[%c0_5, %c0_6] : memref<128x128xf32, #tpu.memory_space<vmem>>, vector<128x128xf32>
    tpu.vector_store %arg5[%c0_5, %c0_6], %5 {strides = array<i32>} : memref<128x128xf32, #tpu.memory_space<vmem>>, vector<128x128xf32>,
    return
  }
  func.func @transform_0(%arg0: i32, %arg1: i32) -> (i32, i32) {
    %c0_i32 = arith.constant 0 : i32
    %c0_i32_0 = arith.constant 0 : i32
    return %arg0, %c0_i32 : i32, i32
  }
  func.func @transform_1(%arg0: i32, %arg1: i32) -> (i32, i32) {
    %c0_i32 = arith.constant 0 : i32
    %c0_i32_0 = arith.constant 0 : i32
    return %c0_i32, %arg1 : i32, i32
  }
  func.func @transform_2(%arg0: i32, %arg1: i32) -> (i32, i32) {
    %c0_i32 = arith.constant 0 : i32
    %c0_i32_0 = arith.constant 0 : i32
    return %c0_i32, %arg1 : i32, i32
  }
  func.func @transform_3(%arg0: i32, %arg1: i32) -> (i32, i32) {
    %c0_i32 = arith.constant 0 : i32
    return %arg0, %arg1 : i32, i32
  }
}

module attributes {stable_mosaic.version = 11 : i64} {
  func.func @_gemm_kernel(%arg0: i32, %arg1: i32, %arg2: memref<128x384xbf16, #tpu.memory_space<vmem>>, %arg3: memref<384x128xbf16, #tpu.memory_space<vmem>>, %arg4: memref<1x128xf32, #tpu.memory_space<vmem>>, %arg5: memref<128x128xf32, #tpu.memory_space<vmem>>) attributes {dimension_semantics = [#tpu.dimension_semantics<parallel>, #tpu.dimension_semantics<parallel>], iteration_bounds = array<i64: 4, 1>, scalar_prefetch = 0 : i64, scratch_operands = 0 : i64, tpu.core_type = #tpu.core_type<tc>, window_params = [{transform_indices = @transform_0, window_bounds = array<i64: 128, 384>}, {transform_indices = @transform_1, window_bounds = array<i64: 384, 128>}, {transform_indices = @transform_2, window_bounds = array<i64: 1, 128>}, {transform_indices = @transform_3, window_bounds = array<i64: 128, 128>}]} {
    %c0 = arith.constant 0 : index
    %c0_0 = arith.constant 0 : index
    %0 = vector.load %arg2[%c0, %c0_0] : memref<128x384xbf16, #tpu.memory_space<vmem>>, vector<128x384xbf16>
    %c0_1 = arith.constant 0 : index
    %c0_2 = arith.constant 0 : index
    %1 = vector.load %arg3[%c0_1, %c0_2] : memref<384x128xbf16, #tpu.memory_space<vmem>>, vector<384x128xbf16>
    %cst = arith.constant dense<0.000000e+00> : vector<128x128xf32>
    %2 = tpu.matmul %0, %1, %cst {dimension_numbers = #tpu.dot_dimension_numbers<[1], [0], [0], [1], [0, 0, 1, 1], [], []>} : vector<128x384xbf16>, vector<384x128xbf16>, vector<128x128xf32> -> vector<128x128xf32>
    %c0_3 = arith.constant 0 : index
    %c0_4 = arith.constant 0 : index
    %3 = vector.load %arg4[%c0_3, %c0_4] : memref<1x128xf32, #tpu.memory_space<vmem>>, vector<1x128xf32>
    %4 = vector.broadcast %3 : vector<1x128xf32> to vector<128x128xf32>
    %5 = arith.addf %2, %4 : vector<128x128xf32>
    %c0_5 = arith.constant 0 : index
    %c0_6 = arith.constant 0 : index
    %6 = vector.load %arg5[%c0_5, %c0_6] : memref<128x128xf32, #tpu.memory_space<vmem>>, vector<128x128xf32>
    tpu.vector_store %arg5[%c0_5, %c0_6], %5 {strides = array<i32>} : memref<128x128xf32, #tpu.memory_space<vmem>>, vector<128x128xf32>,
    return
  }
  func.func @transform_0(%arg0: i32, %arg1: i32) -> (i32, i32) {
    %c0_i32 = arith.constant 0 : i32
    %c0_i32_0 = arith.constant 0 : i32
    return %arg0, %c0_i32 : i32, i32
  }
  func.func @transform_1(%arg0: i32, %arg1: i32) -> (i32, i32) {
    %c0_i32 = arith.constant 0 : i32
    %c0_i32_0 = arith.constant 0 : i32
    return %c0_i32, %arg1 : i32, i32
  }
  func.func @transform_2(%arg0: i32, %arg1: i32) -> (i32, i32) {
    %c0_i32 = arith.constant 0 : i32
    %c0_i32_0 = arith.constant 0 : i32
    return %c0_i32, %arg1 : i32, i32
  }
  func.func @transform_3(%arg0: i32, %arg1: i32) -> (i32, i32) {
    %c0_i32 = arith.constant 0 : i32
    return %arg0, %arg1 : i32, i32
  }
}

module attributes {stable_mosaic.version = 11 : i64} {
  func.func @_gemm_kernel(%arg0: i32, %arg1: i32, %arg2: memref<128x640xbf16, #tpu.memory_space<vmem>>, %arg3: memref<640x128xbf16, #tpu.memory_space<vmem>>, %arg4: memref<1x128xf32, #tpu.memory_space<vmem>>, %arg5: memref<128x128xf32, #tpu.memory_space<vmem>>) attributes {dimension_semantics = [#tpu.dimension_semantics<parallel>, #tpu.dimension_semantics<parallel>], iteration_bounds = array<i64: 4, 1>, scalar_prefetch = 0 : i64, scratch_operands = 0 : i64, tpu.core_type = #tpu.core_type<tc>, window_params = [{transform_indices = @transform_0, window_bounds = array<i64: 128, 640>}, {transform_indices = @transform_1, window_bounds = array<i64: 640, 128>}, {transform_indices = @transform_2, window_bounds = array<i64: 1, 128>}, {transform_indices = @transform_3, window_bounds = array<i64: 128, 128>}]} {
    %c0 = arith.constant 0 : index
    %c0_0 = arith.constant 0 : index
    %0 = vector.load %arg2[%c0, %c0_0] : memref<128x640xbf16, #tpu.memory_space<vmem>>, vector<128x640xbf16>
    %c0_1 = arith.constant 0 : index
    %c0_2 = arith.constant 0 : index
    %1 = vector.load %arg3[%c0_1, %c0_2] : memref<640x128xbf16, #tpu.memory_space<vmem>>, vector<640x128xbf16>
    %cst = arith.constant dense<0.000000e+00> : vector<128x128xf32>
    %2 = tpu.matmul %0, %1, %cst {dimension_numbers = #tpu.dot_dimension_numbers<[1], [0], [0], [1], [0, 0, 1, 1], [], []>} : vector<128x640xbf16>, vector<640x128xbf16>, vector<128x128xf32> -> vector<128x128xf32>
    %c0_3 = arith.constant 0 : index
    %c0_4 = arith.constant 0 : index
    %3 = vector.load %arg4[%c0_3, %c0_4] : memref<1x128xf32, #tpu.memory_space<vmem>>, vector<1x128xf32>
    %4 = vector.broadcast %3 : vector<1x128xf32> to vector<128x128xf32>
    %5 = arith.addf %2, %4 : vector<128x128xf32>
    %cst_5 = arith.constant 0.000000e+00 : f32
    %6 = vector.broadcast %cst_5 : f32 to vector<128x128xf32>
    %7 = arith.maximumf %5, %6 : vector<128x128xf32>
    %c0_6 = arith.constant 0 : index
    %c0_7 = arith.constant 0 : index
    %8 = vector.load %arg5[%c0_6, %c0_7] : memref<128x128xf32, #tpu.memory_space<vmem>>, vector<128x128xf32>
    tpu.vector_store %arg5[%c0_6, %c0_7], %7 {strides = array<i32>} : memref<128x128xf32, #tpu.memory_space<vmem>>, vector<128x128xf32>,
    return
  }
  func.func @transform_0(%arg0: i32, %arg1: i32) -> (i32, i32) {
    %c0_i32 = arith.constant 0 : i32
    %c0_i32_0 = arith.constant 0 : i32
    return %arg0, %c0_i32 : i32, i32
  }
  func.func @transform_1(%arg0: i32, %arg1: i32) -> (i32, i32) {
    %c0_i32 = arith.constant 0 : i32
    %c0_i32_0 = arith.constant 0 : i32
    return %c0_i32, %arg1 : i32, i32
  }
  func.func @transform_2(%arg0: i32, %arg1: i32) -> (i32, i32) {
    %c0_i32 = arith.constant 0 : i32
    %c0_i32_0 = arith.constant 0 : i32
    return %c0_i32, %arg1 : i32, i32
  }
  func.func @transform_3(%arg0: i32, %arg1: i32) -> (i32, i32) {
    %c0_i32 = arith.constant 0 : i32
    return %arg0, %arg1 : i32, i32
  }
}

module attributes {stable_mosaic.version = 11 : i64} {
  func.func @_gemm_acc_kernel(%arg0: i32, %arg1: i32, %arg2: i32, %arg3: memref<16x8192xbf16, #tpu.memory_space<vmem>>, %arg4: memref<8192x256xbf16, #tpu.memory_space<vmem>>, %arg5: memref<1x256xf32, #tpu.memory_space<vmem>>, %arg6: memref<16x256xf32, #tpu.memory_space<vmem>>, %arg7: memref<16x256xf32, #tpu.memory_space<vmem>>) attributes {dimension_semantics = [#tpu.dimension_semantics<parallel>, #tpu.dimension_semantics<parallel>, #tpu.dimension_semantics<arbitrary>], iteration_bounds = array<i64: 1, 2, 4>, scalar_prefetch = 0 : i64, scratch_operands = 1 : i64, tpu.core_type = #tpu.core_type<tc>, window_params = [{transform_indices = @transform_0, window_bounds = array<i64: 16, 8192>}, {transform_indices = @transform_1, window_bounds = array<i64: 8192, 256>}, {transform_indices = @transform_2, window_bounds = array<i64: 1, 256>}, {transform_indices = @transform_3, window_bounds = array<i64: 16, 256>}]} {
    %c0_i32 = arith.constant 0 : i32
    %0 = arith.cmpi eq, %arg2, %c0_i32 : i32
    %1 = arith.extui %0 : i1 to i32
    %c0_i32_0 = arith.constant 0 : i32
    %2 = arith.cmpi ne, %1, %c0_i32_0 : i32
    scf.if %2 {
      %cst_9 = arith.constant 0.000000e+00 : f32
      %12 = vector.broadcast %cst_9 : f32 to vector<16x256xf32>
      %c0_10 = arith.constant 0 : index
      %c0_11 = arith.constant 0 : index
      %13 = vector.load %arg7[%c0_10, %c0_11] : memref<16x256xf32, #tpu.memory_space<vmem>>, vector<16x256xf32>
      tpu.vector_store %arg7[%c0_10, %c0_11], %12 {strides = array<i32>} : memref<16x256xf32, #tpu.memory_space<vmem>>, vector<16x256xf32>,
    } else {
    }
    %c0 = arith.constant 0 : index
    %c0_1 = arith.constant 0 : index
    %3 = vector.load %arg7[%c0, %c0_1] : memref<16x256xf32, #tpu.memory_space<vmem>>, vector<16x256xf32>
    %c0_2 = arith.constant 0 : index
    %c0_3 = arith.constant 0 : index
    %4 = vector.load %arg3[%c0_2, %c0_3] : memref<16x8192xbf16, #tpu.memory_space<vmem>>, vector<16x8192xbf16>
    %c0_4 = arith.constant 0 : index
    %c0_5 = arith.constant 0 : index
    %5 = vector.load %arg4[%c0_4, %c0_5] : memref<8192x256xbf16, #tpu.memory_space<vmem>>, vector<8192x256xbf16>
    %cst = arith.constant dense<0.000000e+00> : vector<16x256xf32>
    %6 = tpu.matmul %4, %5, %cst {dimension_numbers = #tpu.dot_dimension_numbers<[1], [0], [0], [1], [0, 0, 1, 1], [], []>} : vector<16x8192xbf16>, vector<8192x256xbf16>, vector<16x256xf32> -> vector<16x256xf32>
    %7 = arith.addf %3, %6 : vector<16x256xf32>
    %c0_6 = arith.constant 0 : index
    %c0_7 = arith.constant 0 : index
    %8 = vector.load %arg7[%c0_6, %c0_7] : memref<16x256xf32, #tpu.memory_space<vmem>>, vector<16x256xf32>
    tpu.vector_store %arg7[%c0_6, %c0_7], %7 {strides = array<i32>} : memref<16x256xf32, #tpu.memory_space<vmem>>, vector<16x256xf32>,
    %c3_i32 = arith.constant 3 : i32
    %9 = arith.cmpi eq, %arg2, %c3_i32 : i32
    %10 = arith.extui %9 : i1 to i32
    %c0_i32_8 = arith.constant 0 : i32
    %11 = arith.cmpi ne, %10, %c0_i32_8 : i32
    scf.if %11 {
      %c0_9 = arith.constant 0 : index
      %c0_10 = arith.constant 0 : index
      %12 = vector.load %arg7[%c0_9, %c0_10] : memref<16x256xf32, #tpu.memory_space<vmem>>, vector<16x256xf32>
      %c0_11 = arith.constant 0 : index
      %c0_12 = arith.constant 0 : index
      %13 = vector.load %arg5[%c0_11, %c0_12] : memref<1x256xf32, #tpu.memory_space<vmem>>, vector<1x256xf32>
      %14 = vector.broadcast %13 : vector<1x256xf32> to vector<16x256xf32>
      %15 = arith.addf %12, %14 : vector<16x256xf32>
      %cst_13 = arith.constant 0.000000e+00 : f32
      %16 = vector.broadcast %cst_13 : f32 to vector<16x256xf32>
      %17 = arith.maximumf %15, %16 : vector<16x256xf32>
      %c0_14 = arith.constant 0 : index
      %c0_15 = arith.constant 0 : index
      %18 = vector.load %arg6[%c0_14, %c0_15] : memref<16x256xf32, #tpu.memory_space<vmem>>, vector<16x256xf32>
      tpu.vector_store %arg6[%c0_14, %c0_15], %17 {strides = array<i32>} : memref<16x256xf32, #tpu.memory_space<vmem>>, vector<16x256xf32>,
    } else {
    }
    return
  }
  func.func @transform_0(%arg0: i32, %arg1: i32, %arg2: i32) -> (i32, i32) {
    %c0_i32 = arith.constant 0 : i32
    return %arg0, %arg2 : i32, i32
  }
  func.func @transform_1(%arg0: i32, %arg1: i32, %arg2: i32) -> (i32, i32) {
    %c0_i32 = arith.constant 0 : i32
    return %arg2, %arg1 : i32, i32
  }
  func.func @transform_2(%arg0: i32, %arg1: i32, %arg2: i32) -> (i32, i32) {
    %c0_i32 = arith.constant 0 : i32
    %c0_i32_0 = arith.constant 0 : i32
    return %c0_i32, %arg1 : i32, i32
  }
  func.func @transform_3(%arg0: i32, %arg1: i32, %arg2: i32) -> (i32, i32) {
    %c0_i32 = arith.constant 0 : i32
    return %arg0, %arg1 : i32, i32
  }
}

module attributes {stable_mosaic.version = 11 : i64} {
  func.func @_bottleneck_kernel(%arg0: i32, %arg1: memref<16x512xbf16, #tpu.memory_space<vmem>>, %arg2: memref<512x32xbf16, #tpu.memory_space<vmem>>, %arg3: memref<1x32xf32, #tpu.memory_space<vmem>>, %arg4: memref<32x256xbf16, #tpu.memory_space<vmem>>, %arg5: memref<1x256xf32, #tpu.memory_space<vmem>>, %arg6: memref<16x256xf32, #tpu.memory_space<vmem>>) attributes {dimension_semantics = [#tpu.dimension_semantics<arbitrary>], iteration_bounds = array<i64: 1>, scalar_prefetch = 0 : i64, scratch_operands = 0 : i64, tpu.core_type = #tpu.core_type<tc>, window_params = [{pipeline_mode = #tpu.pipeline_mode<synchronous>, transform_indices = @transform_0, window_bounds = array<i64: 16, 512>}, {pipeline_mode = #tpu.pipeline_mode<synchronous>, transform_indices = @transform_1, window_bounds = array<i64: 512, 32>}, {pipeline_mode = #tpu.pipeline_mode<synchronous>, transform_indices = @transform_2, window_bounds = array<i64: 1, 32>}, {pipeline_mode = #tpu.pipeline_mode<synchronous>, transform_indices = @transform_3, window_bounds = array<i64: 32, 256>}, {pipeline_mode = #tpu.pipeline_mode<synchronous>, transform_indices = @transform_4, window_bounds = array<i64: 1, 256>}, {pipeline_mode = #tpu.pipeline_mode<synchronous>, transform_indices = @transform_5, window_bounds = array<i64: 16, 256>}]} {
    %c0 = arith.constant 0 : index
    %c0_0 = arith.constant 0 : index
    %0 = vector.load %arg1[%c0, %c0_0] : memref<16x512xbf16, #tpu.memory_space<vmem>>, vector<16x512xbf16>
    %c0_1 = arith.constant 0 : index
    %c0_2 = arith.constant 0 : index
    %1 = vector.load %arg2[%c0_1, %c0_2] : memref<512x32xbf16, #tpu.memory_space<vmem>>, vector<512x32xbf16>
    %cst = arith.constant dense<0.000000e+00> : vector<16x32xf32>
    %2 = tpu.matmul %0, %1, %cst {dimension_numbers = #tpu.dot_dimension_numbers<[1], [0], [0], [1], [0, 0, 1, 1], [], []>} : vector<16x512xbf16>, vector<512x32xbf16>, vector<16x32xf32> -> vector<16x32xf32>
    %c0_3 = arith.constant 0 : index
    %c0_4 = arith.constant 0 : index
    %3 = vector.load %arg3[%c0_3, %c0_4] : memref<1x32xf32, #tpu.memory_space<vmem>>, vector<1x32xf32>
    %4 = vector.broadcast %3 : vector<1x32xf32> to vector<16x32xf32>
    %5 = arith.addf %2, %4 : vector<16x32xf32>
    %6 = arith.truncf %5 : vector<16x32xf32> to vector<16x32xbf16>
    %c0_5 = arith.constant 0 : index
    %c0_6 = arith.constant 0 : index
    %7 = vector.load %arg4[%c0_5, %c0_6] : memref<32x256xbf16, #tpu.memory_space<vmem>>, vector<32x256xbf16>
    %cst_7 = arith.constant dense<0.000000e+00> : vector<16x256xf32>
    %8 = tpu.matmul %6, %7, %cst_7 {dimension_numbers = #tpu.dot_dimension_numbers<[1], [0], [0], [1], [0, 0, 1, 1], [], []>} : vector<16x32xbf16>, vector<32x256xbf16>, vector<16x256xf32> -> vector<16x256xf32>
    %c0_8 = arith.constant 0 : index
    %c0_9 = arith.constant 0 : index
    %9 = vector.load %arg5[%c0_8, %c0_9] : memref<1x256xf32, #tpu.memory_space<vmem>>, vector<1x256xf32>
    %10 = vector.broadcast %9 : vector<1x256xf32> to vector<16x256xf32>
    %11 = arith.addf %8, %10 : vector<16x256xf32>
    %cst_10 = arith.constant 0.000000e+00 : f32
    %12 = vector.broadcast %cst_10 : f32 to vector<16x256xf32>
    %13 = arith.maximumf %11, %12 : vector<16x256xf32>
    %c0_11 = arith.constant 0 : index
    %c0_12 = arith.constant 0 : index
    %14 = vector.load %arg6[%c0_11, %c0_12] : memref<16x256xf32, #tpu.memory_space<vmem>>, vector<16x256xf32>
    tpu.vector_store %arg6[%c0_11, %c0_12], %13 {strides = array<i32>} : memref<16x256xf32, #tpu.memory_space<vmem>>, vector<16x256xf32>,
    return
  }
  func.func @transform_0(%arg0: i32) -> (i32, i32) {
    %c0_i32 = arith.constant 0 : i32
    %c0_i32_0 = arith.constant 0 : i32
    %c0_i32_1 = arith.constant 0 : i32
    return %c0_i32, %c0_i32_0 : i32, i32
  }
  func.func @transform_1(%arg0: i32) -> (i32, i32) {
    %c0_i32 = arith.constant 0 : i32
    %c0_i32_0 = arith.constant 0 : i32
    %c0_i32_1 = arith.constant 0 : i32
    return %c0_i32, %c0_i32_0 : i32, i32
  }
  func.func @transform_2(%arg0: i32) -> (i32, i32) {
    %c0_i32 = arith.constant 0 : i32
    %c0_i32_0 = arith.constant 0 : i32
    %c0_i32_1 = arith.constant 0 : i32
    return %c0_i32, %c0_i32_0 : i32, i32
  }
  func.func @transform_3(%arg0: i32) -> (i32, i32) {
    %c0_i32 = arith.constant 0 : i32
    %c0_i32_0 = arith.constant 0 : i32
    %c0_i32_1 = arith.constant 0 : i32
    return %c0_i32, %c0_i32_0 : i32, i32
  }
  func.func @transform_4(%arg0: i32) -> (i32, i32) {
    %c0_i32 = arith.constant 0 : i32
    %c0_i32_0 = arith.constant 0 : i32
    %c0_i32_1 = arith.constant 0 : i32
    return %c0_i32, %c0_i32_0 : i32, i32
  }
  func.func @transform_5(%arg0: i32) -> (i32, i32) {
    %c0_i32 = arith.constant 0 : i32
    %c0_i32_0 = arith.constant 0 : i32
    %c0_i32_1 = arith.constant 0 : i32
    return %c0_i32, %c0_i32_0 : i32, i32
  }
}

module attributes {stable_mosaic.version = 11 : i64} {
  func.func @_gemm_kernel(%arg0: i32, %arg1: i32, %arg2: memref<16x256xbf16, #tpu.memory_space<vmem>>, %arg3: memref<256x2048xbf16, #tpu.memory_space<vmem>>, %arg4: memref<1x2048xf32, #tpu.memory_space<vmem>>, %arg5: memref<16x2048xf32, #tpu.memory_space<vmem>>) attributes {dimension_semantics = [#tpu.dimension_semantics<parallel>, #tpu.dimension_semantics<parallel>], iteration_bounds = array<i64: 1, 16>, scalar_prefetch = 0 : i64, scratch_operands = 0 : i64, tpu.core_type = #tpu.core_type<tc>, window_params = [{transform_indices = @transform_0, window_bounds = array<i64: 16, 256>}, {transform_indices = @transform_1, window_bounds = array<i64: 256, 2048>}, {transform_indices = @transform_2, window_bounds = array<i64: 1, 2048>}, {transform_indices = @transform_3, window_bounds = array<i64: 16, 2048>}]} {
    %c0 = arith.constant 0 : index
    %c0_0 = arith.constant 0 : index
    %0 = vector.load %arg2[%c0, %c0_0] : memref<16x256xbf16, #tpu.memory_space<vmem>>, vector<16x256xbf16>
    %c0_1 = arith.constant 0 : index
    %c0_2 = arith.constant 0 : index
    %1 = vector.load %arg3[%c0_1, %c0_2] : memref<256x2048xbf16, #tpu.memory_space<vmem>>, vector<256x2048xbf16>
    %cst = arith.constant dense<0.000000e+00> : vector<16x2048xf32>
    %2 = tpu.matmul %0, %1, %cst {dimension_numbers = #tpu.dot_dimension_numbers<[1], [0], [0], [1], [0, 0, 1, 1], [], []>} : vector<16x256xbf16>, vector<256x2048xbf16>, vector<16x2048xf32> -> vector<16x2048xf32>
    %c0_3 = arith.constant 0 : index
    %c0_4 = arith.constant 0 : index
    %3 = vector.load %arg4[%c0_3, %c0_4] : memref<1x2048xf32, #tpu.memory_space<vmem>>, vector<1x2048xf32>
    %4 = vector.broadcast %3 : vector<1x2048xf32> to vector<16x2048xf32>
    %5 = arith.addf %2, %4 : vector<16x2048xf32>
    %cst_5 = arith.constant 0.000000e+00 : f32
    %6 = vector.broadcast %cst_5 : f32 to vector<16x2048xf32>
    %7 = arith.maximumf %5, %6 : vector<16x2048xf32>
    %c0_6 = arith.constant 0 : index
    %c0_7 = arith.constant 0 : index
    %8 = vector.load %arg5[%c0_6, %c0_7] : memref<16x2048xf32, #tpu.memory_space<vmem>>, vector<16x2048xf32>
    tpu.vector_store %arg5[%c0_6, %c0_7], %7 {strides = array<i32>} : memref<16x2048xf32, #tpu.memory_space<vmem>>, vector<16x2048xf32>,
    return
  }
  func.func @transform_0(%arg0: i32, %arg1: i32) -> (i32, i32) {
    %c0_i32 = arith.constant 0 : i32
    %c0_i32_0 = arith.constant 0 : i32
    return %arg0, %c0_i32 : i32, i32
  }
  func.func @transform_1(%arg0: i32, %arg1: i32) -> (i32, i32) {
    %c0_i32 = arith.constant 0 : i32
    %c0_i32_0 = arith.constant 0 : i32
    return %c0_i32, %arg1 : i32, i32
  }
  func.func @transform_2(%arg0: i32, %arg1: i32) -> (i32, i32) {
    %c0_i32 = arith.constant 0 : i32
    %c0_i32_0 = arith.constant 0 : i32
    return %c0_i32, %arg1 : i32, i32
  }
  func.func @transform_3(%arg0: i32, %arg1: i32) -> (i32, i32) {
    %c0_i32 = arith.constant 0 : i32
    return %arg0, %arg1 : i32, i32
  }
}

module attributes {stable_mosaic.version = 11 : i64} {
  func.func @_gemm_kernel(%arg0: i32, %arg1: i32, %arg2: memref<128x128xbf16, #tpu.memory_space<vmem>>, %arg3: memref<128x256xbf16, #tpu.memory_space<vmem>>, %arg4: memref<1x256xf32, #tpu.memory_space<vmem>>, %arg5: memref<128x256xf32, #tpu.memory_space<vmem>>) attributes {dimension_semantics = [#tpu.dimension_semantics<parallel>, #tpu.dimension_semantics<parallel>], iteration_bounds = array<i64: 4, 3>, scalar_prefetch = 0 : i64, scratch_operands = 0 : i64, tpu.core_type = #tpu.core_type<tc>, window_params = [{transform_indices = @transform_0, window_bounds = array<i64: 128, 128>}, {transform_indices = @transform_1, window_bounds = array<i64: 128, 256>}, {transform_indices = @transform_2, window_bounds = array<i64: 1, 256>}, {transform_indices = @transform_3, window_bounds = array<i64: 128, 256>}]} {
    %c0 = arith.constant 0 : index
    %c0_0 = arith.constant 0 : index
    %0 = vector.load %arg2[%c0, %c0_0] : memref<128x128xbf16, #tpu.memory_space<vmem>>, vector<128x128xbf16>
    %c0_1 = arith.constant 0 : index
    %c0_2 = arith.constant 0 : index
    %1 = vector.load %arg3[%c0_1, %c0_2] : memref<128x256xbf16, #tpu.memory_space<vmem>>, vector<128x256xbf16>
    %cst = arith.constant dense<0.000000e+00> : vector<128x256xf32>
    %2 = tpu.matmul %0, %1, %cst {dimension_numbers = #tpu.dot_dimension_numbers<[1], [0], [0], [1], [0, 0, 1, 1], [], []>} : vector<128x128xbf16>, vector<128x256xbf16>, vector<128x256xf32> -> vector<128x256xf32>
    %c0_3 = arith.constant 0 : index
    %c0_4 = arith.constant 0 : index
    %3 = vector.load %arg4[%c0_3, %c0_4] : memref<1x256xf32, #tpu.memory_space<vmem>>, vector<1x256xf32>
    %4 = vector.broadcast %3 : vector<1x256xf32> to vector<128x256xf32>
    %5 = arith.addf %2, %4 : vector<128x256xf32>
    %c0_5 = arith.constant 0 : index
    %c0_6 = arith.constant 0 : index
    %6 = vector.load %arg5[%c0_5, %c0_6] : memref<128x256xf32, #tpu.memory_space<vmem>>, vector<128x256xf32>
    tpu.vector_store %arg5[%c0_5, %c0_6], %5 {strides = array<i32>} : memref<128x256xf32, #tpu.memory_space<vmem>>, vector<128x256xf32>,
    return
  }
  func.func @transform_0(%arg0: i32, %arg1: i32) -> (i32, i32) {
    %c0_i32 = arith.constant 0 : i32
    %c0_i32_0 = arith.constant 0 : i32
    return %arg0, %c0_i32 : i32, i32
  }
  func.func @transform_1(%arg0: i32, %arg1: i32) -> (i32, i32) {
    %c0_i32 = arith.constant 0 : i32
    %c0_i32_0 = arith.constant 0 : i32
    return %c0_i32, %arg1 : i32, i32
  }
  func.func @transform_2(%arg0: i32, %arg1: i32) -> (i32, i32) {
    %c0_i32 = arith.constant 0 : i32
    %c0_i32_0 = arith.constant 0 : i32
    return %c0_i32, %arg1 : i32, i32
  }
  func.func @transform_3(%arg0: i32, %arg1: i32) -> (i32, i32) {
    %c0_i32 = arith.constant 0 : i32
    return %arg0, %arg1 : i32, i32
  }
}

module attributes {stable_mosaic.version = 11 : i64} {
  func.func @_gemm_kernel(%arg0: i32, %arg1: i32, %arg2: memref<128x640xbf16, #tpu.memory_space<vmem>>, %arg3: memref<640x128xbf16, #tpu.memory_space<vmem>>, %arg4: memref<1x128xf32, #tpu.memory_space<vmem>>, %arg5: memref<128x128xf32, #tpu.memory_space<vmem>>) attributes {dimension_semantics = [#tpu.dimension_semantics<parallel>, #tpu.dimension_semantics<parallel>], iteration_bounds = array<i64: 18, 1>, scalar_prefetch = 0 : i64, scratch_operands = 0 : i64, tpu.core_type = #tpu.core_type<tc>, window_params = [{transform_indices = @transform_0, window_bounds = array<i64: 128, 640>}, {transform_indices = @transform_1, window_bounds = array<i64: 640, 128>}, {transform_indices = @transform_2, window_bounds = array<i64: 1, 128>}, {transform_indices = @transform_3, window_bounds = array<i64: 128, 128>}]} {
    %c0 = arith.constant 0 : index
    %c0_0 = arith.constant 0 : index
    %0 = vector.load %arg2[%c0, %c0_0] : memref<128x640xbf16, #tpu.memory_space<vmem>>, vector<128x640xbf16>
    %c0_1 = arith.constant 0 : index
    %c0_2 = arith.constant 0 : index
    %1 = vector.load %arg3[%c0_1, %c0_2] : memref<640x128xbf16, #tpu.memory_space<vmem>>, vector<640x128xbf16>
    %cst = arith.constant dense<0.000000e+00> : vector<128x128xf32>
    %2 = tpu.matmul %0, %1, %cst {dimension_numbers = #tpu.dot_dimension_numbers<[1], [0], [0], [1], [0, 0, 1, 1], [], []>} : vector<128x640xbf16>, vector<640x128xbf16>, vector<128x128xf32> -> vector<128x128xf32>
    %c0_3 = arith.constant 0 : index
    %c0_4 = arith.constant 0 : index
    %3 = vector.load %arg4[%c0_3, %c0_4] : memref<1x128xf32, #tpu.memory_space<vmem>>, vector<1x128xf32>
    %4 = vector.broadcast %3 : vector<1x128xf32> to vector<128x128xf32>
    %5 = arith.addf %2, %4 : vector<128x128xf32>
    %c0_5 = arith.constant 0 : index
    %c0_6 = arith.constant 0 : index
    %6 = vector.load %arg5[%c0_5, %c0_6] : memref<128x128xf32, #tpu.memory_space<vmem>>, vector<128x128xf32>
    tpu.vector_store %arg5[%c0_5, %c0_6], %5 {strides = array<i32>} : memref<128x128xf32, #tpu.memory_space<vmem>>, vector<128x128xf32>,
    return
  }
  func.func @transform_0(%arg0: i32, %arg1: i32) -> (i32, i32) {
    %c0_i32 = arith.constant 0 : i32
    %c0_i32_0 = arith.constant 0 : i32
    return %arg0, %c0_i32 : i32, i32
  }
  func.func @transform_1(%arg0: i32, %arg1: i32) -> (i32, i32) {
    %c0_i32 = arith.constant 0 : i32
    %c0_i32_0 = arith.constant 0 : i32
    return %c0_i32, %arg1 : i32, i32
  }
  func.func @transform_2(%arg0: i32, %arg1: i32) -> (i32, i32) {
    %c0_i32 = arith.constant 0 : i32
    %c0_i32_0 = arith.constant 0 : i32
    return %c0_i32, %arg1 : i32, i32
  }
  func.func @transform_3(%arg0: i32, %arg1: i32) -> (i32, i32) {
    %c0_i32 = arith.constant 0 : i32
    return %arg0, %arg1 : i32, i32
  }
}

module attributes {stable_mosaic.version = 11 : i64} {
  func.func @_gemm_kernel(%arg0: i32, %arg1: i32, %arg2: memref<128x384xbf16, #tpu.memory_space<vmem>>, %arg3: memref<384x128xbf16, #tpu.memory_space<vmem>>, %arg4: memref<1x128xf32, #tpu.memory_space<vmem>>, %arg5: memref<128x128xf32, #tpu.memory_space<vmem>>) attributes {dimension_semantics = [#tpu.dimension_semantics<parallel>, #tpu.dimension_semantics<parallel>], iteration_bounds = array<i64: 18, 1>, scalar_prefetch = 0 : i64, scratch_operands = 0 : i64, tpu.core_type = #tpu.core_type<tc>, window_params = [{transform_indices = @transform_0, window_bounds = array<i64: 128, 384>}, {transform_indices = @transform_1, window_bounds = array<i64: 384, 128>}, {transform_indices = @transform_2, window_bounds = array<i64: 1, 128>}, {transform_indices = @transform_3, window_bounds = array<i64: 128, 128>}]} {
    %c0 = arith.constant 0 : index
    %c0_0 = arith.constant 0 : index
    %0 = vector.load %arg2[%c0, %c0_0] : memref<128x384xbf16, #tpu.memory_space<vmem>>, vector<128x384xbf16>
    %c0_1 = arith.constant 0 : index
    %c0_2 = arith.constant 0 : index
    %1 = vector.load %arg3[%c0_1, %c0_2] : memref<384x128xbf16, #tpu.memory_space<vmem>>, vector<384x128xbf16>
    %cst = arith.constant dense<0.000000e+00> : vector<128x128xf32>
    %2 = tpu.matmul %0, %1, %cst {dimension_numbers = #tpu.dot_dimension_numbers<[1], [0], [0], [1], [0, 0, 1, 1], [], []>} : vector<128x384xbf16>, vector<384x128xbf16>, vector<128x128xf32> -> vector<128x128xf32>
    %c0_3 = arith.constant 0 : index
    %c0_4 = arith.constant 0 : index
    %3 = vector.load %arg4[%c0_3, %c0_4] : memref<1x128xf32, #tpu.memory_space<vmem>>, vector<1x128xf32>
    %4 = vector.broadcast %3 : vector<1x128xf32> to vector<128x128xf32>
    %5 = arith.addf %2, %4 : vector<128x128xf32>
    %6 = arith.negf %5 : vector<128x128xf32>
    %7 = math.exp %6 : vector<128x128xf32>
    %cst_5 = arith.constant 1.000000e+00 : f32
    %8 = vector.broadcast %cst_5 : f32 to vector<128x128xf32>
    %9 = arith.addf %8, %7 : vector<128x128xf32>
    %10 = arith.divf %8, %9 : vector<128x128xf32>
    %c0_6 = arith.constant 0 : index
    %c0_7 = arith.constant 0 : index
    %11 = vector.load %arg5[%c0_6, %c0_7] : memref<128x128xf32, #tpu.memory_space<vmem>>, vector<128x128xf32>
    tpu.vector_store %arg5[%c0_6, %c0_7], %10 {strides = array<i32>} : memref<128x128xf32, #tpu.memory_space<vmem>>, vector<128x128xf32>,
    return
  }
  func.func @transform_0(%arg0: i32, %arg1: i32) -> (i32, i32) {
    %c0_i32 = arith.constant 0 : i32
    %c0_i32_0 = arith.constant 0 : i32
    return %arg0, %c0_i32 : i32, i32
  }
  func.func @transform_1(%arg0: i32, %arg1: i32) -> (i32, i32) {
    %c0_i32 = arith.constant 0 : i32
    %c0_i32_0 = arith.constant 0 : i32
    return %c0_i32, %arg1 : i32, i32
  }
  func.func @transform_2(%arg0: i32, %arg1: i32) -> (i32, i32) {
    %c0_i32 = arith.constant 0 : i32
    %c0_i32_0 = arith.constant 0 : i32
    return %c0_i32, %arg1 : i32, i32
  }
  func.func @transform_3(%arg0: i32, %arg1: i32) -> (i32, i32) {
    %c0_i32 = arith.constant 0 : i32
    return %arg0, %arg1 : i32, i32
  }
}

</mosaic_0001>

<bundles_post_ra>
// kernel: forward.10
= control target key start
LH: loop header
LB: loop body
LE: loop exit
PB: predicated region body
PF: predicated region fallthrough
CT: control target
= control target key end

     0   :  { %s770_s12 = smov 0   ;;  %s772_s13 = smov 0   ;;  %s862_s0 = inlined_call_operand.vmem [shape: bf16[512,128], index: 0, kind: input, shape index: {}]   ;;  %s863_s1 = inlined_call_operand.vmem [shape: bf16[128,128], index: 1, kind: input, shape index: {}]   ;;  %s864_s2 = inlined_call_operand.vmem [shape: f32[1,128], index: 2, kind: input, shape index: {}]   ;;  %s865_s3 = inlined_call_operand.vmem [shape: f32[512,128], index: 3, kind: output, shape index: {}]  }
   0x1   :  { %s774_s14 = smov 0  }
   0x2 LB: > { %s25_s15 = sadd.s32 1, %s744_s13  ;;  %p598_p0 = scmp.ge.s32.totalorder %s748_s14, 1  ;;  %s748_s14 = sphi %s774_s14, %s13_s14   ;;  %s744_s13 = sphi %s772_s13, %s867_s13   ;;  %s740_s12 = sphi %s770_s12, %s866_s12  }
   0x3   : > { %p27_p1 = scmp.ge.s32.totalorder %s25_s15, 4  ;;  %p169_p2 = scmp.lt.s32.totalorder %s748_s14, 5 }
   0x5   : > { %s869_s15 = smov (%p27_p1, %s25_s15), 0  ;;  %p170_p3 = pnand %p598_p0, %p169_p2 }
   0x6   : > { %s599_s18 = sshll.u32 (!%p170_p3), %s740_s12, 4 }
   0x7   : > { %173 = sbr.rel (%p170_p3) target bundleno = 257 (0x101), region = 32  ;;  %p204_p4 = scmp.lt.s32.totalorder (!%p170_p3), %s599_s18, 63 }
   0xc   : > { %v710_v0 = vld [vmem:[%s863_s1 + $0x38] sm:$0xff]   ;;  %v711_v1 = vld [vmem:[%s863_s1 + $0x30] sm:$0xff]   ;;  %s871_s18 = smov (!%p204_p4, %s599_s18), 63  ;;  %v712_v2 = vld [vmem:[%s863_s1 + $0x28] sm:$0xff]  }
   0xd   : > { %638 = vmatprep.subr.bf16.mxu0 %v710_v0  ;;  %670 = vmatprep.subr.bf16.mxu1 %v710_v0  ;;  %s600_s23 = sshll.u32 %s871_s18, 2  ;;  %v713_v3 = vld [vmem:[%s863_s1 + $0x20] sm:$0xff]   ;;  %v714_v6 = vld [vmem:[%s863_s1 + $0x18] sm:$0xff]   ;;  %v715_v7 = vld [vmem:[%s863_s1 + $0x10] sm:$0xff]   ;;  %s602_s12 = sshll.u32 %s871_s18, 3 }
   0xe   : > { %639 = vmatpush3.bf16.msra.mxu0 %v710_v0  ;;  %678 = vmatpush3.bf16.msra.mxu1 %v710_v0  ;;  %s803_s26 = scalar_lea.vmem %s862_s0, %s600_s23  ;;  %v716_v8 = vld [vmem:[%s863_s1 + $0x8] sm:$0xff]   ;;  %v717_v9 = vld [vmem:[%s863_s1] sm:$0xff]   ;;  %s835_s19 = scalar_lea.vmem %s865_s3, %s602_s12 }
   0xf   : > { %640 = vmatprep.subr.bf16.mxu0 %v711_v1  ;;  %671 = vmatprep.subr.bf16.mxu1 %v711_v1  ;;  %v718_v4 = vld [vmem:[%s803_s26] sm:$0xff]   ;;  %v720_v10 = vld [vmem:[%s803_s26 + $0x8] sm:$0xff]   ;;  %v722_v12 = vld [vmem:[%s803_s26 + $0x10] sm:$0xff]  }
  0x10   : > { %v719_v5 = vld [vmem:[%s803_s26 + $0x20] sm:$0xff]   ;;  %654 = vmatprep.mubr.bf16.mxu0 %v718_v4  ;;  %v721_v11 = vld [vmem:[%s803_s26 + $0x28] sm:$0xff]   ;;  %v723_v13 = vld [vmem:[%s803_s26 + $0x30] sm:$0xff]  }
  0x11   : > { %662 = vmatprep.mubr.bf16.mxu1 %v719_v5  ;;  %v724_v14 = vld [vmem:[%s803_s26 + $0x18] sm:$0xff]   ;;  %v603_v16 = vld [vmem:[%s864_s2] ss:$0 sm:$0xff] }
  0x12   : > { %641 = vmatpush3.bf16.msra.mxu0 %v711_v1  ;;  %679 = vmatpush3.bf16.msra.mxu1 %v711_v1  ;;  %v725_v15 = vld [vmem:[%s803_s26 + $0x38] sm:$0xff]  }
  0x13   : > { %642 = vmatprep.subr.bf16.mxu0 %v712_v2  ;;  %672 = vmatprep.subr.bf16.mxu1 %v712_v2 }
  0x16   : > { %643 = vmatpush3.bf16.msra.mxu0 %v712_v2  ;;  %680 = vmatpush3.bf16.msra.mxu1 %v712_v2 }
  0x17   : > { %644 = vmatprep.subr.bf16.mxu0 %v713_v3  ;;  %673 = vmatprep.subr.bf16.mxu1 %v713_v3 }
  0x1a   : > { %645 = vmatpush3.bf16.msra.mxu0 %v713_v3  ;;  %681 = vmatpush3.bf16.msra.mxu1 %v713_v3 }
  0x1b   : > { %646 = vmatprep.subr.bf16.mxu0 %v714_v6  ;;  %674 = vmatprep.subr.bf16.mxu1 %v714_v6 }
  0x1e   : > { %647 = vmatpush3.bf16.msra.mxu0 %v714_v6  ;;  %682 = vmatpush3.bf16.msra.mxu1 %v714_v6 }
  0x1f   : > { %648 = vmatprep.subr.bf16.mxu0 %v715_v7  ;;  %675 = vmatprep.subr.bf16.mxu1 %v715_v7 }
  0x22   : > { %649 = vmatpush3.bf16.msra.mxu0 %v715_v7  ;;  %683 = vmatpush3.bf16.msra.mxu1 %v715_v7 }
  0x23   : > { %650 = vmatprep.subr.bf16.mxu0 %v716_v8  ;;  %676 = vmatprep.subr.bf16.mxu1 %v716_v8 }
  0x26   : > { %651 = vmatpush3.bf16.msra.mxu0 %v716_v8  ;;  %684 = vmatpush3.bf16.msra.mxu1 %v716_v8 }
  0x27   : > { %652 = vmatprep.subr.bf16.mxu0 %v717_v9  ;;  %677 = vmatprep.subr.bf16.mxu1 %v717_v9 }
  0x2a   : > { %653 = vmatpush3.bf16.msra.mxu0 %v717_v9  ;;  %685 = vmatpush3.bf16.msra.mxu1 %v717_v9 }
  0x2d   : > { %655 = vmatmul.mubr.bf16.vlgmr.msra.gmra.mxu0 %v720_v10  ;;  %663 = vmatmul.mubr.bf16.vlgmr.msra.gmra.mxu1 %v721_v11 }
  0x2e   : > { %658 = vmatprep.mubr.bf16.mxu0 %v722_v12  ;;  %666 = vmatprep.mubr.bf16.mxu1 %v723_v13 }
  0x35   : > { %659 = vmatmul.mubr.bf16.gmra.mxu0 %v724_v14  ;;  %667 = vmatmul.mubr.bf16.gmra.mxu1 %v725_v15 }
  0xed   : > { %v656_v17 = vpop.f32.mrf.mxu0  ;;  %v664_v18 = vpop.f32.mrf.mxu1 }
  0xee   : > { %v404_v19 = vadd.f32 %v656_v17, %v603_v16  ;;  %v436_v20 = vadd.f32 %v664_v18, %v603_v16 }
  0xef   : > { %v395_v21 = vpop.f32.mrf.mxu0  ;;  %v427_v22 = vpop.f32.mrf.mxu1 }
  0xf0   : > { %v460_v23 = vmax.f32 %v404_v19, 0.0  ;;  %v468_v24 = vmax.f32 %v436_v20, 0.0  ;;  %v396_v25 = vadd.f32 %v603_v16, %v395_v21  ;;  %v428_v26 = vadd.f32 %v603_v16, %v427_v22 }
  0xf1   : > { %v657_v27 = vpop.f32.mrf.mxu0  ;;  %v665_v28 = vpop.f32.mrf.mxu1 }
  0xf2   : > { %476 = vst [vmem:[%s835_s19 + $0x10] sm:$0xff] %v460_v23  ;;  %484 = vst [vmem:[%s835_s19 + $0x50] sm:$0xff] %v468_v24  ;;  %v458_v29 = vmax.f32 %v396_v25, 0.0  ;;  %v466_v30 = vmax.f32 %v428_v26, 0.0  ;;  %v407_v31 = vadd.f32 %v657_v27, %v603_v16  ;;  %v439_v32 = vadd.f32 %v665_v28, %v603_v16 }
  0xf3   : > { %v398_v33 = vpop.f32.mrf.mxu0  ;;  %v430_v34 = vpop.f32.mrf.mxu1 }
  0xf4   : > { %474 = vst [vmem:[%s835_s19] sm:$0xff] %v458_v29  ;;  %482 = vst [vmem:[%s835_s19 + $0x40] sm:$0xff] %v466_v30  ;;  %v461_v35 = vmax.f32 %v407_v31, 0.0  ;;  %v469_v36 = vmax.f32 %v439_v32, 0.0  ;;  %v399_v37 = vadd.f32 %v603_v16, %v398_v33  ;;  %v431_v38 = vadd.f32 %v603_v16, %v430_v34 }
  0xf5   : > { %v660_v39 = vpop.f32.mrf.mxu0  ;;  %v668_v40 = vpop.f32.mrf.mxu1 }
  0xf6   : > { %477 = vst [vmem:[%s835_s19 + $0x18] sm:$0xff] %v461_v35  ;;  %485 = vst [vmem:[%s835_s19 + $0x58] sm:$0xff] %v469_v36  ;;  %v459_v41 = vmax.f32 %v399_v37, 0.0  ;;  %v467_v42 = vmax.f32 %v431_v38, 0.0  ;;  %v420_v43 = vadd.f32 %v660_v39, %v603_v16  ;;  %v452_v44 = vadd.f32 %v668_v40, %v603_v16 }
  0xf7   : > { %v411_v45 = vpop.f32.mrf.mxu0  ;;  %v443_v46 = vpop.f32.mrf.mxu1 }
  0xf8   : > { %475 = vst [vmem:[%s835_s19 + $0x8] sm:$0xff] %v459_v41  ;;  %483 = vst [vmem:[%s835_s19 + $0x48] sm:$0xff] %v467_v42  ;;  %v464_v47 = vmax.f32 %v420_v43, 0.0  ;;  %v472_v48 = vmax.f32 %v452_v44, 0.0  ;;  %v412_v49 = vadd.f32 %v603_v16, %v411_v45  ;;  %v444_v50 = vadd.f32 %v603_v16, %v443_v46 }
  0xf9   : > { %v661_v51 = vpop.f32.mrf.mxu0  ;;  %v669_v52 = vpop.f32.mrf.mxu1 }
  0xfa   : > { %480 = vst [vmem:[%s835_s19 + $0x30] sm:$0xff] %v464_v47  ;;  %488 = vst [vmem:[%s835_s19 + $0x70] sm:$0xff] %v472_v48  ;;  %v462_v53 = vmax.f32 %v412_v49, 0.0  ;;  %v470_v54 = vmax.f32 %v444_v50, 0.0  ;;  %v423_v55 = vadd.f32 %v661_v51, %v603_v16  ;;  %v455_v56 = vadd.f32 %v669_v52, %v603_v16 }
  0xfb   : > { %v414_v57 = vpop.f32.mrf.mxu0  ;;  %v446_v58 = vpop.f32.mrf.mxu1 }
  0xfc   : > { %478 = vst [vmem:[%s835_s19 + $0x20] sm:$0xff] %v462_v53  ;;  %486 = vst [vmem:[%s835_s19 + $0x60] sm:$0xff] %v470_v54  ;;  %v465_v59 = vmax.f32 %v423_v55, 0.0  ;;  %v473_v60 = vmax.f32 %v455_v56, 0.0  ;;  %v415_v61 = vadd.f32 %v603_v16, %v414_v57  ;;  %v447_v62 = vadd.f32 %v603_v16, %v446_v58 }
  0xfe   : > { %481 = vst [vmem:[%s835_s19 + $0x38] sm:$0xff] %v465_v59  ;;  %489 = vst [vmem:[%s835_s19 + $0x78] sm:$0xff] %v473_v60  ;;  %v463_v63 = vmax.f32 %v415_v61, 0.0  ;;  %v471_v0 = vmax.f32 %v447_v62, 0.0 }
 0x100   : > { %479 = vst [vmem:[%s835_s19 + $0x28] sm:$0xff] %v463_v63  ;;  %487 = vst [vmem:[%s835_s19 + $0x68] sm:$0xff] %v471_v0 }
 0x101 PF: > { %s13_s14 = sadd.s32 1, %s748_s14   ;;  %s866_s12 = smov %s744_s13 }
 0x102   : > { %p10_p5 = scmp.ge.s32.totalorder %s13_s14, 6   ;;  %s867_s13 = smov %s869_s15 }
 0x104   :  { %12 = sbr.rel (!%p10_p5) target bundleno = 2 (0x2), region = 68 }

// kernel: forward.11
= control target key start
LH: loop header
LB: loop body
LE: loop exit
PB: predicated region body
PF: predicated region fallthrough
CT: control target
= control target key end

     0   :  { %s911_s12 = smov 0   ;;  %s913_s13 = smov 0   ;;  %s1056_s0 = inlined_call_operand.vmem [shape: bf16[512,256], index: 0, kind: input, shape index: {}]   ;;  %s1057_s1 = inlined_call_operand.vmem [shape: bf16[256,128], index: 1, kind: input, shape index: {}]   ;;  %s1058_s2 = inlined_call_operand.vmem [shape: f32[1,128], index: 2, kind: input, shape index: {}]   ;;  %s1059_s3 = inlined_call_operand.vmem [shape: f32[512,128], index: 3, kind: output, shape index: {}]  }
   0x1   :  { %s915_s14 = smov 0  }
   0x2 LB: > { %s25_s15 = sadd.s32 1, %s885_s13  ;;  %p681_p0 = scmp.ge.s32.totalorder %s889_s14, 1  ;;  %s889_s14 = sphi %s915_s14, %s13_s14   ;;  %s885_s13 = sphi %s913_s13, %s1061_s13   ;;  %s881_s12 = sphi %s911_s12, %s1060_s12  }
   0x3   : > { %p27_p1 = scmp.ge.s32.totalorder %s25_s15, 4  ;;  %p170_p2 = scmp.lt.s32.totalorder %s889_s14, 5 }
   0x5   : > { %s1063_s15 = smov (%p27_p1, %s25_s15), 0  ;;  %p171_p3 = pnand %p681_p0, %p170_p2 }
   0x6   : > { %s682_s18 = sshll.u32 (!%p171_p3), %s881_s12, 4 }
   0x7   : > { %174 = sbr.rel (%p171_p3) target bundleno = 273 (0x111), region = 32  ;;  %p206_p4 = scmp.lt.s32.totalorder (!%p171_p3), %s682_s18, 63 }
   0xc   : > { %v827_v0 = vld [vmem:[%s1057_s1 + $0x78] sm:$0xff]   ;;  %v829_v2 = vld [vmem:[%s1057_s1 + $0x70] sm:$0xff]   ;;  %v831_v4 = vld [vmem:[%s1057_s1 + $0x68] sm:$0xff]   ;;  %s1065_s18 = smov (!%p206_p4, %s682_s18), 63 }
   0xd   : > { %v828_v1 = vld [vmem:[%s1057_s1 + $0x38] sm:$0xff]   ;;  %723 = vmatprep.subr.bf16.mxu0 %v827_v0  ;;  %787 = vmatprep.subr.bf16.mxu1 %v827_v0  ;;  %v830_v3 = vld [vmem:[%s1057_s1 + $0x30] sm:$0xff]   ;;  %v832_v5 = vld [vmem:[%s1057_s1 + $0x28] sm:$0xff]   ;;  %s722_s6 = sshll.u32 %s1065_s18, 3 }
   0xe   : > { %724 = vmatpush3.bf16.msra.mxu0 %v828_v1  ;;  %795 = vmatpush3.bf16.msra.mxu1 %v828_v1  ;;  %v833_v6 = vld [vmem:[%s1057_s1 + $0x60] sm:$0xff]   ;;  %v835_v8 = vld [vmem:[%s1057_s1 + $0x58] sm:$0xff]   ;;  %s964_s11 = scalar_lea.vmem %s1056_s0, %s722_s6  ;;  %v837_v10 = vld [vmem:[%s1057_s1 + $0x50] sm:$0xff]   ;;  %s1013_s8 = scalar_lea.vmem %s1059_s3, %s722_s6 }
   0xf   : > { %725 = vmatprep.subr.bf16.mxu0 %v829_v2  ;;  %788 = vmatprep.subr.bf16.mxu1 %v829_v2  ;;  %v834_v7 = vld [vmem:[%s1057_s1 + $0x20] sm:$0xff]   ;;  %v836_v9 = vld [vmem:[%s1057_s1 + $0x18] sm:$0xff]   ;;  %v838_v13 = vld [vmem:[%s1057_s1 + $0x10] sm:$0xff]  }
  0x10   : > { %v845_v11 = vld [vmem:[%s964_s11 + $0x4] ss:$8 sps:$4 sm:$0xff]   ;;  %v843_v18 = vld [vmem:[%s964_s11] ss:$8 sps:$4 sm:$0xff]   ;;  %v849_v20 = vld [vmem:[%s964_s11 + $0x14] ss:$8 sps:$4 sm:$0xff]  }
  0x11   : > { %v848_v12 = vld [vmem:[%s964_s11 + $0x44] ss:$8 sps:$4 sm:$0xff]   ;;  %492 = vmatprep.mubr.bf16.mxu0 %v845_v11  ;;  %v846_v19 = vld [vmem:[%s964_s11 + $0x40] ss:$8 sps:$4 sm:$0xff]   ;;  %v851_v21 = vld [vmem:[%s964_s11 + $0x54] ss:$8 sps:$4 sm:$0xff]  }
  0x12   : > { %726 = vmatpush3.bf16.msra.mxu0 %v830_v3  ;;  %796 = vmatpush3.bf16.msra.mxu1 %v830_v3  ;;  %v839_v14 = vld [vmem:[%s1057_s1 + $0x48] sm:$0xff]   ;;  %v841_v16 = vld [vmem:[%s1057_s1 + $0x40] sm:$0xff]   ;;  %v853_v22 = vld [vmem:[%s964_s11 + $0x10] ss:$8 sps:$4 sm:$0xff]  }
  0x13   : > { %727 = vmatprep.subr.bf16.mxu0 %v831_v4  ;;  %789 = vmatprep.subr.bf16.mxu1 %v831_v4  ;;  %v840_v15 = vld [vmem:[%s1057_s1 + $0x8] sm:$0xff]   ;;  %v842_v17 = vld [vmem:[%s1057_s1] sm:$0xff]   ;;  %v854_v23 = vld [vmem:[%s964_s11 + $0x50] ss:$8 sps:$4 sm:$0xff]  }
  0x14   : > { %524 = vmatprep.mubr.bf16.mxu1 %v848_v12  ;;  %v855_v24 = vld [vmem:[%s964_s11 + $0x24] ss:$8 sps:$4 sm:$0xff]   ;;  %v859_v26 = vld [vmem:[%s964_s11 + $0x20] ss:$8 sps:$4 sm:$0xff]   ;;  %v861_v28 = vld [vmem:[%s964_s11 + $0x34] ss:$8 sps:$4 sm:$0xff]  }
  0x15   : > { %v857_v25 = vld [vmem:[%s964_s11 + $0x64] ss:$8 sps:$4 sm:$0xff]   ;;  %v860_v27 = vld [vmem:[%s964_s11 + $0x60] ss:$8 sps:$4 sm:$0xff]   ;;  %v863_v29 = vld [vmem:[%s964_s11 + $0x74] ss:$8 sps:$4 sm:$0xff]  }
  0x16   : > { %728 = vmatpush3.bf16.msra.mxu0 %v832_v5  ;;  %797 = vmatpush3.bf16.msra.mxu1 %v832_v5  ;;  %v865_v30 = vld [vmem:[%s964_s11 + $0x30] ss:$8 sps:$4 sm:$0xff]   ;;  %v1006_v34 = vld [vmem:[%s1058_s2] ss:$0 sm:$0xff] }
  0x17   : > { %729 = vmatprep.subr.bf16.mxu0 %v833_v6  ;;  %790 = vmatprep.subr.bf16.mxu1 %v833_v6  ;;  %v866_v31 = vld [vmem:[%s964_s11 + $0x70] ss:$8 sps:$4 sm:$0xff]  }
  0x1a   : > { %730 = vmatpush3.bf16.msra.mxu0 %v834_v7  ;;  %798 = vmatpush3.bf16.msra.mxu1 %v834_v7 }
  0x1b   : > { %731 = vmatprep.subr.bf16.mxu0 %v835_v8  ;;  %791 = vmatprep.subr.bf16.mxu1 %v835_v8 }
  0x1e   : > { %732 = vmatpush3.bf16.msra.mxu0 %v836_v9  ;;  %799 = vmatpush3.bf16.msra.mxu1 %v836_v9 }
  0x1f   : > { %733 = vmatprep.subr.bf16.mxu0 %v837_v10  ;;  %792 = vmatprep.subr.bf16.mxu1 %v837_v10 }
  0x22   : > { %734 = vmatpush3.bf16.msra.mxu0 %v838_v13  ;;  %800 = vmatpush3.bf16.msra.mxu1 %v838_v13 }
  0x23   : > { %735 = vmatprep.subr.bf16.mxu0 %v839_v14  ;;  %793 = vmatprep.subr.bf16.mxu1 %v839_v14 }
  0x26   : > { %736 = vmatpush3.bf16.msra.mxu0 %v840_v15  ;;  %801 = vmatpush3.bf16.msra.mxu1 %v840_v15 }
  0x27   : > { %737 = vmatprep.subr.bf16.mxu0 %v841_v16  ;;  %794 = vmatprep.subr.bf16.mxu1 %v841_v16 }
  0x2a   : > { %738 = vmatpush3.bf16.msra.mxu0 %v842_v17  ;;  %802 = vmatpush3.bf16.msra.mxu1 %v842_v17 }
  0x2d   : > { %493 = vmatmul.mubr.bf16.vlgmr.msra.gmra.mxu0 %v843_v18  ;;  %525 = vmatmul.mubr.bf16.vlgmr.msra.gmra.mxu1 %v846_v19 }
  0x2e   : > { %500 = vmatprep.mubr.bf16.mxu0 %v849_v20  ;;  %532 = vmatprep.mubr.bf16.mxu1 %v851_v21 }
  0x35   : > { %501 = vmatmul.mubr.bf16.gmra.mxu0 %v853_v22  ;;  %533 = vmatmul.mubr.bf16.gmra.mxu1 %v854_v23 }
  0x36   : > { %508 = vmatprep.mubr.bf16.mxu0 %v855_v24  ;;  %540 = vmatprep.mubr.bf16.mxu1 %v857_v25 }
  0x3d   : > { %509 = vmatmul.mubr.bf16.gmra.mxu0 %v859_v26  ;;  %541 = vmatmul.mubr.bf16.gmra.mxu1 %v860_v27 }
  0x3e   : > { %516 = vmatprep.mubr.bf16.mxu0 %v861_v28  ;;  %548 = vmatprep.mubr.bf16.mxu1 %v863_v29 }
  0x45   : > { %517 = vmatmul.mubr.bf16.gmra.mxu0 %v865_v30  ;;  %549 = vmatmul.mubr.bf16.gmra.mxu1 %v866_v31 }
  0xed   : > { %v739_v32 = vpop.f32.mrf.mxu0  ;;  %v763_v33 = vpop.f32.mrf.mxu1 }
  0xef   : > { %v740_v35 = vpop.f32.mrf.mxu0  ;;  %v764_v36 = vpop.f32.mrf.mxu1 }
  0xf0   : > { %v741_v37 = vadd.f32 %v740_v35, %v739_v32  ;;  %v765_v38 = vadd.f32 %v764_v36, %v763_v33 }
  0xf1   : > { %v742_v39 = vpop.f32.mrf.mxu0  ;;  %v766_v40 = vpop.f32.mrf.mxu1 }
  0xf2   : > { %v495_v41 = vadd.f32 %v741_v37, %v1006_v34  ;;  %v527_v42 = vadd.f32 %v765_v38, %v1006_v34 }
  0xf3   : > { %v743_v43 = vpop.f32.mrf.mxu0  ;;  %v767_v44 = vpop.f32.mrf.mxu1 }
  0xf4   : > { %557 = vst [vmem:[%s1013_s8] sm:$0xff] %v495_v41  ;;  %565 = vst [vmem:[%s1013_s8 + $0x40] sm:$0xff] %v527_v42  ;;  %v744_v45 = vadd.f32 %v743_v43, %v742_v39  ;;  %v768_v46 = vadd.f32 %v767_v44, %v766_v40 }
  0xf5   : > { %v745_v47 = vpop.f32.mrf.mxu0  ;;  %v769_v48 = vpop.f32.mrf.mxu1 }
  0xf6   : > { %v498_v49 = vadd.f32 %v744_v45, %v1006_v34  ;;  %v530_v50 = vadd.f32 %v768_v46, %v1006_v34 }
  0xf7   : > { %v746_v51 = vpop.f32.mrf.mxu0  ;;  %v770_v52 = vpop.f32.mrf.mxu1 }
  0xf8   : > { %558 = vst [vmem:[%s1013_s8 + $0x8] sm:$0xff] %v498_v49  ;;  %566 = vst [vmem:[%s1013_s8 + $0x48] sm:$0xff] %v530_v50  ;;  %v747_v53 = vadd.f32 %v746_v51, %v745_v47  ;;  %v771_v54 = vadd.f32 %v770_v52, %v769_v48 }
  0xf9   : > { %v748_v55 = vpop.f32.mrf.mxu0  ;;  %v772_v56 = vpop.f32.mrf.mxu1 }
  0xfa   : > { %v503_v57 = vadd.f32 %v747_v53, %v1006_v34  ;;  %v535_v58 = vadd.f32 %v771_v54, %v1006_v34 }
  0xfb   : > { %v749_v59 = vpop.f32.mrf.mxu0  ;;  %v773_v60 = vpop.f32.mrf.mxu1 }
  0xfc   : > { %559 = vst [vmem:[%s1013_s8 + $0x10] sm:$0xff] %v503_v57  ;;  %567 = vst [vmem:[%s1013_s8 + $0x50] sm:$0xff] %v535_v58  ;;  %v750_v61 = vadd.f32 %v749_v59, %v748_v55  ;;  %v774_v62 = vadd.f32 %v773_v60, %v772_v56 }
  0xfd   : > { %v751_v63 = vpop.f32.mrf.mxu0  ;;  %v775_v0 = vpop.f32.mrf.mxu1 }
  0xfe   : > { %v506_v1 = vadd.f32 %v750_v61, %v1006_v34  ;;  %v538_v2 = vadd.f32 %v774_v62, %v1006_v34 }
  0xff   : > { %v752_v3 = vpop.f32.mrf.mxu0  ;;  %v776_v4 = vpop.f32.mrf.mxu1 }
 0x100   : > { %560 = vst [vmem:[%s1013_s8 + $0x18] sm:$0xff] %v506_v1  ;;  %568 = vst [vmem:[%s1013_s8 + $0x58] sm:$0xff] %v538_v2  ;;  %v753_v5 = vadd.f32 %v752_v3, %v751_v63  ;;  %v777_v6 = vadd.f32 %v776_v4, %v775_v0 }
 0x101   : > { %v754_v7 = vpop.f32.mrf.mxu0  ;;  %v778_v8 = vpop.f32.mrf.mxu1 }
 0x102   : > { %v511_v9 = vadd.f32 %v753_v5, %v1006_v34  ;;  %v543_v10 = vadd.f32 %v777_v6, %v1006_v34 }
 0x103   : > { %v755_v11 = vpop.f32.mrf.mxu0  ;;  %v779_v12 = vpop.f32.mrf.mxu1 }
 0x104   : > { %561 = vst [vmem:[%s1013_s8 + $0x20] sm:$0xff] %v511_v9  ;;  %569 = vst [vmem:[%s1013_s8 + $0x60] sm:$0xff] %v543_v10  ;;  %v756_v13 = vadd.f32 %v755_v11, %v754_v7  ;;  %v780_v14 = vadd.f32 %v779_v12, %v778_v8 }
 0x105   : > { %v757_v15 = vpop.f32.mrf.mxu0  ;;  %v781_v16 = vpop.f32.mrf.mxu1 }
 0x106   : > { %v514_v17 = vadd.f32 %v756_v13, %v1006_v34  ;;  %v546_v18 = vadd.f32 %v780_v14, %v1006_v34 }
 0x107   : > { %v758_v19 = vpop.f32.mrf.mxu0  ;;  %v782_v20 = vpop.f32.mrf.mxu1 }
 0x108   : > { %562 = vst [vmem:[%s1013_s8 + $0x28] sm:$0xff] %v514_v17  ;;  %570 = vst [vmem:[%s1013_s8 + $0x68] sm:$0xff] %v546_v18  ;;  %v759_v21 = vadd.f32 %v758_v19, %v757_v15  ;;  %v783_v22 = vadd.f32 %v782_v20, %v781_v16 }
 0x109   : > { %v760_v23 = vpop.f32.mrf.mxu0  ;;  %v784_v24 = vpop.f32.mrf.mxu1 }
 0x10a   : > { %v519_v25 = vadd.f32 %v759_v21, %v1006_v34  ;;  %v551_v26 = vadd.f32 %v783_v22, %v1006_v34 }
 0x10b   : > { %v761_v27 = vpop.f32.mrf.mxu0  ;;  %v785_v28 = vpop.f32.mrf.mxu1 }
 0x10c   : > { %563 = vst [vmem:[%s1013_s8 + $0x30] sm:$0xff] %v519_v25  ;;  %571 = vst [vmem:[%s1013_s8 + $0x70] sm:$0xff] %v551_v26  ;;  %v762_v29 = vadd.f32 %v761_v27, %v760_v23  ;;  %v786_v30 = vadd.f32 %v785_v28, %v784_v24 }
 0x10e   : > { %v522_v31 = vadd.f32 %v762_v29, %v1006_v34  ;;  %v554_v32 = vadd.f32 %v786_v30, %v1006_v34 }
 0x110   : > { %564 = vst [vmem:[%s1013_s8 + $0x38] sm:$0xff] %v522_v31  ;;  %572 = vst [vmem:[%s1013_s8 + $0x78] sm:$0xff] %v554_v32 }
 0x111 PF: > { %s13_s14 = sadd.s32 1, %s889_s14   ;;  %s1060_s12 = smov %s885_s13 }
 0x112   : > { %p10_p5 = scmp.ge.s32.totalorder %s13_s14, 6   ;;  %s1061_s13 = smov %s1063_s15 }
 0x114   :  { %12 = sbr.rel (!%p10_p5) target bundleno = 2 (0x2), region = 68 }

// kernel: forward.12
= control target key start
LH: loop header
LB: loop body
LE: loop exit
PB: predicated region body
PF: predicated region fallthrough
CT: control target
= control target key end

     0   :  { %s1199_s12 = smov 0   ;;  %s1201_s13 = smov 0   ;;  %s1376_s0 = inlined_call_operand.vmem [shape: bf16[512,384], index: 0, kind: input, shape index: {}]   ;;  %s1377_s1 = inlined_call_operand.vmem [shape: bf16[384,128], index: 1, kind: input, shape index: {}]   ;;  %s1378_s2 = inlined_call_operand.vmem [shape: f32[1,128], index: 2, kind: input, shape index: {}]   ;;  %s1379_s3 = inlined_call_operand.vmem [shape: f32[512,128], index: 3, kind: output, shape index: {}]  }
   0x1   :  { %s1203_s14 = smov 0  }
   0x2 LB: > { %s25_s15 = sadd.s32 1, %s1173_s13  ;;  %p906_p0 = scmp.ge.s32.totalorder %s1177_s14, 1  ;;  %s1177_s14 = sphi %s1203_s14, %s13_s14   ;;  %s1173_s13 = sphi %s1201_s13, %s1381_s13   ;;  %s1169_s12 = sphi %s1199_s12, %s1380_s12  }
   0x3   : > { %p27_p1 = scmp.ge.s32.totalorder %s25_s15, 4  ;;  %p170_p2 = scmp.lt.s32.totalorder %s1177_s14, 5 }
   0x5   : > { %s1383_s15 = smov (%p27_p1, %s25_s15), 0  ;;  %p171_p3 = pnand %p906_p0, %p170_p2 }
   0x6   : > { %s907_s30 = sshll.u32 (!%p171_p3), %s1169_s12, 4 }
   0x7   : > { %174 = sbr.rel (%p171_p3) target bundleno = 307 (0x133), region = 32  ;;  %p206_p4 = scmp.lt.s32.totalorder (!%p171_p3), %s907_s30, 63 }
   0xc   : > { %v1099_v0 = vld [vmem:[%s1377_s1 + $0x78] sm:$0xff]   ;;  %v1101_v2 = vld [vmem:[%s1377_s1 + $0x70] sm:$0xff]   ;;  %v1104_v5 = vld [vmem:[%s1377_s1 + $0x68] sm:$0xff]   ;;  %s1385_s30 = smov (!%p206_p4, %s907_s30), 63 }
   0xd   : > { %v1100_v1 = vld [vmem:[%s1377_s1 + $0x38] sm:$0xff]   ;;  %962 = vmatprep.subr.bf16.mxu0 %v1099_v0  ;;  %v1103_v4 = vld [vmem:[%s1377_s1 + $0x30] sm:$0xff]   ;;  %v1106_v7 = vld [vmem:[%s1377_s1 + $0x28] sm:$0xff]   ;;  %s1074_s25 = smul.u32 12, %s1385_s30  ;;  %s910_s24 = sshll.u32 %s1385_s30, 3 }
   0xe   : > { %963 = vmatpush3.bf16.msra.mxu0 %v1100_v1  ;;  %v1102_v3 = vld [vmem:[%s1377_s1 + $0xb8] sm:$0xff]   ;;  %v1105_v6 = vld [vmem:[%s1377_s1 + $0xb0] sm:$0xff]   ;;  %v1107_v8 = vld [vmem:[%s1377_s1 + $0x60] sm:$0xff]   ;;  %s1334_s27 = scalar_lea.vmem %s1379_s3, %s910_s24 }
   0xf   : > { %964 = vmatprep.subr.bf16.mxu0 %v1101_v2  ;;  %1042 = vmatprep.subr.bf16.mxu1 %v1102_v3  ;;  %v1108_v9 = vld [vmem:[%s1377_s1 + $0xa8] sm:$0xff]   ;;  %v1109_v10 = vld [vmem:[%s1377_s1 + $0x20] sm:$0xff]   ;;  %v1110_v11 = vld [vmem:[%s1377_s1 + $0x58] sm:$0xff]   ;;  %s1286_s10 = scalar_lea.vmem %s1376_s0, %s1074_s25 }
  0x10   : > { %1043 = vmatpush3.bf16.msra.mxu1 %v1102_v3  ;;  %v1111_v12 = vld [vmem:[%s1377_s1 + $0xa0] sm:$0xff]   ;;  %v1112_v13 = vld [vmem:[%s1377_s1 + $0x18] sm:$0xff]   ;;  %v1113_v15 = vld [vmem:[%s1377_s1 + $0x50] sm:$0xff]  }
  0x11   : > { %1044 = vmatprep.subr.bf16.mxu1 %v1105_v6  ;;  %v1114_v14 = vld [vmem:[%s1377_s1 + $0x98] sm:$0xff]   ;;  %v1115_v16 = vld [vmem:[%s1377_s1 + $0x10] sm:$0xff]   ;;  %v1116_v18 = vld [vmem:[%s1377_s1 + $0x48] sm:$0xff]  }
  0x12   : > { %965 = vmatpush3.bf16.msra.mxu0 %v1103_v4  ;;  %v1117_v17 = vld [vmem:[%s1377_s1 + $0x90] sm:$0xff]   ;;  %v1118_v19 = vld [vmem:[%s1377_s1 + $0x8] sm:$0xff]   ;;  %v1119_v20 = vld [vmem:[%s1377_s1 + $0x40] sm:$0xff]  }
  0x13   : > { %966 = vmatprep.subr.bf16.mxu0 %v1104_v5  ;;  %v1120_v21 = vld [vmem:[%s1377_s1 + $0x88] sm:$0xff]   ;;  %v1124_v22 = vld [vmem:[%s1286_s10 + $0x4] ss:$12 sps:$4 sm:$0xff]   ;;  %v1131_v31 = vld [vmem:[%s1286_s10 + $0x34] ss:$12 sps:$4 sm:$0xff]  }
  0x14   : > { %1045 = vmatpush3.bf16.msra.mxu1 %v1105_v6  ;;  %v1121_v23 = vld [vmem:[%s1377_s1] sm:$0xff]   ;;  %620 = vmatprep.mubr.bf16.mxu0 %v1124_v22  ;;  %v1126_v24 = vld [vmem:[%s1286_s10 + $0x8] ss:$12 sps:$4 sm:$0xff]   ;;  %v1135_v32 = vld [vmem:[%s1286_s10 + $0x50] ss:$12 sps:$4 sm:$0xff]  }
  0x15   : > { %1046 = vmatprep.subr.bf16.mxu1 %v1108_v9  ;;  %v1125_v25 = vld [vmem:[%s1377_s1 + $0x80] sm:$0xff]   ;;  %1058 = vmatprep.mubr.bf16.mxu1 %v1126_v24  ;;  %v1128_v27 = vld [vmem:[%s1286_s10 + $0x1c] ss:$12 sps:$4 sm:$0xff]   ;;  %v1136_v35 = vld [vmem:[%s1286_s10 + $0x4c] ss:$12 sps:$4 sm:$0xff]  }
  0x16   : > { %967 = vmatpush3.bf16.msra.mxu0 %v1106_v7  ;;  %v1122_v26 = vld [vmem:[%s1286_s10] ss:$12 sps:$4 sm:$0xff]   ;;  %v1134_v29 = vld [vmem:[%s1286_s10 + $0x38] ss:$12 sps:$4 sm:$0xff]   ;;  %v1142_v33 = vld [vmem:[%s1286_s10 + $0x68] ss:$12 sps:$4 sm:$0xff]  }
  0x17   : > { %968 = vmatprep.subr.bf16.mxu0 %v1107_v8  ;;  %v1127_v28 = vld [vmem:[%s1286_s10 + $0x20] ss:$12 sps:$4 sm:$0xff]   ;;  %v1130_v30 = vld [vmem:[%s1286_s10 + $0x18] ss:$12 sps:$4 sm:$0xff]   ;;  %v1133_v34 = vld [vmem:[%s1286_s10 + $0x30] ss:$12 sps:$4 sm:$0xff]  }
  0x18   : > { %1047 = vmatpush3.bf16.msra.mxu1 %v1108_v9  ;;  %v1143_v36 = vld [vmem:[%s1286_s10 + $0x80] ss:$12 sps:$4 sm:$0xff]   ;;  %v1150_v37 = vld [vmem:[%s1286_s10 + $0x98] ss:$12 sps:$4 sm:$0xff]   ;;  %v1138_v38 = vld [vmem:[%s1286_s10 + $0x48] ss:$12 sps:$4 sm:$0xff]  }
  0x19   : > { %1048 = vmatprep.subr.bf16.mxu1 %v1111_v12  ;;  %v1139_v39 = vld [vmem:[%s1286_s10 + $0x64] ss:$12 sps:$4 sm:$0xff]   ;;  %v1141_v41 = vld [vmem:[%s1286_s10 + $0x60] ss:$12 sps:$4 sm:$0xff]   ;;  %v1144_v42 = vld [vmem:[%s1286_s10 + $0x7c] ss:$12 sps:$4 sm:$0xff]  }
  0x1a   : > { %969 = vmatpush3.bf16.msra.mxu0 %v1109_v10  ;;  %v1151_v40 = vld [vmem:[%s1286_s10 + $0xb0] ss:$12 sps:$4 sm:$0xff]   ;;  %v1146_v43 = vld [vmem:[%s1286_s10 + $0x78] ss:$12 sps:$4 sm:$0xff]   ;;  %v1147_v44 = vld [vmem:[%s1286_s10 + $0x94] ss:$12 sps:$4 sm:$0xff]  }
  0x1b   : > { %970 = vmatprep.subr.bf16.mxu0 %v1110_v11  ;;  %v1149_v45 = vld [vmem:[%s1286_s10 + $0x90] ss:$12 sps:$4 sm:$0xff]   ;;  %v1152_v46 = vld [vmem:[%s1286_s10 + $0xac] ss:$12 sps:$4 sm:$0xff]   ;;  %v1154_v47 = vld [vmem:[%s1286_s10 + $0xa8] ss:$12 sps:$4 sm:$0xff]  }
  0x1c   : > { %1049 = vmatpush3.bf16.msra.mxu1 %v1111_v12  ;;  %v1327_v50 = vld [vmem:[%s1378_s2] ss:$0 sm:$0xff] }
  0x1d   : > { %1050 = vmatprep.subr.bf16.mxu1 %v1114_v14 }
  0x1e   : > { %971 = vmatpush3.bf16.msra.mxu0 %v1112_v13 }
  0x1f   : > { %972 = vmatprep.subr.bf16.mxu0 %v1113_v15 }
  0x20   : > { %1051 = vmatpush3.bf16.msra.mxu1 %v1114_v14 }
  0x21   : > { %1052 = vmatprep.subr.bf16.mxu1 %v1117_v17 }
  0x22   : > { %973 = vmatpush3.bf16.msra.mxu0 %v1115_v16 }
  0x23   : > { %974 = vmatprep.subr.bf16.mxu0 %v1116_v18 }
  0x24   : > { %1053 = vmatpush3.bf16.msra.mxu1 %v1117_v17 }
  0x25   : > { %1054 = vmatprep.subr.bf16.mxu1 %v1120_v21 }
  0x26   : > { %975 = vmatpush3.bf16.msra.mxu0 %v1118_v19 }
  0x27   : > { %976 = vmatprep.subr.bf16.mxu0 %v1119_v20 }
  0x28   : > { %1055 = vmatpush3.bf16.msra.mxu1 %v1120_v21 }
  0x29   : > { %1056 = vmatprep.subr.bf16.mxu1 %v1125_v25 }
  0x2a   : > { %977 = vmatpush3.bf16.msra.mxu0 %v1121_v23 }
  0x2c   : > { %1057 = vmatpush3.bf16.msra.mxu1 %v1125_v25 }
  0x2d   : > { %621 = vmatmul.mubr.bf16.vlgmr.msra.gmra.mxu0 %v1122_v26 }
  0x2e   : > { %628 = vmatprep.mubr.bf16.mxu0 %v1128_v27 }
  0x2f   : > { %1059 = vmatmul.mubr.bf16.vlgmr.msra.gmra.mxu1 %v1127_v28 }
  0x30   : > { %1062 = vmatprep.mubr.bf16.mxu1 %v1134_v29 }
  0x35   : > { %629 = vmatmul.mubr.bf16.gmra.mxu0 %v1130_v30 }
  0x36   : > { %636 = vmatprep.mubr.bf16.mxu0 %v1131_v31 }
  0x37   : > { %1063 = vmatmul.mubr.bf16.gmra.mxu1 %v1135_v32 }
  0x38   : > { %1066 = vmatprep.mubr.bf16.mxu1 %v1142_v33 }
  0x3d   : > { %637 = vmatmul.mubr.bf16.gmra.mxu0 %v1133_v34 }
  0x3e   : > { %644 = vmatprep.mubr.bf16.mxu0 %v1136_v35 }
  0x3f   : > { %1067 = vmatmul.mubr.bf16.gmra.mxu1 %v1143_v36 }
  0x40   : > { %1070 = vmatprep.mubr.bf16.mxu1 %v1150_v37 }
  0x45   : > { %645 = vmatmul.mubr.bf16.gmra.mxu0 %v1138_v38 }
  0x46   : > { %652 = vmatprep.mubr.bf16.mxu0 %v1139_v39 }
  0x47   : > { %1071 = vmatmul.mubr.bf16.gmra.mxu1 %v1151_v40 }
  0x4d   : > { %653 = vmatmul.mubr.bf16.gmra.mxu0 %v1141_v41 }
  0x4e   : > { %660 = vmatprep.mubr.bf16.mxu0 %v1144_v42 }
  0x55   : > { %661 = vmatmul.mubr.bf16.gmra.mxu0 %v1146_v43 }
  0x56   : > { %668 = vmatprep.mubr.bf16.mxu0 %v1147_v44 }
  0x5d   : > { %669 = vmatmul.mubr.bf16.gmra.mxu0 %v1149_v45 }
  0x5e   : > { %676 = vmatprep.mubr.bf16.mxu0 %v1152_v46 }
  0x65   : > { %677 = vmatmul.mubr.bf16.gmra.mxu0 %v1154_v47 }
  0xed   : > { %v978_v48 = vpop.f32.mrf.mxu0 }
  0xef   : > { %v979_v49 = vpop.f32.mrf.mxu0  ;;  %v1060_v52 = vpop.f32.mrf.mxu1 }
  0xf0   : > { %v980_v51 = vadd.f32 %v979_v49, %v978_v48 }
  0xf1   : > { %v981_v53 = vpop.f32.mrf.mxu0  ;;  %v719_v55 = vpop.f32.mrf.mxu1 }
  0xf2   : > { %v623_v54 = vadd.f32 %v980_v51, %v1327_v50 }
  0xf3   : > { %v982_v56 = vpop.f32.mrf.mxu0  ;;  %v1061_v59 = vpop.f32.mrf.mxu1 }
  0xf4   : > { %v983_v57 = vadd.f32 %v982_v56, %v981_v53  ;;  %v720_v58 = vadd.f32 %v719_v55, %v623_v54 }
  0xf5   : > { %v984_v60 = vpop.f32.mrf.mxu0  ;;  %v722_v62 = vpop.f32.mrf.mxu1 }
  0xf6   : > { %782 = vst [vmem:[%s1334_s27] sm:$0xff] %v720_v58  ;;  %v626_v61 = vadd.f32 %v983_v57, %v1327_v50 }
  0xf7   : > { %v985_v63 = vpop.f32.mrf.mxu0  ;;  %v1064_v3 = vpop.f32.mrf.mxu1 }
  0xf8   : > { %v986_v0 = vadd.f32 %v985_v63, %v984_v60  ;;  %v723_v1 = vadd.f32 %v722_v62, %v626_v61 }
  0xf9   : > { %v987_v2 = vpop.f32.mrf.mxu0  ;;  %v735_v9 = vpop.f32.mrf.mxu1 }
  0xfa   : > { %v631_v4 = vadd.f32 %v986_v0, %v1327_v50  ;;  %783 = vst [vmem:[%s1334_s27 + $0x8] sm:$0xff] %v723_v1 }
  0xfb   : > { %v988_v5 = vpop.f32.mrf.mxu0  ;;  %v1065_v15 = vpop.f32.mrf.mxu1 }
  0xfc   : > { %v728_v6 = vadd.f32 %v1060_v52, %v631_v4  ;;  %v989_v7 = vadd.f32 %v988_v5, %v987_v2 }
  0xfd   : > { %v990_v8 = vpop.f32.mrf.mxu0  ;;  %v738_v21 = vpop.f32.mrf.mxu1 }
  0xfe   : > { %784 = vst [vmem:[%s1334_s27 + $0x10] sm:$0xff] %v728_v6  ;;  %v634_v10 = vadd.f32 %v989_v7, %v1327_v50 }
  0xff   : > { %v991_v11 = vpop.f32.mrf.mxu0  ;;  %v1068_v27 = vpop.f32.mrf.mxu1 }
 0x100   : > { %v731_v12 = vadd.f32 %v1061_v59, %v634_v10  ;;  %v992_v13 = vadd.f32 %v991_v11, %v990_v8 }
 0x101   : > { %v993_v14 = vpop.f32.mrf.mxu0  ;;  %v751_v33 = vpop.f32.mrf.mxu1 }
 0x102   : > { %785 = vst [vmem:[%s1334_s27 + $0x18] sm:$0xff] %v731_v12  ;;  %v639_v16 = vadd.f32 %v992_v13, %v1327_v50 }
 0x103   : > { %v994_v17 = vpop.f32.mrf.mxu0  ;;  %v1069_v39 = vpop.f32.mrf.mxu1 }
 0x104   : > { %v995_v18 = vadd.f32 %v994_v17, %v993_v14  ;;  %v736_v19 = vadd.f32 %v735_v9, %v639_v16 }
 0x105   : > { %v996_v20 = vpop.f32.mrf.mxu0  ;;  %v754_v45 = vpop.f32.mrf.mxu1 }
 0x106   : > { %786 = vst [vmem:[%s1334_s27 + $0x20] sm:$0xff] %v736_v19  ;;  %v642_v22 = vadd.f32 %v995_v18, %v1327_v50 }
 0x107   : > { %v997_v23 = vpop.f32.mrf.mxu0  ;;  %v1072_v52 = vpop.f32.mrf.mxu1 }
 0x108   : > { %v998_v24 = vadd.f32 %v997_v23, %v996_v20  ;;  %v739_v25 = vadd.f32 %v738_v21, %v642_v22 }
 0x109   : > { %v999_v26 = vpop.f32.mrf.mxu0  ;;  %v767_v58 = vpop.f32.mrf.mxu1 }
 0x10a   : > { %v647_v28 = vadd.f32 %v998_v24, %v1327_v50  ;;  %787 = vst [vmem:[%s1334_s27 + $0x28] sm:$0xff] %v739_v25 }
 0x10b   : > { %v1000_v29 = vpop.f32.mrf.mxu0  ;;  %v1073_v0 = vpop.f32.mrf.mxu1 }
 0x10c   : > { %v744_v30 = vadd.f32 %v1064_v3, %v647_v28  ;;  %v1001_v31 = vadd.f32 %v1000_v29, %v999_v26 }
 0x10d   : > { %v1002_v32 = vpop.f32.mrf.mxu0  ;;  %v770_v6 = vpop.f32.mrf.mxu1 }
 0x10e   : > { %788 = vst [vmem:[%s1334_s27 + $0x30] sm:$0xff] %v744_v30  ;;  %v650_v34 = vadd.f32 %v1001_v31, %v1327_v50 }
 0x10f   : > { %v1003_v35 = vpop.f32.mrf.mxu0 }
 0x110   : > { %v747_v36 = vadd.f32 %v1065_v15, %v650_v34  ;;  %v1004_v37 = vadd.f32 %v1003_v35, %v1002_v32 }
 0x111   : > { %v1005_v38 = vpop.f32.mrf.mxu0 }
 0x112   : > { %789 = vst [vmem:[%s1334_s27 + $0x38] sm:$0xff] %v747_v36  ;;  %v655_v40 = vadd.f32 %v1004_v37, %v1327_v50 }
 0x113   : > { %v1006_v41 = vpop.f32.mrf.mxu0 }
 0x114   : > { %v1007_v42 = vadd.f32 %v1006_v41, %v1005_v38  ;;  %v752_v43 = vadd.f32 %v751_v33, %v655_v40 }
 0x115   : > { %v1008_v44 = vpop.f32.mrf.mxu0 }
 0x116   : > { %790 = vst [vmem:[%s1334_s27 + $0x40] sm:$0xff] %v752_v43  ;;  %v658_v46 = vadd.f32 %v1007_v42, %v1327_v50 }
 0x117   : > { %v1009_v47 = vpop.f32.mrf.mxu0 }
 0x118   : > { %v1010_v48 = vadd.f32 %v1009_v47, %v1008_v44  ;;  %v755_v49 = vadd.f32 %v754_v45, %v658_v46 }
 0x119   : > { %v1011_v51 = vpop.f32.mrf.mxu0 }
 0x11a   : > { %v663_v53 = vadd.f32 %v1010_v48, %v1327_v50  ;;  %791 = vst [vmem:[%s1334_s27 + $0x48] sm:$0xff] %v755_v49 }
 0x11b   : > { %v1012_v54 = vpop.f32.mrf.mxu0 }
 0x11c   : > { %v760_v55 = vadd.f32 %v1068_v27, %v663_v53  ;;  %v1013_v56 = vadd.f32 %v1012_v54, %v1011_v51 }
 0x11d   : > { %v1014_v57 = vpop.f32.mrf.mxu0 }
 0x11e   : > { %792 = vst [vmem:[%s1334_s27 + $0x50] sm:$0xff] %v760_v55  ;;  %v666_v59 = vadd.f32 %v1013_v56, %v1327_v50 }
 0x11f   : > { %v1015_v60 = vpop.f32.mrf.mxu0 }
 0x120   : > { %v763_v61 = vadd.f32 %v1069_v39, %v666_v59  ;;  %v1016_v62 = vadd.f32 %v1015_v60, %v1014_v57 }
 0x121   : > { %v1017_v63 = vpop.f32.mrf.mxu0 }
 0x122   : > { %793 = vst [vmem:[%s1334_s27 + $0x58] sm:$0xff] %v763_v61  ;;  %v671_v1 = vadd.f32 %v1016_v62, %v1327_v50 }
 0x123   : > { %v1018_v2 = vpop.f32.mrf.mxu0 }
 0x124   : > { %v1019_v3 = vadd.f32 %v1018_v2, %v1017_v63  ;;  %v768_v4 = vadd.f32 %v767_v58, %v671_v1 }
 0x125   : > { %v1020_v5 = vpop.f32.mrf.mxu0 }
 0x126   : > { %794 = vst [vmem:[%s1334_s27 + $0x60] sm:$0xff] %v768_v4  ;;  %v674_v7 = vadd.f32 %v1019_v3, %v1327_v50 }
 0x127   : > { %v1021_v8 = vpop.f32.mrf.mxu0 }
 0x128   : > { %v1022_v9 = vadd.f32 %v1021_v8, %v1020_v5  ;;  %v771_v10 = vadd.f32 %v770_v6, %v674_v7 }
 0x129   : > { %v1023_v11 = vpop.f32.mrf.mxu0 }
 0x12a   : > { %v679_v12 = vadd.f32 %v1022_v9, %v1327_v50  ;;  %795 = vst [vmem:[%s1334_s27 + $0x68] sm:$0xff] %v771_v10 }
 0x12b   : > { %v1024_v13 = vpop.f32.mrf.mxu0 }
 0x12c   : > { %v776_v14 = vadd.f32 %v1072_v52, %v679_v12  ;;  %v1025_v15 = vadd.f32 %v1024_v13, %v1023_v11 }
 0x12e   : > { %796 = vst [vmem:[%s1334_s27 + $0x70] sm:$0xff] %v776_v14  ;;  %v682_v16 = vadd.f32 %v1025_v15, %v1327_v50 }
 0x130   : > { %v779_v17 = vadd.f32 %v1073_v0, %v682_v16 }
 0x132   : > { %797 = vst [vmem:[%s1334_s27 + $0x78] sm:$0xff] %v779_v17 }
 0x133 PF: > { %s13_s14 = sadd.s32 1, %s1177_s14   ;;  %s1380_s12 = smov %s1173_s13 }
 0x134   : > { %p10_p5 = scmp.ge.s32.totalorder %s13_s14, 6   ;;  %s1381_s13 = smov %s1383_s15 }
 0x136   :  { %12 = sbr.rel (!%p10_p5) target bundleno = 2 (0x2), region = 68 }

// kernel: forward.13
= control target key start
LH: loop header
LB: loop body
LE: loop exit
PB: predicated region body
PF: predicated region fallthrough
CT: control target
= control target key end

     0   :  { %s1688_s12 = smov 0   ;;  %s1690_s13 = smov 0   ;;  %s2019_s0 = inlined_call_operand.vmem [shape: bf16[512,640], index: 0, kind: input, shape index: {}]   ;;  %s2020_s1 = inlined_call_operand.vmem [shape: bf16[640,128], index: 1, kind: input, shape index: {}]   ;;  %s2021_s2 = inlined_call_operand.vmem [shape: f32[1,128], index: 2, kind: input, shape index: {}]   ;;  %s2022_s3 = inlined_call_operand.vmem [shape: f32[512,128], index: 3, kind: output, shape index: {}]  }
   0x1   :  { %s1692_s14 = smov 0  }
   0x2 LB: > { %s25_s15 = sadd.s32 1, %s1662_s13  ;;  %p1243_p0 = scmp.ge.s32.totalorder %s1666_s14, 1  ;;  %s1666_s14 = sphi %s1692_s14, %s13_s14   ;;  %s1662_s13 = sphi %s1690_s13, %s2028_s13   ;;  %s1658_s12 = sphi %s1688_s12, %s2027_s12  }
   0x3   : > { %p27_p1 = scmp.ge.s32.totalorder %s25_s15, 4  ;;  %p170_p2 = scmp.lt.s32.totalorder %s1666_s14, 5 }
   0x5   : > { %s2030_s15 = smov (%p27_p1, %s25_s15), 0  ;;  %p171_p3 = pnand %p1243_p0, %p170_p2 }
   0x7   : > { %174 = sbr.rel (%p171_p3) target bundleno = 323 (0x143), region = 32 }
   0xc   : > { %v1548_v0 = vld [vmem:[%s2020_s1 + $0x78] sm:$0xff]   ;;  %v1552_v4 = vld [vmem:[%s2020_s1 + $0x70] sm:$0xff]   ;;  %v1556_v8 = vld [vmem:[%s2020_s1 + $0x68] sm:$0xff]   ;;  %s1244_s23 = sshll.u32 %s1658_s12, 4 }
   0xd   : > { %v1549_v1 = vld [vmem:[%s2020_s1 + $0xf8] sm:$0xff]   ;;  %1331 = vmatprep.subr.bf16.mxu0 %v1548_v0  ;;  %v1553_v5 = vld [vmem:[%s2020_s1 + $0xf0] sm:$0xff]   ;;  %v1557_v9 = vld [vmem:[%s2020_s1 + $0xe8] sm:$0xff]   ;;  %p206_p4 = scmp.lt.s32.totalorder %s1244_s23, 63 }
   0xe   : > { %v1550_v2 = vld [vmem:[%s2020_s1 + $0x38] sm:$0xff]   ;;  %1395 = vmatprep.subr.bf16.mxu1 %v1549_v1  ;;  %v1554_v6 = vld [vmem:[%s2020_s1 + $0x30] sm:$0xff]   ;;  %v1558_v10 = vld [vmem:[%s2020_s1 + $0x28] sm:$0xff]  }
   0xf   : > { %v1551_v3 = vld [vmem:[%s2020_s1 + $0xb8] sm:$0xff]   ;;  %1332 = vmatpush3.bf16.msra.mxu0 %v1550_v2  ;;  %v1555_v7 = vld [vmem:[%s2020_s1 + $0xb0] sm:$0xff]   ;;  %v1559_v11 = vld [vmem:[%s2020_s1 + $0xa8] sm:$0xff]   ;;  %s2032_s23 = smov (!%p206_p4, %s1244_s23), 63 }
  0x10   : > { %1396 = vmatpush3.bf16.msra.mxu1 %v1551_v3  ;;  %1333 = vmatprep.subr.bf16.mxu0 %v1552_v4  ;;  %v1560_v12 = vld [vmem:[%s2020_s1 + $0x60] sm:$0xff]   ;;  %v1564_v16 = vld [vmem:[%s2020_s1 + $0x58] sm:$0xff]   ;;  %v1568_v20 = vld [vmem:[%s2020_s1 + $0x50] sm:$0xff]   ;;  %s1523_s22 = smul.u32 20, %s2032_s23 }
  0x11   : > { %1397 = vmatprep.subr.bf16.mxu1 %v1553_v5  ;;  %v1561_v13 = vld [vmem:[%s2020_s1 + $0xe0] sm:$0xff]   ;;  %v1565_v17 = vld [vmem:[%s2020_s1 + $0xd8] sm:$0xff]   ;;  %v1569_v21 = vld [vmem:[%s2020_s1 + $0xd0] sm:$0xff]  }
  0x12   : > { %v1562_v14 = vld [vmem:[%s2020_s1 + $0x20] sm:$0xff]   ;;  %v1566_v18 = vld [vmem:[%s2020_s1 + $0x18] sm:$0xff]   ;;  %v1570_v22 = vld [vmem:[%s2020_s1 + $0x10] sm:$0xff]   ;;  %s1805_s6 = scalar_lea.vmem %s2019_s0, %s1523_s22 }
  0x13   : > { %1334 = vmatpush3.bf16.msra.mxu0 %v1554_v6  ;;  %v1563_v15 = vld [vmem:[%s2020_s1 + $0xa0] sm:$0xff]   ;;  %v1567_v19 = vld [vmem:[%s2020_s1 + $0x98] sm:$0xff]   ;;  %v1571_v23 = vld [vmem:[%s2020_s1 + $0x90] sm:$0xff]  }
  0x14   : > { %1398 = vmatpush3.bf16.msra.mxu1 %v1555_v7  ;;  %1335 = vmatprep.subr.bf16.mxu0 %v1556_v8  ;;  %v1572_v24 = vld [vmem:[%s2020_s1 + $0x48] sm:$0xff]   ;;  %v1576_v28 = vld [vmem:[%s2020_s1 + $0x40] sm:$0xff]   ;;  %v1586_v36 = vld [vmem:[%s2020_s1 + $0x138] sm:$0xff]  }
  0x15   : > { %1399 = vmatprep.subr.bf16.mxu1 %v1557_v9  ;;  %v1573_v25 = vld [vmem:[%s2020_s1 + $0xc8] sm:$0xff]   ;;  %v1577_v29 = vld [vmem:[%s2020_s1 + $0xc0] sm:$0xff]   ;;  %v1593_v39 = vld [vmem:[%s2020_s1 + $0x130] sm:$0xff]  }
  0x16   : > { %v1574_v26 = vld [vmem:[%s2020_s1 + $0x8] sm:$0xff]   ;;  %v1578_v30 = vld [vmem:[%s2020_s1] sm:$0xff]   ;;  %v1596_v43 = vld [vmem:[%s1805_s6 + $0x5c] ss:$20 sps:$4 sm:$0xff]  }
  0x17   : > { %1336 = vmatpush3.bf16.msra.mxu0 %v1558_v10  ;;  %v1575_v27 = vld [vmem:[%s2020_s1 + $0x88] sm:$0xff]   ;;  %v1579_v31 = vld [vmem:[%s2020_s1 + $0x80] sm:$0xff]   ;;  %v1601_v48 = vld [vmem:[%s1805_s6 + $0x7c] ss:$20 sps:$4 sm:$0xff]  }
  0x18   : > { %1400 = vmatpush3.bf16.msra.mxu1 %v1559_v11  ;;  %1337 = vmatprep.subr.bf16.mxu0 %v1560_v12  ;;  %v1580_v32 = vld [vmem:[%s1805_s6] ss:$20 sps:$4 sm:$0xff]   ;;  %v1582_v33 = vld [vmem:[%s1805_s6 + $0x4] ss:$20 sps:$4 sm:$0xff]   ;;  %v1583_v34 = vld [vmem:[%s1805_s6 + $0x8] ss:$20 sps:$4 sm:$0xff]  }
  0x19   : > { %1401 = vmatprep.subr.bf16.mxu1 %v1561_v13  ;;  %v1585_v35 = vld [vmem:[%s1805_s6 + $0xc] ss:$20 sps:$4 sm:$0xff]   ;;  %844 = vmatprep.mubr.bf16.mxu0 %v1582_v33  ;;  %v1589_v38 = vld [vmem:[%s1805_s6 + $0x34] ss:$20 sps:$4 sm:$0xff]   ;;  %v1592_v41 = vld [vmem:[%s1805_s6 + $0x30] ss:$20 sps:$4 sm:$0xff]  }
  0x1a   : > { %941 = vmatprep.mubr.bf16.mxu1 %v1585_v35  ;;  %v1587_v37 = vld [vmem:[%s1805_s6 + $0x2c] ss:$20 sps:$4 sm:$0xff]   ;;  %v1591_v40 = vld [vmem:[%s1805_s6 + $0x28] ss:$20 sps:$4 sm:$0xff]   ;;  %v1598_v46 = vld [vmem:[%s1805_s6 + $0x50] ss:$20 sps:$4 sm:$0xff]  }
  0x1b   : > { %1338 = vmatpush3.bf16.msra.mxu0 %v1562_v14  ;;  %v1594_v42 = vld [vmem:[%s1805_s6 + $0x54] ss:$20 sps:$4 sm:$0xff]   ;;  %v1607_v45 = vld [vmem:[%s2020_s1 + $0x120] sm:$0xff]   ;;  %v1599_v47 = vld [vmem:[%s1805_s6 + $0x58] ss:$20 sps:$4 sm:$0xff]  }
  0x1c   : > { %1402 = vmatpush3.bf16.msra.mxu1 %v1563_v15  ;;  %1339 = vmatprep.subr.bf16.mxu0 %v1564_v16  ;;  %v1600_v44 = vld [vmem:[%s2020_s1 + $0x128] sm:$0xff]   ;;  %v1603_v49 = vld [vmem:[%s1805_s6 + $0x84] ss:$20 sps:$4 sm:$0xff]   ;;  %v1621_v51 = vld [vmem:[%s2020_s1 + $0x110] sm:$0xff]  }
  0x1d   : > { %1403 = vmatprep.subr.bf16.mxu1 %v1565_v17  ;;  %v1614_v50 = vld [vmem:[%s2020_s1 + $0x118] sm:$0xff]   ;;  %v1606_v53 = vld [vmem:[%s1805_s6 + $0x80] ss:$20 sps:$4 sm:$0xff]   ;;  %v1628_v55 = vld [vmem:[%s2020_s1 + $0x108] sm:$0xff]  }
  0x1e   : > { %v1605_v52 = vld [vmem:[%s1805_s6 + $0x78] ss:$20 sps:$4 sm:$0xff]   ;;  %v1635_v57 = vld [vmem:[%s2020_s1 + $0x100] sm:$0xff]   ;;  %v1613_v59 = vld [vmem:[%s1805_s6 + $0xa8] ss:$20 sps:$4 sm:$0xff]  }
  0x1f   : > { %1340 = vmatpush3.bf16.msra.mxu0 %v1566_v18  ;;  %v1608_v54 = vld [vmem:[%s1805_s6 + $0xa4] ss:$20 sps:$4 sm:$0xff]   ;;  %v1610_v56 = vld [vmem:[%s1805_s6 + $0xac] ss:$20 sps:$4 sm:$0xff]   ;;  %v1617_v61 = vld [vmem:[%s1805_s6 + $0xd4] ss:$20 sps:$4 sm:$0xff]  }
  0x20   : > { %1404 = vmatpush3.bf16.msra.mxu1 %v1567_v19  ;;  %1341 = vmatprep.subr.bf16.mxu0 %v1568_v20  ;;  %v1612_v58 = vld [vmem:[%s1805_s6 + $0xa0] ss:$20 sps:$4 sm:$0xff]   ;;  %v1619_v62 = vld [vmem:[%s1805_s6 + $0xc8] ss:$20 sps:$4 sm:$0xff]   ;;  %v1620_v63 = vld [vmem:[%s1805_s6 + $0xd0] ss:$20 sps:$4 sm:$0xff]  }
  0x21   : > { %1405 = vmatprep.subr.bf16.mxu1 %v1569_v21  ;;  %v1615_v60 = vld [vmem:[%s1805_s6 + $0xcc] ss:$20 sps:$4 sm:$0xff]   ;;  %v1622_v0 = vld [vmem:[%s1805_s6 + $0xf4] ss:$20 sps:$4 sm:$0xff]   ;;  %v1624_v1 = vld [vmem:[%s1805_s6 + $0xfc] ss:$20 sps:$4 sm:$0xff]  }
  0x22   : > { %v1626_v2 = vld [vmem:[%s1805_s6 + $0xf0] ss:$20 sps:$4 sm:$0xff]   ;;  %v1627_v3 = vld [vmem:[%s1805_s6 + $0xf8] ss:$20 sps:$4 sm:$0xff]   ;;  %v1634_v7 = vld [vmem:[%s1805_s6 + $0x120] ss:$20 sps:$4 sm:$0xff]  }
  0x23   : > { %1342 = vmatpush3.bf16.msra.mxu0 %v1570_v22  ;;  %v1629_v4 = vld [vmem:[%s1805_s6 + $0x11c] ss:$20 sps:$4 sm:$0xff]   ;;  %v1631_v5 = vld [vmem:[%s1805_s6 + $0x124] ss:$20 sps:$4 sm:$0xff]   ;;  %v1640_v12 = vld [vmem:[%s1805_s6 + $0x60] ss:$20 sps:$4 sm:$0xff]  }
  0x24   : > { %1406 = vmatpush3.bf16.msra.mxu1 %v1571_v23  ;;  %1343 = vmatprep.subr.bf16.mxu0 %v1572_v24  ;;  %v1633_v6 = vld [vmem:[%s1805_s6 + $0x118] ss:$20 sps:$4 sm:$0xff]   ;;  %v1636_v8 = vld [vmem:[%s1805_s6 + $0x10] ss:$20 sps:$4 sm:$0xff]   ;;  %v1641_v13 = vld [vmem:[%s1805_s6 + $0x100] ss:$20 sps:$4 sm:$0xff]  }
  0x25   : > { %1407 = vmatprep.subr.bf16.mxu1 %v1573_v25  ;;  %v1637_v9 = vld [vmem:[%s1805_s6 + $0xb0] ss:$20 sps:$4 sm:$0xff]   ;;  %v1638_v10 = vld [vmem:[%s1805_s6 + $0x38] ss:$20 sps:$4 sm:$0xff]   ;;  %v1642_v14 = vld [vmem:[%s1805_s6 + $0x88] ss:$20 sps:$4 sm:$0xff]  }
  0x26   : > { %v1639_v11 = vld [vmem:[%s1805_s6 + $0xd8] ss:$20 sps:$4 sm:$0xff]   ;;  %v1643_v15 = vld [vmem:[%s1805_s6 + $0x128] ss:$20 sps:$4 sm:$0xff]   ;;  %s1247_s6 = sshll.u32 %s2032_s23, 3 }
  0x27   : > { %1344 = vmatpush3.bf16.msra.mxu0 %v1574_v26  ;;  %s1971_s8 = scalar_lea.vmem %s2022_s3, %s1247_s6 }
  0x28   : > { %1408 = vmatpush3.bf16.msra.mxu1 %v1575_v27  ;;  %1345 = vmatprep.subr.bf16.mxu0 %v1576_v28 }
  0x29   : > { %1409 = vmatprep.subr.bf16.mxu1 %v1577_v29 }
  0x2b   : > { %1346 = vmatpush3.bf16.msra.mxu0 %v1578_v30 }
  0x2c   : > { %1410 = vmatpush3.bf16.msra.mxu1 %v1579_v31  ;;  %1475 = vmatprep.subr.bf16.mxu0 %v1586_v36 }
  0x2d   : > { %1507 = vmatprep.subr.bf16.mxu1 %v1586_v36 }
  0x2e   : > { %845 = vmatmul.mubr.bf16.vlgmr.msra.gmra.mxu0 %v1580_v32 }
  0x2f   : > { %942 = vmatmul.mubr.bf16.vlgmr.msra.gmra.mxu1 %v1583_v34  ;;  %1476 = vmatpush3.bf16.msra.mxu0 %v1586_v36 }
  0x30   : > { %1515 = vmatpush3.bf16.msra.mxu1 %v1586_v36  ;;  %852 = vmatprep.mubr.bf16.mxu0 %v1587_v37 }
  0x31   : > { %949 = vmatprep.mubr.bf16.mxu1 %v1589_v38  ;;  %1477 = vmatprep.subr.bf16.mxu0 %v1593_v39 }
  0x32   : > { %1508 = vmatprep.subr.bf16.mxu1 %v1593_v39 }
  0x33   : > { %1478 = vmatpush3.bf16.msra.mxu0 %v1593_v39 }
  0x34   : > { %1516 = vmatpush3.bf16.msra.mxu1 %v1593_v39  ;;  %1479 = vmatprep.subr.bf16.mxu0 %v1600_v44 }
  0x35   : > { %1509 = vmatprep.subr.bf16.mxu1 %v1600_v44 }
  0x36   : > { %853 = vmatmul.mubr.bf16.gmra.mxu0 %v1591_v40 }
  0x37   : > { %950 = vmatmul.mubr.bf16.gmra.mxu1 %v1592_v41  ;;  %860 = vmatprep.mubr.bf16.mxu0 %v1594_v42 }
  0x38   : > { %957 = vmatprep.mubr.bf16.mxu1 %v1596_v43  ;;  %1480 = vmatpush3.bf16.msra.mxu0 %v1600_v44 }
  0x39   : > { %1517 = vmatpush3.bf16.msra.mxu1 %v1600_v44  ;;  %1481 = vmatprep.subr.bf16.mxu0 %v1607_v45 }
  0x3a   : > { %1510 = vmatprep.subr.bf16.mxu1 %v1607_v45 }
  0x3c   : > { %1482 = vmatpush3.bf16.msra.mxu0 %v1607_v45 }
  0x3d   : > { %1518 = vmatpush3.bf16.msra.mxu1 %v1607_v45  ;;  %1483 = vmatprep.subr.bf16.mxu0 %v1614_v50 }
  0x3e   : > { %861 = vmatmul.mubr.bf16.gmra.mxu0 %v1598_v46  ;;  %1511 = vmatprep.subr.bf16.mxu1 %v1614_v50 }
  0x3f   : > { %958 = vmatmul.mubr.bf16.gmra.mxu1 %v1599_v47  ;;  %868 = vmatprep.mubr.bf16.mxu0 %v1601_v48 }
  0x40   : > { %965 = vmatprep.mubr.bf16.mxu1 %v1603_v49  ;;  %1484 = vmatpush3.bf16.msra.mxu0 %v1614_v50 }
  0x41   : > { %1519 = vmatpush3.bf16.msra.mxu1 %v1614_v50  ;;  %1485 = vmatprep.subr.bf16.mxu0 %v1621_v51 }
  0x42   : > { %1512 = vmatprep.subr.bf16.mxu1 %v1621_v51 }
  0x44   : > { %1486 = vmatpush3.bf16.msra.mxu0 %v1621_v51 }
  0x45   : > { %1520 = vmatpush3.bf16.msra.mxu1 %v1621_v51  ;;  %1487 = vmatprep.subr.bf16.mxu0 %v1628_v55 }
  0x46   : > { %869 = vmatmul.mubr.bf16.gmra.mxu0 %v1605_v52  ;;  %1513 = vmatprep.subr.bf16.mxu1 %v1628_v55 }
  0x47   : > { %966 = vmatmul.mubr.bf16.gmra.mxu1 %v1606_v53  ;;  %876 = vmatprep.mubr.bf16.mxu0 %v1608_v54 }
  0x48   : > { %973 = vmatprep.mubr.bf16.mxu1 %v1610_v56  ;;  %1488 = vmatpush3.bf16.msra.mxu0 %v1628_v55 }
  0x49   : > { %1521 = vmatpush3.bf16.msra.mxu1 %v1628_v55  ;;  %1489 = vmatprep.subr.bf16.mxu0 %v1635_v57 }
  0x4a   : > { %1514 = vmatprep.subr.bf16.mxu1 %v1635_v57 }
  0x4c   : > { %1490 = vmatpush3.bf16.msra.mxu0 %v1635_v57 }
  0x4d   : > { %1522 = vmatpush3.bf16.msra.mxu1 %v1635_v57 }
  0x4e   : > { %877 = vmatmul.mubr.bf16.gmra.mxu0 %v1612_v58 }
  0x4f   : > { %974 = vmatmul.mubr.bf16.gmra.mxu1 %v1613_v59  ;;  %884 = vmatprep.mubr.bf16.mxu0 %v1615_v60 }
  0x50   : > { %981 = vmatprep.mubr.bf16.mxu1 %v1617_v61 }
  0x56   : > { %885 = vmatmul.mubr.bf16.gmra.mxu0 %v1619_v62 }
  0x57   : > { %982 = vmatmul.mubr.bf16.gmra.mxu1 %v1620_v63  ;;  %892 = vmatprep.mubr.bf16.mxu0 %v1622_v0 }
  0x58   : > { %989 = vmatprep.mubr.bf16.mxu1 %v1624_v1 }
  0x5e   : > { %893 = vmatmul.mubr.bf16.gmra.mxu0 %v1626_v2 }
  0x5f   : > { %990 = vmatmul.mubr.bf16.gmra.mxu1 %v1627_v3  ;;  %900 = vmatprep.mubr.bf16.mxu0 %v1629_v4 }
  0x60   : > { %997 = vmatprep.mubr.bf16.mxu1 %v1631_v5 }
  0x66   : > { %901 = vmatmul.mubr.bf16.gmra.mxu0 %v1633_v6  ;;  %v1926_v6 = vld [vmem:[%s2021_s2] ss:$0 sm:$0xff] }
  0x67   : > { %998 = vmatmul.mubr.bf16.gmra.mxu1 %v1634_v7  ;;  %1491 = vmatprep.mubr.bf16.mxu0 %v1636_v8 }
  0x68   : > { %1499 = vmatprep.mubr.bf16.mxu1 %v1637_v9 }
  0x6e   : > { %1492 = vmatmul.mubr.bf16.vlgmr.msra.gmra.mxu0 %v1638_v10 }
  0x6f   : > { %1500 = vmatmul.mubr.bf16.vlgmr.msra.gmra.mxu1 %v1639_v11  ;;  %1495 = vmatprep.mubr.bf16.mxu0 %v1640_v12 }
  0x70   : > { %1503 = vmatprep.mubr.bf16.mxu1 %v1641_v13 }
  0x76   : > { %1496 = vmatmul.mubr.bf16.gmra.mxu0 %v1642_v14 }
  0x77   : > { %1504 = vmatmul.mubr.bf16.gmra.mxu1 %v1643_v15 }
  0xee   : > { %v1347_v16 = vpop.f32.mrf.mxu0 }
  0xef   : > { %v1877_v17 = vpop.f32.mrf.mxu1 }
  0xf0   : > { %v1348_v18 = vpop.f32.mrf.mxu0 }
  0xf1   : > { %v1412_v19 = vpop.f32.mrf.mxu1  ;;  %v1349_v4 = vadd.f32 %v1348_v18, %v1347_v16 }
  0xf2   : > { %v1350_v20 = vpop.f32.mrf.mxu0  ;;  %v1413_v18 = vadd.f32 %v1412_v19, %v1877_v17 }
  0xf3   : > { %v1879_v21 = vpop.f32.mrf.mxu1  ;;  %v847_v14 = vadd.f32 %v1349_v4, %v1926_v6 }
  0xf4   : > { %v1351_v22 = vpop.f32.mrf.mxu0 }
  0xf5   : > { %v1415_v23 = vpop.f32.mrf.mxu1  ;;  %v1352_v7 = vadd.f32 %v1351_v22, %v1350_v20 }
  0xf6   : > { %v1353_v24 = vpop.f32.mrf.mxu0  ;;  %v1416_v20 = vadd.f32 %v1415_v23, %v1879_v21  ;;  %v944_v21 = vadd.f32 %v1413_v18, %v847_v14 }
  0xf7   : > { %v1881_v25 = vpop.f32.mrf.mxu1 }
  0xf8   : > { %v1354_v26 = vpop.f32.mrf.mxu0 }
  0xf9   : > { %v1883_v27 = vpop.f32.mrf.mxu1  ;;  %v1355_v9 = vadd.f32 %v1354_v26, %v1353_v24 }
  0xfa   : > { %v1356_v28 = vpop.f32.mrf.mxu0  ;;  %v1419_v17 = vadd.f32 %v1883_v27, %v1881_v25 }
  0xfb   : > { %v1885_v29 = vpop.f32.mrf.mxu1  ;;  %v855_v22 = vadd.f32 %v1355_v9, %v1926_v6 }
  0xfc   : > { %v1357_v30 = vpop.f32.mrf.mxu0 }
  0xfd   : > { %v1887_v31 = vpop.f32.mrf.mxu1  ;;  %v1358_v11 = vadd.f32 %v1357_v30, %v1356_v28 }
  0xfe   : > { %v1359_v32 = vpop.f32.mrf.mxu0  ;;  %v1422_v23 = vadd.f32 %v1887_v31, %v1885_v29 }
  0xff   : > { %v1889_v33 = vpop.f32.mrf.mxu1  ;;  %v858_v30 = vadd.f32 %v1358_v11, %v1926_v6 }
 0x100   : > { %v1360_v34 = vpop.f32.mrf.mxu0 }
 0x101   : > { %v1891_v35 = vpop.f32.mrf.mxu1  ;;  %v1361_v12 = vadd.f32 %v1360_v34, %v1359_v32  ;;  %v955_v31 = vadd.f32 %v1422_v23, %v858_v30 }
 0x102   : > { %v1362_v36 = vpop.f32.mrf.mxu0 }
 0x103   : > { %v1893_v37 = vpop.f32.mrf.mxu1  ;;  %v863_v32 = vadd.f32 %v1361_v12, %v1926_v6 }
 0x104   : > { %2023 = vst [vmem:[#allocation2_spill] sm:$0xff] %v1893_v37  ;;  %v1363_v38 = vpop.f32.mrf.mxu0 }
 0x105   : > { %v1895_v39 = vpop.f32.mrf.mxu1  ;;  %v1364_v34 = vadd.f32 %v1363_v38, %v1362_v36 }
 0x106   : > { %2024 = vst [vmem:[#allocation3_spill] sm:$0xff] %v1895_v39  ;;  %v1365_v40 = vpop.f32.mrf.mxu0  ;;  %v850_v39 = vadd.f32 %v1352_v7, %v1926_v6 }
 0x107   : > { %v1897_v41 = vpop.f32.mrf.mxu1 }
 0x108   : > { %v1366_v42 = vpop.f32.mrf.mxu0  ;;  %v947_v36 = vadd.f32 %v1416_v20, %v850_v39 }
 0x109   : > { %v1899_v43 = vpop.f32.mrf.mxu1  ;;  %v1367_v24 = vadd.f32 %v1366_v42, %v1365_v40  ;;  %v1425_v40 = vadd.f32 %v1891_v35, %v1889_v33 }
 0x10a   : > { %v1901_v44 = vpop.f32.mrf.mxu0  ;;  %v1431_v35 = vadd.f32 %v1899_v43, %v1897_v41 }
 0x10b   : > { %v1903_v45 = vpop.f32.mrf.mxu1  ;;  %v871_v38 = vadd.f32 %v1367_v24, %v1926_v6  ;;  %v1959_v33 = vadd.f32 %v1425_v40, %v863_v32 }
 0x10c   : > { %v1905_v46 = vpop.f32.mrf.mxu0 }
 0x10d   : > { %v1907_v47 = vpop.f32.mrf.mxu1 }
 0x10e   : > { %v1371_v48 = vpop.f32.mrf.mxu0 }
 0x10f   : > { %v1909_v49 = vpop.f32.mrf.mxu1 }
 0x110   : > { %v1372_v50 = vpop.f32.mrf.mxu0 }
 0x111   : > { %v1911_v51 = vpop.f32.mrf.mxu1  ;;  %v1373_v26 = vadd.f32 %v1372_v50, %v1371_v48 }
 0x112   : > { %v1374_v52 = vpop.f32.mrf.mxu0  ;;  %v1437_v39 = vadd.f32 %v1911_v51, %v1909_v49  ;;  %v968_v51 = vadd.f32 %v1431_v35, %v871_v38  ;;  %v1434_v38 = vadd.f32 %v1907_v47, %v1903_v45  ;;  %v2025_v35 = vld [vmem:[#allocation2_spill] sm:$0xff] }
 0x113   : > { %v1913_v53 = vpop.f32.mrf.mxu1  ;;  %v879_v50 = vadd.f32 %v1373_v26, %v1926_v6 }
 0x114   : > { %v1375_v54 = vpop.f32.mrf.mxu0 }
 0x115   : > { %v1915_v55 = vpop.f32.mrf.mxu1  ;;  %v1376_v42 = vadd.f32 %v1375_v54, %v1374_v52  ;;  %v976_v49 = vadd.f32 %v1437_v39, %v879_v50  ;;  %v2026_v39 = vld [vmem:[#allocation3_spill] sm:$0xff] }
 0x116   : > { %v1377_v56 = vpop.f32.mrf.mxu0 }
 0x117   : > { %v1441_v57 = vpop.f32.mrf.mxu1 }
 0x118   : > { %v1378_v58 = vpop.f32.mrf.mxu0 }
 0x119   : > { %v1442_v59 = vpop.f32.mrf.mxu1  ;;  %v1379_v15 = vadd.f32 %v1378_v58, %v1377_v56 }
 0x11a   : > { %v1380_v60 = vpop.f32.mrf.mxu0  ;;  %v1443_v25 = vadd.f32 %v1442_v59, %v1441_v57  ;;  %v882_v59 = vadd.f32 %v1376_v42, %v1926_v6 }
 0x11b   : > { %v1444_v61 = vpop.f32.mrf.mxu1  ;;  %v887_v19 = vadd.f32 %v1379_v15, %v1926_v6  ;;  %v1370_v15 = vadd.f32 %v1905_v46, %v1901_v44 }
 0x11c   : > { %v1381_v62 = vpop.f32.mrf.mxu0 }
 0x11d   : > { %v1445_v63 = vpop.f32.mrf.mxu1  ;;  %v1382_v56 = vadd.f32 %v1381_v62, %v1380_v60  ;;  %v952_v60 = vadd.f32 %v1419_v17, %v855_v22  ;;  %v1955_v62 = vadd.f32 %v1364_v34, %v1926_v6  ;;  %v984_v57 = vadd.f32 %v1443_v25, %v887_v19 }
 0x11e   : > { %v1383_v0 = vpop.f32.mrf.mxu0  ;;  %v1446_v9 = vadd.f32 %v1445_v63, %v1444_v61  ;;  %v874_v19 = vadd.f32 %v1370_v15, %v1926_v6 }
 0x11f   : > { %v1917_v1 = vpop.f32.mrf.mxu1  ;;  %v890_v7 = vadd.f32 %v1382_v56, %v1926_v6 }
 0x120   : > { %v1384_v2 = vpop.f32.mrf.mxu0 }
 0x121   : > { %v1919_v3 = vpop.f32.mrf.mxu1  ;;  %v1385_v11 = vadd.f32 %v1384_v2, %v1383_v0  ;;  %v987_v2 = vadd.f32 %v1446_v9, %v890_v7 }
 0x122   : > { %v1921_v5 = vpop.f32.mrf.mxu0 }
 0x123   : > { %v1928_v8 = vpop.f32.mrf.mxu1  ;;  %v895_v24 = vadd.f32 %v1385_v11, %v1926_v6 }
 0x124   : > { %v1930_v10 = vpop.f32.mrf.mxu0 }
 0x125   : > { %v1932_v13 = vpop.f32.mrf.mxu1 }
 0x126   : > { %v1389_v16 = vpop.f32.mrf.mxu0 }
 0x127   : > { %v1937_v37 = vpop.f32.mrf.mxu1 }
 0x128   : > { %v1390_v28 = vpop.f32.mrf.mxu0 }
 0x129   : > { %v1454_v58 = vpop.f32.mrf.mxu1  ;;  %v1391_v52 = vadd.f32 %v1390_v28, %v1389_v16  ;;  %v1440_v16 = vadd.f32 %v1915_v55, %v1913_v53  ;;  %v1388_v55 = vadd.f32 %v1930_v10, %v1921_v5 }
 0x12a   : > { %v1392_v4 = vpop.f32.mrf.mxu0  ;;  %v1455_v32 = vadd.f32 %v1454_v58, %v1937_v37 }
 0x12b   : > { %v1950_v48 = vpop.f32.mrf.mxu1  ;;  %v903_v44 = vadd.f32 %v1391_v52, %v1926_v6  ;;  %v979_v53 = vadd.f32 %v1440_v16, %v882_v59  ;;  %v1428_v52 = vadd.f32 %v2026_v39, %v2025_v35 }
 0x12c   : > { %v1393_v27 = vpop.f32.mrf.mxu0 }
 0x12d   : > { %v1457_v29 = vpop.f32.mrf.mxu1  ;;  %v1394_v46 = vadd.f32 %v1393_v27, %v1392_v4  ;;  %v1449_v4 = vadd.f32 %v1919_v3, %v1917_v1  ;;  %v1000_v58 = vadd.f32 %v1455_v32, %v903_v44 }
 0x12e   : > { %v1493_v54 = vpop.f32.mrf.mxu0  ;;  %v1458_v27 = vadd.f32 %v1457_v29, %v1950_v48 }
 0x12f   : > { %v1049_v12 = vadd.f32 %v1493_v54, %v952_v60  ;;  %v1501_v14 = vpop.f32.mrf.mxu1  ;;  %v906_v42 = vadd.f32 %v1394_v46, %v1926_v6  ;;  %v992_v3 = vadd.f32 %v1449_v4, %v895_v24 }
 0x130   : > { %v1081_v41 = vadd.f32 %v1501_v14, %v984_v57  ;;  %v1040_v43 = vpop.f32.mrf.mxu0  ;;  %v971_v57 = vadd.f32 %v1434_v38, %v874_v19 }
 0x131   : > { %v1105_v61 = vmax.f32 %v1049_v12, 0.0  ;;  %v1041_v63 = vadd.f32 %v1040_v43, %v944_v21  ;;  %v1072_v0 = vpop.f32.mrf.mxu1  ;;  %v1003_v9 = vadd.f32 %v1458_v27, %v906_v42 }
 0x132   : > { %v1113_v18 = vmax.f32 %v1081_v41, 0.0  ;;  %v1073_v20 = vadd.f32 %v1072_v0, %v976_v49  ;;  %v1494_v22 = vpop.f32.mrf.mxu0 }
 0x133   : > { %1121 = vst [vmem:[%s1971_s8 + $0x10] sm:$0xff] %v1105_v61  ;;  %v1103_v26 = vmax.f32 %v1041_v63, 0.0  ;;  %v1052_v28 = vadd.f32 %v1494_v22, %v955_v31  ;;  %v1502_v30 = vpop.f32.mrf.mxu1 }
 0x134   : > { %1129 = vst [vmem:[%s1971_s8 + $0x50] sm:$0xff] %v1113_v18  ;;  %v1111_v34 = vmax.f32 %v1073_v20, 0.0  ;;  %v1084_v56 = vadd.f32 %v1502_v30, %v987_v2  ;;  %v1043_v17 = vpop.f32.mrf.mxu0 }
 0x135   : > { %1119 = vst [vmem:[%s1971_s8] sm:$0xff] %v1103_v26  ;;  %v1106_v21 = vmax.f32 %v1052_v28, 0.0  ;;  %v1044_v23 = vadd.f32 %v1043_v17, %v947_v36  ;;  %v1075_v40 = vpop.f32.mrf.mxu1  ;;  %v898_v36 = vadd.f32 %v1388_v55, %v1926_v6  ;;  %v1452_v6 = vadd.f32 %v1932_v13, %v1928_v8 }
 0x136   : > { %1127 = vst [vmem:[%s1971_s8 + $0x40] sm:$0xff] %v1111_v34  ;;  %v1114_v5 = vmax.f32 %v1084_v56, 0.0  ;;  %v1076_v37 = vadd.f32 %v1075_v40, %v979_v53  ;;  %v1497_v10 = vpop.f32.mrf.mxu0 }
 0x137   : > { %1122 = vst [vmem:[%s1971_s8 + $0x18] sm:$0xff] %v1106_v21  ;;  %v1104_v50 = vmax.f32 %v1044_v23, 0.0  ;;  %v1065_v25 = vadd.f32 %v1497_v10, %v968_v51  ;;  %v1505_v1 = vpop.f32.mrf.mxu1  ;;  %v995_v41 = vadd.f32 %v1452_v6, %v898_v36 }
 0x138   : > { %1130 = vst [vmem:[%s1971_s8 + $0x58] sm:$0xff] %v1114_v5  ;;  %v1112_v60 = vmax.f32 %v1076_v37, 0.0  ;;  %v1097_v7 = vadd.f32 %v1505_v1, %v1000_v58  ;;  %v1056_v31 = vpop.f32.mrf.mxu0 }
 0x139   : > { %1120 = vst [vmem:[%s1971_s8 + $0x8] sm:$0xff] %v1104_v50  ;;  %v1109_v45 = vmax.f32 %v1065_v25, 0.0  ;;  %v1057_v47 = vadd.f32 %v1056_v31, %v1959_v33  ;;  %v1088_v54 = vpop.f32.mrf.mxu1  ;;  %v963_v33 = vadd.f32 %v1428_v52, %v1955_v62 }
 0x13a   : > { %1128 = vst [vmem:[%s1971_s8 + $0x48] sm:$0xff] %v1112_v60  ;;  %v1117_v48 = vmax.f32 %v1097_v7, 0.0  ;;  %v1089_v29 = vadd.f32 %v1088_v54, %v992_v3  ;;  %v1498_v59 = vpop.f32.mrf.mxu0 }
 0x13b   : > { %1125 = vst [vmem:[%s1971_s8 + $0x30] sm:$0xff] %v1109_v45  ;;  %v1107_v11 = vmax.f32 %v1057_v47, 0.0  ;;  %v1068_v12 = vadd.f32 %v1498_v59, %v971_v57  ;;  %v1506_v14 = vpop.f32.mrf.mxu1 }
 0x13c   : > { %1133 = vst [vmem:[%s1971_s8 + $0x70] sm:$0xff] %v1117_v48  ;;  %v1115_v15 = vmax.f32 %v1089_v29, 0.0  ;;  %v1100_v8 = vadd.f32 %v1506_v14, %v1003_v9  ;;  %v1059_v13 = vpop.f32.mrf.mxu0 }
 0x13d   : > { %1123 = vst [vmem:[%s1971_s8 + $0x20] sm:$0xff] %v1107_v11  ;;  %v1110_v43 = vmax.f32 %v1068_v12, 0.0  ;;  %v1060_v49 = vadd.f32 %v1059_v13, %v963_v33  ;;  %v1091_v51 = vpop.f32.mrf.mxu1 }
 0x13e   : > { %1131 = vst [vmem:[%s1971_s8 + $0x60] sm:$0xff] %v1115_v15  ;;  %v1118_v16 = vmax.f32 %v1100_v8, 0.0  ;;  %v1092_v61 = vadd.f32 %v1091_v51, %v995_v41 }
 0x13f   : > { %1126 = vst [vmem:[%s1971_s8 + $0x38] sm:$0xff] %v1110_v43  ;;  %v1108_v63 = vmax.f32 %v1060_v49, 0.0 }
 0x140   : > { %1134 = vst [vmem:[%s1971_s8 + $0x78] sm:$0xff] %v1118_v16  ;;  %v1116_v0 = vmax.f32 %v1092_v61, 0.0 }
 0x141   : > { %1124 = vst [vmem:[%s1971_s8 + $0x28] sm:$0xff] %v1108_v63 }
 0x142   : > { %1132 = vst [vmem:[%s1971_s8 + $0x68] sm:$0xff] %v1116_v0 }
 0x143 PF: > { %s13_s14 = sadd.s32 1, %s1666_s14   ;;  %s2027_s12 = smov %s1662_s13 }
 0x144   : > { %p10_p5 = scmp.ge.s32.totalorder %s13_s14, 6   ;;  %s2028_s13 = smov %s2030_s15 }
 0x146   :  { %12 = sbr.rel (!%p10_p5) target bundleno = 2 (0x2), region = 68 }

// kernel: forward.15
= control target key start
LH: loop header
LB: loop body
LE: loop exit
PB: predicated region body
PF: predicated region fallthrough
CT: control target
= control target key end

     0   :  { %v617_v40 = vmov 0   ;;  %vm427_vm0 = vcmask 261120   ;;  %v397_v59 = vlaneseq  ;;  %s786_s1 = inlined_call_operand.vmem [shape: bf16[512,32], index: 1, kind: input, shape index: {}]   ;;  %s787_s0 = inlined_call_operand.vmem [shape: bf16[16,512], index: 0, kind: input, shape index: {}]   ;;  %s788_s3 = inlined_call_operand.vmem [shape: bf16[32,256], index: 3, kind: input, shape index: {}]   ;;  %s789_s2 = inlined_call_operand.vmem [shape: f32[1,32], index: 2, kind: input, shape index: {}]   ;;  %s790_s4 = inlined_call_operand.vmem [shape: f32[1,256], index: 4, kind: input, shape index: {}]   ;;  %s791_s5 = inlined_call_operand.vmem [shape: f32[16,256], index: 5, kind: output, shape index: {}]  }
   0x1   :  { %v573_v0 = vld [vmem:[%s786_s1 + $0x78] sm:$0xff]   ;;  %v577_v4 = vld [vmem:[%s786_s1 + $0x70] sm:$0xff]   ;;  %v581_v8 = vld [vmem:[%s786_s1 + $0x68] sm:$0xff]  }
   0x2   :  { %v574_v1 = vld [vmem:[%s786_s1 + $0xf8] sm:$0xff]   ;;  %528 = vmatprep.subr.bf16.mxu0 %v573_v0  ;;  %v578_v5 = vld [vmem:[%s786_s1 + $0xf0] sm:$0xff]   ;;  %v582_v9 = vld [vmem:[%s786_s1 + $0xe8] sm:$0xff]   ;;  %v398_v60 = vshrl.u32 %v397_v59, 7 }
   0x3   :  { %v575_v2 = vld [vmem:[%s786_s1 + $0x38] sm:$0xff]   ;;  %550 = vmatprep.subr.bf16.mxu1 %v574_v1  ;;  %v579_v6 = vld [vmem:[%s786_s1 + $0x30] sm:$0xff]   ;;  %v583_v10 = vld [vmem:[%s786_s1 + $0x28] sm:$0xff]  }
   0x4   :  { %v576_v3 = vld [vmem:[%s786_s1 + $0xb8] sm:$0xff]   ;;  %529 = vmatpush3.bf16.msra.mxu0 %v575_v2  ;;  %v580_v7 = vld [vmem:[%s786_s1 + $0xb0] sm:$0xff]   ;;  %v584_v11 = vld [vmem:[%s786_s1 + $0xa8] sm:$0xff]   ;;  %v399_v61 = vsub.s32 0, %v398_v60  ;;  %v403_v63 = vsub.s32 1, %v398_v60 }
   0x5   :  { %551 = vmatpush3.bf16.msra.mxu1 %v576_v3  ;;  %530 = vmatprep.subr.bf16.mxu0 %v577_v4  ;;  %v585_v12 = vld [vmem:[%s786_s1 + $0x60] sm:$0xff]   ;;  %v589_v16 = vld [vmem:[%s786_s1 + $0x58] sm:$0xff]   ;;  %v593_v20 = vld [vmem:[%s786_s1 + $0x50] sm:$0xff]  }
   0x6   :  { %552 = vmatprep.subr.bf16.mxu1 %v578_v5  ;;  %v586_v13 = vld [vmem:[%s786_s1 + $0xe0] sm:$0xff]   ;;  %v590_v17 = vld [vmem:[%s786_s1 + $0xd8] sm:$0xff]   ;;  %v594_v21 = vld [vmem:[%s786_s1 + $0xd0] sm:$0xff]  }
   0x7   :  { %v587_v14 = vld [vmem:[%s786_s1 + $0x20] sm:$0xff]   ;;  %v591_v18 = vld [vmem:[%s786_s1 + $0x18] sm:$0xff]   ;;  %v595_v22 = vld [vmem:[%s786_s1 + $0x10] sm:$0xff]  }
   0x8   :  { %531 = vmatpush3.bf16.msra.mxu0 %v579_v6  ;;  %v588_v15 = vld [vmem:[%s786_s1 + $0xa0] sm:$0xff]   ;;  %v592_v19 = vld [vmem:[%s786_s1 + $0x98] sm:$0xff]   ;;  %v596_v23 = vld [vmem:[%s786_s1 + $0x90] sm:$0xff]  }
   0x9   :  { %553 = vmatpush3.bf16.msra.mxu1 %v580_v7  ;;  %532 = vmatprep.subr.bf16.mxu0 %v581_v8  ;;  %v597_v24 = vld [vmem:[%s786_s1 + $0x48] sm:$0xff]   ;;  %v601_v28 = vld [vmem:[%s786_s1 + $0x40] sm:$0xff]   ;;  %v613_v36 = vld [vmem:[%s788_s3 + $0x14] ss:$8 sps:$4 sm:$0xff]  }
   0xa   :  { %554 = vmatprep.subr.bf16.mxu1 %v582_v9  ;;  %v598_v25 = vld [vmem:[%s786_s1 + $0xc8] sm:$0xff]   ;;  %v602_v29 = vld [vmem:[%s786_s1 + $0xc0] sm:$0xff]   ;;  %v611_v37 = vld [vmem:[%s788_s3 + $0x10] ss:$8 sps:$4 sm:$0xff]  }
   0xb   :  { %v599_v26 = vld [vmem:[%s786_s1 + $0x8] sm:$0xff]   ;;  %v603_v30 = vld [vmem:[%s786_s1] sm:$0xff]  }
   0xc   :  { %533 = vmatpush3.bf16.msra.mxu0 %v583_v10  ;;  %v600_v27 = vld [vmem:[%s786_s1 + $0x88] sm:$0xff]   ;;  %v604_v31 = vld [vmem:[%s786_s1 + $0x80] sm:$0xff]  }
   0xd   :  { %555 = vmatpush3.bf16.msra.mxu1 %v584_v11  ;;  %534 = vmatprep.subr.bf16.mxu0 %v585_v12  ;;  %v605_v32 = vld [vmem:[%s787_s0] ss:$16 sps:$4 sm:$0xff]   ;;  %v607_v33 = vld [vmem:[%s787_s0 + $0x4] ss:$16 sps:$4 sm:$0xff]   ;;  %v608_v34 = vld [vmem:[%s787_s0 + $0x8] ss:$16 sps:$4 sm:$0xff]  }
   0xe   :  { %556 = vmatprep.subr.bf16.mxu1 %v586_v13  ;;  %v610_v35 = vld [vmem:[%s787_s0 + $0xc] ss:$16 sps:$4 sm:$0xff]   ;;  %340 = vmatprep.mubr.bf16.mxu0 %v607_v33  ;;  %v614_v39 = vld [vmem:[%s788_s3] ss:$8 sps:$4 sm:$0xff]  }
   0xf   :  { %381 = vmatprep.mubr.bf16.mxu1 %v610_v35  ;;  %v616_v38 = vld [vmem:[%s788_s3 + $0x4] ss:$8 sps:$4 sm:$0xff]   ;;  %v486_v46 = vld [vmem:[%s789_s2] ss:$0 sm:$0xff] }
  0x10   :  { %535 = vmatpush3.bf16.msra.mxu0 %v587_v14  ;;  %v395_v62 = vld [vmem:[%s790_s4] sm:$0x3] }
  0x11   :  { %557 = vmatpush3.bf16.msra.mxu1 %v588_v15  ;;  %536 = vmatprep.subr.bf16.mxu0 %v589_v16  ;;  %v400_v0 = vrot.slane %v395_v62, %v399_v61  ;;  %v404_v1 = vrot.slane %v395_v62, %v403_v63 }
  0x12   :  { %558 = vmatprep.subr.bf16.mxu1 %v590_v17 }
  0x14   :  { %537 = vmatpush3.bf16.msra.mxu0 %v591_v18 }
  0x15   :  { %559 = vmatpush3.bf16.msra.mxu1 %v592_v19  ;;  %538 = vmatprep.subr.bf16.mxu0 %v593_v20 }
  0x16   :  { %560 = vmatprep.subr.bf16.mxu1 %v594_v21 }
  0x18   :  { %539 = vmatpush3.bf16.msra.mxu0 %v595_v22 }
  0x19   :  { %561 = vmatpush3.bf16.msra.mxu1 %v596_v23  ;;  %540 = vmatprep.subr.bf16.mxu0 %v597_v24 }
  0x1a   :  { %562 = vmatprep.subr.bf16.mxu1 %v598_v25 }
  0x1c   :  { %541 = vmatpush3.bf16.msra.mxu0 %v599_v26 }
  0x1d   :  { %563 = vmatpush3.bf16.msra.mxu1 %v600_v27  ;;  %542 = vmatprep.subr.bf16.mxu0 %v601_v28 }
  0x1e   :  { %564 = vmatprep.subr.bf16.mxu1 %v602_v29 }
  0x20   :  { %543 = vmatpush3.bf16.msra.mxu0 %v603_v30 }
  0x21   :  { %565 = vmatpush3.bf16.msra.mxu1 %v604_v31  ;;  %443 = vmatprep.subr.bf16.mxu0 %v613_v36 }
  0x23   :  { %341 = vmatmul.mubr.bf16.vlgmr.msra.gmra.mxu0 %v605_v32 }
  0x24   :  { %382 = vmatmul.mubr.bf16.vlgmr.msra.gmra.mxu1 %v608_v34  ;;  %444 = vmatpush1.bf16.msra.mxu0 %v611_v37 }
  0x25   :  { %445 = vmatprep.subr.bf16.mxu0 %v616_v38  ;;  %463 = vmatprep.mubr.bf16.mxu0 %v617_v40 }
  0x28   :  { %446 = vmatpush1.bf16.msra.mxu0 %v614_v39 }
  0xe3   :  { %v544_v41 = vpop.f32.mrf.mxu0 }
  0xe4   :  { %v566_v42 = vpop.f32.mrf.mxu1 }
  0xe5   :  { %v545_v43 = vpop.f32.mrf.mxu0 }
  0xe6   :  { %v546_v44 = vadd.f32 %v545_v43, %v544_v41  ;;  %v567_v45 = vpop.f32.mrf.mxu1 }
  0xe7   :  { %v547_v47 = vpop.f32.mrf.mxu0  ;;  %v568_v53 = vadd.f32 %v567_v45, %v566_v42 }
  0xe8   :  { %v569_v48 = vpop.f32.mrf.mxu1  ;;  %v343_v50 = vadd.f32 %v546_v44, %v486_v46 }
  0xe9   :  { %v548_v49 = vpop.f32.mrf.mxu0 }
  0xea   :  { %v549_v51 = vadd.f32 %v548_v49, %v547_v47  ;;  %v570_v52 = vpop.f32.mrf.mxu1  ;;  %v384_v56 = vadd.f32 %v568_v53, %v343_v50 }
  0xeb   :  { %v571_v55 = vadd.f32 %v570_v52, %v569_v48 }
  0xec   :  { %v346_v54 = vadd.f32 %v549_v51, %v486_v46 }
  0xee   :  { %v387_v57 = vadd.f32 %v571_v55, %v346_v54 }
  0xf0   :  { %v390_v58 = vpack.c.bf16 %v387_v57, %v384_v56 }
  0xf2   :  { %527 = vmatmul.mubr.msk.bf16.vlgmr.msra.gmra.mxu0 %vm427_vm0, %v390_v58 }
 0x1b2   :  { %v465_v2 = vpop.f32.mrf.mxu0 }
 0x1b3   :  { %v466_v3 = vadd.f32 %v465_v2, %v400_v0 }
 0x1b4   :  { %v467_v4 = vpop.f32.mrf.mxu0 }
 0x1b5   :  { %v474_v5 = vmax.f32 %v466_v3, 0.0  ;;  %v468_v6 = vadd.f32 %v467_v4, %v404_v1 }
 0x1b6   :  { %v469_v7 = vpop.f32.mrf.mxu0 }
 0x1b7   :  { %478 = vst [vmem:[%s791_s5] sm:$0xff] %v474_v5  ;;  %v475_v8 = vmax.f32 %v468_v6, 0.0  ;;  %v470_v9 = vadd.f32 %v469_v7, %v400_v0 }
 0x1b8   :  { %v471_v10 = vpop.f32.mrf.mxu0 }
 0x1b9   :  { %479 = vst [vmem:[%s791_s5 + $0x8] sm:$0xff] %v475_v8  ;;  %v476_v11 = vmax.f32 %v470_v9, 0.0  ;;  %v472_v12 = vadd.f32 %v471_v10, %v404_v1 }
 0x1bb   :  { %480 = vst [vmem:[%s791_s5 + $0x10] sm:$0xff] %v476_v11  ;;  %v477_v13 = vmax.f32 %v472_v12, 0.0 }
 0x1bd   :  { %481 = vst [vmem:[%s791_s5 + $0x18] sm:$0xff] %v477_v13 }

// kernel: forward.17
= control target key start
LH: loop header
LB: loop body
LE: loop exit
PB: predicated region body
PF: predicated region fallthrough
CT: control target
= control target key end

     0   :  { %s1081_s12 = smov 0   ;;  %s1083_s13 = smov 0   ;;  %s1401_s0 = inlined_call_operand.vmem [shape: bf16[512,128], index: 0, kind: input, shape index: {}]   ;;  %s1402_s1 = inlined_call_operand.vmem [shape: bf16[128,768], index: 1, kind: input, shape index: {}]   ;;  %s1403_s2 = inlined_call_operand.vmem [shape: f32[1,768], index: 2, kind: input, shape index: {}]   ;;  %s1404_s3 = inlined_call_operand.vmem [shape: f32[512,768], index: 3, kind: output, shape index: {}]  }
   0x1   :  { %s1085_s14 = smov 0   ;;  %s1087_s15 = smov 0  }
   0x2   :  { %s1089_s16 = smov 0   ;;  %s1091_s17 = smov 0  }
   0x3   :  { %s1093_s18 = smov 0   ;;  %s1095_s19 = smov 0  }
   0x4   :  { %s1097_s20 = smov 0  }
   0x5 LB: > { %s821_s21 = sadd.s32 4294967295, %s1058_s20   ;;  %s22_s22 = sadd.s32 1, %s1050_s18  ;;  %s1058_s20 = sphi %s1097_s20, %s13_s20   ;;  %s1054_s19 = sphi %s1095_s19, %s1413_s19   ;;  %s1050_s18 = sphi %s1093_s18, %s1412_s18   ;;  %s1046_s17 = sphi %s1091_s17, %s1411_s17   ;;  %s1042_s16 = sphi %s1089_s16, %s1410_s16   ;;  %s1038_s15 = sphi %s1087_s15, %s1409_s15   ;;  %s1034_s14 = sphi %s1085_s14, %s1408_s14   ;;  %s1030_s13 = sphi %s1083_s13, %s1407_s13   ;;  %s1026_s12 = sphi %s1081_s12, %s1406_s12  }
   0x6   : > { %p23_p0 = scmp.ge.s32.totalorder %s22_s22, 3  ;;  %s25_s23 = sadd.s32 1, %s1054_s19 }
   0x7   : > { %s58_s24 = sadd.s32 1, %s1038_s15  ;;  %p65_p1 = scmp.ne.s32.totalorder %s1038_s15, %s1034_s14 }
   0x8   : > { %s1415_s22 = smov (%p23_p0, %s22_s22), 0  ;;  %s1417_s23 = smov (!%p23_p0, %s25_s23), %s1054_s19 }
   0x9   : > { %s55_s25 = ssub.s32 %s1050_s18, %s1415_s22  ;;  %p66_p2 = scmp.eq.s32.totalorder %s1058_s20, 0 }
   0xa   : > { %p27_p3 = scmp.ge.s32.totalorder %s1417_s23, 4  ;;  %p56_p4 = scmp.eq.s32.totalorder %s55_s25, 0 }
   0xb   : > { %p67_p5 = por %p66_p2, %p65_p1  ;;  %s112_s26 = sadd.s32 1, %s1030_s13 }
   0xc   : > { %s1419_s23 = smov (%p27_p3, %s1417_s23), 0  ;;  %p122_p6 = scmp.ne.s32.totalorder %s1030_s13, %s1026_s12 }
   0xd   : > { %s1142_s27 = scalar_select %p56_p4, %s1038_s15, %s58_s24  }
   0xe   : > { %s107_s28 = ssub.s32 %s1054_s19, %s1419_s23  ;;  %p123_p7 = scmp.eq.s32.totalorder %s821_s21, 11 }
   0xf   : > { %s109_s29 = sor.u32 %s107_s28, %s55_s25  ;;  %p824_p10 = scmp.ge.s32.totalorder %s1058_s20, 12 }
  0x10   : > { %p110_p8 = scmp.eq.s32.totalorder %s109_s29, 0  ;;  %p1148_p9 = por %p123_p7, %p122_p6 }
  0x11   : > { %145 = sbr.rel (%p824_p10) target bundleno = 34 (0x22), region = 16 }
  0x12   : > { %s1153_s4 = scalar_select %p110_p8, %s1030_s13, %s112_s26  }
  0x16   : > { %157 = sbr.rel (!%p67_p5) target bundleno = 34 (0x22), region = 24  ;;  %s159_s5 = sand.u32 (%p67_p5), 1, %s1038_s15  }
  0x17   : > { %s865_s6 = sshll.u32 (%p67_p5), %s1050_s18, 3  ;;  %s825_s7 = sshll.u32 (%p67_p5), %s159_s5, 7 }
  0x18   : > { %s1161_s10 = scalar_lea.vmem (%p67_p5), %s1402_s1, %s865_s6  ;;  %s161_s11 = scalar_lea.vmem (%p67_p5), [#allocation2], %s825_s7 }
  0x19   : > { %v223_v0 = vld [vmem:[%s1161_s10] sm:$0xff] (%p67_p5)  ;;  %v225_v1 = vld [vmem:[%s1161_s10 + $0x18] sm:$0xff] (%p67_p5)  ;;  %v227_v2 = vld [vmem:[%s1161_s10 + $0x30] sm:$0xff] (%p67_p5) }
  0x1a   : > { %224 = vst [vmem:[%s161_s11] sm:$0xff] (%p67_p5), %v223_v0  ;;  %226 = vst [vmem:[%s161_s11 + $0x8] sm:$0xff] (%p67_p5), %v225_v1  ;;  %v229_v3 = vld [vmem:[%s1161_s10 + $0x48] sm:$0xff] (%p67_p5)  ;;  %v231_v4 = vld [vmem:[%s1161_s10 + $0x60] sm:$0xff] (%p67_p5) }
  0x1b   : > { %228 = vst [vmem:[%s161_s11 + $0x10] sm:$0xff] %v227_v2  ;;  %v233_v5 = vld [vmem:[%s1161_s10 + $0x78] sm:$0xff]  ;;  %230 = vst [vmem:[%s161_s11 + $0x18] sm:$0xff] %v229_v3  ;;  %v235_v6 = vld [vmem:[%s1161_s10 + $0x90] sm:$0xff] }
  0x1c   : > { %232 = vst [vmem:[%s161_s11 + $0x20] sm:$0xff] %v231_v4  ;;  %234 = vst [vmem:[%s161_s11 + $0x28] sm:$0xff] %v233_v5  ;;  %v237_v7 = vld [vmem:[%s1161_s10 + $0xa8] sm:$0xff]  ;;  %v239_v8 = vld [vmem:[%s1161_s10 + $0xc0] sm:$0xff] }
  0x1d   : > { %236 = vst [vmem:[%s161_s11 + $0x30] sm:$0xff] %v235_v6  ;;  %238 = vst [vmem:[%s161_s11 + $0x38] sm:$0xff] %v237_v7  ;;  %v241_v9 = vld [vmem:[%s1161_s10 + $0xd8] sm:$0xff]  ;;  %v243_v10 = vld [vmem:[%s1161_s10 + $0xf0] sm:$0xff] }
  0x1e   : > { %240 = vst [vmem:[%s161_s11 + $0x40] sm:$0xff] %v239_v8  ;;  %v245_v11 = vld [vmem:[%s1161_s10 + $0x108] sm:$0xff]  ;;  %242 = vst [vmem:[%s161_s11 + $0x48] sm:$0xff] %v241_v9  ;;  %v247_v12 = vld [vmem:[%s1161_s10 + $0x120] sm:$0xff] }
  0x1f   : > { %244 = vst [vmem:[%s161_s11 + $0x50] sm:$0xff] %v243_v10  ;;  %246 = vst [vmem:[%s161_s11 + $0x58] sm:$0xff] %v245_v11  ;;  %v249_v13 = vld [vmem:[%s1161_s10 + $0x138] sm:$0xff]  ;;  %v251_v14 = vld [vmem:[%s1161_s10 + $0x150] sm:$0xff] }
  0x20   : > { %248 = vst [vmem:[%s161_s11 + $0x60] sm:$0xff] %v247_v12  ;;  %250 = vst [vmem:[%s161_s11 + $0x68] sm:$0xff] %v249_v13  ;;  %v253_v15 = vld [vmem:[%s1161_s10 + $0x168] sm:$0xff] }
  0x21   : > { %252 = vst [vmem:[%s161_s11 + $0x70] sm:$0xff] %v251_v14  ;;  %254 = vst [vmem:[%s161_s11 + $0x78] sm:$0xff] %v253_v15 }
  0x22 PF: > { %p828_p11 = scmp.ge.s32.totalorder %s1058_s20, 1  ;;  %p267_p12 = scmp.lt.s32.totalorder %s1058_s20, 13 }
  0x24   : > { %p268_p13 = pnand %p828_p11, %p267_p12 }
  0x25   : > { %s274_s21 = sand.u32 (!%p268_p13), 1, %s1034_s14   ;;  %s831_s24 = sshll.u32 (!%p268_p13), %s1046_s17, 4 }
  0x26   : > { %271 = sbr.rel (%p268_p13) target bundleno = 312 (0x138), region = 66  ;;  %s829_s25 = sshll.u32 (!%p268_p13), %s274_s21, 7 }
  0x27   : > { %p306_p0 = scmp.lt.s32.totalorder (!%p268_p13), %s831_s24, 63  ;;  %s1185_s26 = scalar_lea.vmem (!%p268_p13), [#allocation2], %s829_s25 }
  0x28   : > { %s1223_s6 = sshll.u32 (!%p268_p13), %s1042_s16, 1  ;;  %s302_s11 = sand.u32 (!%p268_p13), 1, %s1026_s12  }
  0x29   : > { %p313_p1 = scmp.lt.s32.totalorder (!%p268_p13), %s1223_s6, 5  ;;  %s830_s21 = sshll.u32 (!%p268_p13), %s302_s11, 8 }
  0x2a   : > { %s1237_s16 = scalar_lea.vmem (!%p268_p13), [#allocation3], %s830_s21 }
  0x2b   : > { %v1060_v16 = vmov 0   ;;  %v956_v17 = vld [vmem:[%s1185_s26 + $0x74] ss:$8 sps:$4 sm:$0xff]   ;;  %v958_v18 = vld [vmem:[%s1185_s26 + $0x70] ss:$8 sps:$4 sm:$0xff]   ;;  %s1421_s24 = smov (!%p306_p0, %s831_s24), 63  ;;  %v354_v41 = vlaneseq }
  0x2c   : > { %524 = vmatprep.mubr.bf16.mxu0 %v1060_v16  ;;  %564 = vmatprep.mubr.bf16.mxu1 %v1060_v16  ;;  %v959_v19 = vld [vmem:[%s1185_s26 + $0x64] ss:$8 sps:$4 sm:$0xff]   ;;  %v961_v20 = vld [vmem:[%s1185_s26 + $0x60] ss:$8 sps:$4 sm:$0xff]   ;;  %v962_v21 = vld [vmem:[%s1185_s26 + $0x54] ss:$8 sps:$4 sm:$0xff]  }
  0x2d   : > { %492 = vmatprep.subr.bf16.mxu0 %v956_v17  ;;  %866 = vmatprep.subr.bf16.mxu1 %v956_v17  ;;  %s832_s14 = sshll.u32 %s1421_s24, 2  ;;  %v964_v22 = vld [vmem:[%s1185_s26 + $0x50] ss:$8 sps:$4 sm:$0xff]   ;;  %v965_v23 = vld [vmem:[%s1185_s26 + $0x44] ss:$8 sps:$4 sm:$0xff]   ;;  %v355_v42 = vshrl.u32 %v354_v41, 7 }
  0x2e   : > { %493 = vmatpush1.bf16.msra.mxu0 %v958_v18  ;;  %874 = vmatpush1.bf16.msra.mxu1 %v958_v18  ;;  %s1197_s5 = scalar_lea.vmem %s1401_s0, %s832_s14  ;;  %v967_v24 = vld [vmem:[%s1185_s26 + $0x40] ss:$8 sps:$4 sm:$0xff]   ;;  %v968_v25 = vld [vmem:[%s1185_s26 + $0x34] ss:$8 sps:$4 sm:$0xff]   ;;  %v970_v26 = vld [vmem:[%s1185_s26 + $0x30] ss:$8 sps:$4 sm:$0xff]  }
  0x2f   : > { %494 = vmatprep.subr.bf16.mxu0 %v959_v19  ;;  %867 = vmatprep.subr.bf16.mxu1 %v959_v19  ;;  %v971_v27 = vld [vmem:[%s1185_s26 + $0x24] ss:$8 sps:$4 sm:$0xff]   ;;  %v973_v28 = vld [vmem:[%s1185_s26 + $0x20] ss:$8 sps:$4 sm:$0xff]   ;;  %v974_v29 = vld [vmem:[%s1185_s26 + $0x14] ss:$8 sps:$4 sm:$0xff]  }
  0x30   : > { %v976_v30 = vld [vmem:[%s1185_s26 + $0x10] ss:$8 sps:$4 sm:$0xff]   ;;  %v977_v31 = vld [vmem:[%s1185_s26 + $0x4] ss:$8 sps:$4 sm:$0xff]   ;;  %v979_v32 = vld [vmem:[%s1185_s26] ss:$8 sps:$4 sm:$0xff]  }
  0x31   : > { %v980_v33 = vld [vmem:[%s1197_s5] sm:$0xff]   ;;  %v982_v35 = vld [vmem:[%s1197_s5 + $0x8] sm:$0xff]   ;;  %v984_v37 = vld [vmem:[%s1197_s5 + $0x10] sm:$0xff]   ;;  %s314_s7 = scalar_select %p313_p1, %s1223_s6, 5  ;;  %v356_v43 = vsub.s32 0, %v355_v42  ;;  %v360_v45 = vsub.s32 1, %v355_v42 }
  0x32   : > { %495 = vmatpush1.bf16.msra.mxu0 %v961_v20  ;;  %875 = vmatpush1.bf16.msra.mxu1 %v961_v20  ;;  %v981_v34 = vld [vmem:[%s1197_s5 + $0x20] sm:$0xff]   ;;  %v983_v36 = vld [vmem:[%s1197_s5 + $0x28] sm:$0xff]   ;;  %v985_v38 = vld [vmem:[%s1197_s5 + $0x30] sm:$0xff]   ;;  %s882_s12 = smul.u32 (%p1148_p9), 96, %s1046_s17 }
  0x33   : > { %496 = vmatprep.subr.bf16.mxu0 %v962_v21  ;;  %868 = vmatprep.subr.bf16.mxu1 %v962_v21  ;;  %v986_v39 = vld [vmem:[%s1197_s5 + $0x18] sm:$0xff]   ;;  %s315_s10 = scalar_lea.vmem %s1403_s2, %s314_s7 }
  0x34   : > { %v987_v40 = vld [vmem:[%s1197_s5 + $0x38] sm:$0xff]   ;;  %v352_v44 = vld [vmem:[%s315_s10] sm:$0x3]  ;;  %s647_s30 = sadd.s32 (%p1148_p9), %s882_s12, %s1223_s6 }
  0x35   : > { %v1231_v46 = vrot.slane %v352_v44, %v356_v43  ;;  %v1233_v47 = vrot.slane %v352_v44, %v360_v45  ;;  %s862_s24 = sshll.u32 (%p1148_p9), %s647_s30, 3 }
  0x36   : > { %497 = vmatpush1.bf16.msra.mxu0 %v964_v22  ;;  %876 = vmatpush1.bf16.msra.mxu1 %v964_v22  ;;  %s1320_s17 = scalar_lea.vmem (%p1148_p9), %s1404_s3, %s862_s24 }
  0x37   : > { %498 = vmatprep.subr.bf16.mxu0 %v965_v23  ;;  %869 = vmatprep.subr.bf16.mxu1 %v965_v23 }
  0x3a   : > { %499 = vmatpush1.bf16.msra.mxu0 %v967_v24  ;;  %877 = vmatpush1.bf16.msra.mxu1 %v967_v24 }
  0x3b   : > { %500 = vmatprep.subr.bf16.mxu0 %v968_v25  ;;  %870 = vmatprep.subr.bf16.mxu1 %v968_v25 }
  0x3e   : > { %501 = vmatpush1.bf16.msra.mxu0 %v970_v26  ;;  %878 = vmatpush1.bf16.msra.mxu1 %v970_v26 }
  0x3f   : > { %502 = vmatprep.subr.bf16.mxu0 %v971_v27  ;;  %871 = vmatprep.subr.bf16.mxu1 %v971_v27 }
  0x42   : > { %503 = vmatpush1.bf16.msra.mxu0 %v973_v28  ;;  %879 = vmatpush1.bf16.msra.mxu1 %v973_v28 }
  0x43   : > { %504 = vmatprep.subr.bf16.mxu0 %v974_v29  ;;  %872 = vmatprep.subr.bf16.mxu1 %v974_v29 }
  0x46   : > { %505 = vmatpush1.bf16.msra.mxu0 %v976_v30  ;;  %880 = vmatpush1.bf16.msra.mxu1 %v976_v30 }
  0x47   : > { %506 = vmatprep.subr.bf16.mxu0 %v977_v31  ;;  %873 = vmatprep.subr.bf16.mxu1 %v977_v31 }
  0x4a   : > { %507 = vmatpush1.bf16.msra.mxu0 %v979_v32  ;;  %881 = vmatpush1.bf16.msra.mxu1 %v979_v32 }
  0x4d   : > { %525 = vmatmul.mubr.bf16.vlgmr.msra.gmra.mxu0 %v980_v33  ;;  %565 = vmatmul.mubr.bf16.vlgmr.msra.gmra.mxu1 %v981_v34 }
  0x4e   : > { %534 = vmatprep.mubr.bf16.mxu0 %v1060_v16  ;;  %574 = vmatprep.mubr.bf16.mxu1 %v1060_v16 }
  0x55   : > { %535 = vmatmul.mubr.bf16.gmra.mxu0 %v982_v35  ;;  %575 = vmatmul.mubr.bf16.gmra.mxu1 %v983_v36 }
  0x56   : > { %544 = vmatprep.mubr.bf16.mxu0 %v1060_v16  ;;  %584 = vmatprep.mubr.bf16.mxu1 %v1060_v16 }
  0x5d   : > { %545 = vmatmul.mubr.bf16.gmra.mxu0 %v984_v37  ;;  %585 = vmatmul.mubr.bf16.gmra.mxu1 %v985_v38 }
  0x5e   : > { %554 = vmatprep.mubr.bf16.mxu0 %v1060_v16  ;;  %594 = vmatprep.mubr.bf16.mxu1 %v1060_v16 }
  0x65   : > { %555 = vmatmul.mubr.bf16.gmra.mxu0 %v986_v39  ;;  %595 = vmatmul.mubr.bf16.gmra.mxu1 %v987_v40 }
 0x10d   : > { %v526_v48 = vpop.f32.mrf.mxu0  ;;  %v566_v49 = vpop.f32.mrf.mxu1 }
 0x10e   : > { %v527_v50 = vadd.f32 %v526_v48, %v1231_v46  ;;  %v567_v51 = vadd.f32 %v566_v49, %v1231_v46 }
 0x10f   : > { %v528_v52 = vpop.f32.mrf.mxu0  ;;  %v568_v53 = vpop.f32.mrf.mxu1 }
 0x110   : > { %605 = vst [vmem:[%s1237_s16] sm:$0xff] %v527_v50  ;;  %621 = vst [vmem:[%s1237_s16 + $0x80] sm:$0xff] %v567_v51  ;;  %v529_v54 = vadd.f32 %v528_v52, %v1233_v47  ;;  %v569_v55 = vadd.f32 %v568_v53, %v1233_v47 }
 0x111   : > { %v530_v56 = vpop.f32.mrf.mxu0  ;;  %v570_v57 = vpop.f32.mrf.mxu1 }
 0x112   : > { %606 = vst [vmem:[%s1237_s16 + $0x8] sm:$0xff] %v529_v54  ;;  %622 = vst [vmem:[%s1237_s16 + $0x88] sm:$0xff] %v569_v55  ;;  %v531_v58 = vadd.f32 %v530_v56, %v1231_v46  ;;  %v571_v59 = vadd.f32 %v570_v57, %v1231_v46 }
 0x113   : > { %v532_v60 = vpop.f32.mrf.mxu0  ;;  %v572_v61 = vpop.f32.mrf.mxu1 }
 0x114   : > { %607 = vst [vmem:[%s1237_s16 + $0x10] sm:$0xff] %v531_v58  ;;  %623 = vst [vmem:[%s1237_s16 + $0x90] sm:$0xff] %v571_v59  ;;  %v533_v62 = vadd.f32 %v532_v60, %v1233_v47  ;;  %v573_v63 = vadd.f32 %v572_v61, %v1233_v47 }
 0x115   : > { %v536_v0 = vpop.f32.mrf.mxu0  ;;  %v576_v1 = vpop.f32.mrf.mxu1 }
 0x116   : > { %608 = vst [vmem:[%s1237_s16 + $0x18] sm:$0xff] %v533_v62  ;;  %624 = vst [vmem:[%s1237_s16 + $0x98] sm:$0xff] %v573_v63  ;;  %v537_v2 = vadd.f32 %v536_v0, %v1231_v46  ;;  %v577_v3 = vadd.f32 %v576_v1, %v1231_v46 }
 0x117   : > { %v538_v4 = vpop.f32.mrf.mxu0  ;;  %v578_v5 = vpop.f32.mrf.mxu1  ;;  %v694_v0 = vld [vmem:[%s1237_s16 + $0x80] sm:$0xff] (%p1148_p9) }
 0x118   : > { %609 = vst [vmem:[%s1237_s16 + $0x20] sm:$0xff] %v537_v2  ;;  %625 = vst [vmem:[%s1237_s16 + $0xa0] sm:$0xff] %v577_v3  ;;  %v539_v6 = vadd.f32 %v538_v4, %v1233_v47  ;;  %v579_v7 = vadd.f32 %v578_v5, %v1233_v47 }
 0x119   : > { %v540_v8 = vpop.f32.mrf.mxu0  ;;  %v580_v9 = vpop.f32.mrf.mxu1  ;;  %v696_v1 = vld [vmem:[%s1237_s16 + $0x88] sm:$0xff] (%p1148_p9)  ;;  %695 = vst [vmem:[%s1320_s17 + $0x180] sm:$0xff] (%p1148_p9), %v694_v0 }
 0x11a   : > { %610 = vst [vmem:[%s1237_s16 + $0x28] sm:$0xff] %v539_v6  ;;  %626 = vst [vmem:[%s1237_s16 + $0xa8] sm:$0xff] %v579_v7  ;;  %v541_v10 = vadd.f32 %v540_v8, %v1231_v46  ;;  %v581_v11 = vadd.f32 %v580_v9, %v1231_v46 }
 0x11b   : > { %v542_v12 = vpop.f32.mrf.mxu0  ;;  %v582_v13 = vpop.f32.mrf.mxu1  ;;  %v666_v50 = vld [vmem:[%s1237_s16 + $0x10] sm:$0xff] (%p1148_p9)  ;;  %697 = vst [vmem:[%s1320_s17 + $0x188] sm:$0xff] (%p1148_p9), %v696_v1 }
 0x11c   : > { %611 = vst [vmem:[%s1237_s16 + $0x30] sm:$0xff] %v541_v10  ;;  %627 = vst [vmem:[%s1237_s16 + $0xb0] sm:$0xff] %v581_v11  ;;  %v543_v14 = vadd.f32 %v542_v12, %v1233_v47  ;;  %v583_v15 = vadd.f32 %v582_v13, %v1233_v47  ;;  %v698_v2 = vld [vmem:[%s1237_s16 + $0x90] sm:$0xff] (%p1148_p9) }
 0x11d   : > { %v546_v16 = vpop.f32.mrf.mxu0  ;;  %v586_v17 = vpop.f32.mrf.mxu1  ;;  %v668_v51 = vld [vmem:[%s1237_s16 + $0x18] sm:$0xff] (%p1148_p9)  ;;  %667 = vst [vmem:[%s1320_s17 + $0x30] sm:$0xff] (%p1148_p9), %v666_v50  ;;  %699 = vst [vmem:[%s1320_s17 + $0x1b0] sm:$0xff] (%p1148_p9), %v698_v2 }
 0x11e   : > { %612 = vst [vmem:[%s1237_s16 + $0x38] sm:$0xff] %v543_v14  ;;  %628 = vst [vmem:[%s1237_s16 + $0xb8] sm:$0xff] %v583_v15  ;;  %v547_v18 = vadd.f32 %v546_v16, %v1231_v46  ;;  %v587_v19 = vadd.f32 %v586_v17, %v1231_v46  ;;  %v700_v3 = vld [vmem:[%s1237_s16 + $0x98] sm:$0xff] (%p1148_p9) }
 0x11f   : > { %v548_v20 = vpop.f32.mrf.mxu0  ;;  %v588_v21 = vpop.f32.mrf.mxu1  ;;  %v670_v52 = vld [vmem:[%s1237_s16 + $0x20] sm:$0xff] (%p1148_p9)  ;;  %669 = vst [vmem:[%s1320_s17 + $0x38] sm:$0xff] (%p1148_p9), %v668_v51  ;;  %701 = vst [vmem:[%s1320_s17 + $0x1b8] sm:$0xff] (%p1148_p9), %v700_v3 }
 0x120   : > { %613 = vst [vmem:[%s1237_s16 + $0x40] sm:$0xff] %v547_v18  ;;  %629 = vst [vmem:[%s1237_s16 + $0xc0] sm:$0xff] %v587_v19  ;;  %v549_v22 = vadd.f32 %v548_v20, %v1233_v47  ;;  %v589_v23 = vadd.f32 %v588_v21, %v1233_v47  ;;  %v702_v4 = vld [vmem:[%s1237_s16 + $0xa0] sm:$0xff] (%p1148_p9) }
 0x121   : > { %v550_v24 = vpop.f32.mrf.mxu0  ;;  %v590_v25 = vpop.f32.mrf.mxu1  ;;  %v672_v53 = vld [vmem:[%s1237_s16 + $0x28] sm:$0xff] (%p1148_p9)  ;;  %671 = vst [vmem:[%s1320_s17 + $0x60] sm:$0xff] (%p1148_p9), %v670_v52  ;;  %703 = vst [vmem:[%s1320_s17 + $0x1e0] sm:$0xff] (%p1148_p9), %v702_v4 }
 0x122   : > { %614 = vst [vmem:[%s1237_s16 + $0x48] sm:$0xff] %v549_v22  ;;  %630 = vst [vmem:[%s1237_s16 + $0xc8] sm:$0xff] %v589_v23  ;;  %v551_v26 = vadd.f32 %v550_v24, %v1231_v46  ;;  %v591_v27 = vadd.f32 %v590_v25, %v1231_v46  ;;  %v704_v5 = vld [vmem:[%s1237_s16 + $0xa8] sm:$0xff] (%p1148_p9) }
 0x123   : > { %v552_v28 = vpop.f32.mrf.mxu0  ;;  %v592_v29 = vpop.f32.mrf.mxu1  ;;  %v674_v54 = vld [vmem:[%s1237_s16 + $0x30] sm:$0xff] (%p1148_p9)  ;;  %673 = vst [vmem:[%s1320_s17 + $0x68] sm:$0xff] (%p1148_p9), %v672_v53  ;;  %705 = vst [vmem:[%s1320_s17 + $0x1e8] sm:$0xff] (%p1148_p9), %v704_v5 }
 0x124   : > { %615 = vst [vmem:[%s1237_s16 + $0x50] sm:$0xff] %v551_v26  ;;  %631 = vst [vmem:[%s1237_s16 + $0xd0] sm:$0xff] %v591_v27  ;;  %v553_v30 = vadd.f32 %v552_v28, %v1233_v47  ;;  %v593_v31 = vadd.f32 %v592_v29, %v1233_v47  ;;  %v706_v6 = vld [vmem:[%s1237_s16 + $0xb0] sm:$0xff] (%p1148_p9) }
 0x125   : > { %v556_v32 = vpop.f32.mrf.mxu0  ;;  %v596_v33 = vpop.f32.mrf.mxu1  ;;  %v676_v55 = vld [vmem:[%s1237_s16 + $0x38] sm:$0xff] (%p1148_p9)  ;;  %675 = vst [vmem:[%s1320_s17 + $0x90] sm:$0xff] (%p1148_p9), %v674_v54  ;;  %707 = vst [vmem:[%s1320_s17 + $0x210] sm:$0xff] (%p1148_p9), %v706_v6 }
 0x126   : > { %616 = vst [vmem:[%s1237_s16 + $0x58] sm:$0xff] %v553_v30  ;;  %632 = vst [vmem:[%s1237_s16 + $0xd8] sm:$0xff] %v593_v31  ;;  %v557_v34 = vadd.f32 %v556_v32, %v1231_v46  ;;  %v597_v35 = vadd.f32 %v596_v33, %v1231_v46  ;;  %v708_v7 = vld [vmem:[%s1237_s16 + $0xb8] sm:$0xff] (%p1148_p9) }
 0x127   : > { %v558_v36 = vpop.f32.mrf.mxu0  ;;  %v598_v37 = vpop.f32.mrf.mxu1  ;;  %v678_v56 = vld [vmem:[%s1237_s16 + $0x40] sm:$0xff] (%p1148_p9)  ;;  %677 = vst [vmem:[%s1320_s17 + $0x98] sm:$0xff] (%p1148_p9), %v676_v55  ;;  %709 = vst [vmem:[%s1320_s17 + $0x218] sm:$0xff] (%p1148_p9), %v708_v7 }
 0x128   : > { %617 = vst [vmem:[%s1237_s16 + $0x60] sm:$0xff] %v557_v34  ;;  %633 = vst [vmem:[%s1237_s16 + $0xe0] sm:$0xff] %v597_v35  ;;  %v559_v38 = vadd.f32 %v558_v36, %v1233_v47  ;;  %v599_v39 = vadd.f32 %v598_v37, %v1233_v47  ;;  %v710_v8 = vld [vmem:[%s1237_s16 + $0xc0] sm:$0xff] (%p1148_p9) }
 0x129   : > { %v560_v40 = vpop.f32.mrf.mxu0  ;;  %v600_v41 = vpop.f32.mrf.mxu1  ;;  %v680_v57 = vld [vmem:[%s1237_s16 + $0x48] sm:$0xff] (%p1148_p9)  ;;  %679 = vst [vmem:[%s1320_s17 + $0xc0] sm:$0xff] (%p1148_p9), %v678_v56  ;;  %711 = vst [vmem:[%s1320_s17 + $0x240] sm:$0xff] (%p1148_p9), %v710_v8 }
 0x12a   : > { %618 = vst [vmem:[%s1237_s16 + $0x68] sm:$0xff] %v559_v38  ;;  %634 = vst [vmem:[%s1237_s16 + $0xe8] sm:$0xff] %v599_v39  ;;  %v561_v42 = vadd.f32 %v560_v40, %v1231_v46  ;;  %v601_v43 = vadd.f32 %v600_v41, %v1231_v46  ;;  %643 = sbr.rel (!%p1148_p9) target bundleno = 312 (0x138), region = 74  ;;  %v662_v46 = vld [vmem:[%s1237_s16] sm:$0xff] (%p1148_p9)  ;;  %v712_v9 = vld [vmem:[%s1237_s16 + $0xc8] sm:$0xff] (%p1148_p9) }
 0x12b   : > { %v562_v44 = vpop.f32.mrf.mxu0  ;;  %v602_v45 = vpop.f32.mrf.mxu1  ;;  %v682_v58 = vld [vmem:[%s1237_s16 + $0x50] sm:$0xff] (%p1148_p9)  ;;  %663 = vst [vmem:[%s1320_s17] sm:$0xff] (%p1148_p9), %v662_v46  ;;  %681 = vst [vmem:[%s1320_s17 + $0xc8] sm:$0xff] (%p1148_p9), %v680_v57 }
 0x12c   : > { %619 = vst [vmem:[%s1237_s16 + $0x70] sm:$0xff] %v561_v42  ;;  %635 = vst [vmem:[%s1237_s16 + $0xf0] sm:$0xff] %v601_v43  ;;  %v563_v48 = vadd.f32 %v562_v44, %v1233_v47  ;;  %v603_v49 = vadd.f32 %v602_v45, %v1233_v47  ;;  %v664_v47 = vld [vmem:[%s1237_s16 + $0x8] sm:$0xff] (%p1148_p9)  ;;  %v714_v10 = vld [vmem:[%s1237_s16 + $0xd0] sm:$0xff] (%p1148_p9) }
 0x12d   : > { %v684_v59 = vld [vmem:[%s1237_s16 + $0x58] sm:$0xff] (%p1148_p9)  ;;  %665 = vst [vmem:[%s1320_s17 + $0x8] sm:$0xff] (%p1148_p9), %v664_v47  ;;  %683 = vst [vmem:[%s1320_s17 + $0xf0] sm:$0xff] (%p1148_p9), %v682_v58 }
 0x12e   : > { %620 = vst [vmem:[%s1237_s16 + $0x78] sm:$0xff] %v563_v48  ;;  %636 = vst [vmem:[%s1237_s16 + $0xf8] sm:$0xff] %v603_v49  ;;  %v716_v11 = vld [vmem:[%s1237_s16 + $0xd8] sm:$0xff] (%p1148_p9) }
 0x12f   : > { %v686_v60 = vld [vmem:[%s1237_s16 + $0x60] sm:$0xff]  ;;  %685 = vst [vmem:[%s1320_s17 + $0xf8] sm:$0xff] %v684_v59  ;;  %713 = vst [vmem:[%s1320_s17 + $0x248] sm:$0xff] %v712_v9 }
 0x130   : > { %687 = vst [vmem:[%s1320_s17 + $0x120] sm:$0xff] %v686_v60  ;;  %715 = vst [vmem:[%s1320_s17 + $0x270] sm:$0xff] %v714_v10  ;;  %v718_v12 = vld [vmem:[%s1237_s16 + $0xe0] sm:$0xff] }
 0x131   : > { %v688_v61 = vld [vmem:[%s1237_s16 + $0x68] sm:$0xff]  ;;  %717 = vst [vmem:[%s1320_s17 + $0x278] sm:$0xff] %v716_v11  ;;  %719 = vst [vmem:[%s1320_s17 + $0x2a0] sm:$0xff] %v718_v12 }
 0x132   : > { %689 = vst [vmem:[%s1320_s17 + $0x128] sm:$0xff] %v688_v61  ;;  %v720_v13 = vld [vmem:[%s1237_s16 + $0xe8] sm:$0xff] }
 0x133   : > { %v690_v62 = vld [vmem:[%s1237_s16 + $0x70] sm:$0xff]  ;;  %721 = vst [vmem:[%s1320_s17 + $0x2a8] sm:$0xff] %v720_v13 }
 0x134   : > { %691 = vst [vmem:[%s1320_s17 + $0x150] sm:$0xff] %v690_v62  ;;  %v722_v14 = vld [vmem:[%s1237_s16 + $0xf0] sm:$0xff] }
 0x135   : > { %v692_v63 = vld [vmem:[%s1237_s16 + $0x78] sm:$0xff]  ;;  %723 = vst [vmem:[%s1320_s17 + $0x2d0] sm:$0xff] %v722_v14 }
 0x136   : > { %693 = vst [vmem:[%s1320_s17 + $0x158] sm:$0xff] %v692_v63  ;;  %v724_v15 = vld [vmem:[%s1237_s16 + $0xf8] sm:$0xff] }
 0x137   : > { %725 = vst [vmem:[%s1320_s17 + $0x2d8] sm:$0xff] %v724_v15 }
 0x138 PF: > { %s13_s20 = sadd.s32 1, %s1058_s20   ;;  %s1406_s12 = smov %s1030_s13 }
 0x139   : > { %p10_p2 = scmp.ge.s32.totalorder %s13_s20, 14   ;;  %s1407_s13 = smov %s1153_s4 }
 0x13a   : > { %s1408_s14 = smov %s1038_s15  ;;  %s1409_s15 = smov %s1142_s27 }
 0x13b   : > { %s1410_s16 = smov %s1050_s18  ;;  %s1411_s17 = smov %s1054_s19 }
 0x13c   : > { %s1412_s18 = smov %s1415_s22  ;;  %s1413_s19 = smov %s1419_s23 }
 0x13d   :  { %12 = sbr.rel (!%p10_p2) target bundleno = 5 (0x5), region = 134 }

// kernel: forward.16
= control target key start
LH: loop header
LB: loop body
LE: loop exit
PB: predicated region body
PF: predicated region fallthrough
CT: control target
= control target key end

     0   :  { %s3362_s12 = smov 0   ;;  %s3364_s13 = smov 0   ;;  %s4396_s0 = inlined_call_operand.vmem [shape: bf16[16,256], index: 0, kind: input, shape index: {}]   ;;  %s4397_s1 = inlined_call_operand.vmem [shape: bf16[256,32768], index: 1, kind: input, shape index: {}]   ;;  %s4398_s2 = inlined_call_operand.vmem [shape: f32[1,32768], index: 2, kind: input, shape index: {}]   ;;  %s4399_s3 = inlined_call_operand.vmem [shape: f32[16,32768], index: 3, kind: output, shape index: {}]  }
   0x1   :  { %s3366_s14 = smov 0   ;;  %s3368_s15 = smov 0  }
   0x2   :  { %s3370_s16 = smov 0  }
   0x3 LB: > { %s22_s17 = sadd.s32 1, %s3336_s15  ;;  %s2980_s18 = sadd.s32 4294967295, %s3340_s16   ;;  %s3340_s16 = sphi %s3370_s16, %s13_s16   ;;  %s3336_s15 = sphi %s3368_s15, %s4405_s15   ;;  %s3332_s14 = sphi %s3366_s14, %s4404_s14   ;;  %s3328_s13 = sphi %s3364_s13, %s4403_s13   ;;  %s3324_s12 = sphi %s3362_s12, %s4402_s12  }
   0x4   : > { %p23_p0 = scmp.ge.s32.totalorder %s22_s17, 16  ;;  %p65_p1 = scmp.ne.s32.totalorder %s3328_s13, %s3324_s12 }
   0x5   : > { %p66_p2 = scmp.eq.s32.totalorder %s3340_s16, 0  ;;  %p123_p4 = scmp.eq.s32.totalorder %s2980_s18, 15 }
   0x6   : > { %s4407_s17 = smov (%p23_p0, %s22_s17), 0  ;;  %s58_s20 = sadd.s32 1, %s3328_s13 }
   0x7   : > { %p67_p3 = por %p66_p2, %p65_p1  ;;  %s55_s19 = ssub.s32 %s3336_s15, %s4407_s17 }
   0x8   : > { %p56_p5 = scmp.eq.s32.totalorder %s55_s19, 0  ;;  %p3397_p6 = por %p123_p4, %p65_p1 }
   0x9   : > { %p2984_p7 = scmp.ge.s32.totalorder %s3340_s16, 16 }
   0xa   : > { %s3402_s22 = scalar_select %p56_p5, %s3328_s13, %s58_s20  }
   0xb   : > { %155 = sbr.rel (%p2984_p7) target bundleno = 148 (0x94), region = 20 }
  0x10   : > { %158 = sbr.rel (!%p67_p3) target bundleno = 148 (0x94), region = 24  ;;  %s160_s23 = sand.u32 (%p67_p3), 1, %s3328_s13  }
  0x11   : > { %s3255_s24 = sshll.u32 (%p67_p3), %s3336_s15, 6  ;;  %s2985_s25 = sshll.u32 (%p67_p3), %s160_s23, 11 }
  0x12   : > { %s3410_s28 = scalar_lea.vmem (%p67_p3), %s4397_s1, %s3255_s24  ;;  %s3415_s29 = scalar_lea.vmem (%p67_p3), [#allocation2], %s2985_s25 }
  0x13   : > { %v178_v0 = vld [vmem:[%s3410_s28] sm:$0xff] (%p67_p3)  ;;  %v180_v1 = vld [vmem:[%s3410_s28 + $0x8] sm:$0xff] (%p67_p3)  ;;  %v182_v2 = vld [vmem:[%s3410_s28 + $0x10] sm:$0xff] (%p67_p3) }
  0x14   : > { %179 = vst [vmem:[%s3415_s29] sm:$0xff] (%p67_p3), %v178_v0  ;;  %181 = vst [vmem:[%s3415_s29 + $0x8] sm:$0xff] (%p67_p3), %v180_v1  ;;  %v184_v3 = vld [vmem:[%s3410_s28 + $0x18] sm:$0xff] (%p67_p3)  ;;  %v186_v4 = vld [vmem:[%s3410_s28 + $0x20] sm:$0xff] (%p67_p3) }
  0x15   : > { %183 = vst [vmem:[%s3415_s29 + $0x10] sm:$0xff] %v182_v2  ;;  %v188_v5 = vld [vmem:[%s3410_s28 + $0x28] sm:$0xff]  ;;  %185 = vst [vmem:[%s3415_s29 + $0x18] sm:$0xff] %v184_v3  ;;  %v190_v6 = vld [vmem:[%s3410_s28 + $0x30] sm:$0xff] }
  0x16   : > { %187 = vst [vmem:[%s3415_s29 + $0x20] sm:$0xff] %v186_v4  ;;  %189 = vst [vmem:[%s3415_s29 + $0x28] sm:$0xff] %v188_v5  ;;  %v192_v7 = vld [vmem:[%s3410_s28 + $0x38] sm:$0xff]  ;;  %v194_v8 = vld [vmem:[%s3410_s28 + $0x400] sm:$0xff] }
  0x17   : > { %191 = vst [vmem:[%s3415_s29 + $0x30] sm:$0xff] %v190_v6  ;;  %193 = vst [vmem:[%s3415_s29 + $0x38] sm:$0xff] %v192_v7  ;;  %v196_v9 = vld [vmem:[%s3410_s28 + $0x408] sm:$0xff]  ;;  %v198_v10 = vld [vmem:[%s3410_s28 + $0x410] sm:$0xff] }
  0x18   : > { %195 = vst [vmem:[%s3415_s29 + $0x40] sm:$0xff] %v194_v8  ;;  %v200_v11 = vld [vmem:[%s3410_s28 + $0x418] sm:$0xff]  ;;  %197 = vst [vmem:[%s3415_s29 + $0x48] sm:$0xff] %v196_v9  ;;  %v202_v12 = vld [vmem:[%s3410_s28 + $0x420] sm:$0xff] }
  0x19   : > { %199 = vst [vmem:[%s3415_s29 + $0x50] sm:$0xff] %v198_v10  ;;  %201 = vst [vmem:[%s3415_s29 + $0x58] sm:$0xff] %v200_v11  ;;  %v204_v13 = vld [vmem:[%s3410_s28 + $0x428] sm:$0xff]  ;;  %v206_v14 = vld [vmem:[%s3410_s28 + $0x430] sm:$0xff] }
  0x1a   : > { %203 = vst [vmem:[%s3415_s29 + $0x60] sm:$0xff] %v202_v12  ;;  %205 = vst [vmem:[%s3415_s29 + $0x68] sm:$0xff] %v204_v13  ;;  %v208_v15 = vld [vmem:[%s3410_s28 + $0x438] sm:$0xff]  ;;  %v210_v16 = vld [vmem:[%s3410_s28 + $0x800] sm:$0xff] }
  0x1b   : > { %207 = vst [vmem:[%s3415_s29 + $0x70] sm:$0xff] %v206_v14  ;;  %v212_v17 = vld [vmem:[%s3410_s28 + $0x808] sm:$0xff]  ;;  %209 = vst [vmem:[%s3415_s29 + $0x78] sm:$0xff] %v208_v15  ;;  %v214_v18 = vld [vmem:[%s3410_s28 + $0x810] sm:$0xff] }
  0x1c   : > { %211 = vst [vmem:[%s3415_s29 + $0x80] sm:$0xff] %v210_v16  ;;  %213 = vst [vmem:[%s3415_s29 + $0x88] sm:$0xff] %v212_v17  ;;  %v216_v19 = vld [vmem:[%s3410_s28 + $0x818] sm:$0xff]  ;;  %v218_v20 = vld [vmem:[%s3410_s28 + $0x820] sm:$0xff] }
  0x1d   : > { %215 = vst [vmem:[%s3415_s29 + $0x90] sm:$0xff] %v214_v18  ;;  %217 = vst [vmem:[%s3415_s29 + $0x98] sm:$0xff] %v216_v19  ;;  %v220_v21 = vld [vmem:[%s3410_s28 + $0x828] sm:$0xff]  ;;  %v222_v22 = vld [vmem:[%s3410_s28 + $0x830] sm:$0xff] }
  0x1e   : > { %219 = vst [vmem:[%s3415_s29 + $0xa0] sm:$0xff] %v218_v20  ;;  %v224_v23 = vld [vmem:[%s3410_s28 + $0x838] sm:$0xff]  ;;  %221 = vst [vmem:[%s3415_s29 + $0xa8] sm:$0xff] %v220_v21  ;;  %v226_v24 = vld [vmem:[%s3410_s28 + $0xc00] sm:$0xff] }
  0x1f   : > { %223 = vst [vmem:[%s3415_s29 + $0xb0] sm:$0xff] %v222_v22  ;;  %225 = vst [vmem:[%s3415_s29 + $0xb8] sm:$0xff] %v224_v23  ;;  %v228_v25 = vld [vmem:[%s3410_s28 + $0xc08] sm:$0xff]  ;;  %v230_v26 = vld [vmem:[%s3410_s28 + $0xc10] sm:$0xff] }
  0x20   : > { %227 = vst [vmem:[%s3415_s29 + $0xc0] sm:$0xff] %v226_v24  ;;  %229 = vst [vmem:[%s3415_s29 + $0xc8] sm:$0xff] %v228_v25  ;;  %v232_v27 = vld [vmem:[%s3410_s28 + $0xc18] sm:$0xff]  ;;  %v234_v28 = vld [vmem:[%s3410_s28 + $0xc20] sm:$0xff] }
  0x21   : > { %231 = vst [vmem:[%s3415_s29 + $0xd0] sm:$0xff] %v230_v26  ;;  %v236_v29 = vld [vmem:[%s3410_s28 + $0xc28] sm:$0xff]  ;;  %233 = vst [vmem:[%s3415_s29 + $0xd8] sm:$0xff] %v232_v27  ;;  %v238_v30 = vld [vmem:[%s3410_s28 + $0xc30] sm:$0xff] }
  0x22   : > { %235 = vst [vmem:[%s3415_s29 + $0xe0] sm:$0xff] %v234_v28  ;;  %237 = vst [vmem:[%s3415_s29 + $0xe8] sm:$0xff] %v236_v29  ;;  %v240_v31 = vld [vmem:[%s3410_s28 + $0xc38] sm:$0xff]  ;;  %v242_v32 = vld [vmem:[%s3410_s28 + $0x1000] sm:$0xff] }
  0x23   : > { %239 = vst [vmem:[%s3415_s29 + $0xf0] sm:$0xff] %v238_v30  ;;  %241 = vst [vmem:[%s3415_s29 + $0xf8] sm:$0xff] %v240_v31  ;;  %v244_v33 = vld [vmem:[%s3410_s28 + $0x1008] sm:$0xff]  ;;  %v246_v34 = vld [vmem:[%s3410_s28 + $0x1010] sm:$0xff] }
  0x24   : > { %243 = vst [vmem:[%s3415_s29 + $0x100] sm:$0xff] %v242_v32  ;;  %v248_v35 = vld [vmem:[%s3410_s28 + $0x1018] sm:$0xff]  ;;  %245 = vst [vmem:[%s3415_s29 + $0x108] sm:$0xff] %v244_v33  ;;  %v250_v36 = vld [vmem:[%s3410_s28 + $0x1020] sm:$0xff] }
  0x25   : > { %247 = vst [vmem:[%s3415_s29 + $0x110] sm:$0xff] %v246_v34  ;;  %249 = vst [vmem:[%s3415_s29 + $0x118] sm:$0xff] %v248_v35  ;;  %v252_v37 = vld [vmem:[%s3410_s28 + $0x1028] sm:$0xff]  ;;  %v254_v38 = vld [vmem:[%s3410_s28 + $0x1030] sm:$0xff] }
  0x26   : > { %251 = vst [vmem:[%s3415_s29 + $0x120] sm:$0xff] %v250_v36  ;;  %253 = vst [vmem:[%s3415_s29 + $0x128] sm:$0xff] %v252_v37  ;;  %v256_v39 = vld [vmem:[%s3410_s28 + $0x1038] sm:$0xff]  ;;  %v258_v40 = vld [vmem:[%s3410_s28 + $0x1400] sm:$0xff] }
  0x27   : > { %255 = vst [vmem:[%s3415_s29 + $0x130] sm:$0xff] %v254_v38  ;;  %v260_v41 = vld [vmem:[%s3410_s28 + $0x1408] sm:$0xff]  ;;  %257 = vst [vmem:[%s3415_s29 + $0x138] sm:$0xff] %v256_v39  ;;  %v262_v42 = vld [vmem:[%s3410_s28 + $0x1410] sm:$0xff] }
  0x28   : > { %259 = vst [vmem:[%s3415_s29 + $0x140] sm:$0xff] %v258_v40  ;;  %261 = vst [vmem:[%s3415_s29 + $0x148] sm:$0xff] %v260_v41  ;;  %v264_v43 = vld [vmem:[%s3410_s28 + $0x1418] sm:$0xff]  ;;  %v266_v44 = vld [vmem:[%s3410_s28 + $0x1420] sm:$0xff] }
  0x29   : > { %263 = vst [vmem:[%s3415_s29 + $0x150] sm:$0xff] %v262_v42  ;;  %265 = vst [vmem:[%s3415_s29 + $0x158] sm:$0xff] %v264_v43  ;;  %v268_v45 = vld [vmem:[%s3410_s28 + $0x1428] sm:$0xff]  ;;  %v270_v46 = vld [vmem:[%s3410_s28 + $0x1430] sm:$0xff] }
  0x2a   : > { %267 = vst [vmem:[%s3415_s29 + $0x160] sm:$0xff] %v266_v44  ;;  %v272_v47 = vld [vmem:[%s3410_s28 + $0x1438] sm:$0xff]  ;;  %269 = vst [vmem:[%s3415_s29 + $0x168] sm:$0xff] %v268_v45  ;;  %v274_v48 = vld [vmem:[%s3410_s28 + $0x1800] sm:$0xff] }
  0x2b   : > { %271 = vst [vmem:[%s3415_s29 + $0x170] sm:$0xff] %v270_v46  ;;  %273 = vst [vmem:[%s3415_s29 + $0x178] sm:$0xff] %v272_v47  ;;  %v276_v49 = vld [vmem:[%s3410_s28 + $0x1808] sm:$0xff]  ;;  %v278_v50 = vld [vmem:[%s3410_s28 + $0x1810] sm:$0xff] }
  0x2c   : > { %275 = vst [vmem:[%s3415_s29 + $0x180] sm:$0xff] %v274_v48  ;;  %277 = vst [vmem:[%s3415_s29 + $0x188] sm:$0xff] %v276_v49  ;;  %v280_v51 = vld [vmem:[%s3410_s28 + $0x1818] sm:$0xff]  ;;  %v282_v52 = vld [vmem:[%s3410_s28 + $0x1820] sm:$0xff] }
  0x2d   : > { %279 = vst [vmem:[%s3415_s29 + $0x190] sm:$0xff] %v278_v50  ;;  %v284_v53 = vld [vmem:[%s3410_s28 + $0x1828] sm:$0xff]  ;;  %281 = vst [vmem:[%s3415_s29 + $0x198] sm:$0xff] %v280_v51  ;;  %v286_v54 = vld [vmem:[%s3410_s28 + $0x1830] sm:$0xff] }
  0x2e   : > { %283 = vst [vmem:[%s3415_s29 + $0x1a0] sm:$0xff] %v282_v52  ;;  %285 = vst [vmem:[%s3415_s29 + $0x1a8] sm:$0xff] %v284_v53  ;;  %v288_v55 = vld [vmem:[%s3410_s28 + $0x1838] sm:$0xff]  ;;  %v290_v56 = vld [vmem:[%s3410_s28 + $0x1c00] sm:$0xff] }
  0x2f   : > { %287 = vst [vmem:[%s3415_s29 + $0x1b0] sm:$0xff] %v286_v54  ;;  %289 = vst [vmem:[%s3415_s29 + $0x1b8] sm:$0xff] %v288_v55  ;;  %v292_v57 = vld [vmem:[%s3410_s28 + $0x1c08] sm:$0xff]  ;;  %v294_v58 = vld [vmem:[%s3410_s28 + $0x1c10] sm:$0xff] }
  0x30   : > { %291 = vst [vmem:[%s3415_s29 + $0x1c0] sm:$0xff] %v290_v56  ;;  %v296_v59 = vld [vmem:[%s3410_s28 + $0x1c18] sm:$0xff]  ;;  %293 = vst [vmem:[%s3415_s29 + $0x1c8] sm:$0xff] %v292_v57  ;;  %v298_v60 = vld [vmem:[%s3410_s28 + $0x1c20] sm:$0xff] }
  0x31   : > { %295 = vst [vmem:[%s3415_s29 + $0x1d0] sm:$0xff] %v294_v58  ;;  %297 = vst [vmem:[%s3415_s29 + $0x1d8] sm:$0xff] %v296_v59  ;;  %v300_v61 = vld [vmem:[%s3410_s28 + $0x1c28] sm:$0xff]  ;;  %v302_v62 = vld [vmem:[%s3410_s28 + $0x1c30] sm:$0xff] }
  0x32   : > { %299 = vst [vmem:[%s3415_s29 + $0x1e0] sm:$0xff] %v298_v60  ;;  %301 = vst [vmem:[%s3415_s29 + $0x1e8] sm:$0xff] %v300_v61  ;;  %v304_v63 = vld [vmem:[%s3410_s28 + $0x1c38] sm:$0xff]  ;;  %v306_v0 = vld [vmem:[%s3410_s28 + $0x2000] sm:$0xff] }
  0x33   : > { %303 = vst [vmem:[%s3415_s29 + $0x1f0] sm:$0xff] %v302_v62  ;;  %v308_v1 = vld [vmem:[%s3410_s28 + $0x2008] sm:$0xff]  ;;  %305 = vst [vmem:[%s3415_s29 + $0x1f8] sm:$0xff] %v304_v63  ;;  %v310_v2 = vld [vmem:[%s3410_s28 + $0x2010] sm:$0xff] }
  0x34   : > { %307 = vst [vmem:[%s3415_s29 + $0x200] sm:$0xff] %v306_v0  ;;  %309 = vst [vmem:[%s3415_s29 + $0x208] sm:$0xff] %v308_v1  ;;  %v312_v3 = vld [vmem:[%s3410_s28 + $0x2018] sm:$0xff]  ;;  %v314_v4 = vld [vmem:[%s3410_s28 + $0x2020] sm:$0xff] }
  0x35   : > { %311 = vst [vmem:[%s3415_s29 + $0x210] sm:$0xff] %v310_v2  ;;  %313 = vst [vmem:[%s3415_s29 + $0x218] sm:$0xff] %v312_v3  ;;  %v316_v5 = vld [vmem:[%s3410_s28 + $0x2028] sm:$0xff]  ;;  %v318_v6 = vld [vmem:[%s3410_s28 + $0x2030] sm:$0xff] }
  0x36   : > { %315 = vst [vmem:[%s3415_s29 + $0x220] sm:$0xff] %v314_v4  ;;  %v320_v7 = vld [vmem:[%s3410_s28 + $0x2038] sm:$0xff]  ;;  %317 = vst [vmem:[%s3415_s29 + $0x228] sm:$0xff] %v316_v5  ;;  %v322_v8 = vld [vmem:[%s3410_s28 + $0x2400] sm:$0xff] }
  0x37   : > { %319 = vst [vmem:[%s3415_s29 + $0x230] sm:$0xff] %v318_v6  ;;  %321 = vst [vmem:[%s3415_s29 + $0x238] sm:$0xff] %v320_v7  ;;  %v324_v9 = vld [vmem:[%s3410_s28 + $0x2408] sm:$0xff]  ;;  %v326_v10 = vld [vmem:[%s3410_s28 + $0x2410] sm:$0xff] }
  0x38   : > { %323 = vst [vmem:[%s3415_s29 + $0x240] sm:$0xff] %v322_v8  ;;  %325 = vst [vmem:[%s3415_s29 + $0x248] sm:$0xff] %v324_v9  ;;  %v328_v11 = vld [vmem:[%s3410_s28 + $0x2418] sm:$0xff]  ;;  %v330_v12 = vld [vmem:[%s3410_s28 + $0x2420] sm:$0xff] }
  0x39   : > { %327 = vst [vmem:[%s3415_s29 + $0x250] sm:$0xff] %v326_v10  ;;  %v332_v13 = vld [vmem:[%s3410_s28 + $0x2428] sm:$0xff]  ;;  %329 = vst [vmem:[%s3415_s29 + $0x258] sm:$0xff] %v328_v11  ;;  %v334_v14 = vld [vmem:[%s3410_s28 + $0x2430] sm:$0xff] }
  0x3a   : > { %331 = vst [vmem:[%s3415_s29 + $0x260] sm:$0xff] %v330_v12  ;;  %333 = vst [vmem:[%s3415_s29 + $0x268] sm:$0xff] %v332_v13  ;;  %v336_v15 = vld [vmem:[%s3410_s28 + $0x2438] sm:$0xff]  ;;  %v338_v16 = vld [vmem:[%s3410_s28 + $0x2800] sm:$0xff] }
  0x3b   : > { %335 = vst [vmem:[%s3415_s29 + $0x270] sm:$0xff] %v334_v14  ;;  %337 = vst [vmem:[%s3415_s29 + $0x278] sm:$0xff] %v336_v15  ;;  %v340_v17 = vld [vmem:[%s3410_s28 + $0x2808] sm:$0xff]  ;;  %v342_v18 = vld [vmem:[%s3410_s28 + $0x2810] sm:$0xff] }
  0x3c   : > { %339 = vst [vmem:[%s3415_s29 + $0x280] sm:$0xff] %v338_v16  ;;  %v344_v19 = vld [vmem:[%s3410_s28 + $0x2818] sm:$0xff]  ;;  %341 = vst [vmem:[%s3415_s29 + $0x288] sm:$0xff] %v340_v17  ;;  %v346_v20 = vld [vmem:[%s3410_s28 + $0x2820] sm:$0xff] }
  0x3d   : > { %343 = vst [vmem:[%s3415_s29 + $0x290] sm:$0xff] %v342_v18  ;;  %345 = vst [vmem:[%s3415_s29 + $0x298] sm:$0xff] %v344_v19  ;;  %v348_v21 = vld [vmem:[%s3410_s28 + $0x2828] sm:$0xff]  ;;  %v350_v22 = vld [vmem:[%s3410_s28 + $0x2830] sm:$0xff] }
  0x3e   : > { %347 = vst [vmem:[%s3415_s29 + $0x2a0] sm:$0xff] %v346_v20  ;;  %349 = vst [vmem:[%s3415_s29 + $0x2a8] sm:$0xff] %v348_v21  ;;  %v352_v23 = vld [vmem:[%s3410_s28 + $0x2838] sm:$0xff]  ;;  %v354_v24 = vld [vmem:[%s3410_s28 + $0x2c00] sm:$0xff] }
  0x3f   : > { %351 = vst [vmem:[%s3415_s29 + $0x2b0] sm:$0xff] %v350_v22  ;;  %v356_v25 = vld [vmem:[%s3410_s28 + $0x2c08] sm:$0xff]  ;;  %353 = vst [vmem:[%s3415_s29 + $0x2b8] sm:$0xff] %v352_v23  ;;  %v358_v26 = vld [vmem:[%s3410_s28 + $0x2c10] sm:$0xff] }
  0x40   : > { %355 = vst [vmem:[%s3415_s29 + $0x2c0] sm:$0xff] %v354_v24  ;;  %357 = vst [vmem:[%s3415_s29 + $0x2c8] sm:$0xff] %v356_v25  ;;  %v360_v27 = vld [vmem:[%s3410_s28 + $0x2c18] sm:$0xff]  ;;  %v362_v28 = vld [vmem:[%s3410_s28 + $0x2c20] sm:$0xff] }
  0x41   : > { %359 = vst [vmem:[%s3415_s29 + $0x2d0] sm:$0xff] %v358_v26  ;;  %361 = vst [vmem:[%s3415_s29 + $0x2d8] sm:$0xff] %v360_v27  ;;  %v364_v29 = vld [vmem:[%s3410_s28 + $0x2c28] sm:$0xff]  ;;  %v366_v30 = vld [vmem:[%s3410_s28 + $0x2c30] sm:$0xff] }
  0x42   : > { %363 = vst [vmem:[%s3415_s29 + $0x2e0] sm:$0xff] %v362_v28  ;;  %v368_v31 = vld [vmem:[%s3410_s28 + $0x2c38] sm:$0xff]  ;;  %365 = vst [vmem:[%s3415_s29 + $0x2e8] sm:$0xff] %v364_v29  ;;  %v370_v32 = vld [vmem:[%s3410_s28 + $0x3000] sm:$0xff] }
  0x43   : > { %367 = vst [vmem:[%s3415_s29 + $0x2f0] sm:$0xff] %v366_v30  ;;  %369 = vst [vmem:[%s3415_s29 + $0x2f8] sm:$0xff] %v368_v31  ;;  %v372_v33 = vld [vmem:[%s3410_s28 + $0x3008] sm:$0xff]  ;;  %v374_v34 = vld [vmem:[%s3410_s28 + $0x3010] sm:$0xff] }
  0x44   : > { %371 = vst [vmem:[%s3415_s29 + $0x300] sm:$0xff] %v370_v32  ;;  %373 = vst [vmem:[%s3415_s29 + $0x308] sm:$0xff] %v372_v33  ;;  %v376_v35 = vld [vmem:[%s3410_s28 + $0x3018] sm:$0xff]  ;;  %v378_v36 = vld [vmem:[%s3410_s28 + $0x3020] sm:$0xff] }
  0x45   : > { %375 = vst [vmem:[%s3415_s29 + $0x310] sm:$0xff] %v374_v34  ;;  %v380_v37 = vld [vmem:[%s3410_s28 + $0x3028] sm:$0xff]  ;;  %377 = vst [vmem:[%s3415_s29 + $0x318] sm:$0xff] %v376_v35  ;;  %v382_v38 = vld [vmem:[%s3410_s28 + $0x3030] sm:$0xff] }
  0x46   : > { %379 = vst [vmem:[%s3415_s29 + $0x320] sm:$0xff] %v378_v36  ;;  %381 = vst [vmem:[%s3415_s29 + $0x328] sm:$0xff] %v380_v37  ;;  %v384_v39 = vld [vmem:[%s3410_s28 + $0x3038] sm:$0xff]  ;;  %v386_v40 = vld [vmem:[%s3410_s28 + $0x3400] sm:$0xff] }
  0x47   : > { %383 = vst [vmem:[%s3415_s29 + $0x330] sm:$0xff] %v382_v38  ;;  %385 = vst [vmem:[%s3415_s29 + $0x338] sm:$0xff] %v384_v39  ;;  %v388_v41 = vld [vmem:[%s3410_s28 + $0x3408] sm:$0xff]  ;;  %v390_v42 = vld [vmem:[%s3410_s28 + $0x3410] sm:$0xff] }
  0x48   : > { %387 = vst [vmem:[%s3415_s29 + $0x340] sm:$0xff] %v386_v40  ;;  %v392_v43 = vld [vmem:[%s3410_s28 + $0x3418] sm:$0xff]  ;;  %389 = vst [vmem:[%s3415_s29 + $0x348] sm:$0xff] %v388_v41  ;;  %v394_v44 = vld [vmem:[%s3410_s28 + $0x3420] sm:$0xff] }
  0x49   : > { %391 = vst [vmem:[%s3415_s29 + $0x350] sm:$0xff] %v390_v42  ;;  %393 = vst [vmem:[%s3415_s29 + $0x358] sm:$0xff] %v392_v43  ;;  %v396_v45 = vld [vmem:[%s3410_s28 + $0x3428] sm:$0xff]  ;;  %v398_v46 = vld [vmem:[%s3410_s28 + $0x3430] sm:$0xff] }
  0x4a   : > { %395 = vst [vmem:[%s3415_s29 + $0x360] sm:$0xff] %v394_v44  ;;  %397 = vst [vmem:[%s3415_s29 + $0x368] sm:$0xff] %v396_v45  ;;  %v400_v47 = vld [vmem:[%s3410_s28 + $0x3438] sm:$0xff]  ;;  %v402_v48 = vld [vmem:[%s3410_s28 + $0x3800] sm:$0xff] }
  0x4b   : > { %399 = vst [vmem:[%s3415_s29 + $0x370] sm:$0xff] %v398_v46  ;;  %v404_v49 = vld [vmem:[%s3410_s28 + $0x3808] sm:$0xff]  ;;  %401 = vst [vmem:[%s3415_s29 + $0x378] sm:$0xff] %v400_v47  ;;  %v406_v50 = vld [vmem:[%s3410_s28 + $0x3810] sm:$0xff] }
  0x4c   : > { %403 = vst [vmem:[%s3415_s29 + $0x380] sm:$0xff] %v402_v48  ;;  %405 = vst [vmem:[%s3415_s29 + $0x388] sm:$0xff] %v404_v49  ;;  %v408_v51 = vld [vmem:[%s3410_s28 + $0x3818] sm:$0xff]  ;;  %v410_v52 = vld [vmem:[%s3410_s28 + $0x3820] sm:$0xff] }
  0x4d   : > { %407 = vst [vmem:[%s3415_s29 + $0x390] sm:$0xff] %v406_v50  ;;  %409 = vst [vmem:[%s3415_s29 + $0x398] sm:$0xff] %v408_v51  ;;  %v412_v53 = vld [vmem:[%s3410_s28 + $0x3828] sm:$0xff]  ;;  %v414_v54 = vld [vmem:[%s3410_s28 + $0x3830] sm:$0xff] }
  0x4e   : > { %411 = vst [vmem:[%s3415_s29 + $0x3a0] sm:$0xff] %v410_v52  ;;  %v416_v55 = vld [vmem:[%s3410_s28 + $0x3838] sm:$0xff]  ;;  %413 = vst [vmem:[%s3415_s29 + $0x3a8] sm:$0xff] %v412_v53  ;;  %v418_v56 = vld [vmem:[%s3410_s28 + $0x3c00] sm:$0xff] }
  0x4f   : > { %415 = vst [vmem:[%s3415_s29 + $0x3b0] sm:$0xff] %v414_v54  ;;  %417 = vst [vmem:[%s3415_s29 + $0x3b8] sm:$0xff] %v416_v55  ;;  %v420_v57 = vld [vmem:[%s3410_s28 + $0x3c08] sm:$0xff]  ;;  %v422_v58 = vld [vmem:[%s3410_s28 + $0x3c10] sm:$0xff] }
  0x50   : > { %419 = vst [vmem:[%s3415_s29 + $0x3c0] sm:$0xff] %v418_v56  ;;  %421 = vst [vmem:[%s3415_s29 + $0x3c8] sm:$0xff] %v420_v57  ;;  %v424_v59 = vld [vmem:[%s3410_s28 + $0x3c18] sm:$0xff]  ;;  %v426_v60 = vld [vmem:[%s3410_s28 + $0x3c20] sm:$0xff] }
  0x51   : > { %423 = vst [vmem:[%s3415_s29 + $0x3d0] sm:$0xff] %v422_v58  ;;  %v428_v61 = vld [vmem:[%s3410_s28 + $0x3c28] sm:$0xff]  ;;  %425 = vst [vmem:[%s3415_s29 + $0x3d8] sm:$0xff] %v424_v59  ;;  %v430_v62 = vld [vmem:[%s3410_s28 + $0x3c30] sm:$0xff] }
  0x52   : > { %427 = vst [vmem:[%s3415_s29 + $0x3e0] sm:$0xff] %v426_v60  ;;  %429 = vst [vmem:[%s3415_s29 + $0x3e8] sm:$0xff] %v428_v61  ;;  %v432_v63 = vld [vmem:[%s3410_s28 + $0x3c38] sm:$0xff]  ;;  %v434_v0 = vld [vmem:[%s3410_s28 + $0x4000] sm:$0xff] }
  0x53   : > { %431 = vst [vmem:[%s3415_s29 + $0x3f0] sm:$0xff] %v430_v62  ;;  %433 = vst [vmem:[%s3415_s29 + $0x3f8] sm:$0xff] %v432_v63  ;;  %v436_v1 = vld [vmem:[%s3410_s28 + $0x4008] sm:$0xff]  ;;  %v438_v2 = vld [vmem:[%s3410_s28 + $0x4010] sm:$0xff] }
  0x54   : > { %435 = vst [vmem:[%s3415_s29 + $0x400] sm:$0xff] %v434_v0  ;;  %v440_v3 = vld [vmem:[%s3410_s28 + $0x4018] sm:$0xff]  ;;  %437 = vst [vmem:[%s3415_s29 + $0x408] sm:$0xff] %v436_v1  ;;  %v442_v4 = vld [vmem:[%s3410_s28 + $0x4020] sm:$0xff] }
  0x55   : > { %439 = vst [vmem:[%s3415_s29 + $0x410] sm:$0xff] %v438_v2  ;;  %441 = vst [vmem:[%s3415_s29 + $0x418] sm:$0xff] %v440_v3  ;;  %v444_v5 = vld [vmem:[%s3410_s28 + $0x4028] sm:$0xff]  ;;  %v446_v6 = vld [vmem:[%s3410_s28 + $0x4030] sm:$0xff] }
  0x56   : > { %443 = vst [vmem:[%s3415_s29 + $0x420] sm:$0xff] %v442_v4  ;;  %445 = vst [vmem:[%s3415_s29 + $0x428] sm:$0xff] %v444_v5  ;;  %v448_v7 = vld [vmem:[%s3410_s28 + $0x4038] sm:$0xff]  ;;  %v450_v8 = vld [vmem:[%s3410_s28 + $0x4400] sm:$0xff] }
  0x57   : > { %447 = vst [vmem:[%s3415_s29 + $0x430] sm:$0xff] %v446_v6  ;;  %v452_v9 = vld [vmem:[%s3410_s28 + $0x4408] sm:$0xff]  ;;  %449 = vst [vmem:[%s3415_s29 + $0x438] sm:$0xff] %v448_v7  ;;  %v454_v10 = vld [vmem:[%s3410_s28 + $0x4410] sm:$0xff] }
  0x58   : > { %451 = vst [vmem:[%s3415_s29 + $0x440] sm:$0xff] %v450_v8  ;;  %453 = vst [vmem:[%s3415_s29 + $0x448] sm:$0xff] %v452_v9  ;;  %v456_v11 = vld [vmem:[%s3410_s28 + $0x4418] sm:$0xff]  ;;  %v458_v12 = vld [vmem:[%s3410_s28 + $0x4420] sm:$0xff] }
  0x59   : > { %455 = vst [vmem:[%s3415_s29 + $0x450] sm:$0xff] %v454_v10  ;;  %457 = vst [vmem:[%s3415_s29 + $0x458] sm:$0xff] %v456_v11  ;;  %v460_v13 = vld [vmem:[%s3410_s28 + $0x4428] sm:$0xff]  ;;  %v462_v14 = vld [vmem:[%s3410_s28 + $0x4430] sm:$0xff] }
  0x5a   : > { %459 = vst [vmem:[%s3415_s29 + $0x460] sm:$0xff] %v458_v12  ;;  %v464_v15 = vld [vmem:[%s3410_s28 + $0x4438] sm:$0xff]  ;;  %461 = vst [vmem:[%s3415_s29 + $0x468] sm:$0xff] %v460_v13  ;;  %v466_v16 = vld [vmem:[%s3410_s28 + $0x4800] sm:$0xff] }
  0x5b   : > { %463 = vst [vmem:[%s3415_s29 + $0x470] sm:$0xff] %v462_v14  ;;  %465 = vst [vmem:[%s3415_s29 + $0x478] sm:$0xff] %v464_v15  ;;  %v468_v17 = vld [vmem:[%s3410_s28 + $0x4808] sm:$0xff]  ;;  %v470_v18 = vld [vmem:[%s3410_s28 + $0x4810] sm:$0xff] }
  0x5c   : > { %467 = vst [vmem:[%s3415_s29 + $0x480] sm:$0xff] %v466_v16  ;;  %469 = vst [vmem:[%s3415_s29 + $0x488] sm:$0xff] %v468_v17  ;;  %v472_v19 = vld [vmem:[%s3410_s28 + $0x4818] sm:$0xff]  ;;  %v474_v20 = vld [vmem:[%s3410_s28 + $0x4820] sm:$0xff] }
  0x5d   : > { %471 = vst [vmem:[%s3415_s29 + $0x490] sm:$0xff] %v470_v18  ;;  %v476_v21 = vld [vmem:[%s3410_s28 + $0x4828] sm:$0xff]  ;;  %473 = vst [vmem:[%s3415_s29 + $0x498] sm:$0xff] %v472_v19  ;;  %v478_v22 = vld [vmem:[%s3410_s28 + $0x4830] sm:$0xff] }
  0x5e   : > { %475 = vst [vmem:[%s3415_s29 + $0x4a0] sm:$0xff] %v474_v20  ;;  %477 = vst [vmem:[%s3415_s29 + $0x4a8] sm:$0xff] %v476_v21  ;;  %v480_v23 = vld [vmem:[%s3410_s28 + $0x4838] sm:$0xff]  ;;  %v482_v24 = vld [vmem:[%s3410_s28 + $0x4c00] sm:$0xff] }
  0x5f   : > { %479 = vst [vmem:[%s3415_s29 + $0x4b0] sm:$0xff] %v478_v22  ;;  %481 = vst [vmem:[%s3415_s29 + $0x4b8] sm:$0xff] %v480_v23  ;;  %v484_v25 = vld [vmem:[%s3410_s28 + $0x4c08] sm:$0xff]  ;;  %v486_v26 = vld [vmem:[%s3410_s28 + $0x4c10] sm:$0xff] }
  0x60   : > { %483 = vst [vmem:[%s3415_s29 + $0x4c0] sm:$0xff] %v482_v24  ;;  %v488_v27 = vld [vmem:[%s3410_s28 + $0x4c18] sm:$0xff]  ;;  %485 = vst [vmem:[%s3415_s29 + $0x4c8] sm:$0xff] %v484_v25  ;;  %v490_v28 = vld [vmem:[%s3410_s28 + $0x4c20] sm:$0xff] }
  0x61   : > { %487 = vst [vmem:[%s3415_s29 + $0x4d0] sm:$0xff] %v486_v26  ;;  %489 = vst [vmem:[%s3415_s29 + $0x4d8] sm:$0xff] %v488_v27  ;;  %v492_v29 = vld [vmem:[%s3410_s28 + $0x4c28] sm:$0xff]  ;;  %v494_v30 = vld [vmem:[%s3410_s28 + $0x4c30] sm:$0xff] }
  0x62   : > { %491 = vst [vmem:[%s3415_s29 + $0x4e0] sm:$0xff] %v490_v28  ;;  %493 = vst [vmem:[%s3415_s29 + $0x4e8] sm:$0xff] %v492_v29  ;;  %v496_v31 = vld [vmem:[%s3410_s28 + $0x4c38] sm:$0xff]  ;;  %v498_v32 = vld [vmem:[%s3410_s28 + $0x5000] sm:$0xff] }
  0x63   : > { %495 = vst [vmem:[%s3415_s29 + $0x4f0] sm:$0xff] %v494_v30  ;;  %v500_v33 = vld [vmem:[%s3410_s28 + $0x5008] sm:$0xff]  ;;  %497 = vst [vmem:[%s3415_s29 + $0x4f8] sm:$0xff] %v496_v31  ;;  %v502_v34 = vld [vmem:[%s3410_s28 + $0x5010] sm:$0xff] }
  0x64   : > { %499 = vst [vmem:[%s3415_s29 + $0x500] sm:$0xff] %v498_v32  ;;  %501 = vst [vmem:[%s3415_s29 + $0x508] sm:$0xff] %v500_v33  ;;  %v504_v35 = vld [vmem:[%s3410_s28 + $0x5018] sm:$0xff]  ;;  %v506_v36 = vld [vmem:[%s3410_s28 + $0x5020] sm:$0xff] }
  0x65   : > { %503 = vst [vmem:[%s3415_s29 + $0x510] sm:$0xff] %v502_v34  ;;  %505 = vst [vmem:[%s3415_s29 + $0x518] sm:$0xff] %v504_v35  ;;  %v508_v37 = vld [vmem:[%s3410_s28 + $0x5028] sm:$0xff]  ;;  %v510_v38 = vld [vmem:[%s3410_s28 + $0x5030] sm:$0xff] }
  0x66   : > { %507 = vst [vmem:[%s3415_s29 + $0x520] sm:$0xff] %v506_v36  ;;  %v512_v39 = vld [vmem:[%s3410_s28 + $0x5038] sm:$0xff]  ;;  %509 = vst [vmem:[%s3415_s29 + $0x528] sm:$0xff] %v508_v37  ;;  %v514_v40 = vld [vmem:[%s3410_s28 + $0x5400] sm:$0xff] }
  0x67   : > { %511 = vst [vmem:[%s3415_s29 + $0x530] sm:$0xff] %v510_v38  ;;  %513 = vst [vmem:[%s3415_s29 + $0x538] sm:$0xff] %v512_v39  ;;  %v516_v41 = vld [vmem:[%s3410_s28 + $0x5408] sm:$0xff]  ;;  %v518_v42 = vld [vmem:[%s3410_s28 + $0x5410] sm:$0xff] }
  0x68   : > { %515 = vst [vmem:[%s3415_s29 + $0x540] sm:$0xff] %v514_v40  ;;  %517 = vst [vmem:[%s3415_s29 + $0x548] sm:$0xff] %v516_v41  ;;  %v520_v43 = vld [vmem:[%s3410_s28 + $0x5418] sm:$0xff]  ;;  %v522_v44 = vld [vmem:[%s3410_s28 + $0x5420] sm:$0xff] }
  0x69   : > { %519 = vst [vmem:[%s3415_s29 + $0x550] sm:$0xff] %v518_v42  ;;  %v524_v45 = vld [vmem:[%s3410_s28 + $0x5428] sm:$0xff]  ;;  %521 = vst [vmem:[%s3415_s29 + $0x558] sm:$0xff] %v520_v43  ;;  %v526_v46 = vld [vmem:[%s3410_s28 + $0x5430] sm:$0xff] }
  0x6a   : > { %523 = vst [vmem:[%s3415_s29 + $0x560] sm:$0xff] %v522_v44  ;;  %525 = vst [vmem:[%s3415_s29 + $0x568] sm:$0xff] %v524_v45  ;;  %v528_v47 = vld [vmem:[%s3410_s28 + $0x5438] sm:$0xff]  ;;  %v530_v48 = vld [vmem:[%s3410_s28 + $0x5800] sm:$0xff] }
  0x6b   : > { %527 = vst [vmem:[%s3415_s29 + $0x570] sm:$0xff] %v526_v46  ;;  %529 = vst [vmem:[%s3415_s29 + $0x578] sm:$0xff] %v528_v47  ;;  %v532_v49 = vld [vmem:[%s3410_s28 + $0x5808] sm:$0xff]  ;;  %v534_v50 = vld [vmem:[%s3410_s28 + $0x5810] sm:$0xff] }
  0x6c   : > { %531 = vst [vmem:[%s3415_s29 + $0x580] sm:$0xff] %v530_v48  ;;  %v536_v51 = vld [vmem:[%s3410_s28 + $0x5818] sm:$0xff]  ;;  %533 = vst [vmem:[%s3415_s29 + $0x588] sm:$0xff] %v532_v49  ;;  %v538_v52 = vld [vmem:[%s3410_s28 + $0x5820] sm:$0xff] }
  0x6d   : > { %535 = vst [vmem:[%s3415_s29 + $0x590] sm:$0xff] %v534_v50  ;;  %537 = vst [vmem:[%s3415_s29 + $0x598] sm:$0xff] %v536_v51  ;;  %v540_v53 = vld [vmem:[%s3410_s28 + $0x5828] sm:$0xff]  ;;  %v542_v54 = vld [vmem:[%s3410_s28 + $0x5830] sm:$0xff] }
  0x6e   : > { %539 = vst [vmem:[%s3415_s29 + $0x5a0] sm:$0xff] %v538_v52  ;;  %541 = vst [vmem:[%s3415_s29 + $0x5a8] sm:$0xff] %v540_v53  ;;  %v544_v55 = vld [vmem:[%s3410_s28 + $0x5838] sm:$0xff]  ;;  %v546_v56 = vld [vmem:[%s3410_s28 + $0x5c00] sm:$0xff] }
  0x6f   : > { %543 = vst [vmem:[%s3415_s29 + $0x5b0] sm:$0xff] %v542_v54  ;;  %v548_v57 = vld [vmem:[%s3410_s28 + $0x5c08] sm:$0xff]  ;;  %545 = vst [vmem:[%s3415_s29 + $0x5b8] sm:$0xff] %v544_v55  ;;  %v550_v58 = vld [vmem:[%s3410_s28 + $0x5c10] sm:$0xff] }
  0x70   : > { %547 = vst [vmem:[%s3415_s29 + $0x5c0] sm:$0xff] %v546_v56  ;;  %549 = vst [vmem:[%s3415_s29 + $0x5c8] sm:$0xff] %v548_v57  ;;  %v552_v59 = vld [vmem:[%s3410_s28 + $0x5c18] sm:$0xff]  ;;  %v554_v60 = vld [vmem:[%s3410_s28 + $0x5c20] sm:$0xff] }
  0x71   : > { %551 = vst [vmem:[%s3415_s29 + $0x5d0] sm:$0xff] %v550_v58  ;;  %553 = vst [vmem:[%s3415_s29 + $0x5d8] sm:$0xff] %v552_v59  ;;  %v556_v61 = vld [vmem:[%s3410_s28 + $0x5c28] sm:$0xff]  ;;  %v558_v62 = vld [vmem:[%s3410_s28 + $0x5c30] sm:$0xff] }
  0x72   : > { %555 = vst [vmem:[%s3415_s29 + $0x5e0] sm:$0xff] %v554_v60  ;;  %v560_v63 = vld [vmem:[%s3410_s28 + $0x5c38] sm:$0xff]  ;;  %557 = vst [vmem:[%s3415_s29 + $0x5e8] sm:$0xff] %v556_v61  ;;  %v562_v0 = vld [vmem:[%s3410_s28 + $0x6000] sm:$0xff] }
  0x73   : > { %559 = vst [vmem:[%s3415_s29 + $0x5f0] sm:$0xff] %v558_v62  ;;  %561 = vst [vmem:[%s3415_s29 + $0x5f8] sm:$0xff] %v560_v63  ;;  %v564_v1 = vld [vmem:[%s3410_s28 + $0x6008] sm:$0xff]  ;;  %v566_v2 = vld [vmem:[%s3410_s28 + $0x6010] sm:$0xff] }
  0x74   : > { %563 = vst [vmem:[%s3415_s29 + $0x600] sm:$0xff] %v562_v0  ;;  %565 = vst [vmem:[%s3415_s29 + $0x608] sm:$0xff] %v564_v1  ;;  %v568_v3 = vld [vmem:[%s3410_s28 + $0x6018] sm:$0xff]  ;;  %v570_v4 = vld [vmem:[%s3410_s28 + $0x6020] sm:$0xff] }
  0x75   : > { %567 = vst [vmem:[%s3415_s29 + $0x610] sm:$0xff] %v566_v2  ;;  %v572_v5 = vld [vmem:[%s3410_s28 + $0x6028] sm:$0xff]  ;;  %569 = vst [vmem:[%s3415_s29 + $0x618] sm:$0xff] %v568_v3  ;;  %v574_v6 = vld [vmem:[%s3410_s28 + $0x6030] sm:$0xff] }
  0x76   : > { %571 = vst [vmem:[%s3415_s29 + $0x620] sm:$0xff] %v570_v4  ;;  %573 = vst [vmem:[%s3415_s29 + $0x628] sm:$0xff] %v572_v5  ;;  %v576_v7 = vld [vmem:[%s3410_s28 + $0x6038] sm:$0xff]  ;;  %v578_v8 = vld [vmem:[%s3410_s28 + $0x6400] sm:$0xff] }
  0x77   : > { %575 = vst [vmem:[%s3415_s29 + $0x630] sm:$0xff] %v574_v6  ;;  %577 = vst [vmem:[%s3415_s29 + $0x638] sm:$0xff] %v576_v7  ;;  %v580_v9 = vld [vmem:[%s3410_s28 + $0x6408] sm:$0xff]  ;;  %v582_v10 = vld [vmem:[%s3410_s28 + $0x6410] sm:$0xff] }
  0x78   : > { %579 = vst [vmem:[%s3415_s29 + $0x640] sm:$0xff] %v578_v8  ;;  %v584_v11 = vld [vmem:[%s3410_s28 + $0x6418] sm:$0xff]  ;;  %581 = vst [vmem:[%s3415_s29 + $0x648] sm:$0xff] %v580_v9  ;;  %v586_v12 = vld [vmem:[%s3410_s28 + $0x6420] sm:$0xff] }
  0x79   : > { %583 = vst [vmem:[%s3415_s29 + $0x650] sm:$0xff] %v582_v10  ;;  %585 = vst [vmem:[%s3415_s29 + $0x658] sm:$0xff] %v584_v11  ;;  %v588_v13 = vld [vmem:[%s3410_s28 + $0x6428] sm:$0xff]  ;;  %v590_v14 = vld [vmem:[%s3410_s28 + $0x6430] sm:$0xff] }
  0x7a   : > { %587 = vst [vmem:[%s3415_s29 + $0x660] sm:$0xff] %v586_v12  ;;  %589 = vst [vmem:[%s3415_s29 + $0x668] sm:$0xff] %v588_v13  ;;  %v592_v15 = vld [vmem:[%s3410_s28 + $0x6438] sm:$0xff]  ;;  %v594_v16 = vld [vmem:[%s3410_s28 + $0x6800] sm:$0xff] }
  0x7b   : > { %591 = vst [vmem:[%s3415_s29 + $0x670] sm:$0xff] %v590_v14  ;;  %v596_v17 = vld [vmem:[%s3410_s28 + $0x6808] sm:$0xff]  ;;  %593 = vst [vmem:[%s3415_s29 + $0x678] sm:$0xff] %v592_v15  ;;  %v598_v18 = vld [vmem:[%s3410_s28 + $0x6810] sm:$0xff] }
  0x7c   : > { %595 = vst [vmem:[%s3415_s29 + $0x680] sm:$0xff] %v594_v16  ;;  %597 = vst [vmem:[%s3415_s29 + $0x688] sm:$0xff] %v596_v17  ;;  %v600_v19 = vld [vmem:[%s3410_s28 + $0x6818] sm:$0xff]  ;;  %v602_v20 = vld [vmem:[%s3410_s28 + $0x6820] sm:$0xff] }
  0x7d   : > { %599 = vst [vmem:[%s3415_s29 + $0x690] sm:$0xff] %v598_v18  ;;  %601 = vst [vmem:[%s3415_s29 + $0x698] sm:$0xff] %v600_v19  ;;  %v604_v21 = vld [vmem:[%s3410_s28 + $0x6828] sm:$0xff]  ;;  %v606_v22 = vld [vmem:[%s3410_s28 + $0x6830] sm:$0xff] }
  0x7e   : > { %603 = vst [vmem:[%s3415_s29 + $0x6a0] sm:$0xff] %v602_v20  ;;  %v608_v23 = vld [vmem:[%s3410_s28 + $0x6838] sm:$0xff]  ;;  %605 = vst [vmem:[%s3415_s29 + $0x6a8] sm:$0xff] %v604_v21  ;;  %v610_v24 = vld [vmem:[%s3410_s28 + $0x6c00] sm:$0xff] }
  0x7f   : > { %607 = vst [vmem:[%s3415_s29 + $0x6b0] sm:$0xff] %v606_v22  ;;  %609 = vst [vmem:[%s3415_s29 + $0x6b8] sm:$0xff] %v608_v23  ;;  %v612_v25 = vld [vmem:[%s3410_s28 + $0x6c08] sm:$0xff]  ;;  %v614_v26 = vld [vmem:[%s3410_s28 + $0x6c10] sm:$0xff] }
  0x80   : > { %611 = vst [vmem:[%s3415_s29 + $0x6c0] sm:$0xff] %v610_v24  ;;  %613 = vst [vmem:[%s3415_s29 + $0x6c8] sm:$0xff] %v612_v25  ;;  %v616_v27 = vld [vmem:[%s3410_s28 + $0x6c18] sm:$0xff]  ;;  %v618_v28 = vld [vmem:[%s3410_s28 + $0x6c20] sm:$0xff] }
  0x81   : > { %615 = vst [vmem:[%s3415_s29 + $0x6d0] sm:$0xff] %v614_v26  ;;  %v620_v29 = vld [vmem:[%s3410_s28 + $0x6c28] sm:$0xff]  ;;  %617 = vst [vmem:[%s3415_s29 + $0x6d8] sm:$0xff] %v616_v27  ;;  %v622_v30 = vld [vmem:[%s3410_s28 + $0x6c30] sm:$0xff] }
  0x82   : > { %619 = vst [vmem:[%s3415_s29 + $0x6e0] sm:$0xff] %v618_v28  ;;  %621 = vst [vmem:[%s3415_s29 + $0x6e8] sm:$0xff] %v620_v29  ;;  %v624_v31 = vld [vmem:[%s3410_s28 + $0x6c38] sm:$0xff]  ;;  %v626_v32 = vld [vmem:[%s3410_s28 + $0x7000] sm:$0xff] }
  0x83   : > { %623 = vst [vmem:[%s3415_s29 + $0x6f0] sm:$0xff] %v622_v30  ;;  %625 = vst [vmem:[%s3415_s29 + $0x6f8] sm:$0xff] %v624_v31  ;;  %v628_v33 = vld [vmem:[%s3410_s28 + $0x7008] sm:$0xff]  ;;  %v630_v34 = vld [vmem:[%s3410_s28 + $0x7010] sm:$0xff] }
  0x84   : > { %627 = vst [vmem:[%s3415_s29 + $0x700] sm:$0xff] %v626_v32  ;;  %v632_v35 = vld [vmem:[%s3410_s28 + $0x7018] sm:$0xff]  ;;  %629 = vst [vmem:[%s3415_s29 + $0x708] sm:$0xff] %v628_v33  ;;  %v634_v36 = vld [vmem:[%s3410_s28 + $0x7020] sm:$0xff] }
  0x85   : > { %631 = vst [vmem:[%s3415_s29 + $0x710] sm:$0xff] %v630_v34  ;;  %633 = vst [vmem:[%s3415_s29 + $0x718] sm:$0xff] %v632_v35  ;;  %v636_v37 = vld [vmem:[%s3410_s28 + $0x7028] sm:$0xff]  ;;  %v638_v38 = vld [vmem:[%s3410_s28 + $0x7030] sm:$0xff] }
  0x86   : > { %635 = vst [vmem:[%s3415_s29 + $0x720] sm:$0xff] %v634_v36  ;;  %637 = vst [vmem:[%s3415_s29 + $0x728] sm:$0xff] %v636_v37  ;;  %v640_v39 = vld [vmem:[%s3410_s28 + $0x7038] sm:$0xff]  ;;  %v642_v40 = vld [vmem:[%s3410_s28 + $0x7400] sm:$0xff] }
  0x87   : > { %639 = vst [vmem:[%s3415_s29 + $0x730] sm:$0xff] %v638_v38  ;;  %v644_v41 = vld [vmem:[%s3410_s28 + $0x7408] sm:$0xff]  ;;  %641 = vst [vmem:[%s3415_s29 + $0x738] sm:$0xff] %v640_v39  ;;  %v646_v42 = vld [vmem:[%s3410_s28 + $0x7410] sm:$0xff] }
  0x88   : > { %643 = vst [vmem:[%s3415_s29 + $0x740] sm:$0xff] %v642_v40  ;;  %645 = vst [vmem:[%s3415_s29 + $0x748] sm:$0xff] %v644_v41  ;;  %v648_v43 = vld [vmem:[%s3410_s28 + $0x7418] sm:$0xff]  ;;  %v650_v44 = vld [vmem:[%s3410_s28 + $0x7420] sm:$0xff] }
  0x89   : > { %647 = vst [vmem:[%s3415_s29 + $0x750] sm:$0xff] %v646_v42  ;;  %649 = vst [vmem:[%s3415_s29 + $0x758] sm:$0xff] %v648_v43  ;;  %v652_v45 = vld [vmem:[%s3410_s28 + $0x7428] sm:$0xff]  ;;  %v654_v46 = vld [vmem:[%s3410_s28 + $0x7430] sm:$0xff] }
  0x8a   : > { %651 = vst [vmem:[%s3415_s29 + $0x760] sm:$0xff] %v650_v44  ;;  %v656_v47 = vld [vmem:[%s3410_s28 + $0x7438] sm:$0xff]  ;;  %653 = vst [vmem:[%s3415_s29 + $0x768] sm:$0xff] %v652_v45  ;;  %v658_v48 = vld [vmem:[%s3410_s28 + $0x7800] sm:$0xff] }
  0x8b   : > { %655 = vst [vmem:[%s3415_s29 + $0x770] sm:$0xff] %v654_v46  ;;  %657 = vst [vmem:[%s3415_s29 + $0x778] sm:$0xff] %v656_v47  ;;  %v660_v49 = vld [vmem:[%s3410_s28 + $0x7808] sm:$0xff]  ;;  %v662_v50 = vld [vmem:[%s3410_s28 + $0x7810] sm:$0xff] }
  0x8c   : > { %659 = vst [vmem:[%s3415_s29 + $0x780] sm:$0xff] %v658_v48  ;;  %661 = vst [vmem:[%s3415_s29 + $0x788] sm:$0xff] %v660_v49  ;;  %v664_v51 = vld [vmem:[%s3410_s28 + $0x7818] sm:$0xff]  ;;  %v666_v52 = vld [vmem:[%s3410_s28 + $0x7820] sm:$0xff] }
  0x8d   : > { %663 = vst [vmem:[%s3415_s29 + $0x790] sm:$0xff] %v662_v50  ;;  %v668_v53 = vld [vmem:[%s3410_s28 + $0x7828] sm:$0xff]  ;;  %665 = vst [vmem:[%s3415_s29 + $0x798] sm:$0xff] %v664_v51  ;;  %v670_v54 = vld [vmem:[%s3410_s28 + $0x7830] sm:$0xff] }
  0x8e   : > { %667 = vst [vmem:[%s3415_s29 + $0x7a0] sm:$0xff] %v666_v52  ;;  %669 = vst [vmem:[%s3415_s29 + $0x7a8] sm:$0xff] %v668_v53  ;;  %v672_v55 = vld [vmem:[%s3410_s28 + $0x7838] sm:$0xff]  ;;  %v674_v56 = vld [vmem:[%s3410_s28 + $0x7c00] sm:$0xff] }
  0x8f   : > { %671 = vst [vmem:[%s3415_s29 + $0x7b0] sm:$0xff] %v670_v54  ;;  %673 = vst [vmem:[%s3415_s29 + $0x7b8] sm:$0xff] %v672_v55  ;;  %v676_v57 = vld [vmem:[%s3410_s28 + $0x7c08] sm:$0xff]  ;;  %v678_v58 = vld [vmem:[%s3410_s28 + $0x7c10] sm:$0xff] }
  0x90   : > { %675 = vst [vmem:[%s3415_s29 + $0x7c0] sm:$0xff] %v674_v56  ;;  %v680_v59 = vld [vmem:[%s3410_s28 + $0x7c18] sm:$0xff]  ;;  %677 = vst [vmem:[%s3415_s29 + $0x7c8] sm:$0xff] %v676_v57  ;;  %v682_v60 = vld [vmem:[%s3410_s28 + $0x7c20] sm:$0xff] }
  0x91   : > { %679 = vst [vmem:[%s3415_s29 + $0x7d0] sm:$0xff] %v678_v58  ;;  %681 = vst [vmem:[%s3415_s29 + $0x7d8] sm:$0xff] %v680_v59  ;;  %v684_v61 = vld [vmem:[%s3410_s28 + $0x7c28] sm:$0xff]  ;;  %v686_v62 = vld [vmem:[%s3410_s28 + $0x7c30] sm:$0xff] }
  0x92   : > { %683 = vst [vmem:[%s3415_s29 + $0x7e0] sm:$0xff] %v682_v60  ;;  %685 = vst [vmem:[%s3415_s29 + $0x7e8] sm:$0xff] %v684_v61  ;;  %v688_v63 = vld [vmem:[%s3410_s28 + $0x7c38] sm:$0xff] }
  0x93   : > { %687 = vst [vmem:[%s3415_s29 + $0x7f0] sm:$0xff] %v686_v62  ;;  %689 = vst [vmem:[%s3415_s29 + $0x7f8] sm:$0xff] %v688_v63 }
  0x94 PF: > { %p2988_p8 = scmp.ge.s32.totalorder %s3340_s16, 1  ;;  %p702_p9 = scmp.lt.s32.totalorder %s3340_s16, 17 }
  0x96   : > { %p703_p10 = pnand %p2988_p8, %p702_p9 }
  0x97   : > { %s709_s30 = sand.u32 (!%p703_p10), 1, %s3324_s12   ;;  %s2991_s18 = sshll.u32 (!%p703_p10), %s3332_s14, 4 }
  0x98   : > { %706 = sbr.rel (%p703_p10) target bundleno = 630 (0x276), region = 51  ;;  %s2989_s6 = sshll.u32 (!%p703_p10), %s709_s30, 11 }
  0x99   : > { %s3938_s7 = scalar_lea.vmem (!%p703_p10), [#allocation2], %s2989_s6  ;;  %p4209_p11 = scmp.lt.s32.totalorder (!%p703_p10), %s2991_s18, 255 }
  0x9a   : > { %s2990_s25 = sshll.u32 (!%p703_p10), %s709_s30, 8 }
  0x9b   : > { %s4246_s12 = scalar_lea.vmem (!%p703_p10), [#allocation3], %s2990_s25 }
  0x9d   : > { %v3932_v0 = vld [vmem:[%s4396_s0 + $0x4] ss:$8 sps:$4 sm:$0xff]   ;;  %s4409_s18 = smov (!%p4209_p11, %s2991_s18), 255  ;;  %s3256_s28 = sshll.u32 (%p3397_p6), %s3332_s14, 7 }
  0x9e   : > { %2420 = vmatprep.mubr.bf16.mxu0 %v3932_v0  ;;  %2463 = vmatprep.mubr.bf16.mxu1 %v3932_v0  ;;  %v870_v1 = vld [vmem:[%s3938_s7 + $0x380] sm:$0xff]  ;;  %v871_v3 = vld [vmem:[%s3938_s7 + $0x388] sm:$0xff]  ;;  %s4226_s24 = scalar_lea.vmem %s4398_s2, %s4409_s18  ;;  %s4318_s4 = scalar_lea.vmem (%p3397_p6), %s4399_s3, %s3256_s28 }
  0x9f   : > { %v878_v2 = vld [vmem:[%s3938_s7 + $0x3c0] sm:$0xff]  ;;  %v879_v5 = vld [vmem:[%s3938_s7 + $0x3c8] sm:$0xff] }
  0xa0   : > { %v3107_v4 = vcombine.high %v870_v1, %v878_v2  ;;  %v3106_v6 = vcombine.low %v870_v1, %v878_v2  ;;  %v854_v7 = vld [vmem:[%s3938_s7 + $0x300] sm:$0xff]  ;;  %v3109_v9 = vcombine.high %v871_v3, %v879_v5  ;;  %v3108_v10 = vcombine.low %v871_v3, %v879_v5  ;;  %v855_v12 = vld [vmem:[%s3938_s7 + $0x308] sm:$0xff] }
  0xa1   : > { %v862_v8 = vld [vmem:[%s3938_s7 + $0x340] sm:$0xff]  ;;  %v863_v13 = vld [vmem:[%s3938_s7 + $0x348] sm:$0xff] }
  0xa2   : > { %v3091_v11 = vcombine.high %v854_v7, %v862_v8  ;;  %v838_v14 = vld [vmem:[%s3938_s7 + $0x280] sm:$0xff]  ;;  %2388 = vmatprep.subr.bf16.mxu0 %v3107_v4  ;;  %v3093_v15 = vcombine.high %v855_v12, %v863_v13  ;;  %v839_v17 = vld [vmem:[%s3938_s7 + $0x288] sm:$0xff]  ;;  %2431 = vmatprep.subr.bf16.mxu1 %v3109_v9  ;;  %v3090_v19 = vcombine.low %v854_v7, %v862_v8 }
  0xa3   : > { %v846_v16 = vld [vmem:[%s3938_s7 + $0x2c0] sm:$0xff]  ;;  %v847_v18 = vld [vmem:[%s3938_s7 + $0x2c8] sm:$0xff]  ;;  %2389 = vmatpush1.bf16.msra.mxu0 %v3106_v6  ;;  %2432 = vmatpush1.bf16.msra.mxu1 %v3108_v10  ;;  %v3092_v20 = vcombine.low %v855_v12, %v863_v13 }
  0xa4   : > { %2390 = vmatprep.subr.bf16.mxu0 %v3091_v11  ;;  %v3075_v21 = vcombine.high %v838_v14, %v846_v16  ;;  %2433 = vmatprep.subr.bf16.mxu1 %v3093_v15  ;;  %v3077_v22 = vcombine.high %v839_v17, %v847_v18  ;;  %v822_v23 = vld [vmem:[%s3938_s7 + $0x200] sm:$0xff]  ;;  %v823_v25 = vld [vmem:[%s3938_s7 + $0x208] sm:$0xff]  ;;  %v3074_v27 = vcombine.low %v838_v14, %v846_v16 }
  0xa5   : > { %v830_v24 = vld [vmem:[%s3938_s7 + $0x240] sm:$0xff]  ;;  %v831_v26 = vld [vmem:[%s3938_s7 + $0x248] sm:$0xff]  ;;  %v3076_v28 = vcombine.low %v839_v17, %v847_v18 }
  0xa6   : > { %v3059_v29 = vcombine.high %v822_v23, %v830_v24  ;;  %v3061_v30 = vcombine.high %v823_v25, %v831_v26  ;;  %v806_v31 = vld [vmem:[%s3938_s7 + $0x180] sm:$0xff]  ;;  %v807_v33 = vld [vmem:[%s3938_s7 + $0x188] sm:$0xff]  ;;  %v3058_v35 = vcombine.low %v822_v23, %v830_v24  ;;  %v3060_v36 = vcombine.low %v823_v25, %v831_v26 }
  0xa7   : > { %2391 = vmatpush1.bf16.msra.mxu0 %v3090_v19  ;;  %2434 = vmatpush1.bf16.msra.mxu1 %v3092_v20  ;;  %v814_v32 = vld [vmem:[%s3938_s7 + $0x1c0] sm:$0xff]  ;;  %v815_v34 = vld [vmem:[%s3938_s7 + $0x1c8] sm:$0xff] }
  0xa8   : > { %2392 = vmatprep.subr.bf16.mxu0 %v3075_v21  ;;  %2435 = vmatprep.subr.bf16.mxu1 %v3077_v22  ;;  %v3043_v37 = vcombine.high %v806_v31, %v814_v32  ;;  %v3045_v38 = vcombine.high %v807_v33, %v815_v34  ;;  %v790_v39 = vld [vmem:[%s3938_s7 + $0x100] sm:$0xff]  ;;  %v791_v41 = vld [vmem:[%s3938_s7 + $0x108] sm:$0xff]  ;;  %v3042_v43 = vcombine.low %v806_v31, %v814_v32 }
  0xa9   : > { %v798_v40 = vld [vmem:[%s3938_s7 + $0x140] sm:$0xff]  ;;  %v799_v42 = vld [vmem:[%s3938_s7 + $0x148] sm:$0xff]  ;;  %v3044_v44 = vcombine.low %v807_v33, %v815_v34 }
  0xaa   : > { %v3027_v45 = vcombine.high %v790_v39, %v798_v40  ;;  %v3029_v46 = vcombine.high %v791_v41, %v799_v42  ;;  %v774_v47 = vld [vmem:[%s3938_s7 + $0x80] sm:$0xff]  ;;  %v775_v49 = vld [vmem:[%s3938_s7 + $0x88] sm:$0xff]  ;;  %v3026_v51 = vcombine.low %v790_v39, %v798_v40  ;;  %v3028_v52 = vcombine.low %v791_v41, %v799_v42 }
  0xab   : > { %2393 = vmatpush1.bf16.msra.mxu0 %v3074_v27  ;;  %2436 = vmatpush1.bf16.msra.mxu1 %v3076_v28  ;;  %v782_v48 = vld [vmem:[%s3938_s7 + $0xc0] sm:$0xff]  ;;  %v783_v50 = vld [vmem:[%s3938_s7 + $0xc8] sm:$0xff] }
  0xac   : > { %2394 = vmatprep.subr.bf16.mxu0 %v3059_v29  ;;  %2437 = vmatprep.subr.bf16.mxu1 %v3061_v30  ;;  %v3011_v53 = vcombine.high %v774_v47, %v782_v48  ;;  %v3013_v54 = vcombine.high %v775_v49, %v783_v50  ;;  %v758_v55 = vld [vmem:[%s3938_s7] sm:$0xff]  ;;  %v759_v57 = vld [vmem:[%s3938_s7 + $0x8] sm:$0xff]  ;;  %v3010_v59 = vcombine.low %v774_v47, %v782_v48 }
  0xad   : > { %v766_v56 = vld [vmem:[%s3938_s7 + $0x40] sm:$0xff]  ;;  %v767_v58 = vld [vmem:[%s3938_s7 + $0x48] sm:$0xff]  ;;  %v3012_v60 = vcombine.low %v775_v49, %v783_v50 }
  0xae   : > { %v2995_v61 = vcombine.high %v758_v55, %v766_v56  ;;  %v2997_v62 = vcombine.high %v759_v57, %v767_v58  ;;  %v998_v63 = vld [vmem:[%s3938_s7 + $0x780] sm:$0xff]  ;;  %v999_v2 = vld [vmem:[%s3938_s7 + $0x788] sm:$0xff]  ;;  %v2994_v4 = vcombine.low %v758_v55, %v766_v56  ;;  %v2996_v5 = vcombine.low %v759_v57, %v767_v58 }
  0xaf   : > { %2395 = vmatpush1.bf16.msra.mxu0 %v3058_v35  ;;  %2438 = vmatpush1.bf16.msra.mxu1 %v3060_v36  ;;  %v1006_v1 = vld [vmem:[%s3938_s7 + $0x7c0] sm:$0xff]  ;;  %v1007_v3 = vld [vmem:[%s3938_s7 + $0x7c8] sm:$0xff] }
  0xb0   : > { %2396 = vmatprep.subr.bf16.mxu0 %v3043_v37  ;;  %2439 = vmatprep.subr.bf16.mxu1 %v3045_v38  ;;  %v3235_v6 = vcombine.high %v998_v63, %v1006_v1  ;;  %v3237_v7 = vcombine.high %v999_v2, %v1007_v3  ;;  %v982_v8 = vld [vmem:[%s3938_s7 + $0x700] sm:$0xff]  ;;  %v983_v10 = vld [vmem:[%s3938_s7 + $0x708] sm:$0xff]  ;;  %v3234_v12 = vcombine.low %v998_v63, %v1006_v1  ;;  %v872_v1 = vld [vmem:[%s3938_s7 + $0x390] sm:$0xff] }
  0xb1   : > { %v990_v9 = vld [vmem:[%s3938_s7 + $0x740] sm:$0xff]  ;;  %v991_v11 = vld [vmem:[%s3938_s7 + $0x748] sm:$0xff]  ;;  %v3236_v13 = vcombine.low %v999_v2, %v1007_v3  ;;  %v880_v2 = vld [vmem:[%s3938_s7 + $0x3d0] sm:$0xff] }
  0xb2   : > { %v3219_v14 = vcombine.high %v982_v8, %v990_v9  ;;  %v3221_v15 = vcombine.high %v983_v10, %v991_v11  ;;  %v966_v16 = vld [vmem:[%s3938_s7 + $0x680] sm:$0xff]  ;;  %v967_v18 = vld [vmem:[%s3938_s7 + $0x688] sm:$0xff]  ;;  %v3218_v20 = vcombine.low %v982_v8, %v990_v9  ;;  %v3220_v21 = vcombine.low %v983_v10, %v991_v11  ;;  %v873_v3 = vld [vmem:[%s3938_s7 + $0x398] sm:$0xff] }
  0xb3   : > { %2397 = vmatpush1.bf16.msra.mxu0 %v3042_v43  ;;  %2440 = vmatpush1.bf16.msra.mxu1 %v3044_v44  ;;  %v974_v17 = vld [vmem:[%s3938_s7 + $0x6c0] sm:$0xff]  ;;  %v975_v19 = vld [vmem:[%s3938_s7 + $0x6c8] sm:$0xff]  ;;  %v856_v9 = vld [vmem:[%s3938_s7 + $0x310] sm:$0xff] }
  0xb4   : > { %2398 = vmatprep.subr.bf16.mxu0 %v3027_v45  ;;  %2441 = vmatprep.subr.bf16.mxu1 %v3029_v46  ;;  %v3203_v22 = vcombine.high %v966_v16, %v974_v17  ;;  %v3205_v23 = vcombine.high %v967_v18, %v975_v19  ;;  %v950_v24 = vld [vmem:[%s3938_s7 + $0x600] sm:$0xff]  ;;  %v951_v26 = vld [vmem:[%s3938_s7 + $0x608] sm:$0xff]  ;;  %v3202_v28 = vcombine.low %v966_v16, %v974_v17  ;;  %v864_v10 = vld [vmem:[%s3938_s7 + $0x350] sm:$0xff] }
  0xb5   : > { %v958_v25 = vld [vmem:[%s3938_s7 + $0x640] sm:$0xff]  ;;  %v959_v27 = vld [vmem:[%s3938_s7 + $0x648] sm:$0xff]  ;;  %v3204_v29 = vcombine.low %v967_v18, %v975_v19  ;;  %v3095_v16 = vcombine.high %v856_v9, %v864_v10  ;;  %v840_v18 = vld [vmem:[%s3938_s7 + $0x290] sm:$0xff] }
  0xb6   : > { %v3187_v30 = vcombine.high %v950_v24, %v958_v25  ;;  %v3189_v31 = vcombine.high %v951_v26, %v959_v27  ;;  %v934_v32 = vld [vmem:[%s3938_s7 + $0x580] sm:$0xff]  ;;  %v935_v34 = vld [vmem:[%s3938_s7 + $0x588] sm:$0xff]  ;;  %v3186_v36 = vcombine.low %v950_v24, %v958_v25  ;;  %v3188_v37 = vcombine.low %v951_v26, %v959_v27  ;;  %v848_v19 = vld [vmem:[%s3938_s7 + $0x2d0] sm:$0xff] }
  0xb7   : > { %2399 = vmatpush1.bf16.msra.mxu0 %v3026_v51  ;;  %2442 = vmatpush1.bf16.msra.mxu1 %v3028_v52  ;;  %v942_v33 = vld [vmem:[%s3938_s7 + $0x5c0] sm:$0xff]  ;;  %v943_v35 = vld [vmem:[%s3938_s7 + $0x5c8] sm:$0xff]  ;;  %v3079_v24 = vcombine.high %v840_v18, %v848_v19  ;;  %v824_v26 = vld [vmem:[%s3938_s7 + $0x210] sm:$0xff] }
  0xb8   : > { %2400 = vmatprep.subr.bf16.mxu0 %v3011_v53  ;;  %2443 = vmatprep.subr.bf16.mxu1 %v3013_v54  ;;  %v3171_v38 = vcombine.high %v934_v32, %v942_v33  ;;  %v3173_v39 = vcombine.high %v935_v34, %v943_v35  ;;  %v918_v40 = vld [vmem:[%s3938_s7 + $0x500] sm:$0xff]  ;;  %v919_v42 = vld [vmem:[%s3938_s7 + $0x508] sm:$0xff]  ;;  %v3170_v44 = vcombine.low %v934_v32, %v942_v33  ;;  %v832_v27 = vld [vmem:[%s3938_s7 + $0x250] sm:$0xff] }
  0xb9   : > { %v926_v41 = vld [vmem:[%s3938_s7 + $0x540] sm:$0xff]  ;;  %v927_v43 = vld [vmem:[%s3938_s7 + $0x548] sm:$0xff]  ;;  %v3172_v45 = vcombine.low %v935_v34, %v943_v35  ;;  %v3063_v32 = vcombine.high %v824_v26, %v832_v27  ;;  %v808_v34 = vld [vmem:[%s3938_s7 + $0x190] sm:$0xff] }
  0xba   : > { %v3155_v46 = vcombine.high %v918_v40, %v926_v41  ;;  %v3157_v47 = vcombine.high %v919_v42, %v927_v43  ;;  %v902_v48 = vld [vmem:[%s3938_s7 + $0x480] sm:$0xff]  ;;  %v903_v50 = vld [vmem:[%s3938_s7 + $0x488] sm:$0xff]  ;;  %v3154_v52 = vcombine.low %v918_v40, %v926_v41  ;;  %v3156_v53 = vcombine.low %v919_v42, %v927_v43  ;;  %v816_v35 = vld [vmem:[%s3938_s7 + $0x1d0] sm:$0xff] }
  0xbb   : > { %2401 = vmatpush1.bf16.msra.mxu0 %v3010_v59  ;;  %2444 = vmatpush1.bf16.msra.mxu1 %v3012_v60  ;;  %v910_v49 = vld [vmem:[%s3938_s7 + $0x4c0] sm:$0xff]  ;;  %v911_v51 = vld [vmem:[%s3938_s7 + $0x4c8] sm:$0xff]  ;;  %v3047_v40 = vcombine.high %v808_v34, %v816_v35  ;;  %v792_v42 = vld [vmem:[%s3938_s7 + $0x110] sm:$0xff] }
  0xbc   : > { %2402 = vmatprep.subr.bf16.mxu0 %v2995_v61  ;;  %2445 = vmatprep.subr.bf16.mxu1 %v2997_v62  ;;  %v3139_v54 = vcombine.high %v902_v48, %v910_v49  ;;  %v3141_v55 = vcombine.high %v903_v50, %v911_v51  ;;  %v886_v56 = vld [vmem:[%s3938_s7 + $0x400] sm:$0xff]  ;;  %v887_v58 = vld [vmem:[%s3938_s7 + $0x408] sm:$0xff]  ;;  %v3138_v60 = vcombine.low %v902_v48, %v910_v49  ;;  %v800_v43 = vld [vmem:[%s3938_s7 + $0x150] sm:$0xff] }
  0xbd   : > { %v894_v57 = vld [vmem:[%s3938_s7 + $0x440] sm:$0xff]  ;;  %v895_v59 = vld [vmem:[%s3938_s7 + $0x448] sm:$0xff]  ;;  %v3140_v61 = vcombine.low %v903_v50, %v911_v51  ;;  %v3031_v48 = vcombine.high %v792_v42, %v800_v43  ;;  %v776_v50 = vld [vmem:[%s3938_s7 + $0x90] sm:$0xff] }
  0xbe   : > { %v3123_v62 = vcombine.high %v886_v56, %v894_v57  ;;  %v3125_v63 = vcombine.high %v887_v58, %v895_v59  ;;  %v4013_v11 = vld [vmem:[%s4396_s0] ss:$8 sps:$4 sm:$0xff]   ;;  %v784_v51 = vld [vmem:[%s3938_s7 + $0xd0] sm:$0xff] }
  0xbf   : > { %2403 = vmatpush1.bf16.msra.mxu0 %v2994_v4  ;;  %2446 = vmatpush1.bf16.msra.mxu1 %v2996_v5  ;;  %v881_v4 = vld [vmem:[%s3938_s7 + $0x3d8] sm:$0xff]  ;;  %v3122_v5 = vcombine.low %v886_v56, %v894_v57  ;;  %v3015_v56 = vcombine.high %v776_v50, %v784_v51 }
  0xc0   : > { %2404 = vmatprep.subr.bf16.mxu0 %v3235_v6  ;;  %2447 = vmatprep.subr.bf16.mxu1 %v3237_v7  ;;  %v3124_v6 = vcombine.low %v887_v58, %v895_v59  ;;  %v3111_v7 = vcombine.high %v872_v1, %v880_v2  ;;  %v3113_v8 = vcombine.high %v873_v3, %v881_v4  ;;  %v760_v58 = vld [vmem:[%s3938_s7 + $0x10] sm:$0xff] }
  0xc1   : > { %v768_v59 = vld [vmem:[%s3938_s7 + $0x50] sm:$0xff] }
  0xc3   : > { %2405 = vmatpush2.bf16.msra.mxu0 %v3234_v12  ;;  %2448 = vmatpush2.bf16.msra.mxu1 %v3236_v13  ;;  %v857_v12 = vld [vmem:[%s3938_s7 + $0x318] sm:$0xff] }
  0xc4   : > { %2406 = vmatprep.subr.bf16.mxu0 %v3219_v14  ;;  %2449 = vmatprep.subr.bf16.mxu1 %v3221_v15  ;;  %v865_v13 = vld [vmem:[%s3938_s7 + $0x358] sm:$0xff]  ;;  %v3110_v14 = vcombine.low %v872_v1, %v880_v2  ;;  %v3112_v15 = vcombine.low %v873_v3, %v881_v4  ;;  %v2999_v1 = vcombine.high %v760_v58, %v768_v59  ;;  %v1000_v3 = vld [vmem:[%s3938_s7 + $0x790] sm:$0xff] }
  0xc5   : > { %v3097_v17 = vcombine.high %v857_v12, %v865_v13  ;;  %v1008_v4 = vld [vmem:[%s3938_s7 + $0x7d0] sm:$0xff] }
  0xc7   : > { %2407 = vmatpush2.bf16.msra.mxu0 %v3218_v20  ;;  %2450 = vmatpush2.bf16.msra.mxu1 %v3220_v21  ;;  %v841_v20 = vld [vmem:[%s3938_s7 + $0x298] sm:$0xff] }
  0xc8   : > { %2408 = vmatprep.subr.bf16.mxu0 %v3203_v22  ;;  %2451 = vmatprep.subr.bf16.mxu1 %v3205_v23  ;;  %v849_v21 = vld [vmem:[%s3938_s7 + $0x2d8] sm:$0xff]  ;;  %v3094_v22 = vcombine.low %v856_v9, %v864_v10  ;;  %v3096_v23 = vcombine.low %v857_v12, %v865_v13  ;;  %v3239_v9 = vcombine.high %v1000_v3, %v1008_v4  ;;  %v984_v12 = vld [vmem:[%s3938_s7 + $0x710] sm:$0xff] }
  0xc9   : > { %v3081_v25 = vcombine.high %v841_v20, %v849_v21  ;;  %v992_v13 = vld [vmem:[%s3938_s7 + $0x750] sm:$0xff] }
  0xcb   : > { %2409 = vmatpush2.bf16.msra.mxu0 %v3202_v28  ;;  %2452 = vmatpush2.bf16.msra.mxu1 %v3204_v29  ;;  %v825_v28 = vld [vmem:[%s3938_s7 + $0x218] sm:$0xff] }
  0xcc   : > { %2410 = vmatprep.subr.bf16.mxu0 %v3187_v30  ;;  %2453 = vmatprep.subr.bf16.mxu1 %v3189_v31  ;;  %v833_v29 = vld [vmem:[%s3938_s7 + $0x258] sm:$0xff]  ;;  %v3078_v30 = vcombine.low %v840_v18, %v848_v19  ;;  %v3080_v31 = vcombine.low %v841_v20, %v849_v21  ;;  %v3223_v18 = vcombine.high %v984_v12, %v992_v13  ;;  %v968_v20 = vld [vmem:[%s3938_s7 + $0x690] sm:$0xff] }
  0xcd   : > { %v3065_v33 = vcombine.high %v825_v28, %v833_v29  ;;  %v976_v21 = vld [vmem:[%s3938_s7 + $0x6d0] sm:$0xff] }
  0xcf   : > { %2411 = vmatpush2.bf16.msra.mxu0 %v3186_v36  ;;  %2454 = vmatpush2.bf16.msra.mxu1 %v3188_v37  ;;  %v809_v36 = vld [vmem:[%s3938_s7 + $0x198] sm:$0xff] }
  0xd0   : > { %2412 = vmatprep.subr.bf16.mxu0 %v3171_v38  ;;  %2455 = vmatprep.subr.bf16.mxu1 %v3173_v39  ;;  %v817_v37 = vld [vmem:[%s3938_s7 + $0x1d8] sm:$0xff]  ;;  %v3062_v38 = vcombine.low %v824_v26, %v832_v27  ;;  %v3064_v39 = vcombine.low %v825_v28, %v833_v29  ;;  %v3207_v26 = vcombine.high %v968_v20, %v976_v21  ;;  %v952_v28 = vld [vmem:[%s3938_s7 + $0x610] sm:$0xff] }
  0xd1   : > { %v3049_v41 = vcombine.high %v809_v36, %v817_v37  ;;  %v960_v29 = vld [vmem:[%s3938_s7 + $0x650] sm:$0xff] }
  0xd3   : > { %2413 = vmatpush2.bf16.msra.mxu0 %v3170_v44  ;;  %2456 = vmatpush2.bf16.msra.mxu1 %v3172_v45  ;;  %v793_v44 = vld [vmem:[%s3938_s7 + $0x118] sm:$0xff] }
  0xd4   : > { %2414 = vmatprep.subr.bf16.mxu0 %v3155_v46  ;;  %2457 = vmatprep.subr.bf16.mxu1 %v3157_v47  ;;  %v801_v45 = vld [vmem:[%s3938_s7 + $0x158] sm:$0xff]  ;;  %v3046_v46 = vcombine.low %v808_v34, %v816_v35  ;;  %v3048_v47 = vcombine.low %v809_v36, %v817_v37  ;;  %v3191_v34 = vcombine.high %v952_v28, %v960_v29  ;;  %v936_v36 = vld [vmem:[%s3938_s7 + $0x590] sm:$0xff] }
  0xd5   : > { %v3033_v49 = vcombine.high %v793_v44, %v801_v45  ;;  %v944_v37 = vld [vmem:[%s3938_s7 + $0x5d0] sm:$0xff] }
  0xd7   : > { %2415 = vmatpush2.bf16.msra.mxu0 %v3154_v52  ;;  %2458 = vmatpush2.bf16.msra.mxu1 %v3156_v53  ;;  %v777_v52 = vld [vmem:[%s3938_s7 + $0x98] sm:$0xff] }
  0xd8   : > { %2416 = vmatprep.subr.bf16.mxu0 %v3139_v54  ;;  %2459 = vmatprep.subr.bf16.mxu1 %v3141_v55  ;;  %v785_v53 = vld [vmem:[%s3938_s7 + $0xd8] sm:$0xff]  ;;  %v3030_v54 = vcombine.low %v792_v42, %v800_v43  ;;  %v3032_v55 = vcombine.low %v793_v44, %v801_v45  ;;  %v3175_v42 = vcombine.high %v936_v36, %v944_v37  ;;  %v920_v44 = vld [vmem:[%s3938_s7 + $0x510] sm:$0xff] }
  0xd9   : > { %v3017_v57 = vcombine.high %v777_v52, %v785_v53  ;;  %v928_v45 = vld [vmem:[%s3938_s7 + $0x550] sm:$0xff] }
  0xdb   : > { %2417 = vmatpush2.bf16.msra.mxu0 %v3138_v60  ;;  %2460 = vmatpush2.bf16.msra.mxu1 %v3140_v61  ;;  %v761_v60 = vld [vmem:[%s3938_s7 + $0x18] sm:$0xff] }
  0xdc   : > { %2418 = vmatprep.subr.bf16.mxu0 %v3123_v62  ;;  %2461 = vmatprep.subr.bf16.mxu1 %v3125_v63  ;;  %v769_v61 = vld [vmem:[%s3938_s7 + $0x58] sm:$0xff]  ;;  %v3014_v62 = vcombine.low %v776_v50, %v784_v51  ;;  %v3016_v63 = vcombine.low %v777_v52, %v785_v53  ;;  %v3159_v50 = vcombine.high %v920_v44, %v928_v45  ;;  %v904_v52 = vld [vmem:[%s3938_s7 + $0x490] sm:$0xff] }
  0xdd   : > { %v3001_v2 = vcombine.high %v761_v60, %v769_v61  ;;  %v912_v53 = vld [vmem:[%s3938_s7 + $0x4d0] sm:$0xff] }
  0xdf   : > { %2419 = vmatpush2.bf16.msra.mxu0 %v3122_v5  ;;  %2462 = vmatpush2.bf16.msra.mxu1 %v3124_v6  ;;  %v1001_v5 = vld [vmem:[%s3938_s7 + $0x798] sm:$0xff] }
  0xe0   : > { %2474 = vmatprep.subr.bf16.mxu0 %v3111_v7  ;;  %2517 = vmatprep.subr.bf16.mxu1 %v3113_v8  ;;  %v1009_v6 = vld [vmem:[%s3938_s7 + $0x7d8] sm:$0xff]  ;;  %v2998_v7 = vcombine.low %v760_v58, %v768_v59  ;;  %v3000_v8 = vcombine.low %v761_v60, %v769_v61  ;;  %v3143_v58 = vcombine.high %v904_v52, %v912_v53  ;;  %v888_v60 = vld [vmem:[%s3938_s7 + $0x410] sm:$0xff] }
  0xe1   : > { %v3241_v10 = vcombine.high %v1001_v5, %v1009_v6  ;;  %v896_v61 = vld [vmem:[%s3938_s7 + $0x450] sm:$0xff] }
  0xe2   : > { %2421 = vmatmul.mubr.bf16.vlgmr.msra.gmra.mxu0 %v4013_v11  ;;  %2464 = vmatmul.mubr.bf16.vlgmr.msra.gmra.mxu1 %v4013_v11 }
  0xe3   : > { %2475 = vmatpush1.bf16.msra.mxu0 %v3110_v14  ;;  %2518 = vmatpush1.bf16.msra.mxu1 %v3112_v15  ;;  %v985_v14 = vld [vmem:[%s3938_s7 + $0x718] sm:$0xff] }
  0xe4   : > { %2476 = vmatprep.subr.bf16.mxu0 %v3095_v16  ;;  %2519 = vmatprep.subr.bf16.mxu1 %v3097_v17  ;;  %v993_v15 = vld [vmem:[%s3938_s7 + $0x758] sm:$0xff]  ;;  %v3238_v16 = vcombine.low %v1000_v3, %v1008_v4  ;;  %v3240_v17 = vcombine.low %v1001_v5, %v1009_v6  ;;  %v3127_v3 = vcombine.high %v888_v60, %v896_v61  ;;  %v874_v5 = vld [vmem:[%s3938_s7 + $0x3a0] sm:$0xff] }
  0xe5   : > { %2506 = vmatprep.mubr.bf16.mxu0 %v3932_v0  ;;  %2549 = vmatprep.mubr.bf16.mxu1 %v3932_v0  ;;  %v3225_v19 = vcombine.high %v985_v14, %v993_v15  ;;  %v882_v6 = vld [vmem:[%s3938_s7 + $0x3e0] sm:$0xff] }
  0xe7   : > { %2477 = vmatpush1.bf16.msra.mxu0 %v3094_v22  ;;  %2520 = vmatpush1.bf16.msra.mxu1 %v3096_v23  ;;  %v969_v22 = vld [vmem:[%s3938_s7 + $0x698] sm:$0xff] }
  0xe8   : > { %2478 = vmatprep.subr.bf16.mxu0 %v3079_v24  ;;  %2521 = vmatprep.subr.bf16.mxu1 %v3081_v25  ;;  %v977_v23 = vld [vmem:[%s3938_s7 + $0x6d8] sm:$0xff]  ;;  %v3222_v24 = vcombine.low %v984_v12, %v992_v13  ;;  %v3224_v25 = vcombine.low %v985_v14, %v993_v15  ;;  %v3115_v12 = vcombine.high %v874_v5, %v882_v6  ;;  %v858_v14 = vld [vmem:[%s3938_s7 + $0x320] sm:$0xff] }
  0xe9   : > { %v3209_v27 = vcombine.high %v969_v22, %v977_v23  ;;  %v866_v15 = vld [vmem:[%s3938_s7 + $0x360] sm:$0xff] }
  0xeb   : > { %2479 = vmatpush1.bf16.msra.mxu0 %v3078_v30  ;;  %2522 = vmatpush1.bf16.msra.mxu1 %v3080_v31  ;;  %v953_v30 = vld [vmem:[%s3938_s7 + $0x618] sm:$0xff] }
  0xec   : > { %2480 = vmatprep.subr.bf16.mxu0 %v3063_v32  ;;  %2523 = vmatprep.subr.bf16.mxu1 %v3065_v33  ;;  %v961_v31 = vld [vmem:[%s3938_s7 + $0x658] sm:$0xff]  ;;  %v3206_v32 = vcombine.low %v968_v20, %v976_v21  ;;  %v3208_v33 = vcombine.low %v969_v22, %v977_v23  ;;  %v3099_v20 = vcombine.high %v858_v14, %v866_v15  ;;  %v842_v22 = vld [vmem:[%s3938_s7 + $0x2a0] sm:$0xff] }
  0xed   : > { %v3193_v35 = vcombine.high %v953_v30, %v961_v31  ;;  %v850_v23 = vld [vmem:[%s3938_s7 + $0x2e0] sm:$0xff] }
  0xef   : > { %2481 = vmatpush1.bf16.msra.mxu0 %v3062_v38  ;;  %2524 = vmatpush1.bf16.msra.mxu1 %v3064_v39  ;;  %v937_v38 = vld [vmem:[%s3938_s7 + $0x598] sm:$0xff] }
  0xf0   : > { %2482 = vmatprep.subr.bf16.mxu0 %v3047_v40  ;;  %2525 = vmatprep.subr.bf16.mxu1 %v3049_v41  ;;  %v945_v39 = vld [vmem:[%s3938_s7 + $0x5d8] sm:$0xff]  ;;  %v3190_v40 = vcombine.low %v952_v28, %v960_v29  ;;  %v3192_v41 = vcombine.low %v953_v30, %v961_v31  ;;  %v3083_v28 = vcombine.high %v842_v22, %v850_v23  ;;  %v826_v30 = vld [vmem:[%s3938_s7 + $0x220] sm:$0xff] }
  0xf1   : > { %v3177_v43 = vcombine.high %v937_v38, %v945_v39  ;;  %v834_v31 = vld [vmem:[%s3938_s7 + $0x260] sm:$0xff] }
  0xf3   : > { %2483 = vmatpush1.bf16.msra.mxu0 %v3046_v46  ;;  %2526 = vmatpush1.bf16.msra.mxu1 %v3048_v47  ;;  %v921_v46 = vld [vmem:[%s3938_s7 + $0x518] sm:$0xff] }
  0xf4   : > { %2484 = vmatprep.subr.bf16.mxu0 %v3031_v48  ;;  %2527 = vmatprep.subr.bf16.mxu1 %v3033_v49  ;;  %v929_v47 = vld [vmem:[%s3938_s7 + $0x558] sm:$0xff]  ;;  %v3174_v48 = vcombine.low %v936_v36, %v944_v37  ;;  %v3176_v49 = vcombine.low %v937_v38, %v945_v39  ;;  %v3067_v36 = vcombine.high %v826_v30, %v834_v31  ;;  %v810_v38 = vld [vmem:[%s3938_s7 + $0x1a0] sm:$0xff] }
  0xf5   : > { %v3161_v51 = vcombine.high %v921_v46, %v929_v47  ;;  %v818_v39 = vld [vmem:[%s3938_s7 + $0x1e0] sm:$0xff] }
  0xf7   : > { %2485 = vmatpush1.bf16.msra.mxu0 %v3030_v54  ;;  %2528 = vmatpush1.bf16.msra.mxu1 %v3032_v55  ;;  %v905_v54 = vld [vmem:[%s3938_s7 + $0x498] sm:$0xff] }
  0xf8   : > { %2486 = vmatprep.subr.bf16.mxu0 %v3015_v56  ;;  %2529 = vmatprep.subr.bf16.mxu1 %v3017_v57  ;;  %v913_v55 = vld [vmem:[%s3938_s7 + $0x4d8] sm:$0xff]  ;;  %v3158_v56 = vcombine.low %v920_v44, %v928_v45  ;;  %v3160_v57 = vcombine.low %v921_v46, %v929_v47  ;;  %v794_v45 = vld [vmem:[%s3938_s7 + $0x120] sm:$0xff]  ;;  %v795_v47 = vld [vmem:[%s3938_s7 + $0x128] sm:$0xff] }
  0xf9   : > { %v3145_v59 = vcombine.high %v905_v54, %v913_v55  ;;  %v802_v46 = vld [vmem:[%s3938_s7 + $0x160] sm:$0xff] }
  0xfb   : > { %2487 = vmatpush1.bf16.msra.mxu0 %v3014_v62  ;;  %2530 = vmatpush1.bf16.msra.mxu1 %v3016_v63  ;;  %v889_v62 = vld [vmem:[%s3938_s7 + $0x418] sm:$0xff] }
  0xfc   : > { %2488 = vmatprep.subr.bf16.mxu0 %v2999_v1  ;;  %2531 = vmatprep.subr.bf16.mxu1 %v3001_v2  ;;  %v897_v63 = vld [vmem:[%s3938_s7 + $0x458] sm:$0xff]  ;;  %v3142_v1 = vcombine.low %v904_v52, %v912_v53  ;;  %v3144_v2 = vcombine.low %v905_v54, %v913_v55  ;;  %v778_v53 = vld [vmem:[%s3938_s7 + $0xa0] sm:$0xff]  ;;  %v779_v55 = vld [vmem:[%s3938_s7 + $0xa8] sm:$0xff] }
  0xfd   : > { %v3129_v4 = vcombine.high %v889_v62, %v897_v63  ;;  %v786_v54 = vld [vmem:[%s3938_s7 + $0xe0] sm:$0xff] }
  0xff   : > { %2489 = vmatpush1.bf16.msra.mxu0 %v2998_v7  ;;  %2532 = vmatpush1.bf16.msra.mxu1 %v3000_v8  ;;  %v875_v7 = vld [vmem:[%s3938_s7 + $0x3a8] sm:$0xff] }
 0x100   : > { %2490 = vmatprep.subr.bf16.mxu0 %v3239_v9  ;;  %2533 = vmatprep.subr.bf16.mxu1 %v3241_v10  ;;  %v883_v8 = vld [vmem:[%s3938_s7 + $0x3e8] sm:$0xff]  ;;  %v3126_v9 = vcombine.low %v888_v60, %v896_v61  ;;  %v3128_v10 = vcombine.low %v889_v62, %v897_v63  ;;  %v762_v61 = vld [vmem:[%s3938_s7 + $0x20] sm:$0xff] }
 0x101   : > { %v3117_v13 = vcombine.high %v875_v7, %v883_v8  ;;  %v770_v62 = vld [vmem:[%s3938_s7 + $0x60] sm:$0xff]  ;;  %v763_v63 = vld [vmem:[%s3938_s7 + $0x28] sm:$0xff] }
 0x103   : > { %2491 = vmatpush2.bf16.msra.mxu0 %v3238_v16  ;;  %2534 = vmatpush2.bf16.msra.mxu1 %v3240_v17  ;;  %v859_v16 = vld [vmem:[%s3938_s7 + $0x328] sm:$0xff] }
 0x104   : > { %2492 = vmatprep.subr.bf16.mxu0 %v3223_v18  ;;  %2535 = vmatprep.subr.bf16.mxu1 %v3225_v19  ;;  %v867_v17 = vld [vmem:[%s3938_s7 + $0x368] sm:$0xff]  ;;  %v3114_v18 = vcombine.low %v874_v5, %v882_v6  ;;  %v3116_v19 = vcombine.low %v875_v7, %v883_v8  ;;  %v1002_v6 = vld [vmem:[%s3938_s7 + $0x7a0] sm:$0xff] }
 0x105   : > { %v3101_v21 = vcombine.high %v859_v16, %v867_v17  ;;  %v1010_v7 = vld [vmem:[%s3938_s7 + $0x7e0] sm:$0xff]  ;;  %v1003_v8 = vld [vmem:[%s3938_s7 + $0x7a8] sm:$0xff] }
 0x107   : > { %2493 = vmatpush2.bf16.msra.mxu0 %v3222_v24  ;;  %2536 = vmatpush2.bf16.msra.mxu1 %v3224_v25  ;;  %v843_v24 = vld [vmem:[%s3938_s7 + $0x2a8] sm:$0xff] }
 0x108   : > { %2494 = vmatprep.subr.bf16.mxu0 %v3207_v26  ;;  %2537 = vmatprep.subr.bf16.mxu1 %v3209_v27  ;;  %v851_v25 = vld [vmem:[%s3938_s7 + $0x2e8] sm:$0xff]  ;;  %v3098_v26 = vcombine.low %v858_v14, %v866_v15  ;;  %v3100_v27 = vcombine.low %v859_v16, %v867_v17  ;;  %v986_v15 = vld [vmem:[%s3938_s7 + $0x720] sm:$0xff] }
 0x109   : > { %v3085_v29 = vcombine.high %v843_v24, %v851_v25  ;;  %v994_v16 = vld [vmem:[%s3938_s7 + $0x760] sm:$0xff]  ;;  %v987_v17 = vld [vmem:[%s3938_s7 + $0x728] sm:$0xff] }
 0x10b   : > { %2495 = vmatpush2.bf16.msra.mxu0 %v3206_v32  ;;  %2538 = vmatpush2.bf16.msra.mxu1 %v3208_v33  ;;  %v827_v32 = vld [vmem:[%s3938_s7 + $0x228] sm:$0xff] }
 0x10c   : > { %2496 = vmatprep.subr.bf16.mxu0 %v3191_v34  ;;  %2539 = vmatprep.subr.bf16.mxu1 %v3193_v35  ;;  %v835_v33 = vld [vmem:[%s3938_s7 + $0x268] sm:$0xff]  ;;  %v3082_v34 = vcombine.low %v842_v22, %v850_v23  ;;  %v3084_v35 = vcombine.low %v843_v24, %v851_v25  ;;  %v970_v23 = vld [vmem:[%s3938_s7 + $0x6a0] sm:$0xff] }
 0x10d   : > { %v3069_v37 = vcombine.high %v827_v32, %v835_v33  ;;  %v978_v24 = vld [vmem:[%s3938_s7 + $0x6e0] sm:$0xff]  ;;  %v971_v25 = vld [vmem:[%s3938_s7 + $0x6a8] sm:$0xff] }
 0x10f   : > { %2497 = vmatpush2.bf16.msra.mxu0 %v3190_v40  ;;  %2540 = vmatpush2.bf16.msra.mxu1 %v3192_v41  ;;  %v811_v40 = vld [vmem:[%s3938_s7 + $0x1a8] sm:$0xff] }
 0x110   : > { %2498 = vmatprep.subr.bf16.mxu0 %v3175_v42  ;;  %2541 = vmatprep.subr.bf16.mxu1 %v3177_v43  ;;  %v819_v41 = vld [vmem:[%s3938_s7 + $0x1e8] sm:$0xff]  ;;  %v3066_v42 = vcombine.low %v826_v30, %v834_v31  ;;  %v3051_v43 = vcombine.high %v810_v38, %v818_v39  ;;  %v954_v31 = vld [vmem:[%s3938_s7 + $0x620] sm:$0xff] }
 0x111   : > { %v3053_v44 = vcombine.high %v811_v40, %v819_v41 }
 0x113   : > { %2499 = vmatpush2.bf16.msra.mxu0 %v3174_v48  ;;  %2542 = vmatpush2.bf16.msra.mxu1 %v3176_v49  ;;  %v803_v48 = vld [vmem:[%s3938_s7 + $0x168] sm:$0xff]  ;;  %v3050_v49 = vcombine.low %v810_v38, %v818_v39  ;;  %v938_v39 = vld [vmem:[%s3938_s7 + $0x5a0] sm:$0xff] }
 0x114   : > { %2500 = vmatprep.subr.bf16.mxu0 %v3159_v50  ;;  %2543 = vmatprep.subr.bf16.mxu1 %v3161_v51  ;;  %v3052_v50 = vcombine.low %v811_v40, %v819_v41  ;;  %v3035_v51 = vcombine.high %v794_v45, %v802_v46  ;;  %v3037_v52 = vcombine.high %v795_v47, %v803_v48  ;;  %v946_v40 = vld [vmem:[%s3938_s7 + $0x5e0] sm:$0xff]  ;;  %v939_v41 = vld [vmem:[%s3938_s7 + $0x5a8] sm:$0xff] }
 0x117   : > { %2501 = vmatpush2.bf16.msra.mxu0 %v3158_v56  ;;  %2544 = vmatpush2.bf16.msra.mxu1 %v3160_v57  ;;  %v787_v56 = vld [vmem:[%s3938_s7 + $0xe8] sm:$0xff]  ;;  %v3034_v57 = vcombine.low %v794_v45, %v802_v46  ;;  %v922_v46 = vld [vmem:[%s3938_s7 + $0x520] sm:$0xff] }
 0x118   : > { %2502 = vmatprep.subr.bf16.mxu0 %v3143_v58  ;;  %2545 = vmatprep.subr.bf16.mxu1 %v3145_v59  ;;  %v3036_v58 = vcombine.low %v795_v47, %v803_v48  ;;  %v3019_v59 = vcombine.high %v778_v53, %v786_v54  ;;  %v3021_v60 = vcombine.high %v779_v55, %v787_v56  ;;  %v930_v47 = vld [vmem:[%s3938_s7 + $0x560] sm:$0xff]  ;;  %v923_v48 = vld [vmem:[%s3938_s7 + $0x528] sm:$0xff] }
 0x11b   : > { %2503 = vmatpush2.bf16.msra.mxu0 %v3142_v1  ;;  %2546 = vmatpush2.bf16.msra.mxu1 %v3144_v2  ;;  %v771_v1 = vld [vmem:[%s3938_s7 + $0x68] sm:$0xff]  ;;  %v3018_v2 = vcombine.low %v778_v53, %v786_v54  ;;  %v906_v54 = vld [vmem:[%s3938_s7 + $0x4a0] sm:$0xff] }
 0x11c   : > { %2504 = vmatprep.subr.bf16.mxu0 %v3127_v3  ;;  %2547 = vmatprep.subr.bf16.mxu1 %v3129_v4  ;;  %v3020_v3 = vcombine.low %v779_v55, %v787_v56  ;;  %v3003_v4 = vcombine.high %v762_v61, %v770_v62  ;;  %v3005_v5 = vcombine.high %v763_v63, %v771_v1  ;;  %v914_v55 = vld [vmem:[%s3938_s7 + $0x4e0] sm:$0xff]  ;;  %v907_v56 = vld [vmem:[%s3938_s7 + $0x4a8] sm:$0xff] }
 0x11f   : > { %2505 = vmatpush2.bf16.msra.mxu0 %v3126_v9  ;;  %2548 = vmatpush2.bf16.msra.mxu1 %v3128_v10  ;;  %v1011_v9 = vld [vmem:[%s3938_s7 + $0x7e8] sm:$0xff]  ;;  %v3002_v10 = vcombine.low %v762_v61, %v770_v62  ;;  %v890_v62 = vld [vmem:[%s3938_s7 + $0x420] sm:$0xff] }
 0x120   : > { %2560 = vmatprep.subr.bf16.mxu0 %v3115_v12  ;;  %2603 = vmatprep.subr.bf16.mxu1 %v3117_v13  ;;  %v3004_v12 = vcombine.low %v763_v63, %v771_v1  ;;  %v3243_v13 = vcombine.high %v1002_v6, %v1010_v7  ;;  %v3245_v14 = vcombine.high %v1003_v8, %v1011_v9  ;;  %v898_v63 = vld [vmem:[%s3938_s7 + $0x460] sm:$0xff]  ;;  %v891_v1 = vld [vmem:[%s3938_s7 + $0x428] sm:$0xff] }
 0x122   : > { %2507 = vmatmul.mubr.bf16.vlgmr.msra.gmra.mxu0 %v4013_v11  ;;  %2550 = vmatmul.mubr.bf16.vlgmr.msra.gmra.mxu1 %v4013_v11 }
 0x123   : > { %2561 = vmatpush1.bf16.msra.mxu0 %v3114_v18  ;;  %2604 = vmatpush1.bf16.msra.mxu1 %v3116_v19  ;;  %v995_v18 = vld [vmem:[%s3938_s7 + $0x768] sm:$0xff]  ;;  %v3242_v19 = vcombine.low %v1002_v6, %v1010_v7  ;;  %v876_v7 = vld [vmem:[%s3938_s7 + $0x3b0] sm:$0xff] }
 0x124   : > { %2562 = vmatprep.subr.bf16.mxu0 %v3099_v20  ;;  %2605 = vmatprep.subr.bf16.mxu1 %v3101_v21  ;;  %v3244_v20 = vcombine.low %v1003_v8, %v1011_v9  ;;  %v3227_v21 = vcombine.high %v986_v15, %v994_v16  ;;  %v3229_v22 = vcombine.high %v987_v17, %v995_v18  ;;  %v884_v8 = vld [vmem:[%s3938_s7 + $0x3f0] sm:$0xff]  ;;  %v877_v9 = vld [vmem:[%s3938_s7 + $0x3b8] sm:$0xff] }
 0x125   : > { %2592 = vmatprep.mubr.bf16.mxu0 %v3932_v0  ;;  %2635 = vmatprep.mubr.bf16.mxu1 %v3932_v0  ;;  %v3068_v0 = vcombine.low %v827_v32, %v835_v33  ;;  %v962_v32 = vld [vmem:[%s3938_s7 + $0x660] sm:$0xff]  ;;  %v955_v33 = vld [vmem:[%s3938_s7 + $0x628] sm:$0xff] }
 0x127   : > { %2563 = vmatpush1.bf16.msra.mxu0 %v3098_v26  ;;  %2606 = vmatpush1.bf16.msra.mxu1 %v3100_v27  ;;  %v979_v26 = vld [vmem:[%s3938_s7 + $0x6e8] sm:$0xff]  ;;  %v3226_v27 = vcombine.low %v986_v15, %v994_v16  ;;  %v860_v16 = vld [vmem:[%s3938_s7 + $0x330] sm:$0xff] }
 0x128   : > { %2564 = vmatprep.subr.bf16.mxu0 %v3083_v28  ;;  %2607 = vmatprep.subr.bf16.mxu1 %v3085_v29  ;;  %v3228_v28 = vcombine.low %v987_v17, %v995_v18  ;;  %v3211_v29 = vcombine.high %v970_v23, %v978_v24  ;;  %v3213_v30 = vcombine.high %v971_v25, %v979_v26  ;;  %v868_v17 = vld [vmem:[%s3938_s7 + $0x370] sm:$0xff]  ;;  %v861_v18 = vld [vmem:[%s3938_s7 + $0x338] sm:$0xff] }
 0x12b   : > { %2565 = vmatpush1.bf16.msra.mxu0 %v3082_v34  ;;  %2608 = vmatpush1.bf16.msra.mxu1 %v3084_v35  ;;  %v963_v34 = vld [vmem:[%s3938_s7 + $0x668] sm:$0xff]  ;;  %v3210_v35 = vcombine.low %v970_v23, %v978_v24  ;;  %v844_v24 = vld [vmem:[%s3938_s7 + $0x2b0] sm:$0xff] }
 0x12c   : > { %2566 = vmatprep.subr.bf16.mxu0 %v3067_v36  ;;  %2609 = vmatprep.subr.bf16.mxu1 %v3069_v37  ;;  %v3212_v36 = vcombine.low %v971_v25, %v979_v26  ;;  %v3195_v37 = vcombine.high %v954_v31, %v962_v32  ;;  %v3197_v38 = vcombine.high %v955_v33, %v963_v34  ;;  %v852_v25 = vld [vmem:[%s3938_s7 + $0x2f0] sm:$0xff]  ;;  %v845_v26 = vld [vmem:[%s3938_s7 + $0x2b8] sm:$0xff] }
 0x12f   : > { %2567 = vmatpush1.bf16.msra.mxu0 %v3066_v42  ;;  %2610 = vmatpush1.bf16.msra.mxu1 %v3068_v0  ;;  %v947_v42 = vld [vmem:[%s3938_s7 + $0x5e8] sm:$0xff]  ;;  %v3194_v0 = vcombine.low %v954_v31, %v962_v32  ;;  %v828_v32 = vld [vmem:[%s3938_s7 + $0x230] sm:$0xff] }
 0x130   : > { %2568 = vmatprep.subr.bf16.mxu0 %v3051_v43  ;;  %2611 = vmatprep.subr.bf16.mxu1 %v3053_v44  ;;  %v3196_v43 = vcombine.low %v955_v33, %v963_v34  ;;  %v3179_v44 = vcombine.high %v938_v39, %v946_v40  ;;  %v3181_v45 = vcombine.high %v939_v41, %v947_v42  ;;  %v836_v33 = vld [vmem:[%s3938_s7 + $0x270] sm:$0xff]  ;;  %v3300_v34 = vld [vmem:[%s4396_s0 + $0x4] ss:$8 sps:$4 sm:$0xff]  }
 0x133   : > { %2569 = vmatpush1.bf16.msra.mxu0 %v3050_v49  ;;  %2612 = vmatpush1.bf16.msra.mxu1 %v3052_v50  ;;  %v931_v49 = vld [vmem:[%s3938_s7 + $0x568] sm:$0xff]  ;;  %v3178_v50 = vcombine.low %v938_v39, %v946_v40  ;;  %v812_v40 = vld [vmem:[%s3938_s7 + $0x1b0] sm:$0xff] }
 0x134   : > { %2570 = vmatprep.subr.bf16.mxu0 %v3035_v51  ;;  %2613 = vmatprep.subr.bf16.mxu1 %v3037_v52  ;;  %v3180_v51 = vcombine.low %v939_v41, %v947_v42  ;;  %v3163_v52 = vcombine.high %v922_v46, %v930_v47  ;;  %v3165_v53 = vcombine.high %v923_v48, %v931_v49  ;;  %v820_v41 = vld [vmem:[%s3938_s7 + $0x1f0] sm:$0xff]  ;;  %v813_v42 = vld [vmem:[%s3938_s7 + $0x1b8] sm:$0xff] }
 0x137   : > { %2571 = vmatpush1.bf16.msra.mxu0 %v3034_v57  ;;  %2614 = vmatpush1.bf16.msra.mxu1 %v3036_v58  ;;  %v915_v57 = vld [vmem:[%s3938_s7 + $0x4e8] sm:$0xff]  ;;  %v3162_v58 = vcombine.low %v922_v46, %v930_v47  ;;  %v796_v47 = vld [vmem:[%s3938_s7 + $0x130] sm:$0xff] }
 0x138   : > { %2572 = vmatprep.subr.bf16.mxu0 %v3019_v59  ;;  %2615 = vmatprep.subr.bf16.mxu1 %v3021_v60  ;;  %v3164_v59 = vcombine.low %v923_v48, %v931_v49  ;;  %v3147_v60 = vcombine.high %v906_v54, %v914_v55  ;;  %v3149_v61 = vcombine.high %v907_v56, %v915_v57  ;;  %v804_v48 = vld [vmem:[%s3938_s7 + $0x170] sm:$0xff]  ;;  %v797_v49 = vld [vmem:[%s3938_s7 + $0x138] sm:$0xff] }
 0x13b   : > { %2573 = vmatpush1.bf16.msra.mxu0 %v3018_v2  ;;  %2616 = vmatpush1.bf16.msra.mxu1 %v3020_v3  ;;  %v899_v2 = vld [vmem:[%s3938_s7 + $0x468] sm:$0xff]  ;;  %v3146_v3 = vcombine.low %v906_v54, %v914_v55  ;;  %v780_v55 = vld [vmem:[%s3938_s7 + $0xb0] sm:$0xff] }
 0x13c   : > { %2574 = vmatprep.subr.bf16.mxu0 %v3003_v4  ;;  %2617 = vmatprep.subr.bf16.mxu1 %v3005_v5  ;;  %v3148_v4 = vcombine.low %v907_v56, %v915_v57  ;;  %v3131_v5 = vcombine.high %v890_v62, %v898_v63  ;;  %v3133_v6 = vcombine.high %v891_v1, %v899_v2  ;;  %v788_v56 = vld [vmem:[%s3938_s7 + $0xf0] sm:$0xff]  ;;  %v781_v57 = vld [vmem:[%s3938_s7 + $0xb8] sm:$0xff] }
 0x13f   : > { %2575 = vmatpush1.bf16.msra.mxu0 %v3002_v10  ;;  %2618 = vmatpush1.bf16.msra.mxu1 %v3004_v12  ;;  %v885_v10 = vld [vmem:[%s3938_s7 + $0x3f8] sm:$0xff]  ;;  %v3130_v12 = vcombine.low %v890_v62, %v898_v63  ;;  %v764_v63 = vld [vmem:[%s3938_s7 + $0x30] sm:$0xff] }
 0x140   : > { %2576 = vmatprep.subr.bf16.mxu0 %v3243_v13  ;;  %2619 = vmatprep.subr.bf16.mxu1 %v3245_v14  ;;  %v3132_v13 = vcombine.low %v891_v1, %v899_v2  ;;  %v3119_v14 = vcombine.high %v876_v7, %v884_v8  ;;  %v3121_v15 = vcombine.high %v877_v9, %v885_v10  ;;  %v772_v1 = vld [vmem:[%s3938_s7 + $0x70] sm:$0xff]  ;;  %v765_v2 = vld [vmem:[%s3938_s7 + $0x38] sm:$0xff] }
 0x143   : > { %2577 = vmatpush2.bf16.msra.mxu0 %v3242_v19  ;;  %2620 = vmatpush2.bf16.msra.mxu1 %v3244_v20  ;;  %v869_v19 = vld [vmem:[%s3938_s7 + $0x378] sm:$0xff]  ;;  %v3118_v20 = vcombine.low %v876_v7, %v884_v8  ;;  %v1004_v8 = vld [vmem:[%s3938_s7 + $0x7b0] sm:$0xff] }
 0x144   : > { %2578 = vmatprep.subr.bf16.mxu0 %v3227_v21  ;;  %2621 = vmatprep.subr.bf16.mxu1 %v3229_v22  ;;  %v3120_v21 = vcombine.low %v877_v9, %v885_v10  ;;  %v3103_v22 = vcombine.high %v860_v16, %v868_v17  ;;  %v3105_v23 = vcombine.high %v861_v18, %v869_v19  ;;  %v1012_v9 = vld [vmem:[%s3938_s7 + $0x7f0] sm:$0xff]  ;;  %v1005_v10 = vld [vmem:[%s3938_s7 + $0x7b8] sm:$0xff] }
 0x147   : > { %2579 = vmatpush2.bf16.msra.mxu0 %v3226_v27  ;;  %2622 = vmatpush2.bf16.msra.mxu1 %v3228_v28  ;;  %v853_v27 = vld [vmem:[%s3938_s7 + $0x2f8] sm:$0xff]  ;;  %v3102_v28 = vcombine.low %v860_v16, %v868_v17  ;;  %v988_v17 = vld [vmem:[%s3938_s7 + $0x730] sm:$0xff] }
 0x148   : > { %2580 = vmatprep.subr.bf16.mxu0 %v3211_v29  ;;  %2623 = vmatprep.subr.bf16.mxu1 %v3213_v30  ;;  %v3104_v29 = vcombine.low %v861_v18, %v869_v19  ;;  %v3087_v30 = vcombine.high %v844_v24, %v852_v25  ;;  %v3089_v31 = vcombine.high %v845_v26, %v853_v27  ;;  %v996_v18 = vld [vmem:[%s3938_s7 + $0x770] sm:$0xff]  ;;  %v989_v19 = vld [vmem:[%s3938_s7 + $0x738] sm:$0xff] }
 0x14b   : > { %2581 = vmatpush2.bf16.msra.mxu0 %v3210_v35  ;;  %2624 = vmatpush2.bf16.msra.mxu1 %v3212_v36  ;;  %v837_v35 = vld [vmem:[%s3938_s7 + $0x278] sm:$0xff]  ;;  %v3086_v36 = vcombine.low %v844_v24, %v852_v25  ;;  %v972_v25 = vld [vmem:[%s3938_s7 + $0x6b0] sm:$0xff] }
 0x14c   : > { %2582 = vmatprep.subr.bf16.mxu0 %v3195_v37  ;;  %2625 = vmatprep.subr.bf16.mxu1 %v3197_v38  ;;  %v3088_v37 = vcombine.low %v845_v26, %v853_v27  ;;  %v3071_v38 = vcombine.high %v828_v32, %v836_v33  ;;  %v980_v26 = vld [vmem:[%s3938_s7 + $0x6f0] sm:$0xff]  ;;  %v973_v27 = vld [vmem:[%s3938_s7 + $0x6b8] sm:$0xff] }
 0x14f   : > { %2583 = vmatpush2.bf16.msra.mxu0 %v3194_v0  ;;  %2626 = vmatpush2.bf16.msra.mxu1 %v3196_v43  ;;  %v821_v0 = vld [vmem:[%s3938_s7 + $0x1f8] sm:$0xff]  ;;  %v3070_v43 = vcombine.low %v828_v32, %v836_v33  ;;  %v956_v33 = vld [vmem:[%s3938_s7 + $0x630] sm:$0xff] }
 0x150   : > { %2584 = vmatprep.subr.bf16.mxu0 %v3179_v44  ;;  %2627 = vmatprep.subr.bf16.mxu1 %v3181_v45  ;;  %v3055_v45 = vcombine.high %v812_v40, %v820_v41  ;;  %v3057_v46 = vcombine.high %v813_v42, %v821_v0 }
 0x153   : > { %2585 = vmatpush2.bf16.msra.mxu0 %v3178_v50  ;;  %2628 = vmatpush2.bf16.msra.mxu1 %v3180_v51  ;;  %v805_v50 = vld [vmem:[%s3938_s7 + $0x178] sm:$0xff]  ;;  %v3054_v51 = vcombine.low %v812_v40, %v820_v41  ;;  %v940_v40 = vld [vmem:[%s3938_s7 + $0x5b0] sm:$0xff] }
 0x154   : > { %2586 = vmatprep.subr.bf16.mxu0 %v3163_v52  ;;  %2629 = vmatprep.subr.bf16.mxu1 %v3165_v53  ;;  %v3056_v52 = vcombine.low %v813_v42, %v821_v0  ;;  %v3039_v53 = vcombine.high %v796_v47, %v804_v48  ;;  %v3041_v54 = vcombine.high %v797_v49, %v805_v50  ;;  %v948_v41 = vld [vmem:[%s3938_s7 + $0x5f0] sm:$0xff]  ;;  %v941_v42 = vld [vmem:[%s3938_s7 + $0x5b8] sm:$0xff] }
 0x155   : > { %v949_v0 = vld [vmem:[%s3938_s7 + $0x5f8] sm:$0xff] }
 0x157   : > { %2587 = vmatpush2.bf16.msra.mxu0 %v3162_v58  ;;  %2630 = vmatpush2.bf16.msra.mxu1 %v3164_v59  ;;  %v789_v58 = vld [vmem:[%s3938_s7 + $0xf8] sm:$0xff]  ;;  %v3038_v59 = vcombine.low %v796_v47, %v804_v48  ;;  %v924_v47 = vld [vmem:[%s3938_s7 + $0x530] sm:$0xff] }
 0x158   : > { %2588 = vmatprep.subr.bf16.mxu0 %v3147_v60  ;;  %2631 = vmatprep.subr.bf16.mxu1 %v3149_v61  ;;  %v3040_v60 = vcombine.low %v797_v49, %v805_v50  ;;  %v3023_v61 = vcombine.high %v780_v55, %v788_v56  ;;  %v3025_v62 = vcombine.high %v781_v57, %v789_v58  ;;  %v932_v48 = vld [vmem:[%s3938_s7 + $0x570] sm:$0xff]  ;;  %v925_v49 = vld [vmem:[%s3938_s7 + $0x538] sm:$0xff] }
 0x159   : > { %v933_v50 = vld [vmem:[%s3938_s7 + $0x578] sm:$0xff] }
 0x15b   : > { %2589 = vmatpush2.bf16.msra.mxu0 %v3146_v3  ;;  %2632 = vmatpush2.bf16.msra.mxu1 %v3148_v4  ;;  %v773_v3 = vld [vmem:[%s3938_s7 + $0x78] sm:$0xff]  ;;  %v3022_v4 = vcombine.low %v780_v55, %v788_v56  ;;  %v908_v55 = vld [vmem:[%s3938_s7 + $0x4b0] sm:$0xff] }
 0x15c   : > { %2590 = vmatprep.subr.bf16.mxu0 %v3131_v5  ;;  %2633 = vmatprep.subr.bf16.mxu1 %v3133_v6  ;;  %v3024_v5 = vcombine.low %v781_v57, %v789_v58  ;;  %v3007_v6 = vcombine.high %v764_v63, %v772_v1  ;;  %v3009_v7 = vcombine.high %v765_v2, %v773_v3  ;;  %v916_v56 = vld [vmem:[%s3938_s7 + $0x4f0] sm:$0xff]  ;;  %v909_v57 = vld [vmem:[%s3938_s7 + $0x4b8] sm:$0xff] }
 0x15d   : > { %v917_v58 = vld [vmem:[%s3938_s7 + $0x4f8] sm:$0xff] }
 0x15f   : > { %2591 = vmatpush2.bf16.msra.mxu0 %v3130_v12  ;;  %2634 = vmatpush2.bf16.msra.mxu1 %v3132_v13  ;;  %v1013_v12 = vld [vmem:[%s3938_s7 + $0x7f8] sm:$0xff]  ;;  %v3006_v13 = vcombine.low %v764_v63, %v772_v1  ;;  %v3153_v63 = vcombine.high %v909_v57, %v917_v58  ;;  %v892_v1 = vld [vmem:[%s3938_s7 + $0x430] sm:$0xff] }
 0x160   : > { %2646 = vmatprep.subr.bf16.mxu0 %v3119_v14  ;;  %2689 = vmatprep.subr.bf16.mxu1 %v3121_v15  ;;  %v3008_v14 = vcombine.low %v765_v2, %v773_v3  ;;  %v3247_v15 = vcombine.high %v1004_v8, %v1012_v9  ;;  %v3249_v16 = vcombine.high %v1005_v10, %v1013_v12  ;;  %v900_v2 = vld [vmem:[%s3938_s7 + $0x470] sm:$0xff]  ;;  %v893_v3 = vld [vmem:[%s3938_s7 + $0x438] sm:$0xff] }
 0x162   : > { %2593 = vmatmul.mubr.bf16.vlgmr.msra.gmra.mxu0 %v4013_v11  ;;  %2636 = vmatmul.mubr.bf16.vlgmr.msra.gmra.mxu1 %v4013_v11  ;;  %v829_v11 = vld [vmem:[%s3938_s7 + $0x238] sm:$0xff] }
 0x163   : > { %2647 = vmatpush1.bf16.msra.mxu0 %v3118_v20  ;;  %2690 = vmatpush1.bf16.msra.mxu1 %v3120_v21  ;;  %v3073_v39 = vcombine.high %v829_v11, %v837_v35  ;;  %v3072_v44 = vcombine.low %v829_v11, %v837_v35  ;;  %v997_v20 = vld [vmem:[%s3938_s7 + $0x778] sm:$0xff]  ;;  %v3246_v21 = vcombine.low %v1004_v8, %v1012_v9 }
 0x164   : > { %2648 = vmatprep.subr.bf16.mxu0 %v3103_v22  ;;  %2691 = vmatprep.subr.bf16.mxu1 %v3105_v23  ;;  %v3248_v22 = vcombine.low %v1005_v10, %v1013_v12  ;;  %v3231_v23 = vcombine.high %v988_v17, %v996_v18  ;;  %v3233_v24 = vcombine.high %v989_v19, %v997_v20  ;;  %v957_v11 = vld [vmem:[%s3938_s7 + $0x638] sm:$0xff] }
 0x165   : > { %2678 = vmatprep.mubr.bf16.mxu0 %v3300_v34  ;;  %2721 = vmatprep.mubr.bf16.mxu1 %v3300_v34  ;;  %v964_v34 = vld [vmem:[%s3938_s7 + $0x670] sm:$0xff]  ;;  %v965_v35 = vld [vmem:[%s3938_s7 + $0x678] sm:$0xff]  ;;  %v3135_v8 = vcombine.high %v892_v1, %v900_v2  ;;  %v3134_v10 = vcombine.low %v892_v1, %v900_v2 }
 0x167   : > { %2649 = vmatpush1.bf16.msra.mxu0 %v3102_v28  ;;  %2692 = vmatpush1.bf16.msra.mxu1 %v3104_v29  ;;  %v981_v28 = vld [vmem:[%s3938_s7 + $0x6f8] sm:$0xff]  ;;  %v3230_v29 = vcombine.low %v988_v17, %v996_v18 }
 0x168   : > { %2650 = vmatprep.subr.bf16.mxu0 %v3087_v30  ;;  %2693 = vmatprep.subr.bf16.mxu1 %v3089_v31  ;;  %v3232_v30 = vcombine.low %v989_v19, %v997_v20  ;;  %v3215_v31 = vcombine.high %v972_v25, %v980_v26  ;;  %v3217_v32 = vcombine.high %v973_v27, %v981_v28 }
 0x16b   : > { %2651 = vmatpush1.bf16.msra.mxu0 %v3086_v36  ;;  %2694 = vmatpush1.bf16.msra.mxu1 %v3088_v37  ;;  %v3214_v36 = vcombine.low %v972_v25, %v980_v26  ;;  %v3216_v37 = vcombine.low %v973_v27, %v981_v28 }
 0x16c   : > { %2652 = vmatprep.subr.bf16.mxu0 %v3071_v38  ;;  %2695 = vmatprep.subr.bf16.mxu1 %v3073_v39  ;;  %v3199_v38 = vcombine.high %v956_v33, %v964_v34  ;;  %v3201_v39 = vcombine.high %v957_v11, %v965_v35 }
 0x16f   : > { %2653 = vmatpush1.bf16.msra.mxu0 %v3070_v43  ;;  %2696 = vmatpush1.bf16.msra.mxu1 %v3072_v44  ;;  %v3198_v43 = vcombine.low %v956_v33, %v964_v34  ;;  %v3200_v44 = vcombine.low %v957_v11, %v965_v35 }
 0x170   : > { %2654 = vmatprep.subr.bf16.mxu0 %v3055_v45  ;;  %2697 = vmatprep.subr.bf16.mxu1 %v3057_v46  ;;  %v3183_v45 = vcombine.high %v940_v40, %v948_v41  ;;  %v3185_v46 = vcombine.high %v941_v42, %v949_v0 }
 0x173   : > { %2655 = vmatpush1.bf16.msra.mxu0 %v3054_v51  ;;  %2698 = vmatpush1.bf16.msra.mxu1 %v3056_v52  ;;  %v3182_v51 = vcombine.low %v940_v40, %v948_v41  ;;  %v3184_v52 = vcombine.low %v941_v42, %v949_v0 }
 0x174   : > { %2656 = vmatprep.subr.bf16.mxu0 %v3039_v53  ;;  %2699 = vmatprep.subr.bf16.mxu1 %v3041_v54  ;;  %v3167_v53 = vcombine.high %v924_v47, %v932_v48  ;;  %v3169_v54 = vcombine.high %v925_v49, %v933_v50 }
 0x177   : > { %2657 = vmatpush1.bf16.msra.mxu0 %v3038_v59  ;;  %2700 = vmatpush1.bf16.msra.mxu1 %v3040_v60  ;;  %v3166_v59 = vcombine.low %v924_v47, %v932_v48  ;;  %v1018_v60 = vlaneseq }
 0x178   : > { %2658 = vmatprep.subr.bf16.mxu0 %v3023_v61  ;;  %2701 = vmatprep.subr.bf16.mxu1 %v3025_v62  ;;  %v3168_v61 = vcombine.low %v925_v49, %v933_v50  ;;  %v3151_v62 = vcombine.high %v908_v55, %v916_v56 }
 0x17b   : > { %2659 = vmatpush1.bf16.msra.mxu0 %v3022_v4  ;;  %2702 = vmatpush1.bf16.msra.mxu1 %v3024_v5  ;;  %v901_v4 = vld [vmem:[%s3938_s7 + $0x478] sm:$0xff]  ;;  %v3150_v5 = vcombine.low %v908_v55, %v916_v56 }
 0x17c   : > { %2660 = vmatprep.subr.bf16.mxu0 %v3007_v6  ;;  %2703 = vmatprep.subr.bf16.mxu1 %v3009_v7  ;;  %v4221_v6 = vshrl.u32 %v1018_v60, 7  ;;  %v3152_v7 = vcombine.low %v909_v57, %v917_v58  ;;  %v3137_v9 = vcombine.high %v893_v3, %v901_v4 }
 0x17e   : > { %v1020_v12 = vsub.s32 0, %v4221_v6  ;;  %v1032_v17 = vsub.s32 3, %v4221_v6  ;;  %v1040_v47 = vsub.s32 5, %v4221_v6  ;;  %v1048_v48 = vsub.s32 7, %v4221_v6 }
 0x17f   : > { %2661 = vmatpush1.bf16.msra.mxu0 %v3006_v13  ;;  %2704 = vmatpush1.bf16.msra.mxu1 %v3008_v14  ;;  %v3136_v13 = vcombine.low %v893_v3, %v901_v4  ;;  %v1014_v14 = vld [vmem:[%s4226_s24] sm:$0xff] }
 0x180   : > { %2662 = vmatprep.subr.bf16.mxu0 %v3247_v15  ;;  %2705 = vmatprep.subr.bf16.mxu1 %v3249_v16  ;;  %v1028_v15 = vsub.s32 2, %v4221_v6  ;;  %v1024_v16 = vsub.s32 1, %v4221_v6  ;;  %v1021_v18 = vrot.slane %v1014_v14, %v1020_v12 }
 0x182   : > { %v1029_v19 = vrot.slane %v1014_v14, %v1028_v15  ;;  %v1025_v20 = vrot.slane %v1014_v14, %v1024_v16 }
 0x183   : > { %2663 = vmatpush2.bf16.msra.mxu0 %v3246_v21  ;;  %2706 = vmatpush2.bf16.msra.mxu1 %v3248_v22  ;;  %v3301_v22 = vld [vmem:[%s4396_s0] ss:$8 sps:$4 sm:$0xff]  }
 0x184   : > { %2664 = vmatprep.subr.bf16.mxu0 %v3231_v23  ;;  %2707 = vmatprep.subr.bf16.mxu1 %v3233_v24  ;;  %v1033_v23 = vrot.slane %v1014_v14, %v1032_v17 }
 0x187   : > { %2665 = vmatpush2.bf16.msra.mxu0 %v3230_v29  ;;  %2708 = vmatpush2.bf16.msra.mxu1 %v3232_v30 }
 0x188   : > { %2666 = vmatprep.subr.bf16.mxu0 %v3215_v31  ;;  %2709 = vmatprep.subr.bf16.mxu1 %v3217_v32 }
 0x18b   : > { %2667 = vmatpush2.bf16.msra.mxu0 %v3214_v36  ;;  %2710 = vmatpush2.bf16.msra.mxu1 %v3216_v37 }
 0x18c   : > { %2668 = vmatprep.subr.bf16.mxu0 %v3199_v38  ;;  %2711 = vmatprep.subr.bf16.mxu1 %v3201_v39 }
 0x18f   : > { %2669 = vmatpush2.bf16.msra.mxu0 %v3198_v43  ;;  %2712 = vmatpush2.bf16.msra.mxu1 %v3200_v44 }
 0x190   : > { %2670 = vmatprep.subr.bf16.mxu0 %v3183_v45  ;;  %2713 = vmatprep.subr.bf16.mxu1 %v3185_v46  ;;  %v1036_v45 = vsub.s32 4, %v4221_v6  ;;  %v1044_v46 = vsub.s32 6, %v4221_v6 }
 0x192   : > { %v1037_v49 = vrot.slane %v1014_v14, %v1036_v45  ;;  %v1045_v50 = vrot.slane %v1014_v14, %v1044_v46 }
 0x193   : > { %2671 = vmatpush2.bf16.msra.mxu0 %v3182_v51  ;;  %2714 = vmatpush2.bf16.msra.mxu1 %v3184_v52  ;;  %v1041_v51 = vrot.slane %v1014_v14, %v1040_v47 }
 0x194   : > { %2672 = vmatprep.subr.bf16.mxu0 %v3167_v53  ;;  %2715 = vmatprep.subr.bf16.mxu1 %v3169_v54  ;;  %v1049_v53 = vrot.slane %v1014_v14, %v1048_v48 }
 0x197   : > { %2673 = vmatpush2.bf16.msra.mxu0 %v3166_v59  ;;  %2716 = vmatpush2.bf16.msra.mxu1 %v3168_v61 }
 0x198   : > { %2674 = vmatprep.subr.bf16.mxu0 %v3151_v62  ;;  %2717 = vmatprep.subr.bf16.mxu1 %v3153_v63 }
 0x19b   : > { %2675 = vmatpush2.bf16.msra.mxu0 %v3150_v5  ;;  %2718 = vmatpush2.bf16.msra.mxu1 %v3152_v7 }
 0x19c   : > { %2676 = vmatprep.subr.bf16.mxu0 %v3135_v8  ;;  %2719 = vmatprep.subr.bf16.mxu1 %v3137_v9 }
 0x19f   : > { %2677 = vmatpush2.bf16.msra.mxu0 %v3134_v10  ;;  %2720 = vmatpush2.bf16.msra.mxu1 %v3136_v13 }
 0x1a2   : > { %v2422_v21 = vpop.f32.mrf.mxu0  ;;  %2679 = vmatmul.mubr.bf16.vlgmr.msra.gmra.mxu0 %v3301_v22  ;;  %v2465_v25 = vpop.f32.mrf.mxu1  ;;  %2722 = vmatmul.mubr.bf16.vlgmr.msra.gmra.mxu1 %v3301_v22 }
 0x1a3   : > { %v2423_v24 = vadd.f32 %v2422_v21, %v1021_v18  ;;  %v2466_v26 = vadd.f32 %v2465_v25, %v1029_v19 }
 0x1a4   : > { %v2424_v27 = vpop.f32.mrf.mxu0  ;;  %v2467_v30 = vpop.f32.mrf.mxu1 }
 0x1a5   : > { %v2732_v28 = vmax.f32 %v2423_v24, 0.0  ;;  %v2425_v29 = vadd.f32 %v2424_v27, %v1025_v20  ;;  %v2734_v31 = vmax.f32 %v2466_v26, 0.0  ;;  %v2468_v32 = vadd.f32 %v2467_v30, %v1033_v23 }
 0x1a6   : > { %v2426_v33 = vpop.f32.mrf.mxu0  ;;  %v2469_v35 = vpop.f32.mrf.mxu1 }
 0x1a7   : > { %2764 = vst [vmem:[%s4246_s12] sm:$0xff] %v2732_v28  ;;  %v2733_v34 = vmax.f32 %v2425_v29, 0.0  ;;  %v2427_v11 = vadd.f32 %v2426_v33, %v1021_v18  ;;  %2766 = vst [vmem:[%s4246_s12 + $0x10] sm:$0xff] %v2734_v31  ;;  %v2735_v36 = vmax.f32 %v2468_v32, 0.0  ;;  %v2470_v37 = vadd.f32 %v2469_v35, %v1029_v19 }
 0x1a8   : > { %v2428_v38 = vpop.f32.mrf.mxu0  ;;  %v2471_v41 = vpop.f32.mrf.mxu1 }
 0x1a9   : > { %2765 = vst [vmem:[%s4246_s12 + $0x8] sm:$0xff] %v2733_v34  ;;  %v2748_v39 = vmax.f32 %v2427_v11, 0.0  ;;  %v2429_v40 = vadd.f32 %v2428_v38, %v1025_v20  ;;  %2767 = vst [vmem:[%s4246_s12 + $0x18] sm:$0xff] %v2735_v36  ;;  %v2750_v42 = vmax.f32 %v2470_v37, 0.0  ;;  %v2472_v0 = vadd.f32 %v2471_v41, %v1033_v23  ;;  %v1015_v20 = vld [vmem:[%s4226_s24 + $0x8] sm:$0xff] }
 0x1aa   : > { %v1053_v21 = vrot.slane %v1015_v20, %v1020_v12  ;;  %v1061_v22 = vrot.slane %v1015_v20, %v1028_v15  ;;  %v1057_v23 = vrot.slane %v1015_v20, %v1024_v16  ;;  %v1065_v25 = vrot.slane %v1015_v20, %v1032_v17 }
 0x1ab   : > { %2780 = vst [vmem:[%s4246_s12 + $0x80] sm:$0xff] %v2748_v39  ;;  %v2749_v43 = vmax.f32 %v2429_v40, 0.0  ;;  %2782 = vst [vmem:[%s4246_s12 + $0x90] sm:$0xff] %v2750_v42  ;;  %v2751_v44 = vmax.f32 %v2472_v0, 0.0 }
 0x1ad   : > { %2781 = vst [vmem:[%s4246_s12 + $0x88] sm:$0xff] %v2749_v43  ;;  %2783 = vst [vmem:[%s4246_s12 + $0x98] sm:$0xff] %v2751_v44  ;;  %v1069_v43 = vrot.slane %v1015_v20, %v1036_v45  ;;  %v1077_v44 = vrot.slane %v1015_v20, %v1044_v46 }
 0x1e2   : > { %v2508_v52 = vpop.f32.mrf.mxu0  ;;  %v2551_v55 = vpop.f32.mrf.mxu1 }
 0x1e3   : > { %v2509_v54 = vadd.f32 %v2508_v52, %v1037_v49  ;;  %v2552_v56 = vadd.f32 %v2551_v55, %v1045_v50 }
 0x1e4   : > { %v2510_v57 = vpop.f32.mrf.mxu0  ;;  %v2553_v60 = vpop.f32.mrf.mxu1 }
 0x1e5   : > { %v2736_v58 = vmax.f32 %v2509_v54, 0.0  ;;  %v2511_v59 = vadd.f32 %v2510_v57, %v1041_v51  ;;  %v2738_v61 = vmax.f32 %v2552_v56, 0.0  ;;  %v2554_v62 = vadd.f32 %v2553_v60, %v1049_v53 }
 0x1e6   : > { %v2512_v63 = vpop.f32.mrf.mxu0  ;;  %v2555_v3 = vpop.f32.mrf.mxu1 }
 0x1e7   : > { %2768 = vst [vmem:[%s4246_s12 + $0x20] sm:$0xff] %v2736_v58  ;;  %v2737_v1 = vmax.f32 %v2511_v59, 0.0  ;;  %v2513_v2 = vadd.f32 %v2512_v63, %v1037_v49  ;;  %2770 = vst [vmem:[%s4246_s12 + $0x30] sm:$0xff] %v2738_v61  ;;  %v2739_v4 = vmax.f32 %v2554_v62, 0.0  ;;  %v2556_v5 = vadd.f32 %v2555_v3, %v1045_v50 }
 0x1e8   : > { %v2514_v7 = vpop.f32.mrf.mxu0  ;;  %v2557_v10 = vpop.f32.mrf.mxu1  ;;  %v1073_v49 = vrot.slane %v1015_v20, %v1040_v47 }
 0x1e9   : > { %2769 = vst [vmem:[%s4246_s12 + $0x28] sm:$0xff] %v2737_v1  ;;  %v2752_v8 = vmax.f32 %v2513_v2, 0.0  ;;  %v2515_v9 = vadd.f32 %v2514_v7, %v1041_v51  ;;  %2771 = vst [vmem:[%s4246_s12 + $0x38] sm:$0xff] %v2739_v4  ;;  %v2754_v13 = vmax.f32 %v2556_v5, 0.0  ;;  %v2558_v14 = vadd.f32 %v2557_v10, %v1049_v53  ;;  %v2825_v10 = vld [vmem:[%s4246_s12 + $0x10] sm:$0xff] (%p3397_p6) }
 0x1ea   : > { %v1081_v51 = vrot.slane %v1015_v20, %v1048_v48  ;;  %2826 = vst [vmem:[%s4318_s4 + $0x10] sm:$0xff] (%p3397_p6), %v2825_v10 }
 0x1eb   : > { %2784 = vst [vmem:[%s4246_s12 + $0xa0] sm:$0xff] %v2752_v8  ;;  %v2753_v18 = vmax.f32 %v2515_v9, 0.0  ;;  %2786 = vst [vmem:[%s4246_s12 + $0xb0] sm:$0xff] %v2754_v13  ;;  %v2755_v19 = vmax.f32 %v2558_v14, 0.0  ;;  %v2821_v8 = vld [vmem:[%s4246_s12] sm:$0xff] (%p3397_p6)  ;;  %v2823_v9 = vld [vmem:[%s4246_s12 + $0x8] sm:$0xff] (%p3397_p6) }
 0x1ec   : > { %v2827_v13 = vld [vmem:[%s4246_s12 + $0x18] sm:$0xff] (%p3397_p6)  ;;  %2822 = vst [vmem:[%s4318_s4] sm:$0xff] (%p3397_p6), %v2821_v8  ;;  %2824 = vst [vmem:[%s4318_s4 + $0x8] sm:$0xff] (%p3397_p6), %v2823_v9 }
 0x1ed   : > { %2785 = vst [vmem:[%s4246_s12 + $0xa8] sm:$0xff] %v2753_v18  ;;  %2787 = vst [vmem:[%s4246_s12 + $0xb8] sm:$0xff] %v2755_v19 }
 0x1ee   : > { %v2829_v14 = vld [vmem:[%s4246_s12 + $0x20] sm:$0xff] (%p3397_p6)  ;;  %2828 = vst [vmem:[%s4318_s4 + $0x18] sm:$0xff] (%p3397_p6), %v2827_v13  ;;  %v2833_v19 = vld [vmem:[%s4246_s12 + $0x30] sm:$0xff] (%p3397_p6) }
 0x1ef   : > { %2830 = vst [vmem:[%s4318_s4 + $0x20] sm:$0xff] (%p3397_p6), %v2829_v14  ;;  %2834 = vst [vmem:[%s4318_s4 + $0x30] sm:$0xff] (%p3397_p6), %v2833_v19 }
 0x1f0   : > { %v2831_v18 = vld [vmem:[%s4246_s12 + $0x28] sm:$0xff] (%p3397_p6)  ;;  %v2835_v20 = vld [vmem:[%s4246_s12 + $0x38] sm:$0xff] (%p3397_p6) }
 0x1f1   : > { %2832 = vst [vmem:[%s4318_s4 + $0x28] sm:$0xff] (%p3397_p6), %v2831_v18  ;;  %2836 = vst [vmem:[%s4318_s4 + $0x38] sm:$0xff] (%p3397_p6), %v2835_v20 }
 0x222   : > { %v2594_v24 = vpop.f32.mrf.mxu0  ;;  %v2637_v27 = vpop.f32.mrf.mxu1 }
 0x223   : > { %v2595_v26 = vadd.f32 %v2594_v24, %v1053_v21  ;;  %v2638_v28 = vadd.f32 %v2637_v27, %v1061_v22 }
 0x224   : > { %v2596_v29 = vpop.f32.mrf.mxu0  ;;  %v2639_v32 = vpop.f32.mrf.mxu1 }
 0x225   : > { %v2740_v30 = vmax.f32 %v2595_v26, 0.0  ;;  %v2597_v31 = vadd.f32 %v2596_v29, %v1057_v23  ;;  %v2742_v12 = vmax.f32 %v2638_v28, 0.0  ;;  %v2640_v33 = vadd.f32 %v2639_v32, %v1065_v25  ;;  %v2853_v29 = vld [vmem:[%s4246_s12 + $0x80] sm:$0xff] (%p3397_p6)  ;;  %v2859_v32 = vld [vmem:[%s4246_s12 + $0x98] sm:$0xff] (%p3397_p6) }
 0x226   : > { %v2598_v15 = vpop.f32.mrf.mxu0  ;;  %v2641_v11 = vpop.f32.mrf.mxu1  ;;  %2854 = vst [vmem:[%s4318_s4 + $0x800] sm:$0xff] (%p3397_p6), %v2853_v29  ;;  %2860 = vst [vmem:[%s4318_s4 + $0x818] sm:$0xff] (%p3397_p6), %v2859_v32 }
 0x227   : > { %2772 = vst [vmem:[%s4246_s12 + $0x40] sm:$0xff] %v2740_v30  ;;  %v2741_v16 = vmax.f32 %v2597_v31, 0.0  ;;  %v2599_v34 = vadd.f32 %v2598_v15, %v1053_v21  ;;  %2774 = vst [vmem:[%s4246_s12 + $0x50] sm:$0xff] %v2742_v12  ;;  %v2743_v17 = vmax.f32 %v2640_v33, 0.0  ;;  %v2642_v35 = vadd.f32 %v2641_v11, %v1061_v22  ;;  %v2855_v30 = vld [vmem:[%s4246_s12 + $0x88] sm:$0xff] (%p3397_p6)  ;;  %v2857_v31 = vld [vmem:[%s4246_s12 + $0x90] sm:$0xff] (%p3397_p6) }
 0x228   : > { %v2600_v36 = vpop.f32.mrf.mxu0  ;;  %v2643_v39 = vpop.f32.mrf.mxu1  ;;  %2856 = vst [vmem:[%s4318_s4 + $0x808] sm:$0xff] (%p3397_p6), %v2855_v30  ;;  %v2861_v12 = vld [vmem:[%s4246_s12 + $0xa0] sm:$0xff] (%p3397_p6)  ;;  %2858 = vst [vmem:[%s4318_s4 + $0x810] sm:$0xff] (%p3397_p6), %v2857_v31  ;;  %v2863_v33 = vld [vmem:[%s4246_s12 + $0xa8] sm:$0xff] (%p3397_p6) }
 0x229   : > { %2773 = vst [vmem:[%s4246_s12 + $0x48] sm:$0xff] %v2741_v16  ;;  %v2756_v37 = vmax.f32 %v2599_v34, 0.0  ;;  %v2601_v38 = vadd.f32 %v2600_v36, %v1057_v23  ;;  %2775 = vst [vmem:[%s4246_s12 + $0x58] sm:$0xff] %v2743_v17  ;;  %v2758_v40 = vmax.f32 %v2642_v35, 0.0  ;;  %v2644_v41 = vadd.f32 %v2643_v39, %v1065_v25  ;;  %v2865_v15 = vld [vmem:[%s4246_s12 + $0xb0] sm:$0xff] (%p3397_p6)  ;;  %v2867_v16 = vld [vmem:[%s4246_s12 + $0xb8] sm:$0xff] (%p3397_p6) }
 0x22a   : > { %2862 = vst [vmem:[%s4318_s4 + $0x820] sm:$0xff] (%p3397_p6), %v2861_v12  ;;  %2864 = vst [vmem:[%s4318_s4 + $0x828] sm:$0xff] (%p3397_p6), %v2863_v33 }
 0x22b   : > { %2788 = vst [vmem:[%s4246_s12 + $0xc0] sm:$0xff] %v2756_v37  ;;  %v2757_v42 = vmax.f32 %v2601_v38, 0.0  ;;  %2790 = vst [vmem:[%s4246_s12 + $0xd0] sm:$0xff] %v2758_v40  ;;  %v2759_v0 = vmax.f32 %v2644_v41, 0.0 }
 0x22c   : > { %2866 = vst [vmem:[%s4318_s4 + $0x830] sm:$0xff] (%p3397_p6), %v2865_v15  ;;  %2868 = vst [vmem:[%s4318_s4 + $0x838] sm:$0xff] (%p3397_p6), %v2867_v16 }
 0x22d   : > { %2789 = vst [vmem:[%s4246_s12 + $0xc8] sm:$0xff] %v2757_v42  ;;  %2791 = vst [vmem:[%s4246_s12 + $0xd8] sm:$0xff] %v2759_v0 }
 0x22e   : > { %v2837_v21 = vld [vmem:[%s4246_s12 + $0x40] sm:$0xff] (%p3397_p6)  ;;  %v2841_v23 = vld [vmem:[%s4246_s12 + $0x50] sm:$0xff] (%p3397_p6) }
 0x22f   : > { %2838 = vst [vmem:[%s4318_s4 + $0x40] sm:$0xff] (%p3397_p6), %v2837_v21  ;;  %2842 = vst [vmem:[%s4318_s4 + $0x50] sm:$0xff] (%p3397_p6), %v2841_v23 }
 0x230   : > { %v2839_v22 = vld [vmem:[%s4246_s12 + $0x48] sm:$0xff] (%p3397_p6)  ;;  %v2843_v24 = vld [vmem:[%s4246_s12 + $0x58] sm:$0xff] (%p3397_p6) }
 0x231   : > { %2840 = vst [vmem:[%s4318_s4 + $0x48] sm:$0xff] (%p3397_p6), %v2839_v22  ;;  %2844 = vst [vmem:[%s4318_s4 + $0x58] sm:$0xff] (%p3397_p6), %v2843_v24 }
 0x232   : > { %v2869_v34 = vld [vmem:[%s4246_s12 + $0xc0] sm:$0xff] (%p3397_p6)  ;;  %v2873_v17 = vld [vmem:[%s4246_s12 + $0xd0] sm:$0xff] (%p3397_p6) }
 0x233   : > { %2870 = vst [vmem:[%s4318_s4 + $0x840] sm:$0xff] (%p3397_p6), %v2869_v34  ;;  %2874 = vst [vmem:[%s4318_s4 + $0x850] sm:$0xff] (%p3397_p6), %v2873_v17 }
 0x234   : > { %v2871_v11 = vld [vmem:[%s4246_s12 + $0xc8] sm:$0xff] (%p3397_p6)  ;;  %v2875_v35 = vld [vmem:[%s4246_s12 + $0xd8] sm:$0xff] (%p3397_p6) }
 0x235   : > { %2872 = vst [vmem:[%s4318_s4 + $0x848] sm:$0xff] (%p3397_p6), %v2871_v11  ;;  %2876 = vst [vmem:[%s4318_s4 + $0x858] sm:$0xff] (%p3397_p6), %v2875_v35 }
 0x262   : > { %v2680_v50 = vpop.f32.mrf.mxu0  ;;  %v2723_v53 = vpop.f32.mrf.mxu1 }
 0x263   : > { %v2681_v52 = vadd.f32 %v2680_v50, %v1069_v43  ;;  %v2724_v54 = vadd.f32 %v2723_v53, %v1077_v44 }
 0x264   : > { %v2682_v55 = vpop.f32.mrf.mxu0  ;;  %v2725_v58 = vpop.f32.mrf.mxu1 }
 0x265   : > { %v2744_v56 = vmax.f32 %v2681_v52, 0.0  ;;  %v2683_v57 = vadd.f32 %v2682_v55, %v1073_v49  ;;  %v2746_v45 = vmax.f32 %v2724_v54, 0.0  ;;  %v2726_v59 = vadd.f32 %v2725_v58, %v1081_v51 }
 0x266   : > { %v2684_v46 = vpop.f32.mrf.mxu0  ;;  %v2727_v6 = vpop.f32.mrf.mxu1 }
 0x267   : > { %2776 = vst [vmem:[%s4246_s12 + $0x60] sm:$0xff] %v2744_v56  ;;  %v2745_v47 = vmax.f32 %v2683_v57, 0.0  ;;  %v2685_v60 = vadd.f32 %v2684_v46, %v1069_v43  ;;  %2778 = vst [vmem:[%s4246_s12 + $0x70] sm:$0xff] %v2746_v45  ;;  %v2747_v48 = vmax.f32 %v2726_v59, 0.0  ;;  %v2728_v61 = vadd.f32 %v2727_v6, %v1077_v44 }
 0x268   : > { %v2686_v62 = vpop.f32.mrf.mxu0  ;;  %v2729_v2 = vpop.f32.mrf.mxu1 }
 0x269   : > { %2777 = vst [vmem:[%s4246_s12 + $0x68] sm:$0xff] %v2745_v47  ;;  %v2760_v63 = vmax.f32 %v2685_v60, 0.0  ;;  %v2687_v1 = vadd.f32 %v2686_v62, %v1073_v49  ;;  %2779 = vst [vmem:[%s4246_s12 + $0x78] sm:$0xff] %v2747_v48  ;;  %v2762_v3 = vmax.f32 %v2728_v61, 0.0  ;;  %v2730_v4 = vadd.f32 %v2729_v2, %v1081_v51  ;;  %2802 = sbr.rel (!%p3397_p6) target bundleno = 630 (0x276), region = 59 }
 0x26b   : > { %2792 = vst [vmem:[%s4246_s12 + $0xe0] sm:$0xff] %v2760_v63  ;;  %v2761_v5 = vmax.f32 %v2687_v1, 0.0  ;;  %2794 = vst [vmem:[%s4246_s12 + $0xf0] sm:$0xff] %v2762_v3  ;;  %v2763_v7 = vmax.f32 %v2730_v4, 0.0 }
 0x26d   : > { %2793 = vst [vmem:[%s4246_s12 + $0xe8] sm:$0xff] %v2761_v5  ;;  %2795 = vst [vmem:[%s4246_s12 + $0xf8] sm:$0xff] %v2763_v7 }
 0x26e   : > { %v2845_v25 = vld [vmem:[%s4246_s12 + $0x60] sm:$0xff]  ;;  %v2849_v27 = vld [vmem:[%s4246_s12 + $0x70] sm:$0xff] }
 0x26f   : > { %2846 = vst [vmem:[%s4318_s4 + $0x60] sm:$0xff] %v2845_v25  ;;  %2850 = vst [vmem:[%s4318_s4 + $0x70] sm:$0xff] %v2849_v27 }
 0x270   : > { %v2847_v26 = vld [vmem:[%s4246_s12 + $0x68] sm:$0xff]  ;;  %v2851_v28 = vld [vmem:[%s4246_s12 + $0x78] sm:$0xff] }
 0x271   : > { %2848 = vst [vmem:[%s4318_s4 + $0x68] sm:$0xff] %v2847_v26  ;;  %2852 = vst [vmem:[%s4318_s4 + $0x78] sm:$0xff] %v2851_v28 }
 0x272   : > { %v2877_v36 = vld [vmem:[%s4246_s12 + $0xe0] sm:$0xff]  ;;  %v2881_v38 = vld [vmem:[%s4246_s12 + $0xf0] sm:$0xff] }
 0x273   : > { %2878 = vst [vmem:[%s4318_s4 + $0x860] sm:$0xff] %v2877_v36  ;;  %2882 = vst [vmem:[%s4318_s4 + $0x870] sm:$0xff] %v2881_v38 }
 0x274   : > { %v2879_v37 = vld [vmem:[%s4246_s12 + $0xe8] sm:$0xff]  ;;  %v2883_v39 = vld [vmem:[%s4246_s12 + $0xf8] sm:$0xff] }
 0x275   : > { %2880 = vst [vmem:[%s4318_s4 + $0x868] sm:$0xff] %v2879_v37  ;;  %2884 = vst [vmem:[%s4318_s4 + $0x878] sm:$0xff] %v2883_v39 }
 0x276 PF: > { %s13_s16 = sadd.s32 1, %s3340_s16   ;;  %s4402_s12 = smov %s3328_s13 }
 0x277   : > { %p10_p12 = scmp.ge.s32.totalorder %s13_s16, 18   ;;  %s4403_s13 = smov %s3402_s22 }
 0x278   : > { %s4404_s14 = smov %s3336_s15  ;;  %s4405_s15 = smov %s4407_s17 }
 0x279   :  { %12 = sbr.rel (!%p10_p12) target bundleno = 3 (0x3), region = 119 }

// kernel: forward.14
= control target key start
LH: loop header
LB: loop body
LE: loop exit
PB: predicated region body
PF: predicated region fallthrough
CT: control target
= control target key end

     0   :  { %s13358_s0 = inlined_call_operand.vmem [shape: bf16[16,32768], index: 0, kind: input, shape index: {}]   ;;  %s13359_s1 = inlined_call_operand.hbm [shape: bf16[32768,512], index: 1, kind: input, shape index: {}]   ;;  %s13360_s2 = inlined_call_operand.vmem [shape: f32[1,512], index: 2, kind: input, shape index: {}]   ;;  %s13361_s3 = inlined_call_operand.vmem [shape: f32[16,512], index: 3, kind: output, shape index: {}]  }
   0x1   :  { %13367 = sst [smem:[#allocation33_spill]] %s13358_s0 }
   0x2   :  { %8 = vsyncpa [#allocation5], 0 }
   0x3   :  { %10 = vsyncpa [#allocation5 + $0x1], 0  ;;  %s11415_s12 = smov 0   ;;  %s11417_s13 = smov 0  }
   0x4   :  { %s11419_s14 = smov 0   ;;  %s11421_s15 = smov 0  }
   0x5   :  { %s11423_s16 = smov 0   ;;  %s11425_s17 = smov 0  }
   0x6   :  { %s11427_s18 = smov 0   ;;  %s11429_s19 = smov 0  }
   0x7   :  { %s11431_s20 = smov 0   ;;  %s11433_s21 = smov 0  }
   0x8   :  { %s11435_s22 = smov 0   ;;  %s11437_s23 = smov 0  }
   0x9 LB: > { %13368 = sst [smem:[#allocation8_spill]] %s11360_s16  ;;  %s8511_s24 = sadd.s32 4294967295, %s11388_s23   ;;  %s11388_s23 = sphi %s11437_s23, %s16_s23   ;;  %s11384_s22 = sphi %s11435_s22, %s13430_s22   ;;  %s11380_s21 = sphi %s11433_s21, %s13429_s21   ;;  %s11376_s20 = sphi %s11431_s20, %s13428_s20   ;;  %s11372_s19 = sphi %s11429_s19, %s13427_s19   ;;  %s11368_s18 = sphi %s11427_s18, %s13419_s18   ;;  %s11364_s17 = sphi %s11425_s17, %s13418_s17   ;;  %s11360_s16 = sphi %s11423_s16, %s13417_s16   ;;  %s11356_s15 = sphi %s11421_s15, %s13426_s15   ;;  %s11352_s14 = sphi %s11419_s14, %s13425_s14   ;;  %s11348_s13 = sphi %s11417_s13, %s13424_s13   ;;  %s11344_s12 = sphi %s11415_s12, %s13423_s12  }
   0xa   : > { %13369 = sst [smem:[#allocation9_spill]] %s11368_s18  ;;  %s28_s25 = sadd.s32 1, %s11380_s21 }
   0xb   : > { %13370 = sst [smem:[#allocation10_spill]] %s11384_s22  ;;  %p29_p0 = scmp.ge.s32.totalorder %s28_s25, 4 }
   0xc   : > { %s31_s26 = sadd.s32 1, %s11384_s22  ;;  %s44_s27 = sadd.s32 1, %s11368_s18 }
   0xd   : > { %p51_p1 = scmp.ne.s32.totalorder %s11368_s18, %s11364_s17  ;;  %s13432_s25 = smov (%p29_p0, %s28_s25), 0 }
   0xe   : > { %13371 = sst [smem:[#allocation11_spill]] %s13432_s25  ;;  %s13434_s26 = smov (!%p29_p0, %s31_s26), %s11384_s22 }
   0xf   : > { %s40_s28 = ssub.s32 %s11380_s21, %s13432_s25  ;;  %p52_p2 = scmp.eq.s32.totalorder %s11388_s23, 0 }
  0x10   : > { %p33_p3 = scmp.ge.s32.totalorder %s13434_s26, 2  ;;  %p42_p4 = scmp.eq.s32.totalorder %s40_s28, 0 }
  0x11   : > { %p11487_p5 = por %p52_p2, %p51_p1  ;;  %s72_s30 = sadd.s32 1, %s11360_s16 }
  0x12   : > { %s13436_s26 = smov (%p33_p3, %s13434_s26), 0  ;;  %p79_p6 = scmp.ne.s32.totalorder %s11360_s16, %s11356_s15 }
  0x13   : > { %13373 = sst [smem:[#allocation12_spill]] %s13436_s26  ;;  %s68_s5 = ssub.s32 %s11384_s22, %s13436_s26 }
  0x14   : > { %s11495_s4 = scalar_select %p42_p4, %s11368_s18, %s44_s27  }
  0x15   : > { %s69_s6 = sor.u32 %s68_s5, %s40_s28  ;;  %p85_p7 = scmp.ne.s32.totalorder %s11356_s15, %s11352_s14 }
  0x16   : > { %13374 = sst [smem:[#allocation13_spill]] %s11495_s4  ;;  %p70_p8 = scmp.eq.s32.totalorder %s69_s6, 0 }
  0x17   : > { %p11503_p9 = por %p79_p6, %p52_p2  ;;  %p86_p10 = scmp.eq.s32.totalorder %s8511_s24, 0 }
  0x18   : > { %p124_p11 = scmp.eq.s32.totalorder %s68_s5, 0  ;;  %s126_s10 = sadd.s32 1, %s11348_s13 }
  0x19   : > { %s11510_s8 = scalar_select %p70_p8, %s11360_s16, %s72_s30  }
  0x1a   : > { %p11512_p12 = por %p86_p10, %p85_p7  ;;  %p136_p13 = scmp.ne.s32.totalorder %s11348_s13, %s11344_s12 }
  0x1b   : > { %13376 = sst [smem:[#allocation14_spill]] %s11510_s8  ;;  %p137_p0 = scmp.eq.s32.totalorder %s8511_s24, 7 }
  0x1c   : > { %s11518_s11 = scalar_select %p124_p11, %s11348_s13, %s126_s10  }
  0x1d   : > { %p11524_p1 = por %p137_p0, %p136_p13  ;;  %p8514_p2 = scmp.ge.s32.totalorder %s11388_s23, 8 }
  0x1f   : > { %159 = sbr.rel (%p8514_p2) target bundleno = 96 (0x60), region = 16 }
  0x24   : > { %162 = sbr.rel (!%p11487_p5) target bundleno = 78 (0x4e), region = 20  ;;  %s164_s27 = sand.u32 (%p11487_p5), 1, %s11368_s18  }
  0x25   : > { %s9623_s28 = sshll.u32 (%p11487_p5), %s11380_s21, 8  ;;  %s8515_s30 = sshll.u32 (%p11487_p5), %s164_s27, 9 }
  0x26   : > { %s13379_s0 = sld [smem:[#allocation33_spill]] (%p11487_p5)  ;;  %s11541_s24 = scalar_lea.vmem (%p11487_p5), [#allocation3], %s8515_s30 }
  0x2c   : > { %s11536_s10 = scalar_lea.vmem %s13379_s0, %s9623_s28 }
  0x2d   : > { %v185_v0 = vld [vmem:[%s11536_s10] sm:$0xff]  ;;  %v187_v1 = vld [vmem:[%s11536_s10 + $0x8] sm:$0xff]  ;;  %v189_v2 = vld [vmem:[%s11536_s10 + $0x10] sm:$0xff] }
  0x2e   : > { %186 = vst [vmem:[%s11541_s24] sm:$0xff] %v185_v0  ;;  %188 = vst [vmem:[%s11541_s24 + $0x8] sm:$0xff] %v187_v1  ;;  %v191_v3 = vld [vmem:[%s11536_s10 + $0x18] sm:$0xff]  ;;  %v193_v4 = vld [vmem:[%s11536_s10 + $0x20] sm:$0xff] }
  0x2f   : > { %190 = vst [vmem:[%s11541_s24 + $0x10] sm:$0xff] %v189_v2  ;;  %v195_v5 = vld [vmem:[%s11536_s10 + $0x28] sm:$0xff]  ;;  %192 = vst [vmem:[%s11541_s24 + $0x18] sm:$0xff] %v191_v3  ;;  %v197_v6 = vld [vmem:[%s11536_s10 + $0x30] sm:$0xff] }
  0x30   : > { %194 = vst [vmem:[%s11541_s24 + $0x20] sm:$0xff] %v193_v4  ;;  %196 = vst [vmem:[%s11541_s24 + $0x28] sm:$0xff] %v195_v5  ;;  %v199_v7 = vld [vmem:[%s11536_s10 + $0x38] sm:$0xff]  ;;  %v201_v8 = vld [vmem:[%s11536_s10 + $0x40] sm:$0xff] }
  0x31   : > { %198 = vst [vmem:[%s11541_s24 + $0x30] sm:$0xff] %v197_v6  ;;  %200 = vst [vmem:[%s11541_s24 + $0x38] sm:$0xff] %v199_v7  ;;  %v203_v9 = vld [vmem:[%s11536_s10 + $0x48] sm:$0xff]  ;;  %v205_v10 = vld [vmem:[%s11536_s10 + $0x50] sm:$0xff] }
  0x32   : > { %202 = vst [vmem:[%s11541_s24 + $0x40] sm:$0xff] %v201_v8  ;;  %v207_v11 = vld [vmem:[%s11536_s10 + $0x58] sm:$0xff]  ;;  %204 = vst [vmem:[%s11541_s24 + $0x48] sm:$0xff] %v203_v9  ;;  %v209_v12 = vld [vmem:[%s11536_s10 + $0x60] sm:$0xff] }
  0x33   : > { %206 = vst [vmem:[%s11541_s24 + $0x50] sm:$0xff] %v205_v10  ;;  %208 = vst [vmem:[%s11541_s24 + $0x58] sm:$0xff] %v207_v11  ;;  %v211_v13 = vld [vmem:[%s11536_s10 + $0x68] sm:$0xff]  ;;  %v213_v14 = vld [vmem:[%s11536_s10 + $0x70] sm:$0xff] }
  0x34   : > { %210 = vst [vmem:[%s11541_s24 + $0x60] sm:$0xff] %v209_v12  ;;  %212 = vst [vmem:[%s11541_s24 + $0x68] sm:$0xff] %v211_v13  ;;  %v215_v15 = vld [vmem:[%s11536_s10 + $0x78] sm:$0xff]  ;;  %v217_v16 = vld [vmem:[%s11536_s10 + $0x80] sm:$0xff] }
  0x35   : > { %214 = vst [vmem:[%s11541_s24 + $0x70] sm:$0xff] %v213_v14  ;;  %v219_v17 = vld [vmem:[%s11536_s10 + $0x88] sm:$0xff]  ;;  %216 = vst [vmem:[%s11541_s24 + $0x78] sm:$0xff] %v215_v15  ;;  %v221_v18 = vld [vmem:[%s11536_s10 + $0x90] sm:$0xff] }
  0x36   : > { %218 = vst [vmem:[%s11541_s24 + $0x80] sm:$0xff] %v217_v16  ;;  %220 = vst [vmem:[%s11541_s24 + $0x88] sm:$0xff] %v219_v17  ;;  %v223_v19 = vld [vmem:[%s11536_s10 + $0x98] sm:$0xff]  ;;  %v225_v20 = vld [vmem:[%s11536_s10 + $0xa0] sm:$0xff] }
  0x37   : > { %222 = vst [vmem:[%s11541_s24 + $0x90] sm:$0xff] %v221_v18  ;;  %224 = vst [vmem:[%s11541_s24 + $0x98] sm:$0xff] %v223_v19  ;;  %v227_v21 = vld [vmem:[%s11536_s10 + $0xa8] sm:$0xff]  ;;  %v229_v22 = vld [vmem:[%s11536_s10 + $0xb0] sm:$0xff] }
  0x38   : > { %226 = vst [vmem:[%s11541_s24 + $0xa0] sm:$0xff] %v225_v20  ;;  %v231_v23 = vld [vmem:[%s11536_s10 + $0xb8] sm:$0xff]  ;;  %228 = vst [vmem:[%s11541_s24 + $0xa8] sm:$0xff] %v227_v21  ;;  %v233_v24 = vld [vmem:[%s11536_s10 + $0xc0] sm:$0xff] }
  0x39   : > { %230 = vst [vmem:[%s11541_s24 + $0xb0] sm:$0xff] %v229_v22  ;;  %232 = vst [vmem:[%s11541_s24 + $0xb8] sm:$0xff] %v231_v23  ;;  %v235_v25 = vld [vmem:[%s11536_s10 + $0xc8] sm:$0xff]  ;;  %v237_v26 = vld [vmem:[%s11536_s10 + $0xd0] sm:$0xff] }
  0x3a   : > { %234 = vst [vmem:[%s11541_s24 + $0xc0] sm:$0xff] %v233_v24  ;;  %236 = vst [vmem:[%s11541_s24 + $0xc8] sm:$0xff] %v235_v25  ;;  %v239_v27 = vld [vmem:[%s11536_s10 + $0xd8] sm:$0xff]  ;;  %v241_v28 = vld [vmem:[%s11536_s10 + $0xe0] sm:$0xff] }
  0x3b   : > { %238 = vst [vmem:[%s11541_s24 + $0xd0] sm:$0xff] %v237_v26  ;;  %v243_v29 = vld [vmem:[%s11536_s10 + $0xe8] sm:$0xff]  ;;  %240 = vst [vmem:[%s11541_s24 + $0xd8] sm:$0xff] %v239_v27  ;;  %v245_v30 = vld [vmem:[%s11536_s10 + $0xf0] sm:$0xff] }
  0x3c   : > { %242 = vst [vmem:[%s11541_s24 + $0xe0] sm:$0xff] %v241_v28  ;;  %244 = vst [vmem:[%s11541_s24 + $0xe8] sm:$0xff] %v243_v29  ;;  %v247_v31 = vld [vmem:[%s11536_s10 + $0xf8] sm:$0xff]  ;;  %v249_v32 = vld [vmem:[%s11536_s10 + $0x400] sm:$0xff] }
  0x3d   : > { %246 = vst [vmem:[%s11541_s24 + $0xf0] sm:$0xff] %v245_v30  ;;  %248 = vst [vmem:[%s11541_s24 + $0xf8] sm:$0xff] %v247_v31  ;;  %v251_v33 = vld [vmem:[%s11536_s10 + $0x408] sm:$0xff]  ;;  %v253_v34 = vld [vmem:[%s11536_s10 + $0x410] sm:$0xff] }
  0x3e   : > { %250 = vst [vmem:[%s11541_s24 + $0x100] sm:$0xff] %v249_v32  ;;  %v255_v35 = vld [vmem:[%s11536_s10 + $0x418] sm:$0xff]  ;;  %252 = vst [vmem:[%s11541_s24 + $0x108] sm:$0xff] %v251_v33  ;;  %v257_v36 = vld [vmem:[%s11536_s10 + $0x420] sm:$0xff] }
  0x3f   : > { %254 = vst [vmem:[%s11541_s24 + $0x110] sm:$0xff] %v253_v34  ;;  %256 = vst [vmem:[%s11541_s24 + $0x118] sm:$0xff] %v255_v35  ;;  %v259_v37 = vld [vmem:[%s11536_s10 + $0x428] sm:$0xff]  ;;  %v261_v38 = vld [vmem:[%s11536_s10 + $0x430] sm:$0xff] }
  0x40   : > { %258 = vst [vmem:[%s11541_s24 + $0x120] sm:$0xff] %v257_v36  ;;  %260 = vst [vmem:[%s11541_s24 + $0x128] sm:$0xff] %v259_v37  ;;  %v263_v39 = vld [vmem:[%s11536_s10 + $0x438] sm:$0xff]  ;;  %v265_v40 = vld [vmem:[%s11536_s10 + $0x440] sm:$0xff] }
  0x41   : > { %262 = vst [vmem:[%s11541_s24 + $0x130] sm:$0xff] %v261_v38  ;;  %v267_v41 = vld [vmem:[%s11536_s10 + $0x448] sm:$0xff]  ;;  %264 = vst [vmem:[%s11541_s24 + $0x138] sm:$0xff] %v263_v39  ;;  %v269_v42 = vld [vmem:[%s11536_s10 + $0x450] sm:$0xff] }
  0x42   : > { %266 = vst [vmem:[%s11541_s24 + $0x140] sm:$0xff] %v265_v40  ;;  %268 = vst [vmem:[%s11541_s24 + $0x148] sm:$0xff] %v267_v41  ;;  %v271_v43 = vld [vmem:[%s11536_s10 + $0x458] sm:$0xff]  ;;  %v273_v44 = vld [vmem:[%s11536_s10 + $0x460] sm:$0xff] }
  0x43   : > { %270 = vst [vmem:[%s11541_s24 + $0x150] sm:$0xff] %v269_v42  ;;  %272 = vst [vmem:[%s11541_s24 + $0x158] sm:$0xff] %v271_v43  ;;  %v275_v45 = vld [vmem:[%s11536_s10 + $0x468] sm:$0xff]  ;;  %v277_v46 = vld [vmem:[%s11536_s10 + $0x470] sm:$0xff] }
  0x44   : > { %274 = vst [vmem:[%s11541_s24 + $0x160] sm:$0xff] %v273_v44  ;;  %v279_v47 = vld [vmem:[%s11536_s10 + $0x478] sm:$0xff]  ;;  %276 = vst [vmem:[%s11541_s24 + $0x168] sm:$0xff] %v275_v45  ;;  %v281_v48 = vld [vmem:[%s11536_s10 + $0x480] sm:$0xff] }
  0x45   : > { %278 = vst [vmem:[%s11541_s24 + $0x170] sm:$0xff] %v277_v46  ;;  %280 = vst [vmem:[%s11541_s24 + $0x178] sm:$0xff] %v279_v47  ;;  %v283_v49 = vld [vmem:[%s11536_s10 + $0x488] sm:$0xff]  ;;  %v285_v50 = vld [vmem:[%s11536_s10 + $0x490] sm:$0xff] }
  0x46   : > { %282 = vst [vmem:[%s11541_s24 + $0x180] sm:$0xff] %v281_v48  ;;  %284 = vst [vmem:[%s11541_s24 + $0x188] sm:$0xff] %v283_v49  ;;  %v287_v51 = vld [vmem:[%s11536_s10 + $0x498] sm:$0xff]  ;;  %v289_v52 = vld [vmem:[%s11536_s10 + $0x4a0] sm:$0xff] }
  0x47   : > { %286 = vst [vmem:[%s11541_s24 + $0x190] sm:$0xff] %v285_v50  ;;  %v291_v53 = vld [vmem:[%s11536_s10 + $0x4a8] sm:$0xff]  ;;  %288 = vst [vmem:[%s11541_s24 + $0x198] sm:$0xff] %v287_v51  ;;  %v293_v54 = vld [vmem:[%s11536_s10 + $0x4b0] sm:$0xff] }
  0x48   : > { %290 = vst [vmem:[%s11541_s24 + $0x1a0] sm:$0xff] %v289_v52  ;;  %292 = vst [vmem:[%s11541_s24 + $0x1a8] sm:$0xff] %v291_v53  ;;  %v295_v55 = vld [vmem:[%s11536_s10 + $0x4b8] sm:$0xff]  ;;  %v297_v56 = vld [vmem:[%s11536_s10 + $0x4c0] sm:$0xff] }
  0x49   : > { %294 = vst [vmem:[%s11541_s24 + $0x1b0] sm:$0xff] %v293_v54  ;;  %296 = vst [vmem:[%s11541_s24 + $0x1b8] sm:$0xff] %v295_v55  ;;  %v299_v57 = vld [vmem:[%s11536_s10 + $0x4c8] sm:$0xff]  ;;  %v301_v58 = vld [vmem:[%s11536_s10 + $0x4d0] sm:$0xff] }
  0x4a   : > { %298 = vst [vmem:[%s11541_s24 + $0x1c0] sm:$0xff] %v297_v56  ;;  %v303_v59 = vld [vmem:[%s11536_s10 + $0x4d8] sm:$0xff]  ;;  %300 = vst [vmem:[%s11541_s24 + $0x1c8] sm:$0xff] %v299_v57  ;;  %v305_v60 = vld [vmem:[%s11536_s10 + $0x4e0] sm:$0xff] }
  0x4b   : > { %302 = vst [vmem:[%s11541_s24 + $0x1d0] sm:$0xff] %v301_v58  ;;  %304 = vst [vmem:[%s11541_s24 + $0x1d8] sm:$0xff] %v303_v59  ;;  %v307_v61 = vld [vmem:[%s11536_s10 + $0x4e8] sm:$0xff]  ;;  %v309_v62 = vld [vmem:[%s11536_s10 + $0x4f0] sm:$0xff] }
  0x4c   : > { %306 = vst [vmem:[%s11541_s24 + $0x1e0] sm:$0xff] %v305_v60  ;;  %308 = vst [vmem:[%s11541_s24 + $0x1e8] sm:$0xff] %v307_v61  ;;  %v311_v63 = vld [vmem:[%s11536_s10 + $0x4f8] sm:$0xff] }
  0x4d   : > { %310 = vst [vmem:[%s11541_s24 + $0x1f0] sm:$0xff] %v309_v62  ;;  %312 = vst [vmem:[%s11541_s24 + $0x1f8] sm:$0xff] %v311_v63 }
  0x4e PF: > { %s319_s29 = sand.u32 1, %s11360_s16   ;;  %s8520_s27 = sshll.u32 %s11384_s22, 1 }
  0x4f   : > { %s8518_s28 = sshll.u32 %s319_s29, 13  ;;  %s9624_s30 = sshll.u32 %s11380_s21, 12 }
  0x50   : > { %s330_s5 = sadd.s32 %s9624_s30, %s8520_s27  ;;  %s323_s6 = scalar_lea.vmem [#allocation4], %s8518_s28 }
  0x51   : > { %s333_s0 = sshll.u32 %s323_s6, 4  ;;  %s8522_s26 = sshll.u32 %s330_s5, 6  ;;  %s334_s0 = int_to_ptr.vmem [resolvable:$true] %s333_s0 }
  0x52   : > { %s332_s18 = scalar_lea.hbm %s13359_s1, %s8522_s26  ;;  %s320_s10 = scalar_lea.sflag [#allocation5], %s319_s29 }
  0x53   : > { %s11276_s24 = scalar_lea.vmem %s334_s0, 131072  ;;  %s11390_s8 = smov [#allocation4]  }
  0x54   : > { %p11277_p3 = scmp.ne.s32.totalorder %s334_s0, %s11276_s24  ;;  %s11280_s16 = sshll.u32 %s11390_s8, 4  ;;  %s11281_s16 = int_to_ptr.vmem [resolvable:$false] %s11280_s16 }
  0x55   : > { %s11282_s22 = scalar_lea.vmem %s11281_s16, 262144  ;;  %p11283_p6 = scmp.lt.s32.totalorder %s334_s0, %s11281_s16 }
  0x56   : > { %p11278_p4 = pnand %p11277_p3, %p11503_p9  ;;  %p11284_p7 = scmp.lt.s32.totalorder %s11282_s22, %s11276_s24 }
  0x58   : > { %p11279_p5 = pneg %p11278_p4  ;;  %p11285_p8 = por %p11284_p7, %p11283_p6 }
  0x5a   : > { %p11286_p10 = pnand %p11285_p8, %p11279_p5 }
  0x5c   : > { %11289 = shalt.err (!%p11286_p10)
}
  0x5d   : > { %s11391_s27 = smov 256   ;;  %s11392_s28 = smov 128  }
  0x5e   : > { %s11393_s25 = smov 8  }
  0x5f   : > { %9626 = dma.hbm_to_vmem [thread:$0]  (%p11503_p9), %s332_s18, 131072, %s334_s0, %s320_s10, %s11391_s27, %s11392_s28, %s11393_s25  }
  0x60 PF: > { %p8523_p11 = scmp.ge.s32.totalorder %s11388_s23, 1  ;;  %p349_p13 = scmp.lt.s32.totalorder %s11388_s23, 9 }
  0x62   : > { %p350_p0 = pnand %p8523_p11, %p349_p13 }
  0x64   : > { %353 = sbr.rel (%p350_p0) target bundleno = 1375 (0x55f), region = 51 }
  0x69   : > { %s356_s16 = sand.u32 1, %s11364_s17   ;;  %s362_s22 = sand.u32 1, %s11356_s15  }
  0x6a   : > { %s8524_s26 = sshll.u32 %s356_s16, 9  ;;  %s8525_s4 = sshll.u32 %s362_s22, 13 }
  0x6b   : > { %s11682_s8 = scalar_lea.vmem [#allocation3], %s8524_s26  ;;  %s363_s29 = scalar_lea.sflag [#allocation5], %s362_s22 }
  0x6c   : > { %s11684_s30 = scalar_lea.vmem [#allocation4], %s8525_s4 }
  0x6d   : > { %11339 = dma.done.wait (%p11512_p12), %s363_s29, 131072  }
  0x6e   : > { %11341 = vsyncadd (%p11512_p12), %s363_s29, 4294836224  ;;  %s393_s0 = sand.u32 1, %s11344_s12   ;;  %s8527_s18 = sshll.u32 %s11376_s20, 1 }
  0x6f   : > { %s8526_s7 = sshll.u32 %s393_s0, 5  ;;  %p401_p9 = scmp.lt.s32.totalorder %s8527_s18, 3 }
  0x70   : > { %s11698_s10 = scalar_lea.vmem [#allocation6], %s8526_s7  ;;  %p8528_p2 = scmp.ne.s32.totalorder %s11372_s19, 0 }
  0x71   : > { %s13438_s18 = smov (!%p401_p9, %s8527_s18), 3 }
  0x72   : > { %s403_s6 = scalar_lea.vmem %s13360_s2, %s13438_s18  ;;  %410 = sbr.rel (%p8528_p2) target bundleno = 122 (0x7a), region = 63 }
  0x77   : > { %v11394_v0 = vmov 0.0  }
  0x78   : > { %411 = vst [vmem:[#allocation2 + $0x10] sm:$0xff] %v11394_v0  ;;  %412 = vst [vmem:[#allocation2] sm:$0xff] %v11394_v0 }
  0x79   : > { %413 = vst [vmem:[#allocation2 + $0x18] sm:$0xff] %v11394_v0  ;;  %414 = vst [vmem:[#allocation2 + $0x8] sm:$0xff] %v11394_v0 }
  0x7a PF: > { %v9728_v1 = vld [vmem:[%s11684_s30 + $0x74] ss:$8 sps:$4 sm:$0xff]   ;;  %v9732_v3 = vld [vmem:[%s11684_s30 + $0x70] ss:$8 sps:$4 sm:$0xff]   ;;  %v9734_v5 = vld [vmem:[%s11684_s30 + $0x64] ss:$8 sps:$4 sm:$0xff]  }
  0x7b   : > { %v9730_v2 = vld [vmem:[%s11684_s30 + $0x174] ss:$8 sps:$4 sm:$0xff]   ;;  %6947 = vmatprep.subr.bf16.mxu0 %v9728_v1  ;;  %v9733_v4 = vld [vmem:[%s11684_s30 + $0x170] ss:$8 sps:$4 sm:$0xff]   ;;  %v9736_v6 = vld [vmem:[%s11684_s30 + $0x164] ss:$8 sps:$4 sm:$0xff]  }
  0x7c   : > { %6990 = vmatprep.subr.bf16.mxu1 %v9730_v2  ;;  %6948 = vmatpush1.bf16.msra.mxu0 %v9732_v3  ;;  %v9738_v7 = vld [vmem:[%s11684_s30 + $0x60] ss:$8 sps:$4 sm:$0xff]   ;;  %v9740_v9 = vld [vmem:[%s11684_s30 + $0x54] ss:$8 sps:$4 sm:$0xff]   ;;  %v9744_v11 = vld [vmem:[%s11684_s30 + $0x50] ss:$8 sps:$4 sm:$0xff]  }
  0x7d   : > { %6991 = vmatpush1.bf16.msra.mxu1 %v9733_v4  ;;  %6949 = vmatprep.subr.bf16.mxu0 %v9734_v5  ;;  %v9739_v8 = vld [vmem:[%s11684_s30 + $0x160] ss:$8 sps:$4 sm:$0xff]   ;;  %v9742_v10 = vld [vmem:[%s11684_s30 + $0x154] ss:$8 sps:$4 sm:$0xff]   ;;  %v9745_v12 = vld [vmem:[%s11684_s30 + $0x150] ss:$8 sps:$4 sm:$0xff]  }
  0x7e   : > { %6992 = vmatprep.subr.bf16.mxu1 %v9736_v6  ;;  %v9746_v13 = vld [vmem:[%s11684_s30 + $0x44] ss:$8 sps:$4 sm:$0xff]   ;;  %v9750_v15 = vld [vmem:[%s11684_s30 + $0x40] ss:$8 sps:$4 sm:$0xff]   ;;  %v9752_v17 = vld [vmem:[%s11684_s30 + $0x34] ss:$8 sps:$4 sm:$0xff]  }
  0x7f   : > { %v9748_v14 = vld [vmem:[%s11684_s30 + $0x144] ss:$8 sps:$4 sm:$0xff]   ;;  %v9751_v16 = vld [vmem:[%s11684_s30 + $0x140] ss:$8 sps:$4 sm:$0xff]   ;;  %v9754_v18 = vld [vmem:[%s11684_s30 + $0x134] ss:$8 sps:$4 sm:$0xff]  }
  0x80   : > { %6950 = vmatpush1.bf16.msra.mxu0 %v9738_v7  ;;  %v9756_v19 = vld [vmem:[%s11684_s30 + $0x30] ss:$8 sps:$4 sm:$0xff]   ;;  %v9758_v21 = vld [vmem:[%s11684_s30 + $0x24] ss:$8 sps:$4 sm:$0xff]   ;;  %v9762_v23 = vld [vmem:[%s11684_s30 + $0x20] ss:$8 sps:$4 sm:$0xff]  }
  0x81   : > { %6993 = vmatpush1.bf16.msra.mxu1 %v9739_v8  ;;  %6951 = vmatprep.subr.bf16.mxu0 %v9740_v9  ;;  %v9757_v20 = vld [vmem:[%s11684_s30 + $0x130] ss:$8 sps:$4 sm:$0xff]   ;;  %v9760_v22 = vld [vmem:[%s11684_s30 + $0x124] ss:$8 sps:$4 sm:$0xff]   ;;  %v9763_v24 = vld [vmem:[%s11684_s30 + $0x120] ss:$8 sps:$4 sm:$0xff]  }
  0x82   : > { %6994 = vmatprep.subr.bf16.mxu1 %v9742_v10  ;;  %v9764_v25 = vld [vmem:[%s11684_s30 + $0x14] ss:$8 sps:$4 sm:$0xff]   ;;  %v9768_v27 = vld [vmem:[%s11684_s30 + $0x10] ss:$8 sps:$4 sm:$0xff]   ;;  %v9770_v29 = vld [vmem:[%s11684_s30 + $0x4] ss:$8 sps:$4 sm:$0xff]  }
  0x83   : > { %v9766_v26 = vld [vmem:[%s11684_s30 + $0x114] ss:$8 sps:$4 sm:$0xff]   ;;  %v9769_v28 = vld [vmem:[%s11684_s30 + $0x110] ss:$8 sps:$4 sm:$0xff]   ;;  %v9772_v30 = vld [vmem:[%s11684_s30 + $0x104] ss:$8 sps:$4 sm:$0xff]  }
  0x84   : > { %6952 = vmatpush1.bf16.msra.mxu0 %v9744_v11  ;;  %v9774_v31 = vld [vmem:[%s11684_s30] ss:$8 sps:$4 sm:$0xff]   ;;  %v9776_v33 = vld [vmem:[%s11684_s30 + $0xf4] ss:$8 sps:$4 sm:$0xff]   ;;  %v9780_v35 = vld [vmem:[%s11684_s30 + $0xf0] ss:$8 sps:$4 sm:$0xff]  }
  0x85   : > { %6995 = vmatpush1.bf16.msra.mxu1 %v9745_v12  ;;  %6953 = vmatprep.subr.bf16.mxu0 %v9746_v13  ;;  %v9775_v32 = vld [vmem:[%s11684_s30 + $0x100] ss:$8 sps:$4 sm:$0xff]   ;;  %v9778_v34 = vld [vmem:[%s11684_s30 + $0x1f4] ss:$8 sps:$4 sm:$0xff]   ;;  %v9781_v36 = vld [vmem:[%s11684_s30 + $0x1f0] ss:$8 sps:$4 sm:$0xff]  }
  0x86   : > { %6996 = vmatprep.subr.bf16.mxu1 %v9748_v14  ;;  %v9782_v37 = vld [vmem:[%s11684_s30 + $0xe4] ss:$8 sps:$4 sm:$0xff]   ;;  %v9786_v39 = vld [vmem:[%s11684_s30 + $0xe0] ss:$8 sps:$4 sm:$0xff]   ;;  %v9788_v41 = vld [vmem:[%s11684_s30 + $0xd4] ss:$8 sps:$4 sm:$0xff]  }
  0x87   : > { %v9784_v38 = vld [vmem:[%s11684_s30 + $0x1e4] ss:$8 sps:$4 sm:$0xff]   ;;  %v9787_v40 = vld [vmem:[%s11684_s30 + $0x1e0] ss:$8 sps:$4 sm:$0xff]   ;;  %v9790_v42 = vld [vmem:[%s11684_s30 + $0x1d4] ss:$8 sps:$4 sm:$0xff]  }
  0x88   : > { %6954 = vmatpush1.bf16.msra.mxu0 %v9750_v15  ;;  %v9792_v43 = vld [vmem:[%s11684_s30 + $0xd0] ss:$8 sps:$4 sm:$0xff]   ;;  %v9794_v45 = vld [vmem:[%s11684_s30 + $0xc4] ss:$8 sps:$4 sm:$0xff]   ;;  %v9798_v47 = vld [vmem:[%s11684_s30 + $0xc0] ss:$8 sps:$4 sm:$0xff]  }
  0x89   : > { %6997 = vmatpush1.bf16.msra.mxu1 %v9751_v16  ;;  %6955 = vmatprep.subr.bf16.mxu0 %v9752_v17  ;;  %v9793_v44 = vld [vmem:[%s11684_s30 + $0x1d0] ss:$8 sps:$4 sm:$0xff]   ;;  %v9796_v46 = vld [vmem:[%s11684_s30 + $0x1c4] ss:$8 sps:$4 sm:$0xff]   ;;  %v9799_v48 = vld [vmem:[%s11684_s30 + $0x1c0] ss:$8 sps:$4 sm:$0xff]  }
  0x8a   : > { %6998 = vmatprep.subr.bf16.mxu1 %v9754_v18  ;;  %v419_v49 = vld [vmem:[%s11682_s8] sm:$0xff]  ;;  %v420_v51 = vld [vmem:[%s11682_s8 + $0x8] sm:$0xff]  ;;  %v9800_v53 = vld [vmem:[%s11684_s30 + $0xb4] ss:$8 sps:$4 sm:$0xff]   ;;  %p9617_p12 = scmp.ne.s32.totalorder %s11372_s19, 3 }
  0x8b   : > { %v451_v50 = vld [vmem:[%s11682_s8 + $0x100] sm:$0xff]  ;;  %v452_v52 = vld [vmem:[%s11682_s8 + $0x108] sm:$0xff]  ;;  %v9802_v55 = vld [vmem:[%s11684_s30 + $0x1b4] ss:$8 sps:$4 sm:$0xff]  }
  0x8c   : > { %6956 = vmatpush1.bf16.msra.mxu0 %v9756_v19  ;;  %v8530_v54 = vcombine.high %v419_v49, %v451_v50  ;;  %v8532_v56 = vcombine.high %v420_v51, %v452_v52  ;;  %v9804_v57 = vld [vmem:[%s11684_s30 + $0xb0] ss:$8 sps:$4 sm:$0xff]   ;;  %v9806_v59 = vld [vmem:[%s11684_s30 + $0xa4] ss:$8 sps:$4 sm:$0xff]   ;;  %v9810_v61 = vld [vmem:[%s11684_s30 + $0xa0] ss:$8 sps:$4 sm:$0xff]   ;;  %v8529_v9 = vcombine.low %v419_v49, %v451_v50  ;;  %v8531_v10 = vcombine.low %v420_v51, %v452_v52 }
  0x8d   : > { %6999 = vmatpush1.bf16.msra.mxu1 %v9757_v20  ;;  %6957 = vmatprep.subr.bf16.mxu0 %v9758_v21  ;;  %v9805_v58 = vld [vmem:[%s11684_s30 + $0x1b0] ss:$8 sps:$4 sm:$0xff]   ;;  %v9808_v60 = vld [vmem:[%s11684_s30 + $0x1a4] ss:$8 sps:$4 sm:$0xff]   ;;  %v9811_v62 = vld [vmem:[%s11684_s30 + $0x1a0] ss:$8 sps:$4 sm:$0xff]  }
  0x8e   : > { %7000 = vmatprep.subr.bf16.mxu1 %v9760_v22  ;;  %6979 = vmatprep.mubr.bf16.mxu0 %v8530_v54  ;;  %v9812_v63 = vld [vmem:[%s11684_s30 + $0x94] ss:$8 sps:$4 sm:$0xff]   ;;  %v9816_v1 = vld [vmem:[%s11684_s30 + $0x90] ss:$8 sps:$4 sm:$0xff]   ;;  %v9818_v3 = vld [vmem:[%s11684_s30 + $0x84] ss:$8 sps:$4 sm:$0xff]  }
  0x8f   : > { %7022 = vmatprep.mubr.bf16.mxu1 %v8532_v56  ;;  %v9814_v0 = vld [vmem:[%s11684_s30 + $0x194] ss:$8 sps:$4 sm:$0xff]   ;;  %v9817_v2 = vld [vmem:[%s11684_s30 + $0x190] ss:$8 sps:$4 sm:$0xff]   ;;  %v9820_v4 = vld [vmem:[%s11684_s30 + $0x184] ss:$8 sps:$4 sm:$0xff]  }
  0x90   : > { %6958 = vmatpush1.bf16.msra.mxu0 %v9762_v23  ;;  %v9822_v5 = vld [vmem:[%s11684_s30 + $0x80] ss:$8 sps:$4 sm:$0xff]   ;;  %v9826_v7 = vld [vmem:[%s11684_s30 + $0x274] ss:$8 sps:$4 sm:$0xff]   ;;  %v9824_v11 = vld [vmem:[%s11684_s30 + $0x270] ss:$8 sps:$4 sm:$0xff]  }
  0x91   : > { %7001 = vmatpush1.bf16.msra.mxu1 %v9763_v24  ;;  %6959 = vmatprep.subr.bf16.mxu0 %v9764_v25  ;;  %v9823_v6 = vld [vmem:[%s11684_s30 + $0x180] ss:$8 sps:$4 sm:$0xff]   ;;  %v9829_v8 = vld [vmem:[%s11684_s30 + $0x374] ss:$8 sps:$4 sm:$0xff]   ;;  %v9827_v12 = vld [vmem:[%s11684_s30 + $0x370] ss:$8 sps:$4 sm:$0xff]  }
  0x92   : > { %7002 = vmatprep.subr.bf16.mxu1 %v9766_v26  ;;  %v9832_v13 = vld [vmem:[%s11684_s30 + $0x264] ss:$8 sps:$4 sm:$0xff]   ;;  %v9830_v15 = vld [vmem:[%s11684_s30 + $0x260] ss:$8 sps:$4 sm:$0xff]   ;;  %v9838_v17 = vld [vmem:[%s11684_s30 + $0x254] ss:$8 sps:$4 sm:$0xff]  }
  0x93   : > { %v9835_v14 = vld [vmem:[%s11684_s30 + $0x364] ss:$8 sps:$4 sm:$0xff]   ;;  %v9833_v16 = vld [vmem:[%s11684_s30 + $0x360] ss:$8 sps:$4 sm:$0xff]   ;;  %v9841_v18 = vld [vmem:[%s11684_s30 + $0x354] ss:$8 sps:$4 sm:$0xff]  }
  0x94   : > { %6960 = vmatpush1.bf16.msra.mxu0 %v9768_v27  ;;  %v9836_v19 = vld [vmem:[%s11684_s30 + $0x250] ss:$8 sps:$4 sm:$0xff]   ;;  %v9844_v21 = vld [vmem:[%s11684_s30 + $0x244] ss:$8 sps:$4 sm:$0xff]   ;;  %v9842_v23 = vld [vmem:[%s11684_s30 + $0x240] ss:$8 sps:$4 sm:$0xff]  }
  0x95   : > { %7003 = vmatpush1.bf16.msra.mxu1 %v9769_v28  ;;  %6961 = vmatprep.subr.bf16.mxu0 %v9770_v29  ;;  %v9839_v20 = vld [vmem:[%s11684_s30 + $0x350] ss:$8 sps:$4 sm:$0xff]   ;;  %v9847_v22 = vld [vmem:[%s11684_s30 + $0x344] ss:$8 sps:$4 sm:$0xff]   ;;  %v9845_v24 = vld [vmem:[%s11684_s30 + $0x340] ss:$8 sps:$4 sm:$0xff]  }
  0x96   : > { %7004 = vmatprep.subr.bf16.mxu1 %v9772_v30  ;;  %v9850_v25 = vld [vmem:[%s11684_s30 + $0x234] ss:$8 sps:$4 sm:$0xff]   ;;  %v9848_v27 = vld [vmem:[%s11684_s30 + $0x230] ss:$8 sps:$4 sm:$0xff]   ;;  %v9856_v29 = vld [vmem:[%s11684_s30 + $0x224] ss:$8 sps:$4 sm:$0xff]  }
  0x97   : > { %v9853_v26 = vld [vmem:[%s11684_s30 + $0x334] ss:$8 sps:$4 sm:$0xff]   ;;  %v9851_v28 = vld [vmem:[%s11684_s30 + $0x330] ss:$8 sps:$4 sm:$0xff]   ;;  %v9859_v30 = vld [vmem:[%s11684_s30 + $0x324] ss:$8 sps:$4 sm:$0xff]  }
  0x98   : > { %6962 = vmatpush1.bf16.msra.mxu0 %v9774_v31  ;;  %v9854_v31 = vld [vmem:[%s11684_s30 + $0x220] ss:$8 sps:$4 sm:$0xff]   ;;  %v9872_v49 = vld [vmem:[%s11684_s30 + $0x2f0] ss:$8 sps:$4 sm:$0xff]   ;;  %v9880_v51 = vld [vmem:[%s11684_s30 + $0x2e4] ss:$8 sps:$4 sm:$0xff]  }
  0x99   : > { %7005 = vmatpush1.bf16.msra.mxu1 %v9775_v32  ;;  %6963 = vmatprep.subr.bf16.mxu0 %v9776_v33  ;;  %v9857_v32 = vld [vmem:[%s11684_s30 + $0x320] ss:$8 sps:$4 sm:$0xff]   ;;  %v9862_v33 = vld [vmem:[%s11684_s30 + $0x214] ss:$8 sps:$4 sm:$0xff]   ;;  %v9875_v50 = vld [vmem:[%s11684_s30 + $0x3f0] ss:$8 sps:$4 sm:$0xff]  }
  0x9a   : > { %7006 = vmatprep.subr.bf16.mxu1 %v9778_v34  ;;  %v9865_v34 = vld [vmem:[%s11684_s30 + $0x314] ss:$8 sps:$4 sm:$0xff]   ;;  %v9883_v52 = vld [vmem:[%s11684_s30 + $0x3e4] ss:$8 sps:$4 sm:$0xff]   ;;  %v9881_v54 = vld [vmem:[%s11684_s30 + $0x3e0] ss:$8 sps:$4 sm:$0xff]  }
  0x9b   : > { %v9889_v56 = vld [vmem:[%s11684_s30 + $0x3d4] ss:$8 sps:$4 sm:$0xff]  }
  0x9c   : > { %6964 = vmatpush2.bf16.msra.mxu0 %v9780_v35  ;;  %v9860_v35 = vld [vmem:[%s11684_s30 + $0x210] ss:$8 sps:$4 sm:$0xff]  }
  0x9d   : > { %7007 = vmatpush2.bf16.msra.mxu1 %v9781_v36  ;;  %6965 = vmatprep.subr.bf16.mxu0 %v9782_v37  ;;  %v9863_v36 = vld [vmem:[%s11684_s30 + $0x310] ss:$8 sps:$4 sm:$0xff]  }
  0x9e   : > { %7008 = vmatprep.subr.bf16.mxu1 %v9784_v38  ;;  %v11798_v37 = vld [vmem:[%s11682_s8 + $0x10] sm:$0xff] }
  0x9f   : > { %v11801_v38 = vld [vmem:[%s11682_s8 + $0x110] sm:$0xff] }
  0xa0   : > { %6966 = vmatpush2.bf16.msra.mxu0 %v9786_v39  ;;  %v11804_v39 = vld [vmem:[%s11682_s8 + $0x18] sm:$0xff] }
  0xa1   : > { %7009 = vmatpush2.bf16.msra.mxu1 %v9787_v40  ;;  %6967 = vmatprep.subr.bf16.mxu0 %v9788_v41  ;;  %v11807_v40 = vld [vmem:[%s11682_s8 + $0x118] sm:$0xff]  ;;  %v9868_v41 = vld [vmem:[%s11684_s30 + $0x204] ss:$8 sps:$4 sm:$0xff]  }
  0xa2   : > { %7010 = vmatprep.subr.bf16.mxu1 %v9790_v42  ;;  %v8534_v42 = vcombine.high %v11798_v37, %v11801_v38 }
  0xa4   : > { %6968 = vmatpush2.bf16.msra.mxu0 %v9792_v43  ;;  %v9871_v43 = vld [vmem:[%s11684_s30 + $0x304] ss:$8 sps:$4 sm:$0xff]  }
  0xa5   : > { %7011 = vmatpush2.bf16.msra.mxu1 %v9793_v44  ;;  %6969 = vmatprep.subr.bf16.mxu0 %v9794_v45  ;;  %v8536_v44 = vcombine.high %v11804_v39, %v11807_v40  ;;  %v9866_v45 = vld [vmem:[%s11684_s30 + $0x200] ss:$8 sps:$4 sm:$0xff]  }
  0xa6   : > { %7012 = vmatprep.subr.bf16.mxu1 %v9796_v46  ;;  %v9869_v46 = vld [vmem:[%s11684_s30 + $0x300] ss:$8 sps:$4 sm:$0xff]  }
  0xa8   : > { %6970 = vmatpush2.bf16.msra.mxu0 %v9798_v47  ;;  %v9874_v47 = vld [vmem:[%s11684_s30 + $0x2f4] ss:$8 sps:$4 sm:$0xff]  }
  0xa9   : > { %7013 = vmatpush2.bf16.msra.mxu1 %v9799_v48  ;;  %6971 = vmatprep.subr.bf16.mxu0 %v9800_v53  ;;  %v9877_v48 = vld [vmem:[%s11684_s30 + $0x3f4] ss:$8 sps:$4 sm:$0xff]   ;;  %v9878_v53 = vld [vmem:[%s11684_s30 + $0x2e0] ss:$8 sps:$4 sm:$0xff]  }
  0xaa   : > { %7014 = vmatprep.subr.bf16.mxu1 %v9802_v55  ;;  %v9886_v55 = vld [vmem:[%s11684_s30 + $0x2d4] ss:$8 sps:$4 sm:$0xff]  }
  0xac   : > { %6972 = vmatpush2.bf16.msra.mxu0 %v9804_v57  ;;  %v9884_v57 = vld [vmem:[%s11684_s30 + $0x2d0] ss:$8 sps:$4 sm:$0xff]  }
  0xad   : > { %7015 = vmatpush2.bf16.msra.mxu1 %v9805_v58  ;;  %6973 = vmatprep.subr.bf16.mxu0 %v9806_v59  ;;  %v9887_v58 = vld [vmem:[%s11684_s30 + $0x3d0] ss:$8 sps:$4 sm:$0xff]   ;;  %v9892_v59 = vld [vmem:[%s11684_s30 + $0x2c4] ss:$8 sps:$4 sm:$0xff]  }
  0xae   : > { %7016 = vmatprep.subr.bf16.mxu1 %v9808_v60  ;;  %v9895_v60 = vld [vmem:[%s11684_s30 + $0x3c4] ss:$8 sps:$4 sm:$0xff]  }
  0xb0   : > { %6974 = vmatpush2.bf16.msra.mxu0 %v9810_v61  ;;  %v9890_v61 = vld [vmem:[%s11684_s30 + $0x2c0] ss:$8 sps:$4 sm:$0xff]  }
  0xb1   : > { %7017 = vmatpush2.bf16.msra.mxu1 %v9811_v62  ;;  %6975 = vmatprep.subr.bf16.mxu0 %v9812_v63  ;;  %v9893_v62 = vld [vmem:[%s11684_s30 + $0x3c0] ss:$8 sps:$4 sm:$0xff]   ;;  %v9898_v63 = vld [vmem:[%s11684_s30 + $0x2b4] ss:$8 sps:$4 sm:$0xff]  }
  0xb2   : > { %7018 = vmatprep.subr.bf16.mxu1 %v9814_v0  ;;  %v9901_v0 = vld [vmem:[%s11684_s30 + $0x3b4] ss:$8 sps:$4 sm:$0xff]  }
  0xb4   : > { %6976 = vmatpush2.bf16.msra.mxu0 %v9816_v1  ;;  %v9896_v1 = vld [vmem:[%s11684_s30 + $0x2b0] ss:$8 sps:$4 sm:$0xff]  }
  0xb5   : > { %7019 = vmatpush2.bf16.msra.mxu1 %v9817_v2  ;;  %6977 = vmatprep.subr.bf16.mxu0 %v9818_v3  ;;  %v9899_v2 = vld [vmem:[%s11684_s30 + $0x3b0] ss:$8 sps:$4 sm:$0xff]   ;;  %v9904_v3 = vld [vmem:[%s11684_s30 + $0x2a4] ss:$8 sps:$4 sm:$0xff]  }
  0xb6   : > { %7020 = vmatprep.subr.bf16.mxu1 %v9820_v4  ;;  %v9907_v4 = vld [vmem:[%s11684_s30 + $0x3a4] ss:$8 sps:$4 sm:$0xff]  }
  0xb8   : > { %6978 = vmatpush2.bf16.msra.mxu0 %v9822_v5  ;;  %v9902_v5 = vld [vmem:[%s11684_s30 + $0x2a0] ss:$8 sps:$4 sm:$0xff]  }
  0xb9   : > { %7021 = vmatpush2.bf16.msra.mxu1 %v9823_v6  ;;  %7033 = vmatprep.subr.bf16.mxu0 %v9826_v7  ;;  %v9905_v6 = vld [vmem:[%s11684_s30 + $0x3a0] ss:$8 sps:$4 sm:$0xff]   ;;  %v9910_v7 = vld [vmem:[%s11684_s30 + $0x294] ss:$8 sps:$4 sm:$0xff]  }
  0xba   : > { %7076 = vmatprep.subr.bf16.mxu1 %v9829_v8  ;;  %v9913_v8 = vld [vmem:[%s11684_s30 + $0x394] ss:$8 sps:$4 sm:$0xff]  }
  0xbb   : > { %6980 = vmatmul.mubr.bf16.vlgmr.msra.gmra.mxu0 %v8529_v9  ;;  %v9908_v9 = vld [vmem:[%s11684_s30 + $0x290] ss:$8 sps:$4 sm:$0xff]  }
  0xbc   : > { %7023 = vmatmul.mubr.bf16.vlgmr.msra.gmra.mxu1 %v8531_v10  ;;  %7034 = vmatpush1.bf16.msra.mxu0 %v9824_v11  ;;  %v9911_v10 = vld [vmem:[%s11684_s30 + $0x390] ss:$8 sps:$4 sm:$0xff]   ;;  %v9916_v11 = vld [vmem:[%s11684_s30 + $0x284] ss:$8 sps:$4 sm:$0xff]  }
  0xbd   : > { %7077 = vmatpush1.bf16.msra.mxu1 %v9827_v12  ;;  %7035 = vmatprep.subr.bf16.mxu0 %v9832_v13  ;;  %v9919_v12 = vld [vmem:[%s11684_s30 + $0x384] ss:$8 sps:$4 sm:$0xff]   ;;  %v9914_v13 = vld [vmem:[%s11684_s30 + $0x280] ss:$8 sps:$4 sm:$0xff]  }
  0xbe   : > { %7078 = vmatprep.subr.bf16.mxu1 %v9835_v14  ;;  %7065 = vmatprep.mubr.bf16.mxu0 %v8534_v42  ;;  %v9917_v14 = vld [vmem:[%s11684_s30 + $0x380] ss:$8 sps:$4 sm:$0xff]   ;;  %v9947_v42 = vld [vmem:[%s11684_s30 + $0x530] ss:$8 sps:$4 sm:$0xff]  }
  0xbf   : > { %7108 = vmatprep.mubr.bf16.mxu1 %v8536_v44  ;;  %v9955_v44 = vld [vmem:[%s11684_s30 + $0x524] ss:$8 sps:$4 sm:$0xff]  }
  0xc0   : > { %7036 = vmatpush1.bf16.msra.mxu0 %v9830_v15  ;;  %v9922_v15 = vld [vmem:[%s11684_s30 + $0x474] ss:$8 sps:$4 sm:$0xff]  }
  0xc1   : > { %7079 = vmatpush1.bf16.msra.mxu1 %v9833_v16  ;;  %7037 = vmatprep.subr.bf16.mxu0 %v9838_v17  ;;  %v9925_v16 = vld [vmem:[%s11684_s30 + $0x574] ss:$8 sps:$4 sm:$0xff]   ;;  %v8533_v17 = vcombine.low %v11798_v37, %v11801_v38  ;;  %v9938_v37 = vld [vmem:[%s11684_s30 + $0x440] ss:$8 sps:$4 sm:$0xff]  }
  0xc2   : > { %7080 = vmatprep.subr.bf16.mxu1 %v9841_v18  ;;  %v8535_v18 = vcombine.low %v11804_v39, %v11807_v40  ;;  %v9941_v38 = vld [vmem:[%s11684_s30 + $0x540] ss:$8 sps:$4 sm:$0xff]   ;;  %v9946_v39 = vld [vmem:[%s11684_s30 + $0x434] ss:$8 sps:$4 sm:$0xff]  }
  0xc3   : > { %v9949_v40 = vld [vmem:[%s11684_s30 + $0x534] ss:$8 sps:$4 sm:$0xff]  }
  0xc4   : > { %7038 = vmatpush1.bf16.msra.mxu0 %v9836_v19  ;;  %v9920_v19 = vld [vmem:[%s11684_s30 + $0x470] ss:$8 sps:$4 sm:$0xff]  }
  0xc5   : > { %7081 = vmatpush1.bf16.msra.mxu1 %v9839_v20  ;;  %7039 = vmatprep.subr.bf16.mxu0 %v9844_v21  ;;  %v9923_v20 = vld [vmem:[%s11684_s30 + $0x570] ss:$8 sps:$4 sm:$0xff]   ;;  %v9928_v21 = vld [vmem:[%s11684_s30 + $0x464] ss:$8 sps:$4 sm:$0xff]  }
  0xc6   : > { %7082 = vmatprep.subr.bf16.mxu1 %v9847_v22  ;;  %v9931_v22 = vld [vmem:[%s11684_s30 + $0x564] ss:$8 sps:$4 sm:$0xff]  }
  0xc8   : > { %7040 = vmatpush1.bf16.msra.mxu0 %v9842_v23  ;;  %v9926_v23 = vld [vmem:[%s11684_s30 + $0x460] ss:$8 sps:$4 sm:$0xff]  }
  0xc9   : > { %7083 = vmatpush1.bf16.msra.mxu1 %v9845_v24  ;;  %7041 = vmatprep.subr.bf16.mxu0 %v9850_v25  ;;  %v9929_v24 = vld [vmem:[%s11684_s30 + $0x560] ss:$8 sps:$4 sm:$0xff]  }
  0xca   : > { %7084 = vmatprep.subr.bf16.mxu1 %v9853_v26  ;;  %v11862_v25 = vld [vmem:[%s11682_s8 + $0x20] sm:$0xff] }
  0xcb   : > { %v11865_v26 = vld [vmem:[%s11682_s8 + $0x120] sm:$0xff] }
  0xcc   : > { %7042 = vmatpush1.bf16.msra.mxu0 %v9848_v27  ;;  %v11868_v27 = vld [vmem:[%s11682_s8 + $0x28] sm:$0xff] }
  0xcd   : > { %7085 = vmatpush1.bf16.msra.mxu1 %v9851_v28  ;;  %7043 = vmatprep.subr.bf16.mxu0 %v9856_v29  ;;  %v11871_v28 = vld [vmem:[%s11682_s8 + $0x128] sm:$0xff]  ;;  %v9934_v29 = vld [vmem:[%s11684_s30 + $0x454] ss:$8 sps:$4 sm:$0xff]  }
  0xce   : > { %7086 = vmatprep.subr.bf16.mxu1 %v9859_v30  ;;  %v8538_v30 = vcombine.high %v11862_v25, %v11865_v26 }
  0xd0   : > { %7044 = vmatpush1.bf16.msra.mxu0 %v9854_v31  ;;  %v9937_v31 = vld [vmem:[%s11684_s30 + $0x554] ss:$8 sps:$4 sm:$0xff]  }
  0xd1   : > { %7087 = vmatpush1.bf16.msra.mxu1 %v9857_v32  ;;  %7045 = vmatprep.subr.bf16.mxu0 %v9862_v33  ;;  %v8540_v32 = vcombine.high %v11868_v27, %v11871_v28  ;;  %v9932_v33 = vld [vmem:[%s11684_s30 + $0x450] ss:$8 sps:$4 sm:$0xff]  }
  0xd2   : > { %7088 = vmatprep.subr.bf16.mxu1 %v9865_v34  ;;  %v9935_v34 = vld [vmem:[%s11684_s30 + $0x550] ss:$8 sps:$4 sm:$0xff]  }
  0xd4   : > { %7046 = vmatpush1.bf16.msra.mxu0 %v9860_v35  ;;  %v9940_v35 = vld [vmem:[%s11684_s30 + $0x444] ss:$8 sps:$4 sm:$0xff]  }
  0xd5   : > { %7089 = vmatpush1.bf16.msra.mxu1 %v9863_v36  ;;  %7047 = vmatprep.subr.bf16.mxu0 %v9868_v41  ;;  %v9943_v36 = vld [vmem:[%s11684_s30 + $0x544] ss:$8 sps:$4 sm:$0xff]   ;;  %v9944_v41 = vld [vmem:[%s11684_s30 + $0x430] ss:$8 sps:$4 sm:$0xff]  }
  0xd6   : > { %7090 = vmatprep.subr.bf16.mxu1 %v9871_v43  ;;  %v9952_v43 = vld [vmem:[%s11684_s30 + $0x424] ss:$8 sps:$4 sm:$0xff]  }
  0xd8   : > { %7048 = vmatpush1.bf16.msra.mxu0 %v9866_v45  ;;  %v9950_v45 = vld [vmem:[%s11684_s30 + $0x420] ss:$8 sps:$4 sm:$0xff]  }
  0xd9   : > { %7091 = vmatpush1.bf16.msra.mxu1 %v9869_v46  ;;  %7049 = vmatprep.subr.bf16.mxu0 %v9874_v47  ;;  %v9953_v46 = vld [vmem:[%s11684_s30 + $0x520] ss:$8 sps:$4 sm:$0xff]   ;;  %v9958_v47 = vld [vmem:[%s11684_s30 + $0x414] ss:$8 sps:$4 sm:$0xff]  }
  0xda   : > { %7092 = vmatprep.subr.bf16.mxu1 %v9877_v48  ;;  %v9961_v48 = vld [vmem:[%s11684_s30 + $0x514] ss:$8 sps:$4 sm:$0xff]  }
  0xdc   : > { %7050 = vmatpush2.bf16.msra.mxu0 %v9872_v49  ;;  %v9956_v49 = vld [vmem:[%s11684_s30 + $0x410] ss:$8 sps:$4 sm:$0xff]  }
  0xdd   : > { %7093 = vmatpush2.bf16.msra.mxu1 %v9875_v50  ;;  %7051 = vmatprep.subr.bf16.mxu0 %v9880_v51  ;;  %v9959_v50 = vld [vmem:[%s11684_s30 + $0x510] ss:$8 sps:$4 sm:$0xff]   ;;  %v9964_v51 = vld [vmem:[%s11684_s30 + $0x404] ss:$8 sps:$4 sm:$0xff]  }
  0xde   : > { %7094 = vmatprep.subr.bf16.mxu1 %v9883_v52  ;;  %v9967_v52 = vld [vmem:[%s11684_s30 + $0x504] ss:$8 sps:$4 sm:$0xff]  }
  0xe0   : > { %7052 = vmatpush2.bf16.msra.mxu0 %v9878_v53  ;;  %v9962_v53 = vld [vmem:[%s11684_s30 + $0x400] ss:$8 sps:$4 sm:$0xff]  }
  0xe1   : > { %7095 = vmatpush2.bf16.msra.mxu1 %v9881_v54  ;;  %7053 = vmatprep.subr.bf16.mxu0 %v9886_v55  ;;  %v9965_v54 = vld [vmem:[%s11684_s30 + $0x500] ss:$8 sps:$4 sm:$0xff]   ;;  %v9970_v55 = vld [vmem:[%s11684_s30 + $0x4f4] ss:$8 sps:$4 sm:$0xff]  }
  0xe2   : > { %7096 = vmatprep.subr.bf16.mxu1 %v9889_v56  ;;  %v9973_v56 = vld [vmem:[%s11684_s30 + $0x5f4] ss:$8 sps:$4 sm:$0xff]  }
  0xe4   : > { %7054 = vmatpush2.bf16.msra.mxu0 %v9884_v57  ;;  %v9968_v57 = vld [vmem:[%s11684_s30 + $0x4f0] ss:$8 sps:$4 sm:$0xff]  }
  0xe5   : > { %7097 = vmatpush2.bf16.msra.mxu1 %v9887_v58  ;;  %7055 = vmatprep.subr.bf16.mxu0 %v9892_v59  ;;  %v9971_v58 = vld [vmem:[%s11684_s30 + $0x5f0] ss:$8 sps:$4 sm:$0xff]   ;;  %v9976_v59 = vld [vmem:[%s11684_s30 + $0x4e4] ss:$8 sps:$4 sm:$0xff]  }
  0xe6   : > { %7098 = vmatprep.subr.bf16.mxu1 %v9895_v60  ;;  %v9979_v60 = vld [vmem:[%s11684_s30 + $0x5e4] ss:$8 sps:$4 sm:$0xff]  }
  0xe8   : > { %7056 = vmatpush2.bf16.msra.mxu0 %v9890_v61  ;;  %v9974_v61 = vld [vmem:[%s11684_s30 + $0x4e0] ss:$8 sps:$4 sm:$0xff]  }
  0xe9   : > { %7099 = vmatpush2.bf16.msra.mxu1 %v9893_v62  ;;  %7057 = vmatprep.subr.bf16.mxu0 %v9898_v63  ;;  %v9977_v62 = vld [vmem:[%s11684_s30 + $0x5e0] ss:$8 sps:$4 sm:$0xff]   ;;  %v9982_v63 = vld [vmem:[%s11684_s30 + $0x4d4] ss:$8 sps:$4 sm:$0xff]  }
  0xea   : > { %7100 = vmatprep.subr.bf16.mxu1 %v9901_v0  ;;  %v9985_v0 = vld [vmem:[%s11684_s30 + $0x5d4] ss:$8 sps:$4 sm:$0xff]  }
  0xec   : > { %7058 = vmatpush2.bf16.msra.mxu0 %v9896_v1  ;;  %v9980_v1 = vld [vmem:[%s11684_s30 + $0x4d0] ss:$8 sps:$4 sm:$0xff]  }
  0xed   : > { %7101 = vmatpush2.bf16.msra.mxu1 %v9899_v2  ;;  %7059 = vmatprep.subr.bf16.mxu0 %v9904_v3  ;;  %v9983_v2 = vld [vmem:[%s11684_s30 + $0x5d0] ss:$8 sps:$4 sm:$0xff]   ;;  %v9988_v3 = vld [vmem:[%s11684_s30 + $0x4c4] ss:$8 sps:$4 sm:$0xff]  }
  0xee   : > { %7102 = vmatprep.subr.bf16.mxu1 %v9907_v4  ;;  %v9991_v4 = vld [vmem:[%s11684_s30 + $0x5c4] ss:$8 sps:$4 sm:$0xff]  }
  0xf0   : > { %7060 = vmatpush2.bf16.msra.mxu0 %v9902_v5  ;;  %v9986_v5 = vld [vmem:[%s11684_s30 + $0x4c0] ss:$8 sps:$4 sm:$0xff]  }
  0xf1   : > { %7103 = vmatpush2.bf16.msra.mxu1 %v9905_v6  ;;  %7061 = vmatprep.subr.bf16.mxu0 %v9910_v7  ;;  %v9989_v6 = vld [vmem:[%s11684_s30 + $0x5c0] ss:$8 sps:$4 sm:$0xff]   ;;  %v9994_v7 = vld [vmem:[%s11684_s30 + $0x4b4] ss:$8 sps:$4 sm:$0xff]  }
  0xf2   : > { %7104 = vmatprep.subr.bf16.mxu1 %v9913_v8  ;;  %v9997_v8 = vld [vmem:[%s11684_s30 + $0x5b4] ss:$8 sps:$4 sm:$0xff]  }
  0xf4   : > { %7062 = vmatpush2.bf16.msra.mxu0 %v9908_v9  ;;  %v9992_v9 = vld [vmem:[%s11684_s30 + $0x4b0] ss:$8 sps:$4 sm:$0xff]  }
  0xf5   : > { %7105 = vmatpush2.bf16.msra.mxu1 %v9911_v10  ;;  %7063 = vmatprep.subr.bf16.mxu0 %v9916_v11  ;;  %v9995_v10 = vld [vmem:[%s11684_s30 + $0x5b0] ss:$8 sps:$4 sm:$0xff]   ;;  %v10000_v11 = vld [vmem:[%s11684_s30 + $0x4a4] ss:$8 sps:$4 sm:$0xff]  }
  0xf6   : > { %7106 = vmatprep.subr.bf16.mxu1 %v9919_v12  ;;  %v10003_v12 = vld [vmem:[%s11684_s30 + $0x5a4] ss:$8 sps:$4 sm:$0xff]  }
  0xf8   : > { %7064 = vmatpush2.bf16.msra.mxu0 %v9914_v13  ;;  %v9998_v13 = vld [vmem:[%s11684_s30 + $0x4a0] ss:$8 sps:$4 sm:$0xff]  }
  0xf9   : > { %7107 = vmatpush2.bf16.msra.mxu1 %v9917_v14  ;;  %7119 = vmatprep.subr.bf16.mxu0 %v9922_v15  ;;  %v10001_v14 = vld [vmem:[%s11684_s30 + $0x5a0] ss:$8 sps:$4 sm:$0xff]   ;;  %v10006_v15 = vld [vmem:[%s11684_s30 + $0x494] ss:$8 sps:$4 sm:$0xff]  }
  0xfa   : > { %7162 = vmatprep.subr.bf16.mxu1 %v9925_v16  ;;  %v10009_v16 = vld [vmem:[%s11684_s30 + $0x594] ss:$8 sps:$4 sm:$0xff]  }
  0xfb   : > { %7066 = vmatmul.mubr.bf16.vlgmr.msra.gmra.mxu0 %v8533_v17  ;;  %v10004_v17 = vld [vmem:[%s11684_s30 + $0x490] ss:$8 sps:$4 sm:$0xff]  }
  0xfc   : > { %7109 = vmatmul.mubr.bf16.vlgmr.msra.gmra.mxu1 %v8535_v18  ;;  %7120 = vmatpush1.bf16.msra.mxu0 %v9920_v19  ;;  %v10007_v18 = vld [vmem:[%s11684_s30 + $0x590] ss:$8 sps:$4 sm:$0xff]   ;;  %v10012_v19 = vld [vmem:[%s11684_s30 + $0x484] ss:$8 sps:$4 sm:$0xff]  }
  0xfd   : > { %7163 = vmatpush1.bf16.msra.mxu1 %v9923_v20  ;;  %7121 = vmatprep.subr.bf16.mxu0 %v9928_v21  ;;  %v10015_v20 = vld [vmem:[%s11684_s30 + $0x584] ss:$8 sps:$4 sm:$0xff]   ;;  %v10010_v21 = vld [vmem:[%s11684_s30 + $0x480] ss:$8 sps:$4 sm:$0xff]  }
  0xfe   : > { %7164 = vmatprep.subr.bf16.mxu1 %v9931_v22  ;;  %7151 = vmatprep.mubr.bf16.mxu0 %v8538_v30  ;;  %v10013_v22 = vld [vmem:[%s11684_s30 + $0x580] ss:$8 sps:$4 sm:$0xff]   ;;  %v10019_v30 = vld [vmem:[%s11684_s30 + $0x770] ss:$8 sps:$4 sm:$0xff]  }
  0xff   : > { %7194 = vmatprep.mubr.bf16.mxu1 %v8540_v32  ;;  %v11941_v32 = vld [vmem:[%s11682_s8 + $0x130] sm:$0xff] }
 0x100   : > { %7122 = vmatpush1.bf16.msra.mxu0 %v9926_v23  ;;  %v10018_v23 = vld [vmem:[%s11684_s30 + $0x674] ss:$8 sps:$4 sm:$0xff]  }
 0x101   : > { %7165 = vmatpush1.bf16.msra.mxu1 %v9929_v24  ;;  %7123 = vmatprep.subr.bf16.mxu0 %v9934_v29  ;;  %v10021_v24 = vld [vmem:[%s11684_s30 + $0x774] ss:$8 sps:$4 sm:$0xff]   ;;  %v10016_v29 = vld [vmem:[%s11684_s30 + $0x670] ss:$8 sps:$4 sm:$0xff]  }
 0x102   : > { %7166 = vmatprep.subr.bf16.mxu1 %v9937_v31  ;;  %v11938_v31 = vld [vmem:[%s11682_s8 + $0x30] sm:$0xff] }
 0x104   : > { %7124 = vmatpush1.bf16.msra.mxu0 %v9932_v33  ;;  %v8537_v33 = vcombine.low %v11862_v25, %v11865_v26  ;;  %v8542_v25 = vcombine.high %v11938_v31, %v11941_v32 }
 0x105   : > { %7167 = vmatpush1.bf16.msra.mxu1 %v9935_v34  ;;  %7125 = vmatprep.subr.bf16.mxu0 %v9940_v35  ;;  %v8539_v34 = vcombine.low %v11868_v27, %v11871_v28  ;;  %v11948_v35 = vld [vmem:[%s11682_s8 + $0x38] sm:$0xff]  ;;  %v10022_v27 = vld [vmem:[%s11684_s30 + $0x660] ss:$8 sps:$4 sm:$0xff]  }
 0x106   : > { %7168 = vmatprep.subr.bf16.mxu1 %v9943_v36  ;;  %v11951_v36 = vld [vmem:[%s11682_s8 + $0x138] sm:$0xff]  ;;  %v10025_v28 = vld [vmem:[%s11684_s30 + $0x760] ss:$8 sps:$4 sm:$0xff]  }
 0x107   : > { %v8544_v26 = vcombine.high %v11948_v35, %v11951_v36 }
 0x108   : > { %7126 = vmatpush1.bf16.msra.mxu0 %v9938_v37  ;;  %v10024_v37 = vld [vmem:[%s11684_s30 + $0x664] ss:$8 sps:$4 sm:$0xff]  }
 0x109   : > { %7169 = vmatpush1.bf16.msra.mxu1 %v9941_v38  ;;  %7127 = vmatprep.subr.bf16.mxu0 %v9946_v39  ;;  %v10027_v38 = vld [vmem:[%s11684_s30 + $0x764] ss:$8 sps:$4 sm:$0xff]   ;;  %v10030_v39 = vld [vmem:[%s11684_s30 + $0x654] ss:$8 sps:$4 sm:$0xff]  }
 0x10a   : > { %7170 = vmatprep.subr.bf16.mxu1 %v9949_v40  ;;  %v10033_v40 = vld [vmem:[%s11684_s30 + $0x754] ss:$8 sps:$4 sm:$0xff]  }
 0x10c   : > { %7128 = vmatpush1.bf16.msra.mxu0 %v9944_v41  ;;  %v10028_v41 = vld [vmem:[%s11684_s30 + $0x650] ss:$8 sps:$4 sm:$0xff]  }
 0x10d   : > { %7171 = vmatpush1.bf16.msra.mxu1 %v9947_v42  ;;  %7129 = vmatprep.subr.bf16.mxu0 %v9952_v43  ;;  %v10031_v42 = vld [vmem:[%s11684_s30 + $0x750] ss:$8 sps:$4 sm:$0xff]   ;;  %v10036_v43 = vld [vmem:[%s11684_s30 + $0x644] ss:$8 sps:$4 sm:$0xff]  }
 0x10e   : > { %7172 = vmatprep.subr.bf16.mxu1 %v9955_v44  ;;  %v10039_v44 = vld [vmem:[%s11684_s30 + $0x744] ss:$8 sps:$4 sm:$0xff]  }
 0x110   : > { %7130 = vmatpush1.bf16.msra.mxu0 %v9950_v45  ;;  %v10034_v45 = vld [vmem:[%s11684_s30 + $0x640] ss:$8 sps:$4 sm:$0xff]  }
 0x111   : > { %7173 = vmatpush1.bf16.msra.mxu1 %v9953_v46  ;;  %7131 = vmatprep.subr.bf16.mxu0 %v9958_v47  ;;  %v10037_v46 = vld [vmem:[%s11684_s30 + $0x740] ss:$8 sps:$4 sm:$0xff]   ;;  %v10042_v47 = vld [vmem:[%s11684_s30 + $0x634] ss:$8 sps:$4 sm:$0xff]  }
 0x112   : > { %7174 = vmatprep.subr.bf16.mxu1 %v9961_v48  ;;  %v10045_v48 = vld [vmem:[%s11684_s30 + $0x734] ss:$8 sps:$4 sm:$0xff]  }
 0x114   : > { %7132 = vmatpush1.bf16.msra.mxu0 %v9956_v49  ;;  %v10040_v49 = vld [vmem:[%s11684_s30 + $0x630] ss:$8 sps:$4 sm:$0xff]  }
 0x115   : > { %7175 = vmatpush1.bf16.msra.mxu1 %v9959_v50  ;;  %7133 = vmatprep.subr.bf16.mxu0 %v9964_v51  ;;  %v10043_v50 = vld [vmem:[%s11684_s30 + $0x730] ss:$8 sps:$4 sm:$0xff]   ;;  %v10048_v51 = vld [vmem:[%s11684_s30 + $0x624] ss:$8 sps:$4 sm:$0xff]  }
 0x116   : > { %7176 = vmatprep.subr.bf16.mxu1 %v9967_v52  ;;  %v10051_v52 = vld [vmem:[%s11684_s30 + $0x724] ss:$8 sps:$4 sm:$0xff]  }
 0x118   : > { %7134 = vmatpush1.bf16.msra.mxu0 %v9962_v53  ;;  %v10046_v53 = vld [vmem:[%s11684_s30 + $0x620] ss:$8 sps:$4 sm:$0xff]  }
 0x119   : > { %7177 = vmatpush1.bf16.msra.mxu1 %v9965_v54  ;;  %7135 = vmatprep.subr.bf16.mxu0 %v9970_v55  ;;  %v10049_v54 = vld [vmem:[%s11684_s30 + $0x720] ss:$8 sps:$4 sm:$0xff]   ;;  %v10054_v55 = vld [vmem:[%s11684_s30 + $0x614] ss:$8 sps:$4 sm:$0xff]  }
 0x11a   : > { %7178 = vmatprep.subr.bf16.mxu1 %v9973_v56  ;;  %v10057_v56 = vld [vmem:[%s11684_s30 + $0x714] ss:$8 sps:$4 sm:$0xff]  }
 0x11c   : > { %7136 = vmatpush2.bf16.msra.mxu0 %v9968_v57  ;;  %v10052_v57 = vld [vmem:[%s11684_s30 + $0x610] ss:$8 sps:$4 sm:$0xff]  }
 0x11d   : > { %7179 = vmatpush2.bf16.msra.mxu1 %v9971_v58  ;;  %7137 = vmatprep.subr.bf16.mxu0 %v9976_v59  ;;  %v10055_v58 = vld [vmem:[%s11684_s30 + $0x710] ss:$8 sps:$4 sm:$0xff]   ;;  %v10060_v59 = vld [vmem:[%s11684_s30 + $0x604] ss:$8 sps:$4 sm:$0xff]  }
 0x11e   : > { %7180 = vmatprep.subr.bf16.mxu1 %v9979_v60  ;;  %v10063_v60 = vld [vmem:[%s11684_s30 + $0x704] ss:$8 sps:$4 sm:$0xff]  }
 0x120   : > { %7138 = vmatpush2.bf16.msra.mxu0 %v9974_v61  ;;  %v10058_v61 = vld [vmem:[%s11684_s30 + $0x600] ss:$8 sps:$4 sm:$0xff]  }
 0x121   : > { %7181 = vmatpush2.bf16.msra.mxu1 %v9977_v62  ;;  %7139 = vmatprep.subr.bf16.mxu0 %v9982_v63  ;;  %v10061_v62 = vld [vmem:[%s11684_s30 + $0x700] ss:$8 sps:$4 sm:$0xff]   ;;  %v10066_v63 = vld [vmem:[%s11684_s30 + $0x6f4] ss:$8 sps:$4 sm:$0xff]  }
 0x122   : > { %7182 = vmatprep.subr.bf16.mxu1 %v9985_v0  ;;  %v10069_v0 = vld [vmem:[%s11684_s30 + $0x7f4] ss:$8 sps:$4 sm:$0xff]  }
 0x124   : > { %7140 = vmatpush2.bf16.msra.mxu0 %v9980_v1  ;;  %v10064_v1 = vld [vmem:[%s11684_s30 + $0x6f0] ss:$8 sps:$4 sm:$0xff]  }
 0x125   : > { %7183 = vmatpush2.bf16.msra.mxu1 %v9983_v2  ;;  %7141 = vmatprep.subr.bf16.mxu0 %v9988_v3  ;;  %v10067_v2 = vld [vmem:[%s11684_s30 + $0x7f0] ss:$8 sps:$4 sm:$0xff]   ;;  %v10072_v3 = vld [vmem:[%s11684_s30 + $0x6e4] ss:$8 sps:$4 sm:$0xff]  }
 0x126   : > { %7184 = vmatprep.subr.bf16.mxu1 %v9991_v4  ;;  %v10075_v4 = vld [vmem:[%s11684_s30 + $0x7e4] ss:$8 sps:$4 sm:$0xff]  }
 0x128   : > { %7142 = vmatpush2.bf16.msra.mxu0 %v9986_v5  ;;  %v10070_v5 = vld [vmem:[%s11684_s30 + $0x6e0] ss:$8 sps:$4 sm:$0xff]  }
 0x129   : > { %7185 = vmatpush2.bf16.msra.mxu1 %v9989_v6  ;;  %7143 = vmatprep.subr.bf16.mxu0 %v9994_v7  ;;  %v10073_v6 = vld [vmem:[%s11684_s30 + $0x7e0] ss:$8 sps:$4 sm:$0xff]   ;;  %v10078_v7 = vld [vmem:[%s11684_s30 + $0x6d4] ss:$8 sps:$4 sm:$0xff]  }
 0x12a   : > { %7186 = vmatprep.subr.bf16.mxu1 %v9997_v8  ;;  %v10081_v8 = vld [vmem:[%s11684_s30 + $0x7d4] ss:$8 sps:$4 sm:$0xff]  }
 0x12c   : > { %7144 = vmatpush2.bf16.msra.mxu0 %v9992_v9  ;;  %v10076_v9 = vld [vmem:[%s11684_s30 + $0x6d0] ss:$8 sps:$4 sm:$0xff]  }
 0x12d   : > { %7187 = vmatpush2.bf16.msra.mxu1 %v9995_v10  ;;  %7145 = vmatprep.subr.bf16.mxu0 %v10000_v11  ;;  %v10079_v10 = vld [vmem:[%s11684_s30 + $0x7d0] ss:$8 sps:$4 sm:$0xff]   ;;  %v10084_v11 = vld [vmem:[%s11684_s30 + $0x6c4] ss:$8 sps:$4 sm:$0xff]  }
 0x12e   : > { %7188 = vmatprep.subr.bf16.mxu1 %v10003_v12  ;;  %v10087_v12 = vld [vmem:[%s11684_s30 + $0x7c4] ss:$8 sps:$4 sm:$0xff]  }
 0x130   : > { %7146 = vmatpush2.bf16.msra.mxu0 %v9998_v13  ;;  %v10082_v13 = vld [vmem:[%s11684_s30 + $0x6c0] ss:$8 sps:$4 sm:$0xff]  }
 0x131   : > { %7189 = vmatpush2.bf16.msra.mxu1 %v10001_v14  ;;  %7147 = vmatprep.subr.bf16.mxu0 %v10006_v15  ;;  %v10085_v14 = vld [vmem:[%s11684_s30 + $0x7c0] ss:$8 sps:$4 sm:$0xff]   ;;  %v10090_v15 = vld [vmem:[%s11684_s30 + $0x6b4] ss:$8 sps:$4 sm:$0xff]  }
 0x132   : > { %7190 = vmatprep.subr.bf16.mxu1 %v10009_v16  ;;  %v10093_v16 = vld [vmem:[%s11684_s30 + $0x7b4] ss:$8 sps:$4 sm:$0xff]  }
 0x134   : > { %7148 = vmatpush2.bf16.msra.mxu0 %v10004_v17  ;;  %v10088_v17 = vld [vmem:[%s11684_s30 + $0x6b0] ss:$8 sps:$4 sm:$0xff]  }
 0x135   : > { %7191 = vmatpush2.bf16.msra.mxu1 %v10007_v18  ;;  %7149 = vmatprep.subr.bf16.mxu0 %v10012_v19  ;;  %v10091_v18 = vld [vmem:[%s11684_s30 + $0x7b0] ss:$8 sps:$4 sm:$0xff]   ;;  %v10096_v19 = vld [vmem:[%s11684_s30 + $0x6a4] ss:$8 sps:$4 sm:$0xff]  }
 0x136   : > { %7192 = vmatprep.subr.bf16.mxu1 %v10015_v20  ;;  %v10099_v20 = vld [vmem:[%s11684_s30 + $0x7a4] ss:$8 sps:$4 sm:$0xff]  }
 0x138   : > { %7150 = vmatpush2.bf16.msra.mxu0 %v10010_v21  ;;  %v10094_v21 = vld [vmem:[%s11684_s30 + $0x6a0] ss:$8 sps:$4 sm:$0xff]  }
 0x139   : > { %7193 = vmatpush2.bf16.msra.mxu1 %v10013_v22  ;;  %7205 = vmatprep.subr.bf16.mxu0 %v10018_v23  ;;  %v10097_v22 = vld [vmem:[%s11684_s30 + $0x7a0] ss:$8 sps:$4 sm:$0xff]   ;;  %v10102_v23 = vld [vmem:[%s11684_s30 + $0x694] ss:$8 sps:$4 sm:$0xff]  }
 0x13a   : > { %7248 = vmatprep.subr.bf16.mxu1 %v10021_v24  ;;  %v10105_v24 = vld [vmem:[%s11684_s30 + $0x794] ss:$8 sps:$4 sm:$0xff]  }
 0x13b   : > { %7152 = vmatmul.mubr.bf16.vlgmr.msra.gmra.mxu0 %v8537_v33  ;;  %v10108_v33 = vld [vmem:[%s11684_s30 + $0x684] ss:$8 sps:$4 sm:$0xff]  }
 0x13c   : > { %7195 = vmatmul.mubr.bf16.vlgmr.msra.gmra.mxu1 %v8539_v34  ;;  %7206 = vmatpush1.bf16.msra.mxu0 %v10016_v29  ;;  %v10100_v29 = vld [vmem:[%s11684_s30 + $0x690] ss:$8 sps:$4 sm:$0xff]   ;;  %v10111_v34 = vld [vmem:[%s11684_s30 + $0x784] ss:$8 sps:$4 sm:$0xff]  }
 0x13d   : > { %7249 = vmatpush1.bf16.msra.mxu1 %v10019_v30  ;;  %7207 = vmatprep.subr.bf16.mxu0 %v10024_v37  ;;  %v10103_v30 = vld [vmem:[%s11684_s30 + $0x790] ss:$8 sps:$4 sm:$0xff]   ;;  %v10106_v37 = vld [vmem:[%s11684_s30 + $0x680] ss:$8 sps:$4 sm:$0xff]  }
 0x13e   : > { %7250 = vmatprep.subr.bf16.mxu1 %v10027_v38  ;;  %7237 = vmatprep.mubr.bf16.mxu0 %v8542_v25  ;;  %v10109_v38 = vld [vmem:[%s11684_s30 + $0x780] ss:$8 sps:$4 sm:$0xff]   ;;  %v10114_v25 = vld [vmem:[%s11684_s30 + $0x874] ss:$8 sps:$4 sm:$0xff]  }
 0x13f   : > { %7280 = vmatprep.mubr.bf16.mxu1 %v8544_v26  ;;  %v10117_v26 = vld [vmem:[%s11684_s30 + $0x974] ss:$8 sps:$4 sm:$0xff]  }
 0x140   : > { %7208 = vmatpush1.bf16.msra.mxu0 %v10022_v27  ;;  %v10112_v27 = vld [vmem:[%s11684_s30 + $0x870] ss:$8 sps:$4 sm:$0xff]  }
 0x141   : > { %7251 = vmatpush1.bf16.msra.mxu1 %v10025_v28  ;;  %7209 = vmatprep.subr.bf16.mxu0 %v10030_v39  ;;  %v10115_v28 = vld [vmem:[%s11684_s30 + $0x970] ss:$8 sps:$4 sm:$0xff]   ;;  %v12022_v39 = vld [vmem:[%s11682_s8 + $0x40] sm:$0xff] }
 0x142   : > { %7252 = vmatprep.subr.bf16.mxu1 %v10033_v40  ;;  %v12025_v40 = vld [vmem:[%s11682_s8 + $0x140] sm:$0xff] }
 0x144   : > { %7210 = vmatpush1.bf16.msra.mxu0 %v10028_v41  ;;  %v8541_v41 = vcombine.low %v11938_v31, %v11941_v32  ;;  %v8546_v31 = vcombine.high %v12022_v39, %v12025_v40 }
 0x145   : > { %7253 = vmatpush1.bf16.msra.mxu1 %v10031_v42  ;;  %7211 = vmatprep.subr.bf16.mxu0 %v10036_v43  ;;  %v8543_v42 = vcombine.low %v11948_v35, %v11951_v36  ;;  %v12032_v43 = vld [vmem:[%s11682_s8 + $0x48] sm:$0xff] }
 0x146   : > { %7254 = vmatprep.subr.bf16.mxu1 %v10039_v44  ;;  %v12035_v44 = vld [vmem:[%s11682_s8 + $0x148] sm:$0xff] }
 0x147   : > { %v8548_v32 = vcombine.high %v12032_v43, %v12035_v44  ;;  %v10118_v35 = vld [vmem:[%s11684_s30 + $0x860] ss:$8 sps:$4 sm:$0xff]  }
 0x148   : > { %7212 = vmatpush1.bf16.msra.mxu0 %v10034_v45  ;;  %v10120_v45 = vld [vmem:[%s11684_s30 + $0x864] ss:$8 sps:$4 sm:$0xff]   ;;  %v10121_v36 = vld [vmem:[%s11684_s30 + $0x960] ss:$8 sps:$4 sm:$0xff]  }
 0x149   : > { %7255 = vmatpush1.bf16.msra.mxu1 %v10037_v46  ;;  %7213 = vmatprep.subr.bf16.mxu0 %v10042_v47  ;;  %v10123_v46 = vld [vmem:[%s11684_s30 + $0x964] ss:$8 sps:$4 sm:$0xff]   ;;  %v10126_v47 = vld [vmem:[%s11684_s30 + $0x854] ss:$8 sps:$4 sm:$0xff]  }
 0x14a   : > { %7256 = vmatprep.subr.bf16.mxu1 %v10045_v48  ;;  %v10129_v48 = vld [vmem:[%s11684_s30 + $0x954] ss:$8 sps:$4 sm:$0xff]  }
 0x14c   : > { %7214 = vmatpush1.bf16.msra.mxu0 %v10040_v49  ;;  %v10124_v49 = vld [vmem:[%s11684_s30 + $0x850] ss:$8 sps:$4 sm:$0xff]  }
 0x14d   : > { %7257 = vmatpush1.bf16.msra.mxu1 %v10043_v50  ;;  %7215 = vmatprep.subr.bf16.mxu0 %v10048_v51  ;;  %v10127_v50 = vld [vmem:[%s11684_s30 + $0x950] ss:$8 sps:$4 sm:$0xff]   ;;  %v10132_v51 = vld [vmem:[%s11684_s30 + $0x844] ss:$8 sps:$4 sm:$0xff]  }
 0x14e   : > { %7258 = vmatprep.subr.bf16.mxu1 %v10051_v52  ;;  %v10135_v52 = vld [vmem:[%s11684_s30 + $0x944] ss:$8 sps:$4 sm:$0xff]  }
 0x150   : > { %7216 = vmatpush1.bf16.msra.mxu0 %v10046_v53  ;;  %v10130_v53 = vld [vmem:[%s11684_s30 + $0x840] ss:$8 sps:$4 sm:$0xff]  }
 0x151   : > { %7259 = vmatpush1.bf16.msra.mxu1 %v10049_v54  ;;  %7217 = vmatprep.subr.bf16.mxu0 %v10054_v55  ;;  %v10133_v54 = vld [vmem:[%s11684_s30 + $0x940] ss:$8 sps:$4 sm:$0xff]   ;;  %v10138_v55 = vld [vmem:[%s11684_s30 + $0x834] ss:$8 sps:$4 sm:$0xff]  }
 0x152   : > { %7260 = vmatprep.subr.bf16.mxu1 %v10057_v56  ;;  %v10141_v56 = vld [vmem:[%s11684_s30 + $0x934] ss:$8 sps:$4 sm:$0xff]  }
 0x154   : > { %7218 = vmatpush1.bf16.msra.mxu0 %v10052_v57  ;;  %v10136_v57 = vld [vmem:[%s11684_s30 + $0x830] ss:$8 sps:$4 sm:$0xff]  }
 0x155   : > { %7261 = vmatpush1.bf16.msra.mxu1 %v10055_v58  ;;  %7219 = vmatprep.subr.bf16.mxu0 %v10060_v59  ;;  %v10139_v58 = vld [vmem:[%s11684_s30 + $0x930] ss:$8 sps:$4 sm:$0xff]   ;;  %v10144_v59 = vld [vmem:[%s11684_s30 + $0x824] ss:$8 sps:$4 sm:$0xff]  }
 0x156   : > { %7262 = vmatprep.subr.bf16.mxu1 %v10063_v60  ;;  %v10147_v60 = vld [vmem:[%s11684_s30 + $0x924] ss:$8 sps:$4 sm:$0xff]  }
 0x158   : > { %7220 = vmatpush1.bf16.msra.mxu0 %v10058_v61  ;;  %v10142_v61 = vld [vmem:[%s11684_s30 + $0x820] ss:$8 sps:$4 sm:$0xff]  }
 0x159   : > { %7263 = vmatpush1.bf16.msra.mxu1 %v10061_v62  ;;  %7221 = vmatprep.subr.bf16.mxu0 %v10066_v63  ;;  %v10145_v62 = vld [vmem:[%s11684_s30 + $0x920] ss:$8 sps:$4 sm:$0xff]   ;;  %v10150_v63 = vld [vmem:[%s11684_s30 + $0x814] ss:$8 sps:$4 sm:$0xff]  }
 0x15a   : > { %7264 = vmatprep.subr.bf16.mxu1 %v10069_v0  ;;  %v10153_v0 = vld [vmem:[%s11684_s30 + $0x914] ss:$8 sps:$4 sm:$0xff]  }
 0x15c   : > { %7222 = vmatpush2.bf16.msra.mxu0 %v10064_v1  ;;  %v10148_v1 = vld [vmem:[%s11684_s30 + $0x810] ss:$8 sps:$4 sm:$0xff]  }
 0x15d   : > { %7265 = vmatpush2.bf16.msra.mxu1 %v10067_v2  ;;  %7223 = vmatprep.subr.bf16.mxu0 %v10072_v3  ;;  %v10151_v2 = vld [vmem:[%s11684_s30 + $0x910] ss:$8 sps:$4 sm:$0xff]   ;;  %v10156_v3 = vld [vmem:[%s11684_s30 + $0x804] ss:$8 sps:$4 sm:$0xff]  }
 0x15e   : > { %7266 = vmatprep.subr.bf16.mxu1 %v10075_v4  ;;  %v10159_v4 = vld [vmem:[%s11684_s30 + $0x904] ss:$8 sps:$4 sm:$0xff]  }
 0x160   : > { %7224 = vmatpush2.bf16.msra.mxu0 %v10070_v5  ;;  %v10154_v5 = vld [vmem:[%s11684_s30 + $0x800] ss:$8 sps:$4 sm:$0xff]  }
 0x161   : > { %7267 = vmatpush2.bf16.msra.mxu1 %v10073_v6  ;;  %7225 = vmatprep.subr.bf16.mxu0 %v10078_v7  ;;  %v10157_v6 = vld [vmem:[%s11684_s30 + $0x900] ss:$8 sps:$4 sm:$0xff]   ;;  %v10162_v7 = vld [vmem:[%s11684_s30 + $0x8f4] ss:$8 sps:$4 sm:$0xff]  }
 0x162   : > { %7268 = vmatprep.subr.bf16.mxu1 %v10081_v8  ;;  %v10165_v8 = vld [vmem:[%s11684_s30 + $0x9f4] ss:$8 sps:$4 sm:$0xff]  }
 0x164   : > { %7226 = vmatpush2.bf16.msra.mxu0 %v10076_v9  ;;  %v10160_v9 = vld [vmem:[%s11684_s30 + $0x8f0] ss:$8 sps:$4 sm:$0xff]  }
 0x165   : > { %7269 = vmatpush2.bf16.msra.mxu1 %v10079_v10  ;;  %7227 = vmatprep.subr.bf16.mxu0 %v10084_v11  ;;  %v10163_v10 = vld [vmem:[%s11684_s30 + $0x9f0] ss:$8 sps:$4 sm:$0xff]   ;;  %v10168_v11 = vld [vmem:[%s11684_s30 + $0x8e4] ss:$8 sps:$4 sm:$0xff]  }
 0x166   : > { %7270 = vmatprep.subr.bf16.mxu1 %v10087_v12  ;;  %v10171_v12 = vld [vmem:[%s11684_s30 + $0x9e4] ss:$8 sps:$4 sm:$0xff]  }
 0x168   : > { %7228 = vmatpush2.bf16.msra.mxu0 %v10082_v13  ;;  %v10166_v13 = vld [vmem:[%s11684_s30 + $0x8e0] ss:$8 sps:$4 sm:$0xff]  }
 0x169   : > { %7271 = vmatpush2.bf16.msra.mxu1 %v10085_v14  ;;  %7229 = vmatprep.subr.bf16.mxu0 %v10090_v15  ;;  %v10169_v14 = vld [vmem:[%s11684_s30 + $0x9e0] ss:$8 sps:$4 sm:$0xff]   ;;  %v10174_v15 = vld [vmem:[%s11684_s30 + $0x8d4] ss:$8 sps:$4 sm:$0xff]  }
 0x16a   : > { %7272 = vmatprep.subr.bf16.mxu1 %v10093_v16  ;;  %v10177_v16 = vld [vmem:[%s11684_s30 + $0x9d4] ss:$8 sps:$4 sm:$0xff]  }
 0x16c   : > { %7230 = vmatpush2.bf16.msra.mxu0 %v10088_v17  ;;  %v10172_v17 = vld [vmem:[%s11684_s30 + $0x8d0] ss:$8 sps:$4 sm:$0xff]  }
 0x16d   : > { %7273 = vmatpush2.bf16.msra.mxu1 %v10091_v18  ;;  %7231 = vmatprep.subr.bf16.mxu0 %v10096_v19  ;;  %v10175_v18 = vld [vmem:[%s11684_s30 + $0x9d0] ss:$8 sps:$4 sm:$0xff]   ;;  %v10180_v19 = vld [vmem:[%s11684_s30 + $0x8c4] ss:$8 sps:$4 sm:$0xff]  }
 0x16e   : > { %7274 = vmatprep.subr.bf16.mxu1 %v10099_v20  ;;  %v10183_v20 = vld [vmem:[%s11684_s30 + $0x9c4] ss:$8 sps:$4 sm:$0xff]  }
 0x170   : > { %7232 = vmatpush2.bf16.msra.mxu0 %v10094_v21  ;;  %v10178_v21 = vld [vmem:[%s11684_s30 + $0x8c0] ss:$8 sps:$4 sm:$0xff]  }
 0x171   : > { %7275 = vmatpush2.bf16.msra.mxu1 %v10097_v22  ;;  %7233 = vmatprep.subr.bf16.mxu0 %v10102_v23  ;;  %v10181_v22 = vld [vmem:[%s11684_s30 + $0x9c0] ss:$8 sps:$4 sm:$0xff]   ;;  %v10186_v23 = vld [vmem:[%s11684_s30 + $0x8b4] ss:$8 sps:$4 sm:$0xff]  }
 0x172   : > { %7276 = vmatprep.subr.bf16.mxu1 %v10105_v24  ;;  %v10189_v24 = vld [vmem:[%s11684_s30 + $0x9b4] ss:$8 sps:$4 sm:$0xff]  }
 0x174   : > { %7234 = vmatpush2.bf16.msra.mxu0 %v10100_v29  ;;  %v10184_v29 = vld [vmem:[%s11684_s30 + $0x8b0] ss:$8 sps:$4 sm:$0xff]  }
 0x175   : > { %7277 = vmatpush2.bf16.msra.mxu1 %v10103_v30  ;;  %7235 = vmatprep.subr.bf16.mxu0 %v10108_v33  ;;  %v10187_v30 = vld [vmem:[%s11684_s30 + $0x9b0] ss:$8 sps:$4 sm:$0xff]   ;;  %v10192_v33 = vld [vmem:[%s11684_s30 + $0x8a4] ss:$8 sps:$4 sm:$0xff]  }
 0x176   : > { %7278 = vmatprep.subr.bf16.mxu1 %v10111_v34  ;;  %v10195_v34 = vld [vmem:[%s11684_s30 + $0x9a4] ss:$8 sps:$4 sm:$0xff]  }
 0x178   : > { %7236 = vmatpush2.bf16.msra.mxu0 %v10106_v37  ;;  %v10190_v37 = vld [vmem:[%s11684_s30 + $0x8a0] ss:$8 sps:$4 sm:$0xff]  }
 0x179   : > { %7279 = vmatpush2.bf16.msra.mxu1 %v10109_v38  ;;  %7291 = vmatprep.subr.bf16.mxu0 %v10114_v25  ;;  %v10193_v38 = vld [vmem:[%s11684_s30 + $0x9a0] ss:$8 sps:$4 sm:$0xff]   ;;  %v10198_v25 = vld [vmem:[%s11684_s30 + $0x894] ss:$8 sps:$4 sm:$0xff]  }
 0x17a   : > { %7334 = vmatprep.subr.bf16.mxu1 %v10117_v26  ;;  %v10201_v26 = vld [vmem:[%s11684_s30 + $0x994] ss:$8 sps:$4 sm:$0xff]  }
 0x17b   : > { %7238 = vmatmul.mubr.bf16.vlgmr.msra.gmra.mxu0 %v8541_v41  ;;  %v10204_v41 = vld [vmem:[%s11684_s30 + $0x884] ss:$8 sps:$4 sm:$0xff]  }
 0x17c   : > { %7281 = vmatmul.mubr.bf16.vlgmr.msra.gmra.mxu1 %v8543_v42  ;;  %7292 = vmatpush1.bf16.msra.mxu0 %v10112_v27  ;;  %v10196_v27 = vld [vmem:[%s11684_s30 + $0x890] ss:$8 sps:$4 sm:$0xff]   ;;  %v10207_v42 = vld [vmem:[%s11684_s30 + $0x984] ss:$8 sps:$4 sm:$0xff]  }
 0x17d   : > { %7335 = vmatpush1.bf16.msra.mxu1 %v10115_v28  ;;  %7293 = vmatprep.subr.bf16.mxu0 %v10120_v45  ;;  %v10199_v28 = vld [vmem:[%s11684_s30 + $0x990] ss:$8 sps:$4 sm:$0xff]   ;;  %v10202_v45 = vld [vmem:[%s11684_s30 + $0x880] ss:$8 sps:$4 sm:$0xff]  }
 0x17e   : > { %7336 = vmatprep.subr.bf16.mxu1 %v10123_v46  ;;  %7323 = vmatprep.mubr.bf16.mxu0 %v8546_v31  ;;  %v10205_v46 = vld [vmem:[%s11684_s30 + $0x980] ss:$8 sps:$4 sm:$0xff]   ;;  %v10210_v31 = vld [vmem:[%s11684_s30 + $0xa74] ss:$8 sps:$4 sm:$0xff]  }
 0x17f   : > { %7366 = vmatprep.mubr.bf16.mxu1 %v8548_v32  ;;  %v10213_v32 = vld [vmem:[%s11684_s30 + $0xb74] ss:$8 sps:$4 sm:$0xff]  }
 0x180   : > { %7294 = vmatpush1.bf16.msra.mxu0 %v10118_v35  ;;  %v12104_v35 = vld [vmem:[%s11682_s8 + $0x50] sm:$0xff] }
 0x181   : > { %7337 = vmatpush1.bf16.msra.mxu1 %v10121_v36  ;;  %7295 = vmatprep.subr.bf16.mxu0 %v10126_v47  ;;  %v10208_v36 = vld [vmem:[%s11684_s30 + $0xa70] ss:$8 sps:$4 sm:$0xff]   ;;  %v8545_v47 = vcombine.low %v12022_v39, %v12025_v40  ;;  %v10219_v39 = vld [vmem:[%s11684_s30 + $0xb64] ss:$8 sps:$4 sm:$0xff]   ;;  %v10214_v40 = vld [vmem:[%s11684_s30 + $0xa60] ss:$8 sps:$4 sm:$0xff]  }
 0x182   : > { %7338 = vmatprep.subr.bf16.mxu1 %v10129_v48  ;;  %v8547_v48 = vcombine.low %v12032_v43, %v12035_v44 }
 0x184   : > { %7296 = vmatpush1.bf16.msra.mxu0 %v10124_v49  ;;  %v12112_v49 = vld [vmem:[%s11682_s8 + $0x150] sm:$0xff] }
 0x185   : > { %7339 = vmatpush1.bf16.msra.mxu1 %v10127_v50  ;;  %7297 = vmatprep.subr.bf16.mxu0 %v10132_v51  ;;  %v12115_v50 = vld [vmem:[%s11682_s8 + $0x58] sm:$0xff]  ;;  %v8550_v43 = vcombine.high %v12104_v35, %v12112_v49 }
 0x186   : > { %7340 = vmatprep.subr.bf16.mxu1 %v10135_v52  ;;  %v12118_v51 = vld [vmem:[%s11682_s8 + $0x158] sm:$0xff] }
 0x187   : > { %v10211_v52 = vld [vmem:[%s11684_s30 + $0xb70] ss:$8 sps:$4 sm:$0xff]   ;;  %v8552_v44 = vcombine.high %v12115_v50, %v12118_v51 }
 0x188   : > { %7298 = vmatpush1.bf16.msra.mxu0 %v10130_v53  ;;  %v10216_v53 = vld [vmem:[%s11684_s30 + $0xa64] ss:$8 sps:$4 sm:$0xff]  }
 0x189   : > { %7341 = vmatpush1.bf16.msra.mxu1 %v10133_v54  ;;  %7299 = vmatprep.subr.bf16.mxu0 %v10138_v55  ;;  %v10217_v54 = vld [vmem:[%s11684_s30 + $0xb60] ss:$8 sps:$4 sm:$0xff]   ;;  %v10222_v55 = vld [vmem:[%s11684_s30 + $0xa54] ss:$8 sps:$4 sm:$0xff]  }
 0x18a   : > { %7342 = vmatprep.subr.bf16.mxu1 %v10141_v56  ;;  %v10225_v56 = vld [vmem:[%s11684_s30 + $0xb54] ss:$8 sps:$4 sm:$0xff]  }
 0x18c   : > { %7300 = vmatpush1.bf16.msra.mxu0 %v10136_v57  ;;  %v10220_v57 = vld [vmem:[%s11684_s30 + $0xa50] ss:$8 sps:$4 sm:$0xff]  }
 0x18d   : > { %7343 = vmatpush1.bf16.msra.mxu1 %v10139_v58  ;;  %7301 = vmatprep.subr.bf16.mxu0 %v10144_v59  ;;  %v10223_v58 = vld [vmem:[%s11684_s30 + $0xb50] ss:$8 sps:$4 sm:$0xff]   ;;  %v10228_v59 = vld [vmem:[%s11684_s30 + $0xa44] ss:$8 sps:$4 sm:$0xff]  }
 0x18e   : > { %7344 = vmatprep.subr.bf16.mxu1 %v10147_v60  ;;  %v10231_v60 = vld [vmem:[%s11684_s30 + $0xb44] ss:$8 sps:$4 sm:$0xff]  }
 0x190   : > { %7302 = vmatpush1.bf16.msra.mxu0 %v10142_v61  ;;  %v10226_v61 = vld [vmem:[%s11684_s30 + $0xa40] ss:$8 sps:$4 sm:$0xff]  }
 0x191   : > { %7345 = vmatpush1.bf16.msra.mxu1 %v10145_v62  ;;  %7303 = vmatprep.subr.bf16.mxu0 %v10150_v63  ;;  %v10229_v62 = vld [vmem:[%s11684_s30 + $0xb40] ss:$8 sps:$4 sm:$0xff]   ;;  %v10234_v63 = vld [vmem:[%s11684_s30 + $0xa34] ss:$8 sps:$4 sm:$0xff]  }
 0x192   : > { %7346 = vmatprep.subr.bf16.mxu1 %v10153_v0  ;;  %v10237_v0 = vld [vmem:[%s11684_s30 + $0xb34] ss:$8 sps:$4 sm:$0xff]  }
 0x194   : > { %7304 = vmatpush1.bf16.msra.mxu0 %v10148_v1  ;;  %v10232_v1 = vld [vmem:[%s11684_s30 + $0xa30] ss:$8 sps:$4 sm:$0xff]  }
 0x195   : > { %7347 = vmatpush1.bf16.msra.mxu1 %v10151_v2  ;;  %7305 = vmatprep.subr.bf16.mxu0 %v10156_v3  ;;  %v10235_v2 = vld [vmem:[%s11684_s30 + $0xb30] ss:$8 sps:$4 sm:$0xff]   ;;  %v10240_v3 = vld [vmem:[%s11684_s30 + $0xa24] ss:$8 sps:$4 sm:$0xff]  }
 0x196   : > { %7348 = vmatprep.subr.bf16.mxu1 %v10159_v4  ;;  %v10243_v4 = vld [vmem:[%s11684_s30 + $0xb24] ss:$8 sps:$4 sm:$0xff]  }
 0x198   : > { %7306 = vmatpush1.bf16.msra.mxu0 %v10154_v5  ;;  %v10238_v5 = vld [vmem:[%s11684_s30 + $0xa20] ss:$8 sps:$4 sm:$0xff]  }
 0x199   : > { %7349 = vmatpush1.bf16.msra.mxu1 %v10157_v6  ;;  %7307 = vmatprep.subr.bf16.mxu0 %v10162_v7  ;;  %v10241_v6 = vld [vmem:[%s11684_s30 + $0xb20] ss:$8 sps:$4 sm:$0xff]   ;;  %v10246_v7 = vld [vmem:[%s11684_s30 + $0xa14] ss:$8 sps:$4 sm:$0xff]  }
 0x19a   : > { %7350 = vmatprep.subr.bf16.mxu1 %v10165_v8  ;;  %v10249_v8 = vld [vmem:[%s11684_s30 + $0xb14] ss:$8 sps:$4 sm:$0xff]  }
 0x19c   : > { %7308 = vmatpush2.bf16.msra.mxu0 %v10160_v9  ;;  %v10244_v9 = vld [vmem:[%s11684_s30 + $0xa10] ss:$8 sps:$4 sm:$0xff]  }
 0x19d   : > { %7351 = vmatpush2.bf16.msra.mxu1 %v10163_v10  ;;  %7309 = vmatprep.subr.bf16.mxu0 %v10168_v11  ;;  %v10247_v10 = vld [vmem:[%s11684_s30 + $0xb10] ss:$8 sps:$4 sm:$0xff]   ;;  %v10252_v11 = vld [vmem:[%s11684_s30 + $0xa04] ss:$8 sps:$4 sm:$0xff]  }
 0x19e   : > { %7352 = vmatprep.subr.bf16.mxu1 %v10171_v12  ;;  %v10255_v12 = vld [vmem:[%s11684_s30 + $0xb04] ss:$8 sps:$4 sm:$0xff]  }
 0x1a0   : > { %7310 = vmatpush2.bf16.msra.mxu0 %v10166_v13  ;;  %v10250_v13 = vld [vmem:[%s11684_s30 + $0xa00] ss:$8 sps:$4 sm:$0xff]  }
 0x1a1   : > { %7353 = vmatpush2.bf16.msra.mxu1 %v10169_v14  ;;  %7311 = vmatprep.subr.bf16.mxu0 %v10174_v15  ;;  %v10253_v14 = vld [vmem:[%s11684_s30 + $0xb00] ss:$8 sps:$4 sm:$0xff]   ;;  %v10258_v15 = vld [vmem:[%s11684_s30 + $0xaf4] ss:$8 sps:$4 sm:$0xff]  }
 0x1a2   : > { %7354 = vmatprep.subr.bf16.mxu1 %v10177_v16  ;;  %v10261_v16 = vld [vmem:[%s11684_s30 + $0xbf4] ss:$8 sps:$4 sm:$0xff]  }
 0x1a4   : > { %7312 = vmatpush2.bf16.msra.mxu0 %v10172_v17  ;;  %v10256_v17 = vld [vmem:[%s11684_s30 + $0xaf0] ss:$8 sps:$4 sm:$0xff]  }
 0x1a5   : > { %7355 = vmatpush2.bf16.msra.mxu1 %v10175_v18  ;;  %7313 = vmatprep.subr.bf16.mxu0 %v10180_v19  ;;  %v10259_v18 = vld [vmem:[%s11684_s30 + $0xbf0] ss:$8 sps:$4 sm:$0xff]   ;;  %v10264_v19 = vld [vmem:[%s11684_s30 + $0xae4] ss:$8 sps:$4 sm:$0xff]  }
 0x1a6   : > { %7356 = vmatprep.subr.bf16.mxu1 %v10183_v20  ;;  %v10267_v20 = vld [vmem:[%s11684_s30 + $0xbe4] ss:$8 sps:$4 sm:$0xff]  }
 0x1a8   : > { %7314 = vmatpush2.bf16.msra.mxu0 %v10178_v21  ;;  %v10262_v21 = vld [vmem:[%s11684_s30 + $0xae0] ss:$8 sps:$4 sm:$0xff]  }
 0x1a9   : > { %7357 = vmatpush2.bf16.msra.mxu1 %v10181_v22  ;;  %7315 = vmatprep.subr.bf16.mxu0 %v10186_v23  ;;  %v10265_v22 = vld [vmem:[%s11684_s30 + $0xbe0] ss:$8 sps:$4 sm:$0xff]   ;;  %v10270_v23 = vld [vmem:[%s11684_s30 + $0xad4] ss:$8 sps:$4 sm:$0xff]  }
 0x1aa   : > { %7358 = vmatprep.subr.bf16.mxu1 %v10189_v24  ;;  %v10273_v24 = vld [vmem:[%s11684_s30 + $0xbd4] ss:$8 sps:$4 sm:$0xff]  }
 0x1ac   : > { %7316 = vmatpush2.bf16.msra.mxu0 %v10184_v29  ;;  %v10268_v29 = vld [vmem:[%s11684_s30 + $0xad0] ss:$8 sps:$4 sm:$0xff]  }
 0x1ad   : > { %7359 = vmatpush2.bf16.msra.mxu1 %v10187_v30  ;;  %7317 = vmatprep.subr.bf16.mxu0 %v10192_v33  ;;  %v10271_v30 = vld [vmem:[%s11684_s30 + $0xbd0] ss:$8 sps:$4 sm:$0xff]   ;;  %v10276_v33 = vld [vmem:[%s11684_s30 + $0xac4] ss:$8 sps:$4 sm:$0xff]  }
 0x1ae   : > { %7360 = vmatprep.subr.bf16.mxu1 %v10195_v34  ;;  %v10279_v34 = vld [vmem:[%s11684_s30 + $0xbc4] ss:$8 sps:$4 sm:$0xff]  }
 0x1b0   : > { %7318 = vmatpush2.bf16.msra.mxu0 %v10190_v37  ;;  %v10274_v37 = vld [vmem:[%s11684_s30 + $0xac0] ss:$8 sps:$4 sm:$0xff]  }
 0x1b1   : > { %7361 = vmatpush2.bf16.msra.mxu1 %v10193_v38  ;;  %7319 = vmatprep.subr.bf16.mxu0 %v10198_v25  ;;  %v10277_v38 = vld [vmem:[%s11684_s30 + $0xbc0] ss:$8 sps:$4 sm:$0xff]   ;;  %v10282_v25 = vld [vmem:[%s11684_s30 + $0xab4] ss:$8 sps:$4 sm:$0xff]  }
 0x1b2   : > { %7362 = vmatprep.subr.bf16.mxu1 %v10201_v26  ;;  %v10285_v26 = vld [vmem:[%s11684_s30 + $0xbb4] ss:$8 sps:$4 sm:$0xff]  }
 0x1b4   : > { %7320 = vmatpush2.bf16.msra.mxu0 %v10196_v27  ;;  %v10280_v27 = vld [vmem:[%s11684_s30 + $0xab0] ss:$8 sps:$4 sm:$0xff]  }
 0x1b5   : > { %7363 = vmatpush2.bf16.msra.mxu1 %v10199_v28  ;;  %7321 = vmatprep.subr.bf16.mxu0 %v10204_v41  ;;  %v10283_v28 = vld [vmem:[%s11684_s30 + $0xbb0] ss:$8 sps:$4 sm:$0xff]   ;;  %v10288_v41 = vld [vmem:[%s11684_s30 + $0xaa4] ss:$8 sps:$4 sm:$0xff]  }
 0x1b6   : > { %7364 = vmatprep.subr.bf16.mxu1 %v10207_v42  ;;  %v10291_v42 = vld [vmem:[%s11684_s30 + $0xba4] ss:$8 sps:$4 sm:$0xff]  }
 0x1b8   : > { %7322 = vmatpush2.bf16.msra.mxu0 %v10202_v45  ;;  %v10286_v45 = vld [vmem:[%s11684_s30 + $0xaa0] ss:$8 sps:$4 sm:$0xff]  }
 0x1b9   : > { %7365 = vmatpush2.bf16.msra.mxu1 %v10205_v46  ;;  %7377 = vmatprep.subr.bf16.mxu0 %v10210_v31  ;;  %v10289_v46 = vld [vmem:[%s11684_s30 + $0xba0] ss:$8 sps:$4 sm:$0xff]   ;;  %v10294_v31 = vld [vmem:[%s11684_s30 + $0xa94] ss:$8 sps:$4 sm:$0xff]  }
 0x1ba   : > { %7420 = vmatprep.subr.bf16.mxu1 %v10213_v32  ;;  %v10297_v32 = vld [vmem:[%s11684_s30 + $0xb94] ss:$8 sps:$4 sm:$0xff]  }
 0x1bb   : > { %7324 = vmatmul.mubr.bf16.vlgmr.msra.gmra.mxu0 %v8545_v47  ;;  %v10295_v47 = vld [vmem:[%s11684_s30 + $0xb90] ss:$8 sps:$4 sm:$0xff]  }
 0x1bc   : > { %7367 = vmatmul.mubr.bf16.vlgmr.msra.gmra.mxu1 %v8547_v48  ;;  %7378 = vmatpush1.bf16.msra.mxu0 %v10208_v36  ;;  %v10292_v36 = vld [vmem:[%s11684_s30 + $0xa90] ss:$8 sps:$4 sm:$0xff]   ;;  %v10300_v48 = vld [vmem:[%s11684_s30 + $0xa84] ss:$8 sps:$4 sm:$0xff]  }
 0x1bd   : > { %7421 = vmatpush1.bf16.msra.mxu1 %v10211_v52  ;;  %7379 = vmatprep.subr.bf16.mxu0 %v10216_v53  ;;  %v10303_v52 = vld [vmem:[%s11684_s30 + $0xb84] ss:$8 sps:$4 sm:$0xff]   ;;  %v10298_v53 = vld [vmem:[%s11684_s30 + $0xa80] ss:$8 sps:$4 sm:$0xff]  }
 0x1be   : > { %7422 = vmatprep.subr.bf16.mxu1 %v10219_v39  ;;  %7409 = vmatprep.mubr.bf16.mxu0 %v8550_v43  ;;  %v10301_v39 = vld [vmem:[%s11684_s30 + $0xb80] ss:$8 sps:$4 sm:$0xff]  }
 0x1bf   : > { %7452 = vmatprep.mubr.bf16.mxu1 %v8552_v44  ;;  %v12188_v43 = vld [vmem:[%s11682_s8 + $0x60] sm:$0xff]  ;;  %v10304_v44 = vld [vmem:[%s11684_s30 + $0xc70] ss:$8 sps:$4 sm:$0xff]  }
 0x1c0   : > { %7380 = vmatpush1.bf16.msra.mxu0 %v10214_v40  ;;  %v10306_v40 = vld [vmem:[%s11684_s30 + $0xc74] ss:$8 sps:$4 sm:$0xff]  }
 0x1c1   : > { %7423 = vmatpush1.bf16.msra.mxu1 %v10217_v54  ;;  %7381 = vmatprep.subr.bf16.mxu0 %v10222_v55  ;;  %v10309_v54 = vld [vmem:[%s11684_s30 + $0xd74] ss:$8 sps:$4 sm:$0xff]   ;;  %v8549_v55 = vcombine.low %v12104_v35, %v12112_v49  ;;  %v10315_v35 = vld [vmem:[%s11684_s30 + $0xd64] ss:$8 sps:$4 sm:$0xff]   ;;  %v10310_v49 = vld [vmem:[%s11684_s30 + $0xc60] ss:$8 sps:$4 sm:$0xff]  }
 0x1c2   : > { %7424 = vmatprep.subr.bf16.mxu1 %v10225_v56  ;;  %v8551_v56 = vcombine.low %v12115_v50, %v12118_v51 }
 0x1c4   : > { %7382 = vmatpush1.bf16.msra.mxu0 %v10220_v57  ;;  %v12196_v57 = vld [vmem:[%s11682_s8 + $0x160] sm:$0xff] }
 0x1c5   : > { %7425 = vmatpush1.bf16.msra.mxu1 %v10223_v58  ;;  %7383 = vmatprep.subr.bf16.mxu0 %v10228_v59  ;;  %v12199_v58 = vld [vmem:[%s11682_s8 + $0x68] sm:$0xff]  ;;  %v8554_v50 = vcombine.high %v12188_v43, %v12196_v57 }
 0x1c6   : > { %7426 = vmatprep.subr.bf16.mxu1 %v10231_v60  ;;  %v12202_v59 = vld [vmem:[%s11682_s8 + $0x168] sm:$0xff]  ;;  %v10307_v60 = vld [vmem:[%s11684_s30 + $0xd70] ss:$8 sps:$4 sm:$0xff]  }
 0x1c7   : > { %v8556_v51 = vcombine.high %v12199_v58, %v12202_v59 }
 0x1c8   : > { %7384 = vmatpush1.bf16.msra.mxu0 %v10226_v61  ;;  %v10312_v61 = vld [vmem:[%s11684_s30 + $0xc64] ss:$8 sps:$4 sm:$0xff]  }
 0x1c9   : > { %7427 = vmatpush1.bf16.msra.mxu1 %v10229_v62  ;;  %7385 = vmatprep.subr.bf16.mxu0 %v10234_v63  ;;  %v10313_v62 = vld [vmem:[%s11684_s30 + $0xd60] ss:$8 sps:$4 sm:$0xff]   ;;  %v10318_v63 = vld [vmem:[%s11684_s30 + $0xc54] ss:$8 sps:$4 sm:$0xff]  }
 0x1ca   : > { %7428 = vmatprep.subr.bf16.mxu1 %v10237_v0  ;;  %v10321_v0 = vld [vmem:[%s11684_s30 + $0xd54] ss:$8 sps:$4 sm:$0xff]  }
 0x1cc   : > { %7386 = vmatpush1.bf16.msra.mxu0 %v10232_v1  ;;  %v10316_v1 = vld [vmem:[%s11684_s30 + $0xc50] ss:$8 sps:$4 sm:$0xff]  }
 0x1cd   : > { %7429 = vmatpush1.bf16.msra.mxu1 %v10235_v2  ;;  %7387 = vmatprep.subr.bf16.mxu0 %v10240_v3  ;;  %v10319_v2 = vld [vmem:[%s11684_s30 + $0xd50] ss:$8 sps:$4 sm:$0xff]   ;;  %v10324_v3 = vld [vmem:[%s11684_s30 + $0xc44] ss:$8 sps:$4 sm:$0xff]  }
 0x1ce   : > { %7430 = vmatprep.subr.bf16.mxu1 %v10243_v4  ;;  %v10327_v4 = vld [vmem:[%s11684_s30 + $0xd44] ss:$8 sps:$4 sm:$0xff]  }
 0x1d0   : > { %7388 = vmatpush1.bf16.msra.mxu0 %v10238_v5  ;;  %v10322_v5 = vld [vmem:[%s11684_s30 + $0xc40] ss:$8 sps:$4 sm:$0xff]  }
 0x1d1   : > { %7431 = vmatpush1.bf16.msra.mxu1 %v10241_v6  ;;  %7389 = vmatprep.subr.bf16.mxu0 %v10246_v7  ;;  %v10325_v6 = vld [vmem:[%s11684_s30 + $0xd40] ss:$8 sps:$4 sm:$0xff]   ;;  %v10330_v7 = vld [vmem:[%s11684_s30 + $0xc34] ss:$8 sps:$4 sm:$0xff]  }
 0x1d2   : > { %7432 = vmatprep.subr.bf16.mxu1 %v10249_v8  ;;  %v10333_v8 = vld [vmem:[%s11684_s30 + $0xd34] ss:$8 sps:$4 sm:$0xff]  }
 0x1d4   : > { %7390 = vmatpush1.bf16.msra.mxu0 %v10244_v9  ;;  %v10328_v9 = vld [vmem:[%s11684_s30 + $0xc30] ss:$8 sps:$4 sm:$0xff]  }
 0x1d5   : > { %7433 = vmatpush1.bf16.msra.mxu1 %v10247_v10  ;;  %7391 = vmatprep.subr.bf16.mxu0 %v10252_v11  ;;  %v10331_v10 = vld [vmem:[%s11684_s30 + $0xd30] ss:$8 sps:$4 sm:$0xff]   ;;  %v10336_v11 = vld [vmem:[%s11684_s30 + $0xc24] ss:$8 sps:$4 sm:$0xff]  }
 0x1d6   : > { %7434 = vmatprep.subr.bf16.mxu1 %v10255_v12  ;;  %v10339_v12 = vld [vmem:[%s11684_s30 + $0xd24] ss:$8 sps:$4 sm:$0xff]  }
 0x1d8   : > { %7392 = vmatpush1.bf16.msra.mxu0 %v10250_v13  ;;  %v10334_v13 = vld [vmem:[%s11684_s30 + $0xc20] ss:$8 sps:$4 sm:$0xff]  }
 0x1d9   : > { %7435 = vmatpush1.bf16.msra.mxu1 %v10253_v14  ;;  %7393 = vmatprep.subr.bf16.mxu0 %v10258_v15  ;;  %v10337_v14 = vld [vmem:[%s11684_s30 + $0xd20] ss:$8 sps:$4 sm:$0xff]   ;;  %v10342_v15 = vld [vmem:[%s11684_s30 + $0xc14] ss:$8 sps:$4 sm:$0xff]  }
 0x1da   : > { %7436 = vmatprep.subr.bf16.mxu1 %v10261_v16  ;;  %v10345_v16 = vld [vmem:[%s11684_s30 + $0xd14] ss:$8 sps:$4 sm:$0xff]  }
 0x1dc   : > { %7394 = vmatpush2.bf16.msra.mxu0 %v10256_v17  ;;  %v10340_v17 = vld [vmem:[%s11684_s30 + $0xc10] ss:$8 sps:$4 sm:$0xff]  }
 0x1dd   : > { %7437 = vmatpush2.bf16.msra.mxu1 %v10259_v18  ;;  %7395 = vmatprep.subr.bf16.mxu0 %v10264_v19  ;;  %v10343_v18 = vld [vmem:[%s11684_s30 + $0xd10] ss:$8 sps:$4 sm:$0xff]   ;;  %v10348_v19 = vld [vmem:[%s11684_s30 + $0xc04] ss:$8 sps:$4 sm:$0xff]  }
 0x1de   : > { %7438 = vmatprep.subr.bf16.mxu1 %v10267_v20  ;;  %v10351_v20 = vld [vmem:[%s11684_s30 + $0xd04] ss:$8 sps:$4 sm:$0xff]  }
 0x1e0   : > { %7396 = vmatpush2.bf16.msra.mxu0 %v10262_v21  ;;  %v10346_v21 = vld [vmem:[%s11684_s30 + $0xc00] ss:$8 sps:$4 sm:$0xff]  }
 0x1e1   : > { %7439 = vmatpush2.bf16.msra.mxu1 %v10265_v22  ;;  %7397 = vmatprep.subr.bf16.mxu0 %v10270_v23  ;;  %v10349_v22 = vld [vmem:[%s11684_s30 + $0xd00] ss:$8 sps:$4 sm:$0xff]   ;;  %v10354_v23 = vld [vmem:[%s11684_s30 + $0xcf4] ss:$8 sps:$4 sm:$0xff]  }
 0x1e2   : > { %7440 = vmatprep.subr.bf16.mxu1 %v10273_v24  ;;  %v10357_v24 = vld [vmem:[%s11684_s30 + $0xdf4] ss:$8 sps:$4 sm:$0xff]  }
 0x1e4   : > { %7398 = vmatpush2.bf16.msra.mxu0 %v10268_v29  ;;  %v10352_v29 = vld [vmem:[%s11684_s30 + $0xcf0] ss:$8 sps:$4 sm:$0xff]  }
 0x1e5   : > { %7441 = vmatpush2.bf16.msra.mxu1 %v10271_v30  ;;  %7399 = vmatprep.subr.bf16.mxu0 %v10276_v33  ;;  %v10355_v30 = vld [vmem:[%s11684_s30 + $0xdf0] ss:$8 sps:$4 sm:$0xff]   ;;  %v10360_v33 = vld [vmem:[%s11684_s30 + $0xce4] ss:$8 sps:$4 sm:$0xff]  }
 0x1e6   : > { %7442 = vmatprep.subr.bf16.mxu1 %v10279_v34  ;;  %v10363_v34 = vld [vmem:[%s11684_s30 + $0xde4] ss:$8 sps:$4 sm:$0xff]  }
 0x1e8   : > { %7400 = vmatpush2.bf16.msra.mxu0 %v10274_v37  ;;  %v10358_v37 = vld [vmem:[%s11684_s30 + $0xce0] ss:$8 sps:$4 sm:$0xff]  }
 0x1e9   : > { %7443 = vmatpush2.bf16.msra.mxu1 %v10277_v38  ;;  %7401 = vmatprep.subr.bf16.mxu0 %v10282_v25  ;;  %v10361_v38 = vld [vmem:[%s11684_s30 + $0xde0] ss:$8 sps:$4 sm:$0xff]   ;;  %v10366_v25 = vld [vmem:[%s11684_s30 + $0xcd4] ss:$8 sps:$4 sm:$0xff]  }
 0x1ea   : > { %7444 = vmatprep.subr.bf16.mxu1 %v10285_v26  ;;  %v10369_v26 = vld [vmem:[%s11684_s30 + $0xdd4] ss:$8 sps:$4 sm:$0xff]  }
 0x1ec   : > { %7402 = vmatpush2.bf16.msra.mxu0 %v10280_v27  ;;  %v10364_v27 = vld [vmem:[%s11684_s30 + $0xcd0] ss:$8 sps:$4 sm:$0xff]  }
 0x1ed   : > { %7445 = vmatpush2.bf16.msra.mxu1 %v10283_v28  ;;  %7403 = vmatprep.subr.bf16.mxu0 %v10288_v41  ;;  %v10367_v28 = vld [vmem:[%s11684_s30 + $0xdd0] ss:$8 sps:$4 sm:$0xff]   ;;  %v10372_v41 = vld [vmem:[%s11684_s30 + $0xcc4] ss:$8 sps:$4 sm:$0xff]  }
 0x1ee   : > { %7446 = vmatprep.subr.bf16.mxu1 %v10291_v42  ;;  %v10375_v42 = vld [vmem:[%s11684_s30 + $0xdc4] ss:$8 sps:$4 sm:$0xff]  }
 0x1f0   : > { %7404 = vmatpush2.bf16.msra.mxu0 %v10286_v45  ;;  %v10370_v45 = vld [vmem:[%s11684_s30 + $0xcc0] ss:$8 sps:$4 sm:$0xff]  }
 0x1f1   : > { %7447 = vmatpush2.bf16.msra.mxu1 %v10289_v46  ;;  %7405 = vmatprep.subr.bf16.mxu0 %v10294_v31  ;;  %v10373_v46 = vld [vmem:[%s11684_s30 + $0xdc0] ss:$8 sps:$4 sm:$0xff]   ;;  %v10378_v31 = vld [vmem:[%s11684_s30 + $0xcb4] ss:$8 sps:$4 sm:$0xff]  }
 0x1f2   : > { %7448 = vmatprep.subr.bf16.mxu1 %v10297_v32  ;;  %v10381_v32 = vld [vmem:[%s11684_s30 + $0xdb4] ss:$8 sps:$4 sm:$0xff]  }
 0x1f4   : > { %7406 = vmatpush2.bf16.msra.mxu0 %v10292_v36  ;;  %v10376_v36 = vld [vmem:[%s11684_s30 + $0xcb0] ss:$8 sps:$4 sm:$0xff]  }
 0x1f5   : > { %7449 = vmatpush2.bf16.msra.mxu1 %v10295_v47  ;;  %7407 = vmatprep.subr.bf16.mxu0 %v10300_v48  ;;  %v10379_v47 = vld [vmem:[%s11684_s30 + $0xdb0] ss:$8 sps:$4 sm:$0xff]   ;;  %v10384_v48 = vld [vmem:[%s11684_s30 + $0xca4] ss:$8 sps:$4 sm:$0xff]  }
 0x1f6   : > { %7450 = vmatprep.subr.bf16.mxu1 %v10303_v52  ;;  %v10387_v52 = vld [vmem:[%s11684_s30 + $0xda4] ss:$8 sps:$4 sm:$0xff]  }
 0x1f8   : > { %7408 = vmatpush2.bf16.msra.mxu0 %v10298_v53  ;;  %v10382_v53 = vld [vmem:[%s11684_s30 + $0xca0] ss:$8 sps:$4 sm:$0xff]  }
 0x1f9   : > { %7451 = vmatpush2.bf16.msra.mxu1 %v10301_v39  ;;  %7463 = vmatprep.subr.bf16.mxu0 %v10306_v40  ;;  %v10385_v39 = vld [vmem:[%s11684_s30 + $0xda0] ss:$8 sps:$4 sm:$0xff]   ;;  %v10390_v40 = vld [vmem:[%s11684_s30 + $0xc94] ss:$8 sps:$4 sm:$0xff]  }
 0x1fa   : > { %7506 = vmatprep.subr.bf16.mxu1 %v10309_v54  ;;  %v10393_v54 = vld [vmem:[%s11684_s30 + $0xd94] ss:$8 sps:$4 sm:$0xff]  }
 0x1fb   : > { %7410 = vmatmul.mubr.bf16.vlgmr.msra.gmra.mxu0 %v8549_v55  ;;  %v10391_v55 = vld [vmem:[%s11684_s30 + $0xd90] ss:$8 sps:$4 sm:$0xff]  }
 0x1fc   : > { %7453 = vmatmul.mubr.bf16.vlgmr.msra.gmra.mxu1 %v8551_v56  ;;  %7464 = vmatpush1.bf16.msra.mxu0 %v10304_v44  ;;  %v10388_v44 = vld [vmem:[%s11684_s30 + $0xc90] ss:$8 sps:$4 sm:$0xff]   ;;  %v10396_v56 = vld [vmem:[%s11684_s30 + $0xc84] ss:$8 sps:$4 sm:$0xff]  }
 0x1fd   : > { %7507 = vmatpush1.bf16.msra.mxu1 %v10307_v60  ;;  %7465 = vmatprep.subr.bf16.mxu0 %v10312_v61  ;;  %v10399_v60 = vld [vmem:[%s11684_s30 + $0xd84] ss:$8 sps:$4 sm:$0xff]   ;;  %v10394_v61 = vld [vmem:[%s11684_s30 + $0xc80] ss:$8 sps:$4 sm:$0xff]  }
 0x1fe   : > { %7508 = vmatprep.subr.bf16.mxu1 %v10315_v35  ;;  %7495 = vmatprep.mubr.bf16.mxu0 %v8554_v50  ;;  %v10397_v35 = vld [vmem:[%s11684_s30 + $0xd80] ss:$8 sps:$4 sm:$0xff]   ;;  %v12272_v50 = vld [vmem:[%s11682_s8 + $0x70] sm:$0xff] }
 0x1ff   : > { %7538 = vmatprep.mubr.bf16.mxu1 %v8556_v51  ;;  %v10400_v51 = vld [vmem:[%s11684_s30 + $0xe70] ss:$8 sps:$4 sm:$0xff]  }
 0x200   : > { %7466 = vmatpush1.bf16.msra.mxu0 %v10310_v49  ;;  %v10402_v49 = vld [vmem:[%s11684_s30 + $0xe74] ss:$8 sps:$4 sm:$0xff]  }
 0x201   : > { %7509 = vmatpush1.bf16.msra.mxu1 %v10313_v62  ;;  %7467 = vmatprep.subr.bf16.mxu0 %v10318_v63  ;;  %v10405_v62 = vld [vmem:[%s11684_s30 + $0xf74] ss:$8 sps:$4 sm:$0xff]   ;;  %v8553_v63 = vcombine.low %v12188_v43, %v12196_v57  ;;  %v10411_v43 = vld [vmem:[%s11684_s30 + $0xf64] ss:$8 sps:$4 sm:$0xff]   ;;  %v10406_v57 = vld [vmem:[%s11684_s30 + $0xe60] ss:$8 sps:$4 sm:$0xff]  }
 0x202   : > { %7510 = vmatprep.subr.bf16.mxu1 %v10321_v0  ;;  %v8555_v0 = vcombine.low %v12199_v58, %v12202_v59 }
 0x204   : > { %7468 = vmatpush1.bf16.msra.mxu0 %v10316_v1  ;;  %v12280_v1 = vld [vmem:[%s11682_s8 + $0x170] sm:$0xff] }
 0x205   : > { %7511 = vmatpush1.bf16.msra.mxu1 %v10319_v2  ;;  %7469 = vmatprep.subr.bf16.mxu0 %v10324_v3  ;;  %v12283_v2 = vld [vmem:[%s11682_s8 + $0x78] sm:$0xff]  ;;  %v8558_v58 = vcombine.high %v12272_v50, %v12280_v1 }
 0x206   : > { %7512 = vmatprep.subr.bf16.mxu1 %v10327_v4  ;;  %v12286_v3 = vld [vmem:[%s11682_s8 + $0x178] sm:$0xff] }
 0x207   : > { %v10403_v4 = vld [vmem:[%s11684_s30 + $0xf70] ss:$8 sps:$4 sm:$0xff]   ;;  %v8560_v59 = vcombine.high %v12283_v2, %v12286_v3 }
 0x208   : > { %7470 = vmatpush1.bf16.msra.mxu0 %v10322_v5  ;;  %v10408_v5 = vld [vmem:[%s11684_s30 + $0xe64] ss:$8 sps:$4 sm:$0xff]  }
 0x209   : > { %7513 = vmatpush1.bf16.msra.mxu1 %v10325_v6  ;;  %7471 = vmatprep.subr.bf16.mxu0 %v10330_v7  ;;  %v10409_v6 = vld [vmem:[%s11684_s30 + $0xf60] ss:$8 sps:$4 sm:$0xff]   ;;  %v10414_v7 = vld [vmem:[%s11684_s30 + $0xe54] ss:$8 sps:$4 sm:$0xff]  }
 0x20a   : > { %7514 = vmatprep.subr.bf16.mxu1 %v10333_v8  ;;  %v10417_v8 = vld [vmem:[%s11684_s30 + $0xf54] ss:$8 sps:$4 sm:$0xff]  }
 0x20c   : > { %7472 = vmatpush1.bf16.msra.mxu0 %v10328_v9  ;;  %v10412_v9 = vld [vmem:[%s11684_s30 + $0xe50] ss:$8 sps:$4 sm:$0xff]  }
 0x20d   : > { %7515 = vmatpush1.bf16.msra.mxu1 %v10331_v10  ;;  %7473 = vmatprep.subr.bf16.mxu0 %v10336_v11  ;;  %v10415_v10 = vld [vmem:[%s11684_s30 + $0xf50] ss:$8 sps:$4 sm:$0xff]   ;;  %v10420_v11 = vld [vmem:[%s11684_s30 + $0xe44] ss:$8 sps:$4 sm:$0xff]  }
 0x20e   : > { %7516 = vmatprep.subr.bf16.mxu1 %v10339_v12  ;;  %v10423_v12 = vld [vmem:[%s11684_s30 + $0xf44] ss:$8 sps:$4 sm:$0xff]  }
 0x210   : > { %7474 = vmatpush1.bf16.msra.mxu0 %v10334_v13  ;;  %v10418_v13 = vld [vmem:[%s11684_s30 + $0xe40] ss:$8 sps:$4 sm:$0xff]  }
 0x211   : > { %7517 = vmatpush1.bf16.msra.mxu1 %v10337_v14  ;;  %7475 = vmatprep.subr.bf16.mxu0 %v10342_v15  ;;  %v10421_v14 = vld [vmem:[%s11684_s30 + $0xf40] ss:$8 sps:$4 sm:$0xff]   ;;  %v10426_v15 = vld [vmem:[%s11684_s30 + $0xe34] ss:$8 sps:$4 sm:$0xff]  }
 0x212   : > { %7518 = vmatprep.subr.bf16.mxu1 %v10345_v16  ;;  %v10429_v16 = vld [vmem:[%s11684_s30 + $0xf34] ss:$8 sps:$4 sm:$0xff]  }
 0x214   : > { %7476 = vmatpush1.bf16.msra.mxu0 %v10340_v17  ;;  %v10424_v17 = vld [vmem:[%s11684_s30 + $0xe30] ss:$8 sps:$4 sm:$0xff]  }
 0x215   : > { %7519 = vmatpush1.bf16.msra.mxu1 %v10343_v18  ;;  %7477 = vmatprep.subr.bf16.mxu0 %v10348_v19  ;;  %v10427_v18 = vld [vmem:[%s11684_s30 + $0xf30] ss:$8 sps:$4 sm:$0xff]   ;;  %v10432_v19 = vld [vmem:[%s11684_s30 + $0xe24] ss:$8 sps:$4 sm:$0xff]  }
 0x216   : > { %7520 = vmatprep.subr.bf16.mxu1 %v10351_v20  ;;  %v10435_v20 = vld [vmem:[%s11684_s30 + $0xf24] ss:$8 sps:$4 sm:$0xff]  }
 0x218   : > { %7478 = vmatpush1.bf16.msra.mxu0 %v10346_v21  ;;  %v10430_v21 = vld [vmem:[%s11684_s30 + $0xe20] ss:$8 sps:$4 sm:$0xff]  }
 0x219   : > { %7521 = vmatpush1.bf16.msra.mxu1 %v10349_v22  ;;  %7479 = vmatprep.subr.bf16.mxu0 %v10354_v23  ;;  %v10433_v22 = vld [vmem:[%s11684_s30 + $0xf20] ss:$8 sps:$4 sm:$0xff]   ;;  %v10438_v23 = vld [vmem:[%s11684_s30 + $0xe14] ss:$8 sps:$4 sm:$0xff]  }
 0x21a   : > { %7522 = vmatprep.subr.bf16.mxu1 %v10357_v24  ;;  %v10441_v24 = vld [vmem:[%s11684_s30 + $0xf14] ss:$8 sps:$4 sm:$0xff]  }
 0x21c   : > { %7480 = vmatpush2.bf16.msra.mxu0 %v10352_v29  ;;  %v10436_v29 = vld [vmem:[%s11684_s30 + $0xe10] ss:$8 sps:$4 sm:$0xff]  }
 0x21d   : > { %7523 = vmatpush2.bf16.msra.mxu1 %v10355_v30  ;;  %7481 = vmatprep.subr.bf16.mxu0 %v10360_v33  ;;  %v10439_v30 = vld [vmem:[%s11684_s30 + $0xf10] ss:$8 sps:$4 sm:$0xff]   ;;  %v10444_v33 = vld [vmem:[%s11684_s30 + $0xe04] ss:$8 sps:$4 sm:$0xff]  }
 0x21e   : > { %7524 = vmatprep.subr.bf16.mxu1 %v10363_v34  ;;  %v10447_v34 = vld [vmem:[%s11684_s30 + $0xf04] ss:$8 sps:$4 sm:$0xff]  }
 0x220   : > { %7482 = vmatpush2.bf16.msra.mxu0 %v10358_v37  ;;  %v10442_v37 = vld [vmem:[%s11684_s30 + $0xe00] ss:$8 sps:$4 sm:$0xff]  }
 0x221   : > { %7525 = vmatpush2.bf16.msra.mxu1 %v10361_v38  ;;  %7483 = vmatprep.subr.bf16.mxu0 %v10366_v25  ;;  %v10445_v38 = vld [vmem:[%s11684_s30 + $0xf00] ss:$8 sps:$4 sm:$0xff]   ;;  %v10450_v25 = vld [vmem:[%s11684_s30 + $0xef4] ss:$8 sps:$4 sm:$0xff]  }
 0x222   : > { %7526 = vmatprep.subr.bf16.mxu1 %v10369_v26  ;;  %v10453_v26 = vld [vmem:[%s11684_s30 + $0xff4] ss:$8 sps:$4 sm:$0xff]  }
 0x224   : > { %7484 = vmatpush2.bf16.msra.mxu0 %v10364_v27  ;;  %v10448_v27 = vld [vmem:[%s11684_s30 + $0xef0] ss:$8 sps:$4 sm:$0xff]  }
 0x225   : > { %7527 = vmatpush2.bf16.msra.mxu1 %v10367_v28  ;;  %7485 = vmatprep.subr.bf16.mxu0 %v10372_v41  ;;  %v10451_v28 = vld [vmem:[%s11684_s30 + $0xff0] ss:$8 sps:$4 sm:$0xff]   ;;  %v10456_v41 = vld [vmem:[%s11684_s30 + $0xee4] ss:$8 sps:$4 sm:$0xff]  }
 0x226   : > { %7528 = vmatprep.subr.bf16.mxu1 %v10375_v42  ;;  %v10459_v42 = vld [vmem:[%s11684_s30 + $0xfe4] ss:$8 sps:$4 sm:$0xff]  }
 0x228   : > { %7486 = vmatpush2.bf16.msra.mxu0 %v10370_v45  ;;  %v10454_v45 = vld [vmem:[%s11684_s30 + $0xee0] ss:$8 sps:$4 sm:$0xff]  }
 0x229   : > { %7529 = vmatpush2.bf16.msra.mxu1 %v10373_v46  ;;  %7487 = vmatprep.subr.bf16.mxu0 %v10378_v31  ;;  %v10457_v46 = vld [vmem:[%s11684_s30 + $0xfe0] ss:$8 sps:$4 sm:$0xff]   ;;  %v10462_v31 = vld [vmem:[%s11684_s30 + $0xed4] ss:$8 sps:$4 sm:$0xff]  }
 0x22a   : > { %7530 = vmatprep.subr.bf16.mxu1 %v10381_v32  ;;  %v10465_v32 = vld [vmem:[%s11684_s30 + $0xfd4] ss:$8 sps:$4 sm:$0xff]  }
 0x22c   : > { %7488 = vmatpush2.bf16.msra.mxu0 %v10376_v36  ;;  %v10460_v36 = vld [vmem:[%s11684_s30 + $0xed0] ss:$8 sps:$4 sm:$0xff]  }
 0x22d   : > { %7531 = vmatpush2.bf16.msra.mxu1 %v10379_v47  ;;  %7489 = vmatprep.subr.bf16.mxu0 %v10384_v48  ;;  %v10463_v47 = vld [vmem:[%s11684_s30 + $0xfd0] ss:$8 sps:$4 sm:$0xff]   ;;  %v10468_v48 = vld [vmem:[%s11684_s30 + $0xec4] ss:$8 sps:$4 sm:$0xff]  }
 0x22e   : > { %7532 = vmatprep.subr.bf16.mxu1 %v10387_v52  ;;  %v10471_v52 = vld [vmem:[%s11684_s30 + $0xfc4] ss:$8 sps:$4 sm:$0xff]  }
 0x230   : > { %7490 = vmatpush2.bf16.msra.mxu0 %v10382_v53  ;;  %v10466_v53 = vld [vmem:[%s11684_s30 + $0xec0] ss:$8 sps:$4 sm:$0xff]  }
 0x231   : > { %7533 = vmatpush2.bf16.msra.mxu1 %v10385_v39  ;;  %7491 = vmatprep.subr.bf16.mxu0 %v10390_v40  ;;  %v10469_v39 = vld [vmem:[%s11684_s30 + $0xfc0] ss:$8 sps:$4 sm:$0xff]   ;;  %v10474_v40 = vld [vmem:[%s11684_s30 + $0xeb4] ss:$8 sps:$4 sm:$0xff]  }
 0x232   : > { %7534 = vmatprep.subr.bf16.mxu1 %v10393_v54  ;;  %v10477_v54 = vld [vmem:[%s11684_s30 + $0xfb4] ss:$8 sps:$4 sm:$0xff]  }
 0x234   : > { %7492 = vmatpush2.bf16.msra.mxu0 %v10388_v44  ;;  %v10472_v44 = vld [vmem:[%s11684_s30 + $0xeb0] ss:$8 sps:$4 sm:$0xff]  }
 0x235   : > { %7535 = vmatpush2.bf16.msra.mxu1 %v10391_v55  ;;  %7493 = vmatprep.subr.bf16.mxu0 %v10396_v56  ;;  %v10475_v55 = vld [vmem:[%s11684_s30 + $0xfb0] ss:$8 sps:$4 sm:$0xff]   ;;  %v10480_v56 = vld [vmem:[%s11684_s30 + $0xea4] ss:$8 sps:$4 sm:$0xff]  }
 0x236   : > { %7536 = vmatprep.subr.bf16.mxu1 %v10399_v60  ;;  %v10483_v60 = vld [vmem:[%s11684_s30 + $0xfa4] ss:$8 sps:$4 sm:$0xff]  }
 0x238   : > { %7494 = vmatpush2.bf16.msra.mxu0 %v10394_v61  ;;  %v10478_v61 = vld [vmem:[%s11684_s30 + $0xea0] ss:$8 sps:$4 sm:$0xff]  }
 0x239   : > { %7537 = vmatpush2.bf16.msra.mxu1 %v10397_v35  ;;  %7549 = vmatprep.subr.bf16.mxu0 %v10402_v49  ;;  %v10481_v35 = vld [vmem:[%s11684_s30 + $0xfa0] ss:$8 sps:$4 sm:$0xff]   ;;  %v10486_v49 = vld [vmem:[%s11684_s30 + $0xe94] ss:$8 sps:$4 sm:$0xff]  }
 0x23a   : > { %7592 = vmatprep.subr.bf16.mxu1 %v10405_v62  ;;  %v10489_v62 = vld [vmem:[%s11684_s30 + $0xf94] ss:$8 sps:$4 sm:$0xff]  }
 0x23b   : > { %7496 = vmatmul.mubr.bf16.vlgmr.msra.gmra.mxu0 %v8553_v63  ;;  %v10487_v63 = vld [vmem:[%s11684_s30 + $0xf90] ss:$8 sps:$4 sm:$0xff]  }
 0x23c   : > { %7539 = vmatmul.mubr.bf16.vlgmr.msra.gmra.mxu1 %v8555_v0  ;;  %7550 = vmatpush1.bf16.msra.mxu0 %v10400_v51  ;;  %v10484_v51 = vld [vmem:[%s11684_s30 + $0xe90] ss:$8 sps:$4 sm:$0xff]   ;;  %v10492_v0 = vld [vmem:[%s11684_s30 + $0xe84] ss:$8 sps:$4 sm:$0xff]  }
 0x23d   : > { %7593 = vmatpush1.bf16.msra.mxu1 %v10403_v4  ;;  %7551 = vmatprep.subr.bf16.mxu0 %v10408_v5  ;;  %v10495_v4 = vld [vmem:[%s11684_s30 + $0xf84] ss:$8 sps:$4 sm:$0xff]   ;;  %v10490_v5 = vld [vmem:[%s11684_s30 + $0xe80] ss:$8 sps:$4 sm:$0xff]  }
 0x23e   : > { %7594 = vmatprep.subr.bf16.mxu1 %v10411_v43  ;;  %7581 = vmatprep.mubr.bf16.mxu0 %v8558_v58  ;;  %v10493_v43 = vld [vmem:[%s11684_s30 + $0xf80] ss:$8 sps:$4 sm:$0xff]  }
 0x23f   : > { %7624 = vmatprep.mubr.bf16.mxu1 %v8560_v59  ;;  %v12356_v58 = vld [vmem:[%s11682_s8 + $0x80] sm:$0xff]  ;;  %v10496_v59 = vld [vmem:[%s11684_s30 + $0x1070] ss:$8 sps:$4 sm:$0xff]  }
 0x240   : > { %7552 = vmatpush1.bf16.msra.mxu0 %v10406_v57  ;;  %v10498_v57 = vld [vmem:[%s11684_s30 + $0x1074] ss:$8 sps:$4 sm:$0xff]  }
 0x241   : > { %7595 = vmatpush1.bf16.msra.mxu1 %v10409_v6  ;;  %7553 = vmatprep.subr.bf16.mxu0 %v10414_v7  ;;  %v10501_v6 = vld [vmem:[%s11684_s30 + $0x1174] ss:$8 sps:$4 sm:$0xff]   ;;  %v8557_v7 = vcombine.low %v12272_v50, %v12280_v1  ;;  %v10507_v50 = vld [vmem:[%s11684_s30 + $0x1164] ss:$8 sps:$4 sm:$0xff]   ;;  %v10502_v1 = vld [vmem:[%s11684_s30 + $0x1060] ss:$8 sps:$4 sm:$0xff]  }
 0x242   : > { %7596 = vmatprep.subr.bf16.mxu1 %v10417_v8  ;;  %v8559_v8 = vcombine.low %v12283_v2, %v12286_v3 }
 0x244   : > { %7554 = vmatpush1.bf16.msra.mxu0 %v10412_v9  ;;  %v12364_v9 = vld [vmem:[%s11682_s8 + $0x180] sm:$0xff] }
 0x245   : > { %7597 = vmatpush1.bf16.msra.mxu1 %v10415_v10  ;;  %7555 = vmatprep.subr.bf16.mxu0 %v10420_v11  ;;  %v12367_v10 = vld [vmem:[%s11682_s8 + $0x88] sm:$0xff]  ;;  %v8562_v2 = vcombine.high %v12356_v58, %v12364_v9 }
 0x246   : > { %7598 = vmatprep.subr.bf16.mxu1 %v10423_v12  ;;  %v12370_v11 = vld [vmem:[%s11682_s8 + $0x188] sm:$0xff]  ;;  %v10499_v12 = vld [vmem:[%s11684_s30 + $0x1170] ss:$8 sps:$4 sm:$0xff]  }
 0x247   : > { %v8564_v3 = vcombine.high %v12367_v10, %v12370_v11 }
 0x248   : > { %7556 = vmatpush1.bf16.msra.mxu0 %v10418_v13  ;;  %v10504_v13 = vld [vmem:[%s11684_s30 + $0x1064] ss:$8 sps:$4 sm:$0xff]  }
 0x249   : > { %7599 = vmatpush1.bf16.msra.mxu1 %v10421_v14  ;;  %7557 = vmatprep.subr.bf16.mxu0 %v10426_v15  ;;  %v10505_v14 = vld [vmem:[%s11684_s30 + $0x1160] ss:$8 sps:$4 sm:$0xff]   ;;  %v10510_v15 = vld [vmem:[%s11684_s30 + $0x1054] ss:$8 sps:$4 sm:$0xff]  }
 0x24a   : > { %7600 = vmatprep.subr.bf16.mxu1 %v10429_v16  ;;  %v10513_v16 = vld [vmem:[%s11684_s30 + $0x1154] ss:$8 sps:$4 sm:$0xff]  }
 0x24c   : > { %7558 = vmatpush1.bf16.msra.mxu0 %v10424_v17  ;;  %v10508_v17 = vld [vmem:[%s11684_s30 + $0x1050] ss:$8 sps:$4 sm:$0xff]  }
 0x24d   : > { %7601 = vmatpush1.bf16.msra.mxu1 %v10427_v18  ;;  %7559 = vmatprep.subr.bf16.mxu0 %v10432_v19  ;;  %v10511_v18 = vld [vmem:[%s11684_s30 + $0x1150] ss:$8 sps:$4 sm:$0xff]   ;;  %v10516_v19 = vld [vmem:[%s11684_s30 + $0x1044] ss:$8 sps:$4 sm:$0xff]  }
 0x24e   : > { %7602 = vmatprep.subr.bf16.mxu1 %v10435_v20  ;;  %v10519_v20 = vld [vmem:[%s11684_s30 + $0x1144] ss:$8 sps:$4 sm:$0xff]  }
 0x250   : > { %7560 = vmatpush1.bf16.msra.mxu0 %v10430_v21  ;;  %v10514_v21 = vld [vmem:[%s11684_s30 + $0x1040] ss:$8 sps:$4 sm:$0xff]  }
 0x251   : > { %7603 = vmatpush1.bf16.msra.mxu1 %v10433_v22  ;;  %7561 = vmatprep.subr.bf16.mxu0 %v10438_v23  ;;  %v10517_v22 = vld [vmem:[%s11684_s30 + $0x1140] ss:$8 sps:$4 sm:$0xff]   ;;  %v10522_v23 = vld [vmem:[%s11684_s30 + $0x1034] ss:$8 sps:$4 sm:$0xff]  }
 0x252   : > { %7604 = vmatprep.subr.bf16.mxu1 %v10441_v24  ;;  %v10525_v24 = vld [vmem:[%s11684_s30 + $0x1134] ss:$8 sps:$4 sm:$0xff]  }
 0x254   : > { %7562 = vmatpush1.bf16.msra.mxu0 %v10436_v29  ;;  %v10520_v29 = vld [vmem:[%s11684_s30 + $0x1030] ss:$8 sps:$4 sm:$0xff]  }
 0x255   : > { %7605 = vmatpush1.bf16.msra.mxu1 %v10439_v30  ;;  %7563 = vmatprep.subr.bf16.mxu0 %v10444_v33  ;;  %v10523_v30 = vld [vmem:[%s11684_s30 + $0x1130] ss:$8 sps:$4 sm:$0xff]   ;;  %v10528_v33 = vld [vmem:[%s11684_s30 + $0x1024] ss:$8 sps:$4 sm:$0xff]  }
 0x256   : > { %7606 = vmatprep.subr.bf16.mxu1 %v10447_v34  ;;  %v10531_v34 = vld [vmem:[%s11684_s30 + $0x1124] ss:$8 sps:$4 sm:$0xff]  }
 0x258   : > { %7564 = vmatpush1.bf16.msra.mxu0 %v10442_v37  ;;  %v10526_v37 = vld [vmem:[%s11684_s30 + $0x1020] ss:$8 sps:$4 sm:$0xff]  }
 0x259   : > { %7607 = vmatpush1.bf16.msra.mxu1 %v10445_v38  ;;  %7565 = vmatprep.subr.bf16.mxu0 %v10450_v25  ;;  %v10529_v38 = vld [vmem:[%s11684_s30 + $0x1120] ss:$8 sps:$4 sm:$0xff]   ;;  %v10534_v25 = vld [vmem:[%s11684_s30 + $0x1014] ss:$8 sps:$4 sm:$0xff]  }
 0x25a   : > { %7608 = vmatprep.subr.bf16.mxu1 %v10453_v26  ;;  %v10537_v26 = vld [vmem:[%s11684_s30 + $0x1114] ss:$8 sps:$4 sm:$0xff]  }
 0x25c   : > { %7566 = vmatpush2.bf16.msra.mxu0 %v10448_v27  ;;  %v10532_v27 = vld [vmem:[%s11684_s30 + $0x1010] ss:$8 sps:$4 sm:$0xff]  }
 0x25d   : > { %7609 = vmatpush2.bf16.msra.mxu1 %v10451_v28  ;;  %7567 = vmatprep.subr.bf16.mxu0 %v10456_v41  ;;  %v10535_v28 = vld [vmem:[%s11684_s30 + $0x1110] ss:$8 sps:$4 sm:$0xff]   ;;  %v10540_v41 = vld [vmem:[%s11684_s30 + $0x1004] ss:$8 sps:$4 sm:$0xff]  }
 0x25e   : > { %7610 = vmatprep.subr.bf16.mxu1 %v10459_v42  ;;  %v10543_v42 = vld [vmem:[%s11684_s30 + $0x1104] ss:$8 sps:$4 sm:$0xff]  }
 0x260   : > { %7568 = vmatpush2.bf16.msra.mxu0 %v10454_v45  ;;  %v10538_v45 = vld [vmem:[%s11684_s30 + $0x1000] ss:$8 sps:$4 sm:$0xff]  }
 0x261   : > { %7611 = vmatpush2.bf16.msra.mxu1 %v10457_v46  ;;  %7569 = vmatprep.subr.bf16.mxu0 %v10462_v31  ;;  %v10541_v46 = vld [vmem:[%s11684_s30 + $0x1100] ss:$8 sps:$4 sm:$0xff]   ;;  %v10546_v31 = vld [vmem:[%s11684_s30 + $0x10f4] ss:$8 sps:$4 sm:$0xff]  }
 0x262   : > { %7612 = vmatprep.subr.bf16.mxu1 %v10465_v32  ;;  %v10549_v32 = vld [vmem:[%s11684_s30 + $0x11f4] ss:$8 sps:$4 sm:$0xff]  }
 0x264   : > { %7570 = vmatpush2.bf16.msra.mxu0 %v10460_v36  ;;  %v10544_v36 = vld [vmem:[%s11684_s30 + $0x10f0] ss:$8 sps:$4 sm:$0xff]  }
 0x265   : > { %7613 = vmatpush2.bf16.msra.mxu1 %v10463_v47  ;;  %7571 = vmatprep.subr.bf16.mxu0 %v10468_v48  ;;  %v10547_v47 = vld [vmem:[%s11684_s30 + $0x11f0] ss:$8 sps:$4 sm:$0xff]   ;;  %v10552_v48 = vld [vmem:[%s11684_s30 + $0x10e4] ss:$8 sps:$4 sm:$0xff]  }
 0x266   : > { %7614 = vmatprep.subr.bf16.mxu1 %v10471_v52  ;;  %v10555_v52 = vld [vmem:[%s11684_s30 + $0x11e4] ss:$8 sps:$4 sm:$0xff]  }
 0x268   : > { %7572 = vmatpush2.bf16.msra.mxu0 %v10466_v53  ;;  %v10550_v53 = vld [vmem:[%s11684_s30 + $0x10e0] ss:$8 sps:$4 sm:$0xff]  }
 0x269   : > { %7615 = vmatpush2.bf16.msra.mxu1 %v10469_v39  ;;  %7573 = vmatprep.subr.bf16.mxu0 %v10474_v40  ;;  %v10553_v39 = vld [vmem:[%s11684_s30 + $0x11e0] ss:$8 sps:$4 sm:$0xff]   ;;  %v10558_v40 = vld [vmem:[%s11684_s30 + $0x10d4] ss:$8 sps:$4 sm:$0xff]  }
 0x26a   : > { %7616 = vmatprep.subr.bf16.mxu1 %v10477_v54  ;;  %v10561_v54 = vld [vmem:[%s11684_s30 + $0x11d4] ss:$8 sps:$4 sm:$0xff]  }
 0x26c   : > { %7574 = vmatpush2.bf16.msra.mxu0 %v10472_v44  ;;  %v10556_v44 = vld [vmem:[%s11684_s30 + $0x10d0] ss:$8 sps:$4 sm:$0xff]  }
 0x26d   : > { %7617 = vmatpush2.bf16.msra.mxu1 %v10475_v55  ;;  %7575 = vmatprep.subr.bf16.mxu0 %v10480_v56  ;;  %v10559_v55 = vld [vmem:[%s11684_s30 + $0x11d0] ss:$8 sps:$4 sm:$0xff]   ;;  %v10564_v56 = vld [vmem:[%s11684_s30 + $0x10c4] ss:$8 sps:$4 sm:$0xff]  }
 0x26e   : > { %7618 = vmatprep.subr.bf16.mxu1 %v10483_v60  ;;  %v10567_v60 = vld [vmem:[%s11684_s30 + $0x11c4] ss:$8 sps:$4 sm:$0xff]  }
 0x270   : > { %7576 = vmatpush2.bf16.msra.mxu0 %v10478_v61  ;;  %v10562_v61 = vld [vmem:[%s11684_s30 + $0x10c0] ss:$8 sps:$4 sm:$0xff]  }
 0x271   : > { %7619 = vmatpush2.bf16.msra.mxu1 %v10481_v35  ;;  %7577 = vmatprep.subr.bf16.mxu0 %v10486_v49  ;;  %v10565_v35 = vld [vmem:[%s11684_s30 + $0x11c0] ss:$8 sps:$4 sm:$0xff]   ;;  %v10570_v49 = vld [vmem:[%s11684_s30 + $0x10b4] ss:$8 sps:$4 sm:$0xff]  }
 0x272   : > { %7620 = vmatprep.subr.bf16.mxu1 %v10489_v62  ;;  %v10573_v62 = vld [vmem:[%s11684_s30 + $0x11b4] ss:$8 sps:$4 sm:$0xff]  }
 0x274   : > { %7578 = vmatpush2.bf16.msra.mxu0 %v10484_v51  ;;  %v10568_v51 = vld [vmem:[%s11684_s30 + $0x10b0] ss:$8 sps:$4 sm:$0xff]  }
 0x275   : > { %7621 = vmatpush2.bf16.msra.mxu1 %v10487_v63  ;;  %7579 = vmatprep.subr.bf16.mxu0 %v10492_v0  ;;  %v10571_v63 = vld [vmem:[%s11684_s30 + $0x11b0] ss:$8 sps:$4 sm:$0xff]   ;;  %v10576_v0 = vld [vmem:[%s11684_s30 + $0x10a4] ss:$8 sps:$4 sm:$0xff]  }
 0x276   : > { %7622 = vmatprep.subr.bf16.mxu1 %v10495_v4  ;;  %v10579_v4 = vld [vmem:[%s11684_s30 + $0x11a4] ss:$8 sps:$4 sm:$0xff]  }
 0x278   : > { %7580 = vmatpush2.bf16.msra.mxu0 %v10490_v5  ;;  %v10574_v5 = vld [vmem:[%s11684_s30 + $0x10a0] ss:$8 sps:$4 sm:$0xff]  }
 0x279   : > { %7623 = vmatpush2.bf16.msra.mxu1 %v10493_v43  ;;  %7635 = vmatprep.subr.bf16.mxu0 %v10498_v57  ;;  %v10577_v43 = vld [vmem:[%s11684_s30 + $0x11a0] ss:$8 sps:$4 sm:$0xff]   ;;  %v10582_v57 = vld [vmem:[%s11684_s30 + $0x1094] ss:$8 sps:$4 sm:$0xff]  }
 0x27a   : > { %7678 = vmatprep.subr.bf16.mxu1 %v10501_v6  ;;  %v10585_v6 = vld [vmem:[%s11684_s30 + $0x1194] ss:$8 sps:$4 sm:$0xff]  }
 0x27b   : > { %7582 = vmatmul.mubr.bf16.vlgmr.msra.gmra.mxu0 %v8557_v7  ;;  %v10583_v7 = vld [vmem:[%s11684_s30 + $0x1190] ss:$8 sps:$4 sm:$0xff]  }
 0x27c   : > { %7625 = vmatmul.mubr.bf16.vlgmr.msra.gmra.mxu1 %v8559_v8  ;;  %7636 = vmatpush1.bf16.msra.mxu0 %v10496_v59  ;;  %v10580_v59 = vld [vmem:[%s11684_s30 + $0x1090] ss:$8 sps:$4 sm:$0xff]   ;;  %v10588_v8 = vld [vmem:[%s11684_s30 + $0x1084] ss:$8 sps:$4 sm:$0xff]  }
 0x27d   : > { %7679 = vmatpush1.bf16.msra.mxu1 %v10499_v12  ;;  %7637 = vmatprep.subr.bf16.mxu0 %v10504_v13  ;;  %v10591_v12 = vld [vmem:[%s11684_s30 + $0x1184] ss:$8 sps:$4 sm:$0xff]   ;;  %v10586_v13 = vld [vmem:[%s11684_s30 + $0x1080] ss:$8 sps:$4 sm:$0xff]  }
 0x27e   : > { %7680 = vmatprep.subr.bf16.mxu1 %v10507_v50  ;;  %7667 = vmatprep.mubr.bf16.mxu0 %v8562_v2  ;;  %v10589_v50 = vld [vmem:[%s11684_s30 + $0x1180] ss:$8 sps:$4 sm:$0xff]   ;;  %v12440_v2 = vld [vmem:[%s11682_s8 + $0x90] sm:$0xff] }
 0x27f   : > { %7710 = vmatprep.mubr.bf16.mxu1 %v8564_v3  ;;  %v10592_v3 = vld [vmem:[%s11684_s30 + $0x1270] ss:$8 sps:$4 sm:$0xff]  }
 0x280   : > { %7638 = vmatpush1.bf16.msra.mxu0 %v10502_v1  ;;  %v10594_v1 = vld [vmem:[%s11684_s30 + $0x1274] ss:$8 sps:$4 sm:$0xff]  }
 0x281   : > { %7681 = vmatpush1.bf16.msra.mxu1 %v10505_v14  ;;  %7639 = vmatprep.subr.bf16.mxu0 %v10510_v15  ;;  %v10597_v14 = vld [vmem:[%s11684_s30 + $0x1374] ss:$8 sps:$4 sm:$0xff]   ;;  %v8561_v15 = vcombine.low %v12356_v58, %v12364_v9  ;;  %v10603_v58 = vld [vmem:[%s11684_s30 + $0x1364] ss:$8 sps:$4 sm:$0xff]   ;;  %v10598_v9 = vld [vmem:[%s11684_s30 + $0x1260] ss:$8 sps:$4 sm:$0xff]  }
 0x282   : > { %7682 = vmatprep.subr.bf16.mxu1 %v10513_v16  ;;  %v8563_v16 = vcombine.low %v12367_v10, %v12370_v11 }
 0x284   : > { %7640 = vmatpush1.bf16.msra.mxu0 %v10508_v17  ;;  %v12448_v17 = vld [vmem:[%s11682_s8 + $0x190] sm:$0xff] }
 0x285   : > { %7683 = vmatpush1.bf16.msra.mxu1 %v10511_v18  ;;  %7641 = vmatprep.subr.bf16.mxu0 %v10516_v19  ;;  %v12451_v18 = vld [vmem:[%s11682_s8 + $0x98] sm:$0xff]  ;;  %v8566_v10 = vcombine.high %v12440_v2, %v12448_v17 }
 0x286   : > { %7684 = vmatprep.subr.bf16.mxu1 %v10519_v20  ;;  %v12454_v19 = vld [vmem:[%s11682_s8 + $0x198] sm:$0xff] }
 0x287   : > { %v10595_v20 = vld [vmem:[%s11684_s30 + $0x1370] ss:$8 sps:$4 sm:$0xff]   ;;  %v8568_v11 = vcombine.high %v12451_v18, %v12454_v19 }
 0x288   : > { %7642 = vmatpush1.bf16.msra.mxu0 %v10514_v21  ;;  %v10600_v21 = vld [vmem:[%s11684_s30 + $0x1264] ss:$8 sps:$4 sm:$0xff]  }
 0x289   : > { %7685 = vmatpush1.bf16.msra.mxu1 %v10517_v22  ;;  %7643 = vmatprep.subr.bf16.mxu0 %v10522_v23  ;;  %v10601_v22 = vld [vmem:[%s11684_s30 + $0x1360] ss:$8 sps:$4 sm:$0xff]   ;;  %v10606_v23 = vld [vmem:[%s11684_s30 + $0x1254] ss:$8 sps:$4 sm:$0xff]  }
 0x28a   : > { %7686 = vmatprep.subr.bf16.mxu1 %v10525_v24  ;;  %v10609_v24 = vld [vmem:[%s11684_s30 + $0x1354] ss:$8 sps:$4 sm:$0xff]  }
 0x28c   : > { %7644 = vmatpush1.bf16.msra.mxu0 %v10520_v29  ;;  %v10604_v29 = vld [vmem:[%s11684_s30 + $0x1250] ss:$8 sps:$4 sm:$0xff]  }
 0x28d   : > { %7687 = vmatpush1.bf16.msra.mxu1 %v10523_v30  ;;  %7645 = vmatprep.subr.bf16.mxu0 %v10528_v33  ;;  %v10607_v30 = vld [vmem:[%s11684_s30 + $0x1350] ss:$8 sps:$4 sm:$0xff]   ;;  %v10612_v33 = vld [vmem:[%s11684_s30 + $0x1244] ss:$8 sps:$4 sm:$0xff]  }
 0x28e   : > { %7688 = vmatprep.subr.bf16.mxu1 %v10531_v34  ;;  %v10615_v34 = vld [vmem:[%s11684_s30 + $0x1344] ss:$8 sps:$4 sm:$0xff]  }
 0x290   : > { %7646 = vmatpush1.bf16.msra.mxu0 %v10526_v37  ;;  %v10610_v37 = vld [vmem:[%s11684_s30 + $0x1240] ss:$8 sps:$4 sm:$0xff]  }
 0x291   : > { %7689 = vmatpush1.bf16.msra.mxu1 %v10529_v38  ;;  %7647 = vmatprep.subr.bf16.mxu0 %v10534_v25  ;;  %v10613_v38 = vld [vmem:[%s11684_s30 + $0x1340] ss:$8 sps:$4 sm:$0xff]   ;;  %v10618_v25 = vld [vmem:[%s11684_s30 + $0x1234] ss:$8 sps:$4 sm:$0xff]  }
 0x292   : > { %7690 = vmatprep.subr.bf16.mxu1 %v10537_v26  ;;  %v10621_v26 = vld [vmem:[%s11684_s30 + $0x1334] ss:$8 sps:$4 sm:$0xff]  }
 0x294   : > { %7648 = vmatpush1.bf16.msra.mxu0 %v10532_v27  ;;  %v10616_v27 = vld [vmem:[%s11684_s30 + $0x1230] ss:$8 sps:$4 sm:$0xff]  }
 0x295   : > { %7691 = vmatpush1.bf16.msra.mxu1 %v10535_v28  ;;  %7649 = vmatprep.subr.bf16.mxu0 %v10540_v41  ;;  %v10619_v28 = vld [vmem:[%s11684_s30 + $0x1330] ss:$8 sps:$4 sm:$0xff]   ;;  %v10624_v41 = vld [vmem:[%s11684_s30 + $0x1224] ss:$8 sps:$4 sm:$0xff]  }
 0x296   : > { %7692 = vmatprep.subr.bf16.mxu1 %v10543_v42  ;;  %v10627_v42 = vld [vmem:[%s11684_s30 + $0x1324] ss:$8 sps:$4 sm:$0xff]  }
 0x298   : > { %7650 = vmatpush1.bf16.msra.mxu0 %v10538_v45  ;;  %v10622_v45 = vld [vmem:[%s11684_s30 + $0x1220] ss:$8 sps:$4 sm:$0xff]  }
 0x299   : > { %7693 = vmatpush1.bf16.msra.mxu1 %v10541_v46  ;;  %7651 = vmatprep.subr.bf16.mxu0 %v10546_v31  ;;  %v10625_v46 = vld [vmem:[%s11684_s30 + $0x1320] ss:$8 sps:$4 sm:$0xff]   ;;  %v10630_v31 = vld [vmem:[%s11684_s30 + $0x1214] ss:$8 sps:$4 sm:$0xff]  }
 0x29a   : > { %7694 = vmatprep.subr.bf16.mxu1 %v10549_v32  ;;  %v10633_v32 = vld [vmem:[%s11684_s30 + $0x1314] ss:$8 sps:$4 sm:$0xff]  }
 0x29c   : > { %7652 = vmatpush2.bf16.msra.mxu0 %v10544_v36  ;;  %v10628_v36 = vld [vmem:[%s11684_s30 + $0x1210] ss:$8 sps:$4 sm:$0xff]  }
 0x29d   : > { %7695 = vmatpush2.bf16.msra.mxu1 %v10547_v47  ;;  %7653 = vmatprep.subr.bf16.mxu0 %v10552_v48  ;;  %v10631_v47 = vld [vmem:[%s11684_s30 + $0x1310] ss:$8 sps:$4 sm:$0xff]   ;;  %v10636_v48 = vld [vmem:[%s11684_s30 + $0x1204] ss:$8 sps:$4 sm:$0xff]  }
 0x29e   : > { %7696 = vmatprep.subr.bf16.mxu1 %v10555_v52  ;;  %v10639_v52 = vld [vmem:[%s11684_s30 + $0x1304] ss:$8 sps:$4 sm:$0xff]  }
 0x2a0   : > { %7654 = vmatpush2.bf16.msra.mxu0 %v10550_v53  ;;  %v10634_v53 = vld [vmem:[%s11684_s30 + $0x1200] ss:$8 sps:$4 sm:$0xff]  }
 0x2a1   : > { %7697 = vmatpush2.bf16.msra.mxu1 %v10553_v39  ;;  %7655 = vmatprep.subr.bf16.mxu0 %v10558_v40  ;;  %v10637_v39 = vld [vmem:[%s11684_s30 + $0x1300] ss:$8 sps:$4 sm:$0xff]   ;;  %v10642_v40 = vld [vmem:[%s11684_s30 + $0x12f4] ss:$8 sps:$4 sm:$0xff]  }
 0x2a2   : > { %7698 = vmatprep.subr.bf16.mxu1 %v10561_v54  ;;  %v10645_v54 = vld [vmem:[%s11684_s30 + $0x13f4] ss:$8 sps:$4 sm:$0xff]  }
 0x2a4   : > { %7656 = vmatpush2.bf16.msra.mxu0 %v10556_v44  ;;  %v10640_v44 = vld [vmem:[%s11684_s30 + $0x12f0] ss:$8 sps:$4 sm:$0xff]  }
 0x2a5   : > { %7699 = vmatpush2.bf16.msra.mxu1 %v10559_v55  ;;  %7657 = vmatprep.subr.bf16.mxu0 %v10564_v56  ;;  %v10643_v55 = vld [vmem:[%s11684_s30 + $0x13f0] ss:$8 sps:$4 sm:$0xff]   ;;  %v10648_v56 = vld [vmem:[%s11684_s30 + $0x12e4] ss:$8 sps:$4 sm:$0xff]  }
 0x2a6   : > { %7700 = vmatprep.subr.bf16.mxu1 %v10567_v60  ;;  %v10651_v60 = vld [vmem:[%s11684_s30 + $0x13e4] ss:$8 sps:$4 sm:$0xff]  }
 0x2a8   : > { %7658 = vmatpush2.bf16.msra.mxu0 %v10562_v61  ;;  %v10646_v61 = vld [vmem:[%s11684_s30 + $0x12e0] ss:$8 sps:$4 sm:$0xff]  }
 0x2a9   : > { %7701 = vmatpush2.bf16.msra.mxu1 %v10565_v35  ;;  %7659 = vmatprep.subr.bf16.mxu0 %v10570_v49  ;;  %v10649_v35 = vld [vmem:[%s11684_s30 + $0x13e0] ss:$8 sps:$4 sm:$0xff]   ;;  %v10654_v49 = vld [vmem:[%s11684_s30 + $0x12d4] ss:$8 sps:$4 sm:$0xff]  }
 0x2aa   : > { %7702 = vmatprep.subr.bf16.mxu1 %v10573_v62  ;;  %v10657_v62 = vld [vmem:[%s11684_s30 + $0x13d4] ss:$8 sps:$4 sm:$0xff]  }
 0x2ac   : > { %7660 = vmatpush2.bf16.msra.mxu0 %v10568_v51  ;;  %v10652_v51 = vld [vmem:[%s11684_s30 + $0x12d0] ss:$8 sps:$4 sm:$0xff]  }
 0x2ad   : > { %7703 = vmatpush2.bf16.msra.mxu1 %v10571_v63  ;;  %7661 = vmatprep.subr.bf16.mxu0 %v10576_v0  ;;  %v10655_v63 = vld [vmem:[%s11684_s30 + $0x13d0] ss:$8 sps:$4 sm:$0xff]   ;;  %v10660_v0 = vld [vmem:[%s11684_s30 + $0x12c4] ss:$8 sps:$4 sm:$0xff]  }
 0x2ae   : > { %7704 = vmatprep.subr.bf16.mxu1 %v10579_v4  ;;  %v10663_v4 = vld [vmem:[%s11684_s30 + $0x13c4] ss:$8 sps:$4 sm:$0xff]  }
 0x2b0   : > { %7662 = vmatpush2.bf16.msra.mxu0 %v10574_v5  ;;  %v10658_v5 = vld [vmem:[%s11684_s30 + $0x12c0] ss:$8 sps:$4 sm:$0xff]  }
 0x2b1   : > { %7705 = vmatpush2.bf16.msra.mxu1 %v10577_v43  ;;  %7663 = vmatprep.subr.bf16.mxu0 %v10582_v57  ;;  %v10661_v43 = vld [vmem:[%s11684_s30 + $0x13c0] ss:$8 sps:$4 sm:$0xff]   ;;  %v10666_v57 = vld [vmem:[%s11684_s30 + $0x12b4] ss:$8 sps:$4 sm:$0xff]  }
 0x2b2   : > { %7706 = vmatprep.subr.bf16.mxu1 %v10585_v6  ;;  %v10669_v6 = vld [vmem:[%s11684_s30 + $0x13b4] ss:$8 sps:$4 sm:$0xff]  }
 0x2b4   : > { %7664 = vmatpush2.bf16.msra.mxu0 %v10580_v59  ;;  %v10664_v59 = vld [vmem:[%s11684_s30 + $0x12b0] ss:$8 sps:$4 sm:$0xff]  }
 0x2b5   : > { %7707 = vmatpush2.bf16.msra.mxu1 %v10583_v7  ;;  %7665 = vmatprep.subr.bf16.mxu0 %v10588_v8  ;;  %v10667_v7 = vld [vmem:[%s11684_s30 + $0x13b0] ss:$8 sps:$4 sm:$0xff]   ;;  %v10672_v8 = vld [vmem:[%s11684_s30 + $0x12a4] ss:$8 sps:$4 sm:$0xff]  }
 0x2b6   : > { %7708 = vmatprep.subr.bf16.mxu1 %v10591_v12  ;;  %v10675_v12 = vld [vmem:[%s11684_s30 + $0x13a4] ss:$8 sps:$4 sm:$0xff]  }
 0x2b8   : > { %7666 = vmatpush2.bf16.msra.mxu0 %v10586_v13  ;;  %v10670_v13 = vld [vmem:[%s11684_s30 + $0x12a0] ss:$8 sps:$4 sm:$0xff]  }
 0x2b9   : > { %7709 = vmatpush2.bf16.msra.mxu1 %v10589_v50  ;;  %7721 = vmatprep.subr.bf16.mxu0 %v10594_v1  ;;  %v10673_v50 = vld [vmem:[%s11684_s30 + $0x13a0] ss:$8 sps:$4 sm:$0xff]   ;;  %v10678_v1 = vld [vmem:[%s11684_s30 + $0x1294] ss:$8 sps:$4 sm:$0xff]  }
 0x2ba   : > { %7764 = vmatprep.subr.bf16.mxu1 %v10597_v14  ;;  %v10681_v14 = vld [vmem:[%s11684_s30 + $0x1394] ss:$8 sps:$4 sm:$0xff]  }
 0x2bb   : > { %7668 = vmatmul.mubr.bf16.vlgmr.msra.gmra.mxu0 %v8561_v15  ;;  %v10679_v15 = vld [vmem:[%s11684_s30 + $0x1390] ss:$8 sps:$4 sm:$0xff]  }
 0x2bc   : > { %7711 = vmatmul.mubr.bf16.vlgmr.msra.gmra.mxu1 %v8563_v16  ;;  %7722 = vmatpush1.bf16.msra.mxu0 %v10592_v3  ;;  %v10676_v3 = vld [vmem:[%s11684_s30 + $0x1290] ss:$8 sps:$4 sm:$0xff]   ;;  %v10684_v16 = vld [vmem:[%s11684_s30 + $0x1284] ss:$8 sps:$4 sm:$0xff]  }
 0x2bd   : > { %7765 = vmatpush1.bf16.msra.mxu1 %v10595_v20  ;;  %7723 = vmatprep.subr.bf16.mxu0 %v10600_v21  ;;  %v10687_v20 = vld [vmem:[%s11684_s30 + $0x1384] ss:$8 sps:$4 sm:$0xff]   ;;  %v10682_v21 = vld [vmem:[%s11684_s30 + $0x1280] ss:$8 sps:$4 sm:$0xff]  }
 0x2be   : > { %7766 = vmatprep.subr.bf16.mxu1 %v10603_v58  ;;  %7753 = vmatprep.mubr.bf16.mxu0 %v8566_v10  ;;  %v10685_v58 = vld [vmem:[%s11684_s30 + $0x1380] ss:$8 sps:$4 sm:$0xff]  }
 0x2bf   : > { %7796 = vmatprep.mubr.bf16.mxu1 %v8568_v11  ;;  %v12524_v10 = vld [vmem:[%s11682_s8 + $0xa0] sm:$0xff]  ;;  %v8565_v11 = vcombine.low %v12440_v2, %v12448_v17 }
 0x2c0   : > { %7724 = vmatpush1.bf16.msra.mxu0 %v10598_v9  ;;  %v10690_v9 = vld [vmem:[%s11684_s30 + $0x1474] ss:$8 sps:$4 sm:$0xff]   ;;  %v10696_v2 = vld [vmem:[%s11684_s30 + $0x1464] ss:$8 sps:$4 sm:$0xff]  }
 0x2c1   : > { %7767 = vmatpush1.bf16.msra.mxu1 %v10601_v22  ;;  %7725 = vmatprep.subr.bf16.mxu0 %v10606_v23  ;;  %v10693_v22 = vld [vmem:[%s11684_s30 + $0x1574] ss:$8 sps:$4 sm:$0xff]   ;;  %v8567_v23 = vcombine.low %v12451_v18, %v12454_v19  ;;  %v10699_v17 = vld [vmem:[%s11684_s30 + $0x1564] ss:$8 sps:$4 sm:$0xff]  }
 0x2c2   : > { %7768 = vmatprep.subr.bf16.mxu1 %v10609_v24  ;;  %v12531_v24 = vld [vmem:[%s11682_s8 + $0x1a0] sm:$0xff] }
 0x2c3   : > { %v8570_v18 = vcombine.high %v12524_v10, %v12531_v24 }
 0x2c4   : > { %7726 = vmatpush1.bf16.msra.mxu0 %v10604_v29  ;;  %v12534_v29 = vld [vmem:[%s11682_s8 + $0xa8] sm:$0xff] }
 0x2c5   : > { %7769 = vmatpush1.bf16.msra.mxu1 %v10607_v30  ;;  %7727 = vmatprep.subr.bf16.mxu0 %v10612_v33  ;;  %v12537_v30 = vld [vmem:[%s11682_s8 + $0x1a8] sm:$0xff]  ;;  %v10688_v33 = vld [vmem:[%s11684_s30 + $0x1470] ss:$8 sps:$4 sm:$0xff]  }
 0x2c6   : > { %7770 = vmatprep.subr.bf16.mxu1 %v10615_v34  ;;  %v10691_v34 = vld [vmem:[%s11684_s30 + $0x1570] ss:$8 sps:$4 sm:$0xff]   ;;  %v8572_v19 = vcombine.high %v12534_v29, %v12537_v30 }
 0x2c8   : > { %7728 = vmatpush1.bf16.msra.mxu0 %v10610_v37  ;;  %v10694_v37 = vld [vmem:[%s11684_s30 + $0x1460] ss:$8 sps:$4 sm:$0xff]  }
 0x2c9   : > { %7771 = vmatpush1.bf16.msra.mxu1 %v10613_v38  ;;  %7729 = vmatprep.subr.bf16.mxu0 %v10618_v25  ;;  %v10697_v38 = vld [vmem:[%s11684_s30 + $0x1560] ss:$8 sps:$4 sm:$0xff]   ;;  %v10702_v25 = vld [vmem:[%s11684_s30 + $0x1454] ss:$8 sps:$4 sm:$0xff]  }
 0x2ca   : > { %7772 = vmatprep.subr.bf16.mxu1 %v10621_v26  ;;  %v10705_v26 = vld [vmem:[%s11684_s30 + $0x1554] ss:$8 sps:$4 sm:$0xff]  }
 0x2cc   : > { %7730 = vmatpush1.bf16.msra.mxu0 %v10616_v27  ;;  %v10700_v27 = vld [vmem:[%s11684_s30 + $0x1450] ss:$8 sps:$4 sm:$0xff]  }
 0x2cd   : > { %7773 = vmatpush1.bf16.msra.mxu1 %v10619_v28  ;;  %7731 = vmatprep.subr.bf16.mxu0 %v10624_v41  ;;  %v10703_v28 = vld [vmem:[%s11684_s30 + $0x1550] ss:$8 sps:$4 sm:$0xff]   ;;  %v10708_v41 = vld [vmem:[%s11684_s30 + $0x1444] ss:$8 sps:$4 sm:$0xff]  }
 0x2ce   : > { %7774 = vmatprep.subr.bf16.mxu1 %v10627_v42  ;;  %v10711_v42 = vld [vmem:[%s11684_s30 + $0x1544] ss:$8 sps:$4 sm:$0xff]  }
 0x2d0   : > { %7732 = vmatpush1.bf16.msra.mxu0 %v10622_v45  ;;  %v10706_v45 = vld [vmem:[%s11684_s30 + $0x1440] ss:$8 sps:$4 sm:$0xff]  }
 0x2d1   : > { %7775 = vmatpush1.bf16.msra.mxu1 %v10625_v46  ;;  %7733 = vmatprep.subr.bf16.mxu0 %v10630_v31  ;;  %v10709_v46 = vld [vmem:[%s11684_s30 + $0x1540] ss:$8 sps:$4 sm:$0xff]   ;;  %v10714_v31 = vld [vmem:[%s11684_s30 + $0x1434] ss:$8 sps:$4 sm:$0xff]  }
 0x2d2   : > { %7776 = vmatprep.subr.bf16.mxu1 %v10633_v32  ;;  %v10717_v32 = vld [vmem:[%s11684_s30 + $0x1534] ss:$8 sps:$4 sm:$0xff]  }
 0x2d4   : > { %7734 = vmatpush1.bf16.msra.mxu0 %v10628_v36  ;;  %v10712_v36 = vld [vmem:[%s11684_s30 + $0x1430] ss:$8 sps:$4 sm:$0xff]  }
 0x2d5   : > { %7777 = vmatpush1.bf16.msra.mxu1 %v10631_v47  ;;  %7735 = vmatprep.subr.bf16.mxu0 %v10636_v48  ;;  %v10715_v47 = vld [vmem:[%s11684_s30 + $0x1530] ss:$8 sps:$4 sm:$0xff]   ;;  %v10720_v48 = vld [vmem:[%s11684_s30 + $0x1424] ss:$8 sps:$4 sm:$0xff]  }
 0x2d6   : > { %7778 = vmatprep.subr.bf16.mxu1 %v10639_v52  ;;  %v10723_v52 = vld [vmem:[%s11684_s30 + $0x1524] ss:$8 sps:$4 sm:$0xff]  }
 0x2d8   : > { %7736 = vmatpush1.bf16.msra.mxu0 %v10634_v53  ;;  %v10718_v53 = vld [vmem:[%s11684_s30 + $0x1420] ss:$8 sps:$4 sm:$0xff]  }
 0x2d9   : > { %7779 = vmatpush1.bf16.msra.mxu1 %v10637_v39  ;;  %7737 = vmatprep.subr.bf16.mxu0 %v10642_v40  ;;  %v10721_v39 = vld [vmem:[%s11684_s30 + $0x1520] ss:$8 sps:$4 sm:$0xff]   ;;  %v10726_v40 = vld [vmem:[%s11684_s30 + $0x1414] ss:$8 sps:$4 sm:$0xff]  }
 0x2da   : > { %7780 = vmatprep.subr.bf16.mxu1 %v10645_v54  ;;  %v10729_v54 = vld [vmem:[%s11684_s30 + $0x1514] ss:$8 sps:$4 sm:$0xff]  }
 0x2dc   : > { %7738 = vmatpush2.bf16.msra.mxu0 %v10640_v44  ;;  %v10724_v44 = vld [vmem:[%s11684_s30 + $0x1410] ss:$8 sps:$4 sm:$0xff]  }
 0x2dd   : > { %7781 = vmatpush2.bf16.msra.mxu1 %v10643_v55  ;;  %7739 = vmatprep.subr.bf16.mxu0 %v10648_v56  ;;  %v10727_v55 = vld [vmem:[%s11684_s30 + $0x1510] ss:$8 sps:$4 sm:$0xff]   ;;  %v10732_v56 = vld [vmem:[%s11684_s30 + $0x1404] ss:$8 sps:$4 sm:$0xff]  }
 0x2de   : > { %7782 = vmatprep.subr.bf16.mxu1 %v10651_v60  ;;  %v10735_v60 = vld [vmem:[%s11684_s30 + $0x1504] ss:$8 sps:$4 sm:$0xff]  }
 0x2e0   : > { %7740 = vmatpush2.bf16.msra.mxu0 %v10646_v61  ;;  %v10730_v61 = vld [vmem:[%s11684_s30 + $0x1400] ss:$8 sps:$4 sm:$0xff]  }
 0x2e1   : > { %7783 = vmatpush2.bf16.msra.mxu1 %v10649_v35  ;;  %7741 = vmatprep.subr.bf16.mxu0 %v10654_v49  ;;  %v10733_v35 = vld [vmem:[%s11684_s30 + $0x1500] ss:$8 sps:$4 sm:$0xff]   ;;  %v10738_v49 = vld [vmem:[%s11684_s30 + $0x14f4] ss:$8 sps:$4 sm:$0xff]  }
 0x2e2   : > { %7784 = vmatprep.subr.bf16.mxu1 %v10657_v62  ;;  %v10741_v62 = vld [vmem:[%s11684_s30 + $0x15f4] ss:$8 sps:$4 sm:$0xff]  }
 0x2e4   : > { %7742 = vmatpush2.bf16.msra.mxu0 %v10652_v51  ;;  %v10736_v51 = vld [vmem:[%s11684_s30 + $0x14f0] ss:$8 sps:$4 sm:$0xff]  }
 0x2e5   : > { %7785 = vmatpush2.bf16.msra.mxu1 %v10655_v63  ;;  %7743 = vmatprep.subr.bf16.mxu0 %v10660_v0  ;;  %v10739_v63 = vld [vmem:[%s11684_s30 + $0x15f0] ss:$8 sps:$4 sm:$0xff]   ;;  %v10744_v0 = vld [vmem:[%s11684_s30 + $0x14e4] ss:$8 sps:$4 sm:$0xff]  }
 0x2e6   : > { %7786 = vmatprep.subr.bf16.mxu1 %v10663_v4  ;;  %v10747_v4 = vld [vmem:[%s11684_s30 + $0x15e4] ss:$8 sps:$4 sm:$0xff]  }
 0x2e8   : > { %7744 = vmatpush2.bf16.msra.mxu0 %v10658_v5  ;;  %v10742_v5 = vld [vmem:[%s11684_s30 + $0x14e0] ss:$8 sps:$4 sm:$0xff]  }
 0x2e9   : > { %7787 = vmatpush2.bf16.msra.mxu1 %v10661_v43  ;;  %7745 = vmatprep.subr.bf16.mxu0 %v10666_v57  ;;  %v10745_v43 = vld [vmem:[%s11684_s30 + $0x15e0] ss:$8 sps:$4 sm:$0xff]   ;;  %v10750_v57 = vld [vmem:[%s11684_s30 + $0x14d4] ss:$8 sps:$4 sm:$0xff]  }
 0x2ea   : > { %7788 = vmatprep.subr.bf16.mxu1 %v10669_v6  ;;  %v10753_v6 = vld [vmem:[%s11684_s30 + $0x15d4] ss:$8 sps:$4 sm:$0xff]  }
 0x2ec   : > { %7746 = vmatpush2.bf16.msra.mxu0 %v10664_v59  ;;  %v10748_v59 = vld [vmem:[%s11684_s30 + $0x14d0] ss:$8 sps:$4 sm:$0xff]  }
 0x2ed   : > { %7789 = vmatpush2.bf16.msra.mxu1 %v10667_v7  ;;  %7747 = vmatprep.subr.bf16.mxu0 %v10672_v8  ;;  %v10751_v7 = vld [vmem:[%s11684_s30 + $0x15d0] ss:$8 sps:$4 sm:$0xff]   ;;  %v10756_v8 = vld [vmem:[%s11684_s30 + $0x14c4] ss:$8 sps:$4 sm:$0xff]  }
 0x2ee   : > { %7790 = vmatprep.subr.bf16.mxu1 %v10675_v12  ;;  %v10759_v12 = vld [vmem:[%s11684_s30 + $0x15c4] ss:$8 sps:$4 sm:$0xff]  }
 0x2f0   : > { %7748 = vmatpush2.bf16.msra.mxu0 %v10670_v13  ;;  %v10754_v13 = vld [vmem:[%s11684_s30 + $0x14c0] ss:$8 sps:$4 sm:$0xff]  }
 0x2f1   : > { %7791 = vmatpush2.bf16.msra.mxu1 %v10673_v50  ;;  %7749 = vmatprep.subr.bf16.mxu0 %v10678_v1  ;;  %v10757_v50 = vld [vmem:[%s11684_s30 + $0x15c0] ss:$8 sps:$4 sm:$0xff]   ;;  %v10762_v1 = vld [vmem:[%s11684_s30 + $0x14b4] ss:$8 sps:$4 sm:$0xff]  }
 0x2f2   : > { %7792 = vmatprep.subr.bf16.mxu1 %v10681_v14  ;;  %v10765_v14 = vld [vmem:[%s11684_s30 + $0x15b4] ss:$8 sps:$4 sm:$0xff]  }
 0x2f4   : > { %7750 = vmatpush2.bf16.msra.mxu0 %v10676_v3  ;;  %v10760_v3 = vld [vmem:[%s11684_s30 + $0x14b0] ss:$8 sps:$4 sm:$0xff]  }
 0x2f5   : > { %7793 = vmatpush2.bf16.msra.mxu1 %v10679_v15  ;;  %7751 = vmatprep.subr.bf16.mxu0 %v10684_v16  ;;  %v10763_v15 = vld [vmem:[%s11684_s30 + $0x15b0] ss:$8 sps:$4 sm:$0xff]   ;;  %v10768_v16 = vld [vmem:[%s11684_s30 + $0x14a4] ss:$8 sps:$4 sm:$0xff]  }
 0x2f6   : > { %7794 = vmatprep.subr.bf16.mxu1 %v10687_v20  ;;  %v10771_v20 = vld [vmem:[%s11684_s30 + $0x15a4] ss:$8 sps:$4 sm:$0xff]  }
 0x2f8   : > { %7752 = vmatpush2.bf16.msra.mxu0 %v10682_v21  ;;  %v10766_v21 = vld [vmem:[%s11684_s30 + $0x14a0] ss:$8 sps:$4 sm:$0xff]  }
 0x2f9   : > { %7795 = vmatpush2.bf16.msra.mxu1 %v10685_v58  ;;  %7807 = vmatprep.subr.bf16.mxu0 %v10690_v9  ;;  %v10769_v58 = vld [vmem:[%s11684_s30 + $0x15a0] ss:$8 sps:$4 sm:$0xff]   ;;  %v10774_v9 = vld [vmem:[%s11684_s30 + $0x1494] ss:$8 sps:$4 sm:$0xff]  }
 0x2fa   : > { %7850 = vmatprep.subr.bf16.mxu1 %v10693_v22  ;;  %v10777_v22 = vld [vmem:[%s11684_s30 + $0x1594] ss:$8 sps:$4 sm:$0xff]  }
 0x2fb   : > { %7754 = vmatmul.mubr.bf16.vlgmr.msra.gmra.mxu0 %v8565_v11  ;;  %v10772_v11 = vld [vmem:[%s11684_s30 + $0x1490] ss:$8 sps:$4 sm:$0xff]  }
 0x2fc   : > { %7797 = vmatmul.mubr.bf16.vlgmr.msra.gmra.mxu1 %v8567_v23  ;;  %7808 = vmatpush1.bf16.msra.mxu0 %v10688_v33  ;;  %v10775_v23 = vld [vmem:[%s11684_s30 + $0x1590] ss:$8 sps:$4 sm:$0xff]   ;;  %v10780_v33 = vld [vmem:[%s11684_s30 + $0x1484] ss:$8 sps:$4 sm:$0xff]  }
 0x2fd   : > { %7851 = vmatpush1.bf16.msra.mxu1 %v10691_v34  ;;  %7809 = vmatprep.subr.bf16.mxu0 %v10696_v2  ;;  %v10783_v34 = vld [vmem:[%s11684_s30 + $0x1584] ss:$8 sps:$4 sm:$0xff]   ;;  %v10778_v2 = vld [vmem:[%s11684_s30 + $0x1480] ss:$8 sps:$4 sm:$0xff]  }
 0x2fe   : > { %7852 = vmatprep.subr.bf16.mxu1 %v10699_v17  ;;  %7839 = vmatprep.mubr.bf16.mxu0 %v8570_v18  ;;  %v10781_v17 = vld [vmem:[%s11684_s30 + $0x1580] ss:$8 sps:$4 sm:$0xff]   ;;  %v10786_v18 = vld [vmem:[%s11684_s30 + $0x1674] ss:$8 sps:$4 sm:$0xff]  }
 0x2ff   : > { %7882 = vmatprep.mubr.bf16.mxu1 %v8572_v19  ;;  %v10789_v19 = vld [vmem:[%s11684_s30 + $0x1774] ss:$8 sps:$4 sm:$0xff]  }
 0x300   : > { %7810 = vmatpush1.bf16.msra.mxu0 %v10694_v37  ;;  %v12608_v37 = vld [vmem:[%s11682_s8 + $0xb0] sm:$0xff] }
 0x301   : > { %7853 = vmatpush1.bf16.msra.mxu1 %v10697_v38  ;;  %7811 = vmatprep.subr.bf16.mxu0 %v10702_v25  ;;  %v8569_v38 = vcombine.low %v12524_v10, %v12531_v24  ;;  %v8571_v25 = vcombine.low %v12534_v29, %v12537_v30  ;;  %v10792_v10 = vld [vmem:[%s11684_s30 + $0x1664] ss:$8 sps:$4 sm:$0xff]  }
 0x302   : > { %7854 = vmatprep.subr.bf16.mxu1 %v10705_v26  ;;  %v12615_v26 = vld [vmem:[%s11682_s8 + $0x1b0] sm:$0xff]  ;;  %v10795_v24 = vld [vmem:[%s11684_s30 + $0x1764] ss:$8 sps:$4 sm:$0xff]  }
 0x303   : > { %v8574_v29 = vcombine.high %v12608_v37, %v12615_v26 }
 0x304   : > { %7812 = vmatpush1.bf16.msra.mxu0 %v10700_v27  ;;  %v12618_v27 = vld [vmem:[%s11682_s8 + $0xb8] sm:$0xff] }
 0x305   : > { %7855 = vmatpush1.bf16.msra.mxu1 %v10703_v28  ;;  %7813 = vmatprep.subr.bf16.mxu0 %v10708_v41  ;;  %v12621_v28 = vld [vmem:[%s11682_s8 + $0x1b8] sm:$0xff] }
 0x306   : > { %7856 = vmatprep.subr.bf16.mxu1 %v10711_v42  ;;  %v10784_v41 = vld [vmem:[%s11684_s30 + $0x1670] ss:$8 sps:$4 sm:$0xff]   ;;  %v8576_v30 = vcombine.high %v12618_v27, %v12621_v28 }
 0x307   : > { %v10787_v42 = vld [vmem:[%s11684_s30 + $0x1770] ss:$8 sps:$4 sm:$0xff]  }
 0x308   : > { %7814 = vmatpush1.bf16.msra.mxu0 %v10706_v45  ;;  %v10790_v45 = vld [vmem:[%s11684_s30 + $0x1660] ss:$8 sps:$4 sm:$0xff]  }
 0x309   : > { %7857 = vmatpush1.bf16.msra.mxu1 %v10709_v46  ;;  %7815 = vmatprep.subr.bf16.mxu0 %v10714_v31  ;;  %v10793_v46 = vld [vmem:[%s11684_s30 + $0x1760] ss:$8 sps:$4 sm:$0xff]   ;;  %v10798_v31 = vld [vmem:[%s11684_s30 + $0x1654] ss:$8 sps:$4 sm:$0xff]  }
 0x30a   : > { %7858 = vmatprep.subr.bf16.mxu1 %v10717_v32  ;;  %v10801_v32 = vld [vmem:[%s11684_s30 + $0x1754] ss:$8 sps:$4 sm:$0xff]  }
 0x30c   : > { %7816 = vmatpush1.bf16.msra.mxu0 %v10712_v36  ;;  %v10796_v36 = vld [vmem:[%s11684_s30 + $0x1650] ss:$8 sps:$4 sm:$0xff]  }
 0x30d   : > { %7859 = vmatpush1.bf16.msra.mxu1 %v10715_v47  ;;  %7817 = vmatprep.subr.bf16.mxu0 %v10720_v48  ;;  %v10799_v47 = vld [vmem:[%s11684_s30 + $0x1750] ss:$8 sps:$4 sm:$0xff]   ;;  %v10804_v48 = vld [vmem:[%s11684_s30 + $0x1644] ss:$8 sps:$4 sm:$0xff]  }
 0x30e   : > { %7860 = vmatprep.subr.bf16.mxu1 %v10723_v52  ;;  %v10807_v52 = vld [vmem:[%s11684_s30 + $0x1744] ss:$8 sps:$4 sm:$0xff]  }
 0x310   : > { %7818 = vmatpush1.bf16.msra.mxu0 %v10718_v53  ;;  %v10802_v53 = vld [vmem:[%s11684_s30 + $0x1640] ss:$8 sps:$4 sm:$0xff]  }
 0x311   : > { %7861 = vmatpush1.bf16.msra.mxu1 %v10721_v39  ;;  %7819 = vmatprep.subr.bf16.mxu0 %v10726_v40  ;;  %v10805_v39 = vld [vmem:[%s11684_s30 + $0x1740] ss:$8 sps:$4 sm:$0xff]   ;;  %v10810_v40 = vld [vmem:[%s11684_s30 + $0x1634] ss:$8 sps:$4 sm:$0xff]  }
 0x312   : > { %7862 = vmatprep.subr.bf16.mxu1 %v10729_v54  ;;  %v10813_v54 = vld [vmem:[%s11684_s30 + $0x1734] ss:$8 sps:$4 sm:$0xff]  }
 0x314   : > { %7820 = vmatpush1.bf16.msra.mxu0 %v10724_v44  ;;  %v10808_v44 = vld [vmem:[%s11684_s30 + $0x1630] ss:$8 sps:$4 sm:$0xff]  }
 0x315   : > { %7863 = vmatpush1.bf16.msra.mxu1 %v10727_v55  ;;  %7821 = vmatprep.subr.bf16.mxu0 %v10732_v56  ;;  %v10811_v55 = vld [vmem:[%s11684_s30 + $0x1730] ss:$8 sps:$4 sm:$0xff]   ;;  %v10816_v56 = vld [vmem:[%s11684_s30 + $0x1624] ss:$8 sps:$4 sm:$0xff]  }
 0x316   : > { %7864 = vmatprep.subr.bf16.mxu1 %v10735_v60  ;;  %v10819_v60 = vld [vmem:[%s11684_s30 + $0x1724] ss:$8 sps:$4 sm:$0xff]  }
 0x318   : > { %7822 = vmatpush1.bf16.msra.mxu0 %v10730_v61  ;;  %v10814_v61 = vld [vmem:[%s11684_s30 + $0x1620] ss:$8 sps:$4 sm:$0xff]  }
 0x319   : > { %7865 = vmatpush1.bf16.msra.mxu1 %v10733_v35  ;;  %7823 = vmatprep.subr.bf16.mxu0 %v10738_v49  ;;  %v10817_v35 = vld [vmem:[%s11684_s30 + $0x1720] ss:$8 sps:$4 sm:$0xff]   ;;  %v10822_v49 = vld [vmem:[%s11684_s30 + $0x1614] ss:$8 sps:$4 sm:$0xff]  }
 0x31a   : > { %7866 = vmatprep.subr.bf16.mxu1 %v10741_v62  ;;  %v10825_v62 = vld [vmem:[%s11684_s30 + $0x1714] ss:$8 sps:$4 sm:$0xff]  }
 0x31c   : > { %7824 = vmatpush2.bf16.msra.mxu0 %v10736_v51  ;;  %v10820_v51 = vld [vmem:[%s11684_s30 + $0x1610] ss:$8 sps:$4 sm:$0xff]  }
 0x31d   : > { %7867 = vmatpush2.bf16.msra.mxu1 %v10739_v63  ;;  %7825 = vmatprep.subr.bf16.mxu0 %v10744_v0  ;;  %v10823_v63 = vld [vmem:[%s11684_s30 + $0x1710] ss:$8 sps:$4 sm:$0xff]   ;;  %v10828_v0 = vld [vmem:[%s11684_s30 + $0x1604] ss:$8 sps:$4 sm:$0xff]  }
 0x31e   : > { %7868 = vmatprep.subr.bf16.mxu1 %v10747_v4  ;;  %v10831_v4 = vld [vmem:[%s11684_s30 + $0x1704] ss:$8 sps:$4 sm:$0xff]  }
 0x320   : > { %7826 = vmatpush2.bf16.msra.mxu0 %v10742_v5  ;;  %v10826_v5 = vld [vmem:[%s11684_s30 + $0x1600] ss:$8 sps:$4 sm:$0xff]  }
 0x321   : > { %7869 = vmatpush2.bf16.msra.mxu1 %v10745_v43  ;;  %7827 = vmatprep.subr.bf16.mxu0 %v10750_v57  ;;  %v10829_v43 = vld [vmem:[%s11684_s30 + $0x1700] ss:$8 sps:$4 sm:$0xff]   ;;  %v10834_v57 = vld [vmem:[%s11684_s30 + $0x16f4] ss:$8 sps:$4 sm:$0xff]  }
 0x322   : > { %7870 = vmatprep.subr.bf16.mxu1 %v10753_v6  ;;  %v10837_v6 = vld [vmem:[%s11684_s30 + $0x17f4] ss:$8 sps:$4 sm:$0xff]  }
 0x324   : > { %7828 = vmatpush2.bf16.msra.mxu0 %v10748_v59  ;;  %v10832_v59 = vld [vmem:[%s11684_s30 + $0x16f0] ss:$8 sps:$4 sm:$0xff]  }
 0x325   : > { %7871 = vmatpush2.bf16.msra.mxu1 %v10751_v7  ;;  %7829 = vmatprep.subr.bf16.mxu0 %v10756_v8  ;;  %v10835_v7 = vld [vmem:[%s11684_s30 + $0x17f0] ss:$8 sps:$4 sm:$0xff]   ;;  %v10840_v8 = vld [vmem:[%s11684_s30 + $0x16e4] ss:$8 sps:$4 sm:$0xff]  }
 0x326   : > { %7872 = vmatprep.subr.bf16.mxu1 %v10759_v12  ;;  %v10843_v12 = vld [vmem:[%s11684_s30 + $0x17e4] ss:$8 sps:$4 sm:$0xff]  }
 0x328   : > { %7830 = vmatpush2.bf16.msra.mxu0 %v10754_v13  ;;  %v10838_v13 = vld [vmem:[%s11684_s30 + $0x16e0] ss:$8 sps:$4 sm:$0xff]  }
 0x329   : > { %7873 = vmatpush2.bf16.msra.mxu1 %v10757_v50  ;;  %7831 = vmatprep.subr.bf16.mxu0 %v10762_v1  ;;  %v10841_v50 = vld [vmem:[%s11684_s30 + $0x17e0] ss:$8 sps:$4 sm:$0xff]   ;;  %v10846_v1 = vld [vmem:[%s11684_s30 + $0x16d4] ss:$8 sps:$4 sm:$0xff]  }
 0x32a   : > { %7874 = vmatprep.subr.bf16.mxu1 %v10765_v14  ;;  %v10849_v14 = vld [vmem:[%s11684_s30 + $0x17d4] ss:$8 sps:$4 sm:$0xff]  }
 0x32c   : > { %7832 = vmatpush2.bf16.msra.mxu0 %v10760_v3  ;;  %v10844_v3 = vld [vmem:[%s11684_s30 + $0x16d0] ss:$8 sps:$4 sm:$0xff]  }
 0x32d   : > { %7875 = vmatpush2.bf16.msra.mxu1 %v10763_v15  ;;  %7833 = vmatprep.subr.bf16.mxu0 %v10768_v16  ;;  %v10847_v15 = vld [vmem:[%s11684_s30 + $0x17d0] ss:$8 sps:$4 sm:$0xff]   ;;  %v10852_v16 = vld [vmem:[%s11684_s30 + $0x16c4] ss:$8 sps:$4 sm:$0xff]  }
 0x32e   : > { %7876 = vmatprep.subr.bf16.mxu1 %v10771_v20  ;;  %v10855_v20 = vld [vmem:[%s11684_s30 + $0x17c4] ss:$8 sps:$4 sm:$0xff]  }
 0x330   : > { %7834 = vmatpush2.bf16.msra.mxu0 %v10766_v21  ;;  %v10850_v21 = vld [vmem:[%s11684_s30 + $0x16c0] ss:$8 sps:$4 sm:$0xff]  }
 0x331   : > { %7877 = vmatpush2.bf16.msra.mxu1 %v10769_v58  ;;  %7835 = vmatprep.subr.bf16.mxu0 %v10774_v9  ;;  %v10853_v58 = vld [vmem:[%s11684_s30 + $0x17c0] ss:$8 sps:$4 sm:$0xff]   ;;  %v10858_v9 = vld [vmem:[%s11684_s30 + $0x16b4] ss:$8 sps:$4 sm:$0xff]  }
 0x332   : > { %7878 = vmatprep.subr.bf16.mxu1 %v10777_v22  ;;  %v10861_v22 = vld [vmem:[%s11684_s30 + $0x17b4] ss:$8 sps:$4 sm:$0xff]  }
 0x334   : > { %7836 = vmatpush2.bf16.msra.mxu0 %v10772_v11  ;;  %v10856_v11 = vld [vmem:[%s11684_s30 + $0x16b0] ss:$8 sps:$4 sm:$0xff]  }
 0x335   : > { %7879 = vmatpush2.bf16.msra.mxu1 %v10775_v23  ;;  %7837 = vmatprep.subr.bf16.mxu0 %v10780_v33  ;;  %v10859_v23 = vld [vmem:[%s11684_s30 + $0x17b0] ss:$8 sps:$4 sm:$0xff]   ;;  %v10864_v33 = vld [vmem:[%s11684_s30 + $0x16a4] ss:$8 sps:$4 sm:$0xff]  }
 0x336   : > { %7880 = vmatprep.subr.bf16.mxu1 %v10783_v34  ;;  %v10867_v34 = vld [vmem:[%s11684_s30 + $0x17a4] ss:$8 sps:$4 sm:$0xff]  }
 0x338   : > { %7838 = vmatpush2.bf16.msra.mxu0 %v10778_v2  ;;  %v10862_v2 = vld [vmem:[%s11684_s30 + $0x16a0] ss:$8 sps:$4 sm:$0xff]  }
 0x339   : > { %7881 = vmatpush2.bf16.msra.mxu1 %v10781_v17  ;;  %7893 = vmatprep.subr.bf16.mxu0 %v10786_v18  ;;  %v10865_v17 = vld [vmem:[%s11684_s30 + $0x17a0] ss:$8 sps:$4 sm:$0xff]   ;;  %v10870_v18 = vld [vmem:[%s11684_s30 + $0x1694] ss:$8 sps:$4 sm:$0xff]  }
 0x33a   : > { %7936 = vmatprep.subr.bf16.mxu1 %v10789_v19  ;;  %v10873_v19 = vld [vmem:[%s11684_s30 + $0x1794] ss:$8 sps:$4 sm:$0xff]  }
 0x33b   : > { %7840 = vmatmul.mubr.bf16.vlgmr.msra.gmra.mxu0 %v8569_v38  ;;  %v10868_v38 = vld [vmem:[%s11684_s30 + $0x1690] ss:$8 sps:$4 sm:$0xff]  }
 0x33c   : > { %7883 = vmatmul.mubr.bf16.vlgmr.msra.gmra.mxu1 %v8571_v25  ;;  %7894 = vmatpush1.bf16.msra.mxu0 %v10784_v41  ;;  %v10871_v25 = vld [vmem:[%s11684_s30 + $0x1790] ss:$8 sps:$4 sm:$0xff]   ;;  %v10876_v41 = vld [vmem:[%s11684_s30 + $0x1684] ss:$8 sps:$4 sm:$0xff]  }
 0x33d   : > { %7937 = vmatpush1.bf16.msra.mxu1 %v10787_v42  ;;  %7895 = vmatprep.subr.bf16.mxu0 %v10792_v10  ;;  %v10879_v42 = vld [vmem:[%s11684_s30 + $0x1784] ss:$8 sps:$4 sm:$0xff]   ;;  %v10874_v10 = vld [vmem:[%s11684_s30 + $0x1680] ss:$8 sps:$4 sm:$0xff]  }
 0x33e   : > { %7938 = vmatprep.subr.bf16.mxu1 %v10795_v24  ;;  %7925 = vmatprep.mubr.bf16.mxu0 %v8574_v29  ;;  %v10877_v24 = vld [vmem:[%s11684_s30 + $0x1780] ss:$8 sps:$4 sm:$0xff]   ;;  %v10882_v29 = vld [vmem:[%s11684_s30 + $0x1874] ss:$8 sps:$4 sm:$0xff]  }
 0x33f   : > { %7968 = vmatprep.mubr.bf16.mxu1 %v8576_v30  ;;  %v10885_v30 = vld [vmem:[%s11684_s30 + $0x1974] ss:$8 sps:$4 sm:$0xff]  }
 0x340   : > { %7896 = vmatpush1.bf16.msra.mxu0 %v10790_v45  ;;  %v12692_v45 = vld [vmem:[%s11682_s8 + $0xc0] sm:$0xff] }
 0x341   : > { %7939 = vmatpush1.bf16.msra.mxu1 %v10793_v46  ;;  %7897 = vmatprep.subr.bf16.mxu0 %v10798_v31  ;;  %v8573_v46 = vcombine.low %v12608_v37, %v12615_v26  ;;  %v8575_v31 = vcombine.low %v12618_v27, %v12621_v28  ;;  %v10888_v37 = vld [vmem:[%s11684_s30 + $0x1864] ss:$8 sps:$4 sm:$0xff]  }
 0x342   : > { %7940 = vmatprep.subr.bf16.mxu1 %v10801_v32  ;;  %v12699_v32 = vld [vmem:[%s11682_s8 + $0x1c0] sm:$0xff] }
 0x343   : > { %v10891_v26 = vld [vmem:[%s11684_s30 + $0x1964] ss:$8 sps:$4 sm:$0xff]   ;;  %v8578_v27 = vcombine.high %v12692_v45, %v12699_v32 }
 0x344   : > { %7898 = vmatpush1.bf16.msra.mxu0 %v10796_v36  ;;  %v12702_v36 = vld [vmem:[%s11682_s8 + $0xc8] sm:$0xff] }
 0x345   : > { %7941 = vmatpush1.bf16.msra.mxu1 %v10799_v47  ;;  %7899 = vmatprep.subr.bf16.mxu0 %v10804_v48  ;;  %v12705_v47 = vld [vmem:[%s11682_s8 + $0x1c8] sm:$0xff]  ;;  %v10880_v48 = vld [vmem:[%s11684_s30 + $0x1870] ss:$8 sps:$4 sm:$0xff]  }
 0x346   : > { %7942 = vmatprep.subr.bf16.mxu1 %v10807_v52  ;;  %v10883_v52 = vld [vmem:[%s11684_s30 + $0x1970] ss:$8 sps:$4 sm:$0xff]   ;;  %v8580_v28 = vcombine.high %v12702_v36, %v12705_v47 }
 0x348   : > { %7900 = vmatpush1.bf16.msra.mxu0 %v10802_v53  ;;  %v10886_v53 = vld [vmem:[%s11684_s30 + $0x1860] ss:$8 sps:$4 sm:$0xff]  }
 0x349   : > { %7943 = vmatpush1.bf16.msra.mxu1 %v10805_v39  ;;  %7901 = vmatprep.subr.bf16.mxu0 %v10810_v40  ;;  %v10889_v39 = vld [vmem:[%s11684_s30 + $0x1960] ss:$8 sps:$4 sm:$0xff]   ;;  %v10894_v40 = vld [vmem:[%s11684_s30 + $0x1854] ss:$8 sps:$4 sm:$0xff]  }
 0x34a   : > { %7944 = vmatprep.subr.bf16.mxu1 %v10813_v54  ;;  %v10897_v54 = vld [vmem:[%s11684_s30 + $0x1954] ss:$8 sps:$4 sm:$0xff]  }
 0x34c   : > { %7902 = vmatpush1.bf16.msra.mxu0 %v10808_v44  ;;  %v10892_v44 = vld [vmem:[%s11684_s30 + $0x1850] ss:$8 sps:$4 sm:$0xff]  }
 0x34d   : > { %7945 = vmatpush1.bf16.msra.mxu1 %v10811_v55  ;;  %7903 = vmatprep.subr.bf16.mxu0 %v10816_v56  ;;  %v10895_v55 = vld [vmem:[%s11684_s30 + $0x1950] ss:$8 sps:$4 sm:$0xff]   ;;  %v10900_v56 = vld [vmem:[%s11684_s30 + $0x1844] ss:$8 sps:$4 sm:$0xff]  }
 0x34e   : > { %7946 = vmatprep.subr.bf16.mxu1 %v10819_v60  ;;  %v10903_v60 = vld [vmem:[%s11684_s30 + $0x1944] ss:$8 sps:$4 sm:$0xff]  }
 0x350   : > { %7904 = vmatpush1.bf16.msra.mxu0 %v10814_v61  ;;  %v10898_v61 = vld [vmem:[%s11684_s30 + $0x1840] ss:$8 sps:$4 sm:$0xff]  }
 0x351   : > { %7947 = vmatpush1.bf16.msra.mxu1 %v10817_v35  ;;  %7905 = vmatprep.subr.bf16.mxu0 %v10822_v49  ;;  %v10901_v35 = vld [vmem:[%s11684_s30 + $0x1940] ss:$8 sps:$4 sm:$0xff]   ;;  %v10906_v49 = vld [vmem:[%s11684_s30 + $0x1834] ss:$8 sps:$4 sm:$0xff]  }
 0x352   : > { %7948 = vmatprep.subr.bf16.mxu1 %v10825_v62  ;;  %v10909_v62 = vld [vmem:[%s11684_s30 + $0x1934] ss:$8 sps:$4 sm:$0xff]  }
 0x354   : > { %7906 = vmatpush1.bf16.msra.mxu0 %v10820_v51  ;;  %v10904_v51 = vld [vmem:[%s11684_s30 + $0x1830] ss:$8 sps:$4 sm:$0xff]  }
 0x355   : > { %7949 = vmatpush1.bf16.msra.mxu1 %v10823_v63  ;;  %7907 = vmatprep.subr.bf16.mxu0 %v10828_v0  ;;  %v10907_v63 = vld [vmem:[%s11684_s30 + $0x1930] ss:$8 sps:$4 sm:$0xff]   ;;  %v10912_v0 = vld [vmem:[%s11684_s30 + $0x1824] ss:$8 sps:$4 sm:$0xff]  }
 0x356   : > { %7950 = vmatprep.subr.bf16.mxu1 %v10831_v4  ;;  %v10915_v4 = vld [vmem:[%s11684_s30 + $0x1924] ss:$8 sps:$4 sm:$0xff]  }
 0x358   : > { %7908 = vmatpush1.bf16.msra.mxu0 %v10826_v5  ;;  %v10910_v5 = vld [vmem:[%s11684_s30 + $0x1820] ss:$8 sps:$4 sm:$0xff]  }
 0x359   : > { %7951 = vmatpush1.bf16.msra.mxu1 %v10829_v43  ;;  %7909 = vmatprep.subr.bf16.mxu0 %v10834_v57  ;;  %v10913_v43 = vld [vmem:[%s11684_s30 + $0x1920] ss:$8 sps:$4 sm:$0xff]   ;;  %v10918_v57 = vld [vmem:[%s11684_s30 + $0x1814] ss:$8 sps:$4 sm:$0xff]  }
 0x35a   : > { %7952 = vmatprep.subr.bf16.mxu1 %v10837_v6  ;;  %v10921_v6 = vld [vmem:[%s11684_s30 + $0x1914] ss:$8 sps:$4 sm:$0xff]  }
 0x35c   : > { %7910 = vmatpush2.bf16.msra.mxu0 %v10832_v59  ;;  %v10916_v59 = vld [vmem:[%s11684_s30 + $0x1810] ss:$8 sps:$4 sm:$0xff]  }
 0x35d   : > { %7953 = vmatpush2.bf16.msra.mxu1 %v10835_v7  ;;  %7911 = vmatprep.subr.bf16.mxu0 %v10840_v8  ;;  %v10919_v7 = vld [vmem:[%s11684_s30 + $0x1910] ss:$8 sps:$4 sm:$0xff]   ;;  %v10924_v8 = vld [vmem:[%s11684_s30 + $0x1804] ss:$8 sps:$4 sm:$0xff]  }
 0x35e   : > { %7954 = vmatprep.subr.bf16.mxu1 %v10843_v12  ;;  %v10927_v12 = vld [vmem:[%s11684_s30 + $0x1904] ss:$8 sps:$4 sm:$0xff]  }
 0x360   : > { %7912 = vmatpush2.bf16.msra.mxu0 %v10838_v13  ;;  %v10922_v13 = vld [vmem:[%s11684_s30 + $0x1800] ss:$8 sps:$4 sm:$0xff]  }
 0x361   : > { %7955 = vmatpush2.bf16.msra.mxu1 %v10841_v50  ;;  %7913 = vmatprep.subr.bf16.mxu0 %v10846_v1  ;;  %v10925_v50 = vld [vmem:[%s11684_s30 + $0x1900] ss:$8 sps:$4 sm:$0xff]   ;;  %v10930_v1 = vld [vmem:[%s11684_s30 + $0x18f4] ss:$8 sps:$4 sm:$0xff]  }
 0x362   : > { %7956 = vmatprep.subr.bf16.mxu1 %v10849_v14  ;;  %v10933_v14 = vld [vmem:[%s11684_s30 + $0x19f4] ss:$8 sps:$4 sm:$0xff]  }
 0x364   : > { %7914 = vmatpush2.bf16.msra.mxu0 %v10844_v3  ;;  %v10928_v3 = vld [vmem:[%s11684_s30 + $0x18f0] ss:$8 sps:$4 sm:$0xff]  }
 0x365   : > { %7957 = vmatpush2.bf16.msra.mxu1 %v10847_v15  ;;  %7915 = vmatprep.subr.bf16.mxu0 %v10852_v16  ;;  %v10931_v15 = vld [vmem:[%s11684_s30 + $0x19f0] ss:$8 sps:$4 sm:$0xff]   ;;  %v10936_v16 = vld [vmem:[%s11684_s30 + $0x18e4] ss:$8 sps:$4 sm:$0xff]  }
 0x366   : > { %7958 = vmatprep.subr.bf16.mxu1 %v10855_v20  ;;  %v10939_v20 = vld [vmem:[%s11684_s30 + $0x19e4] ss:$8 sps:$4 sm:$0xff]  }
 0x368   : > { %7916 = vmatpush2.bf16.msra.mxu0 %v10850_v21  ;;  %v10934_v21 = vld [vmem:[%s11684_s30 + $0x18e0] ss:$8 sps:$4 sm:$0xff]  }
 0x369   : > { %7959 = vmatpush2.bf16.msra.mxu1 %v10853_v58  ;;  %7917 = vmatprep.subr.bf16.mxu0 %v10858_v9  ;;  %v10937_v58 = vld [vmem:[%s11684_s30 + $0x19e0] ss:$8 sps:$4 sm:$0xff]   ;;  %v10942_v9 = vld [vmem:[%s11684_s30 + $0x18d4] ss:$8 sps:$4 sm:$0xff]  }
 0x36a   : > { %7960 = vmatprep.subr.bf16.mxu1 %v10861_v22  ;;  %v10945_v22 = vld [vmem:[%s11684_s30 + $0x19d4] ss:$8 sps:$4 sm:$0xff]  }
 0x36c   : > { %7918 = vmatpush2.bf16.msra.mxu0 %v10856_v11  ;;  %v10940_v11 = vld [vmem:[%s11684_s30 + $0x18d0] ss:$8 sps:$4 sm:$0xff]  }
 0x36d   : > { %7961 = vmatpush2.bf16.msra.mxu1 %v10859_v23  ;;  %7919 = vmatprep.subr.bf16.mxu0 %v10864_v33  ;;  %v10943_v23 = vld [vmem:[%s11684_s30 + $0x19d0] ss:$8 sps:$4 sm:$0xff]   ;;  %v10948_v33 = vld [vmem:[%s11684_s30 + $0x18c4] ss:$8 sps:$4 sm:$0xff]  }
 0x36e   : > { %7962 = vmatprep.subr.bf16.mxu1 %v10867_v34  ;;  %v10951_v34 = vld [vmem:[%s11684_s30 + $0x19c4] ss:$8 sps:$4 sm:$0xff]  }
 0x370   : > { %7920 = vmatpush2.bf16.msra.mxu0 %v10862_v2  ;;  %v10946_v2 = vld [vmem:[%s11684_s30 + $0x18c0] ss:$8 sps:$4 sm:$0xff]  }
 0x371   : > { %7963 = vmatpush2.bf16.msra.mxu1 %v10865_v17  ;;  %7921 = vmatprep.subr.bf16.mxu0 %v10870_v18  ;;  %v10949_v17 = vld [vmem:[%s11684_s30 + $0x19c0] ss:$8 sps:$4 sm:$0xff]   ;;  %v10954_v18 = vld [vmem:[%s11684_s30 + $0x18b4] ss:$8 sps:$4 sm:$0xff]  }
 0x372   : > { %7964 = vmatprep.subr.bf16.mxu1 %v10873_v19  ;;  %v10957_v19 = vld [vmem:[%s11684_s30 + $0x19b4] ss:$8 sps:$4 sm:$0xff]  }
 0x374   : > { %7922 = vmatpush2.bf16.msra.mxu0 %v10868_v38  ;;  %v10952_v38 = vld [vmem:[%s11684_s30 + $0x18b0] ss:$8 sps:$4 sm:$0xff]  }
 0x375   : > { %7965 = vmatpush2.bf16.msra.mxu1 %v10871_v25  ;;  %7923 = vmatprep.subr.bf16.mxu0 %v10876_v41  ;;  %v10955_v25 = vld [vmem:[%s11684_s30 + $0x19b0] ss:$8 sps:$4 sm:$0xff]   ;;  %v10960_v41 = vld [vmem:[%s11684_s30 + $0x18a4] ss:$8 sps:$4 sm:$0xff]  }
 0x376   : > { %7966 = vmatprep.subr.bf16.mxu1 %v10879_v42  ;;  %v10963_v42 = vld [vmem:[%s11684_s30 + $0x19a4] ss:$8 sps:$4 sm:$0xff]  }
 0x378   : > { %7924 = vmatpush2.bf16.msra.mxu0 %v10874_v10  ;;  %v10958_v10 = vld [vmem:[%s11684_s30 + $0x18a0] ss:$8 sps:$4 sm:$0xff]  }
 0x379   : > { %7967 = vmatpush2.bf16.msra.mxu1 %v10877_v24  ;;  %7979 = vmatprep.subr.bf16.mxu0 %v10882_v29  ;;  %v10961_v24 = vld [vmem:[%s11684_s30 + $0x19a0] ss:$8 sps:$4 sm:$0xff]   ;;  %v10966_v29 = vld [vmem:[%s11684_s30 + $0x1894] ss:$8 sps:$4 sm:$0xff]  }
 0x37a   : > { %8022 = vmatprep.subr.bf16.mxu1 %v10885_v30  ;;  %v10969_v30 = vld [vmem:[%s11684_s30 + $0x1994] ss:$8 sps:$4 sm:$0xff]  }
 0x37b   : > { %7926 = vmatmul.mubr.bf16.vlgmr.msra.gmra.mxu0 %v8573_v46  ;;  %v10964_v46 = vld [vmem:[%s11684_s30 + $0x1890] ss:$8 sps:$4 sm:$0xff]  }
 0x37c   : > { %7969 = vmatmul.mubr.bf16.vlgmr.msra.gmra.mxu1 %v8575_v31  ;;  %7980 = vmatpush1.bf16.msra.mxu0 %v10880_v48  ;;  %v10967_v31 = vld [vmem:[%s11684_s30 + $0x1990] ss:$8 sps:$4 sm:$0xff]   ;;  %v10972_v48 = vld [vmem:[%s11684_s30 + $0x1884] ss:$8 sps:$4 sm:$0xff]  }
 0x37d   : > { %8023 = vmatpush1.bf16.msra.mxu1 %v10883_v52  ;;  %7981 = vmatprep.subr.bf16.mxu0 %v10888_v37  ;;  %v10975_v52 = vld [vmem:[%s11684_s30 + $0x1984] ss:$8 sps:$4 sm:$0xff]   ;;  %v10970_v37 = vld [vmem:[%s11684_s30 + $0x1880] ss:$8 sps:$4 sm:$0xff]  }
 0x37e   : > { %8024 = vmatprep.subr.bf16.mxu1 %v10891_v26  ;;  %8011 = vmatprep.mubr.bf16.mxu0 %v8578_v27  ;;  %v10973_v26 = vld [vmem:[%s11684_s30 + $0x1980] ss:$8 sps:$4 sm:$0xff]   ;;  %v10978_v27 = vld [vmem:[%s11684_s30 + $0x1a74] ss:$8 sps:$4 sm:$0xff]  }
 0x37f   : > { %8054 = vmatprep.mubr.bf16.mxu1 %v8580_v28  ;;  %v10981_v28 = vld [vmem:[%s11684_s30 + $0x1b74] ss:$8 sps:$4 sm:$0xff]  }
 0x380   : > { %7982 = vmatpush1.bf16.msra.mxu0 %v10886_v53  ;;  %v12776_v53 = vld [vmem:[%s11682_s8 + $0xd0] sm:$0xff] }
 0x381   : > { %8025 = vmatpush1.bf16.msra.mxu1 %v10889_v39  ;;  %7983 = vmatprep.subr.bf16.mxu0 %v10894_v40  ;;  %v8577_v39 = vcombine.low %v12692_v45, %v12699_v32  ;;  %v8579_v40 = vcombine.low %v12702_v36, %v12705_v47  ;;  %v10984_v45 = vld [vmem:[%s11684_s30 + $0x1a64] ss:$8 sps:$4 sm:$0xff]  }
 0x382   : > { %8026 = vmatprep.subr.bf16.mxu1 %v10897_v54  ;;  %v12783_v54 = vld [vmem:[%s11682_s8 + $0x1d0] sm:$0xff]  ;;  %v10987_v32 = vld [vmem:[%s11684_s30 + $0x1b64] ss:$8 sps:$4 sm:$0xff]  }
 0x383   : > { %v8582_v36 = vcombine.high %v12776_v53, %v12783_v54 }
 0x384   : > { %7984 = vmatpush1.bf16.msra.mxu0 %v10892_v44  ;;  %v12786_v44 = vld [vmem:[%s11682_s8 + $0xd8] sm:$0xff] }
 0x385   : > { %8027 = vmatpush1.bf16.msra.mxu1 %v10895_v55  ;;  %7985 = vmatprep.subr.bf16.mxu0 %v10900_v56  ;;  %v12789_v55 = vld [vmem:[%s11682_s8 + $0x1d8] sm:$0xff] }
 0x386   : > { %8028 = vmatprep.subr.bf16.mxu1 %v10903_v60  ;;  %v10976_v56 = vld [vmem:[%s11684_s30 + $0x1a70] ss:$8 sps:$4 sm:$0xff]   ;;  %v8584_v47 = vcombine.high %v12786_v44, %v12789_v55 }
 0x387   : > { %v10979_v60 = vld [vmem:[%s11684_s30 + $0x1b70] ss:$8 sps:$4 sm:$0xff]  }
 0x388   : > { %7986 = vmatpush1.bf16.msra.mxu0 %v10898_v61  ;;  %v10982_v61 = vld [vmem:[%s11684_s30 + $0x1a60] ss:$8 sps:$4 sm:$0xff]  }
 0x389   : > { %8029 = vmatpush1.bf16.msra.mxu1 %v10901_v35  ;;  %7987 = vmatprep.subr.bf16.mxu0 %v10906_v49  ;;  %v10985_v35 = vld [vmem:[%s11684_s30 + $0x1b60] ss:$8 sps:$4 sm:$0xff]   ;;  %v10990_v49 = vld [vmem:[%s11684_s30 + $0x1a54] ss:$8 sps:$4 sm:$0xff]  }
 0x38a   : > { %8030 = vmatprep.subr.bf16.mxu1 %v10909_v62  ;;  %v10993_v62 = vld [vmem:[%s11684_s30 + $0x1b54] ss:$8 sps:$4 sm:$0xff]  }
 0x38c   : > { %7988 = vmatpush1.bf16.msra.mxu0 %v10904_v51  ;;  %v10988_v51 = vld [vmem:[%s11684_s30 + $0x1a50] ss:$8 sps:$4 sm:$0xff]  }
 0x38d   : > { %8031 = vmatpush1.bf16.msra.mxu1 %v10907_v63  ;;  %7989 = vmatprep.subr.bf16.mxu0 %v10912_v0  ;;  %v10991_v63 = vld [vmem:[%s11684_s30 + $0x1b50] ss:$8 sps:$4 sm:$0xff]   ;;  %v10996_v0 = vld [vmem:[%s11684_s30 + $0x1a44] ss:$8 sps:$4 sm:$0xff]  }
 0x38e   : > { %8032 = vmatprep.subr.bf16.mxu1 %v10915_v4  ;;  %v10999_v4 = vld [vmem:[%s11684_s30 + $0x1b44] ss:$8 sps:$4 sm:$0xff]  }
 0x390   : > { %7990 = vmatpush1.bf16.msra.mxu0 %v10910_v5  ;;  %v10994_v5 = vld [vmem:[%s11684_s30 + $0x1a40] ss:$8 sps:$4 sm:$0xff]  }
 0x391   : > { %8033 = vmatpush1.bf16.msra.mxu1 %v10913_v43  ;;  %7991 = vmatprep.subr.bf16.mxu0 %v10918_v57  ;;  %v10997_v43 = vld [vmem:[%s11684_s30 + $0x1b40] ss:$8 sps:$4 sm:$0xff]   ;;  %v11002_v57 = vld [vmem:[%s11684_s30 + $0x1a34] ss:$8 sps:$4 sm:$0xff]  }
 0x392   : > { %8034 = vmatprep.subr.bf16.mxu1 %v10921_v6  ;;  %v11005_v6 = vld [vmem:[%s11684_s30 + $0x1b34] ss:$8 sps:$4 sm:$0xff]  }
 0x394   : > { %7992 = vmatpush1.bf16.msra.mxu0 %v10916_v59  ;;  %v11000_v59 = vld [vmem:[%s11684_s30 + $0x1a30] ss:$8 sps:$4 sm:$0xff]  }
 0x395   : > { %8035 = vmatpush1.bf16.msra.mxu1 %v10919_v7  ;;  %7993 = vmatprep.subr.bf16.mxu0 %v10924_v8  ;;  %v11003_v7 = vld [vmem:[%s11684_s30 + $0x1b30] ss:$8 sps:$4 sm:$0xff]   ;;  %v11008_v8 = vld [vmem:[%s11684_s30 + $0x1a24] ss:$8 sps:$4 sm:$0xff]  }
 0x396   : > { %8036 = vmatprep.subr.bf16.mxu1 %v10927_v12  ;;  %v11011_v12 = vld [vmem:[%s11684_s30 + $0x1b24] ss:$8 sps:$4 sm:$0xff]  }
 0x398   : > { %7994 = vmatpush1.bf16.msra.mxu0 %v10922_v13  ;;  %v11006_v13 = vld [vmem:[%s11684_s30 + $0x1a20] ss:$8 sps:$4 sm:$0xff]  }
 0x399   : > { %8037 = vmatpush1.bf16.msra.mxu1 %v10925_v50  ;;  %7995 = vmatprep.subr.bf16.mxu0 %v10930_v1  ;;  %v11009_v50 = vld [vmem:[%s11684_s30 + $0x1b20] ss:$8 sps:$4 sm:$0xff]   ;;  %v11014_v1 = vld [vmem:[%s11684_s30 + $0x1a14] ss:$8 sps:$4 sm:$0xff]  }
 0x39a   : > { %8038 = vmatprep.subr.bf16.mxu1 %v10933_v14  ;;  %v11017_v14 = vld [vmem:[%s11684_s30 + $0x1b14] ss:$8 sps:$4 sm:$0xff]  }
 0x39c   : > { %7996 = vmatpush2.bf16.msra.mxu0 %v10928_v3  ;;  %v11012_v3 = vld [vmem:[%s11684_s30 + $0x1a10] ss:$8 sps:$4 sm:$0xff]  }
 0x39d   : > { %8039 = vmatpush2.bf16.msra.mxu1 %v10931_v15  ;;  %7997 = vmatprep.subr.bf16.mxu0 %v10936_v16  ;;  %v11015_v15 = vld [vmem:[%s11684_s30 + $0x1b10] ss:$8 sps:$4 sm:$0xff]   ;;  %v11020_v16 = vld [vmem:[%s11684_s30 + $0x1a04] ss:$8 sps:$4 sm:$0xff]  }
 0x39e   : > { %8040 = vmatprep.subr.bf16.mxu1 %v10939_v20  ;;  %v11023_v20 = vld [vmem:[%s11684_s30 + $0x1b04] ss:$8 sps:$4 sm:$0xff]  }
 0x3a0   : > { %7998 = vmatpush2.bf16.msra.mxu0 %v10934_v21  ;;  %v11018_v21 = vld [vmem:[%s11684_s30 + $0x1a00] ss:$8 sps:$4 sm:$0xff]  }
 0x3a1   : > { %8041 = vmatpush2.bf16.msra.mxu1 %v10937_v58  ;;  %7999 = vmatprep.subr.bf16.mxu0 %v10942_v9  ;;  %v11021_v58 = vld [vmem:[%s11684_s30 + $0x1b00] ss:$8 sps:$4 sm:$0xff]   ;;  %v11026_v9 = vld [vmem:[%s11684_s30 + $0x1af4] ss:$8 sps:$4 sm:$0xff]  }
 0x3a2   : > { %8042 = vmatprep.subr.bf16.mxu1 %v10945_v22  ;;  %v11029_v22 = vld [vmem:[%s11684_s30 + $0x1bf4] ss:$8 sps:$4 sm:$0xff]  }
 0x3a4   : > { %8000 = vmatpush2.bf16.msra.mxu0 %v10940_v11  ;;  %v11024_v11 = vld [vmem:[%s11684_s30 + $0x1af0] ss:$8 sps:$4 sm:$0xff]  }
 0x3a5   : > { %8043 = vmatpush2.bf16.msra.mxu1 %v10943_v23  ;;  %8001 = vmatprep.subr.bf16.mxu0 %v10948_v33  ;;  %v11027_v23 = vld [vmem:[%s11684_s30 + $0x1bf0] ss:$8 sps:$4 sm:$0xff]   ;;  %v11032_v33 = vld [vmem:[%s11684_s30 + $0x1ae4] ss:$8 sps:$4 sm:$0xff]  }
 0x3a6   : > { %8044 = vmatprep.subr.bf16.mxu1 %v10951_v34  ;;  %v11035_v34 = vld [vmem:[%s11684_s30 + $0x1be4] ss:$8 sps:$4 sm:$0xff]  }
 0x3a8   : > { %8002 = vmatpush2.bf16.msra.mxu0 %v10946_v2  ;;  %v11030_v2 = vld [vmem:[%s11684_s30 + $0x1ae0] ss:$8 sps:$4 sm:$0xff]  }
 0x3a9   : > { %8045 = vmatpush2.bf16.msra.mxu1 %v10949_v17  ;;  %8003 = vmatprep.subr.bf16.mxu0 %v10954_v18  ;;  %v11033_v17 = vld [vmem:[%s11684_s30 + $0x1be0] ss:$8 sps:$4 sm:$0xff]   ;;  %v11038_v18 = vld [vmem:[%s11684_s30 + $0x1ad4] ss:$8 sps:$4 sm:$0xff]  }
 0x3aa   : > { %8046 = vmatprep.subr.bf16.mxu1 %v10957_v19  ;;  %v11041_v19 = vld [vmem:[%s11684_s30 + $0x1bd4] ss:$8 sps:$4 sm:$0xff]  }
 0x3ac   : > { %8004 = vmatpush2.bf16.msra.mxu0 %v10952_v38  ;;  %v11036_v38 = vld [vmem:[%s11684_s30 + $0x1ad0] ss:$8 sps:$4 sm:$0xff]  }
 0x3ad   : > { %8047 = vmatpush2.bf16.msra.mxu1 %v10955_v25  ;;  %8005 = vmatprep.subr.bf16.mxu0 %v10960_v41  ;;  %v11039_v25 = vld [vmem:[%s11684_s30 + $0x1bd0] ss:$8 sps:$4 sm:$0xff]   ;;  %v11044_v41 = vld [vmem:[%s11684_s30 + $0x1ac4] ss:$8 sps:$4 sm:$0xff]  }
 0x3ae   : > { %8048 = vmatprep.subr.bf16.mxu1 %v10963_v42  ;;  %v11047_v42 = vld [vmem:[%s11684_s30 + $0x1bc4] ss:$8 sps:$4 sm:$0xff]  }
 0x3b0   : > { %8006 = vmatpush2.bf16.msra.mxu0 %v10958_v10  ;;  %v11042_v10 = vld [vmem:[%s11684_s30 + $0x1ac0] ss:$8 sps:$4 sm:$0xff]  }
 0x3b1   : > { %8049 = vmatpush2.bf16.msra.mxu1 %v10961_v24  ;;  %8007 = vmatprep.subr.bf16.mxu0 %v10966_v29  ;;  %v11045_v24 = vld [vmem:[%s11684_s30 + $0x1bc0] ss:$8 sps:$4 sm:$0xff]   ;;  %v11050_v29 = vld [vmem:[%s11684_s30 + $0x1ab4] ss:$8 sps:$4 sm:$0xff]  }
 0x3b2   : > { %8050 = vmatprep.subr.bf16.mxu1 %v10969_v30  ;;  %v11053_v30 = vld [vmem:[%s11684_s30 + $0x1bb4] ss:$8 sps:$4 sm:$0xff]  }
 0x3b4   : > { %8008 = vmatpush2.bf16.msra.mxu0 %v10964_v46  ;;  %v11048_v46 = vld [vmem:[%s11684_s30 + $0x1ab0] ss:$8 sps:$4 sm:$0xff]  }
 0x3b5   : > { %8051 = vmatpush2.bf16.msra.mxu1 %v10967_v31  ;;  %8009 = vmatprep.subr.bf16.mxu0 %v10972_v48  ;;  %v11051_v31 = vld [vmem:[%s11684_s30 + $0x1bb0] ss:$8 sps:$4 sm:$0xff]   ;;  %v11056_v48 = vld [vmem:[%s11684_s30 + $0x1aa4] ss:$8 sps:$4 sm:$0xff]  }
 0x3b6   : > { %8052 = vmatprep.subr.bf16.mxu1 %v10975_v52  ;;  %v11059_v52 = vld [vmem:[%s11684_s30 + $0x1ba4] ss:$8 sps:$4 sm:$0xff]  }
 0x3b8   : > { %8010 = vmatpush2.bf16.msra.mxu0 %v10970_v37  ;;  %v11054_v37 = vld [vmem:[%s11684_s30 + $0x1aa0] ss:$8 sps:$4 sm:$0xff]  }
 0x3b9   : > { %8053 = vmatpush2.bf16.msra.mxu1 %v10973_v26  ;;  %8065 = vmatprep.subr.bf16.mxu0 %v10978_v27  ;;  %v11057_v26 = vld [vmem:[%s11684_s30 + $0x1ba0] ss:$8 sps:$4 sm:$0xff]   ;;  %v11062_v27 = vld [vmem:[%s11684_s30 + $0x1a94] ss:$8 sps:$4 sm:$0xff]  }
 0x3ba   : > { %8108 = vmatprep.subr.bf16.mxu1 %v10981_v28  ;;  %v11065_v28 = vld [vmem:[%s11684_s30 + $0x1b94] ss:$8 sps:$4 sm:$0xff]  }
 0x3bb   : > { %8012 = vmatmul.mubr.bf16.vlgmr.msra.gmra.mxu0 %v8577_v39  ;;  %v11060_v39 = vld [vmem:[%s11684_s30 + $0x1a90] ss:$8 sps:$4 sm:$0xff]  }
 0x3bc   : > { %8055 = vmatmul.mubr.bf16.vlgmr.msra.gmra.mxu1 %v8579_v40  ;;  %8066 = vmatpush1.bf16.msra.mxu0 %v10976_v56  ;;  %v11063_v40 = vld [vmem:[%s11684_s30 + $0x1b90] ss:$8 sps:$4 sm:$0xff]   ;;  %v11068_v56 = vld [vmem:[%s11684_s30 + $0x1a84] ss:$8 sps:$4 sm:$0xff]  }
 0x3bd   : > { %8109 = vmatpush1.bf16.msra.mxu1 %v10979_v60  ;;  %8067 = vmatprep.subr.bf16.mxu0 %v10984_v45  ;;  %v11071_v60 = vld [vmem:[%s11684_s30 + $0x1b84] ss:$8 sps:$4 sm:$0xff]   ;;  %v11066_v45 = vld [vmem:[%s11684_s30 + $0x1a80] ss:$8 sps:$4 sm:$0xff]  }
 0x3be   : > { %8110 = vmatprep.subr.bf16.mxu1 %v10987_v32  ;;  %8097 = vmatprep.mubr.bf16.mxu0 %v8582_v36  ;;  %v11069_v32 = vld [vmem:[%s11684_s30 + $0x1b80] ss:$8 sps:$4 sm:$0xff]   ;;  %v11074_v36 = vld [vmem:[%s11684_s30 + $0x1c74] ss:$8 sps:$4 sm:$0xff]  }
 0x3bf   : > { %8140 = vmatprep.mubr.bf16.mxu1 %v8584_v47  ;;  %v11077_v47 = vld [vmem:[%s11684_s30 + $0x1d74] ss:$8 sps:$4 sm:$0xff]  }
 0x3c0   : > { %8068 = vmatpush1.bf16.msra.mxu0 %v10982_v61  ;;  %v12860_v61 = vld [vmem:[%s11682_s8 + $0xe0] sm:$0xff] }
 0x3c1   : > { %8111 = vmatpush1.bf16.msra.mxu1 %v10985_v35  ;;  %8069 = vmatprep.subr.bf16.mxu0 %v10990_v49  ;;  %v8581_v35 = vcombine.low %v12776_v53, %v12783_v54  ;;  %v8583_v49 = vcombine.low %v12786_v44, %v12789_v55  ;;  %v11080_v53 = vld [vmem:[%s11684_s30 + $0x1c64] ss:$8 sps:$4 sm:$0xff]  }
 0x3c2   : > { %8112 = vmatprep.subr.bf16.mxu1 %v10993_v62  ;;  %v12867_v62 = vld [vmem:[%s11682_s8 + $0x1e0] sm:$0xff] }
 0x3c3   : > { %v11083_v54 = vld [vmem:[%s11684_s30 + $0x1d64] ss:$8 sps:$4 sm:$0xff]   ;;  %v8586_v44 = vcombine.high %v12860_v61, %v12867_v62 }
 0x3c4   : > { %8070 = vmatpush1.bf16.msra.mxu0 %v10988_v51  ;;  %v12870_v51 = vld [vmem:[%s11682_s8 + $0xe8] sm:$0xff] }
 0x3c5   : > { %8113 = vmatpush1.bf16.msra.mxu1 %v10991_v63  ;;  %8071 = vmatprep.subr.bf16.mxu0 %v10996_v0  ;;  %v12873_v63 = vld [vmem:[%s11682_s8 + $0x1e8] sm:$0xff]  ;;  %v11072_v0 = vld [vmem:[%s11684_s30 + $0x1c70] ss:$8 sps:$4 sm:$0xff]  }
 0x3c6   : > { %8114 = vmatprep.subr.bf16.mxu1 %v10999_v4  ;;  %v11075_v4 = vld [vmem:[%s11684_s30 + $0x1d70] ss:$8 sps:$4 sm:$0xff]   ;;  %v8588_v55 = vcombine.high %v12870_v51, %v12873_v63 }
 0x3c8   : > { %8072 = vmatpush1.bf16.msra.mxu0 %v10994_v5  ;;  %v11078_v5 = vld [vmem:[%s11684_s30 + $0x1c60] ss:$8 sps:$4 sm:$0xff]  }
 0x3c9   : > { %8115 = vmatpush1.bf16.msra.mxu1 %v10997_v43  ;;  %8073 = vmatprep.subr.bf16.mxu0 %v11002_v57  ;;  %v11081_v43 = vld [vmem:[%s11684_s30 + $0x1d60] ss:$8 sps:$4 sm:$0xff]   ;;  %v11086_v57 = vld [vmem:[%s11684_s30 + $0x1c54] ss:$8 sps:$4 sm:$0xff]  }
 0x3ca   : > { %8116 = vmatprep.subr.bf16.mxu1 %v11005_v6  ;;  %v11089_v6 = vld [vmem:[%s11684_s30 + $0x1d54] ss:$8 sps:$4 sm:$0xff]  }
 0x3cc   : > { %8074 = vmatpush1.bf16.msra.mxu0 %v11000_v59  ;;  %v11084_v59 = vld [vmem:[%s11684_s30 + $0x1c50] ss:$8 sps:$4 sm:$0xff]  }
 0x3cd   : > { %8117 = vmatpush1.bf16.msra.mxu1 %v11003_v7  ;;  %8075 = vmatprep.subr.bf16.mxu0 %v11008_v8  ;;  %v11087_v7 = vld [vmem:[%s11684_s30 + $0x1d50] ss:$8 sps:$4 sm:$0xff]   ;;  %v11092_v8 = vld [vmem:[%s11684_s30 + $0x1c44] ss:$8 sps:$4 sm:$0xff]  }
 0x3ce   : > { %8118 = vmatprep.subr.bf16.mxu1 %v11011_v12  ;;  %v11095_v12 = vld [vmem:[%s11684_s30 + $0x1d44] ss:$8 sps:$4 sm:$0xff]  }
 0x3d0   : > { %8076 = vmatpush1.bf16.msra.mxu0 %v11006_v13  ;;  %v11090_v13 = vld [vmem:[%s11684_s30 + $0x1c40] ss:$8 sps:$4 sm:$0xff]  }
 0x3d1   : > { %8119 = vmatpush1.bf16.msra.mxu1 %v11009_v50  ;;  %8077 = vmatprep.subr.bf16.mxu0 %v11014_v1  ;;  %v11093_v50 = vld [vmem:[%s11684_s30 + $0x1d40] ss:$8 sps:$4 sm:$0xff]   ;;  %v11098_v1 = vld [vmem:[%s11684_s30 + $0x1c34] ss:$8 sps:$4 sm:$0xff]  }
 0x3d2   : > { %8120 = vmatprep.subr.bf16.mxu1 %v11017_v14  ;;  %v11101_v14 = vld [vmem:[%s11684_s30 + $0x1d34] ss:$8 sps:$4 sm:$0xff]  }
 0x3d4   : > { %8078 = vmatpush1.bf16.msra.mxu0 %v11012_v3  ;;  %v11096_v3 = vld [vmem:[%s11684_s30 + $0x1c30] ss:$8 sps:$4 sm:$0xff]  }
 0x3d5   : > { %8121 = vmatpush1.bf16.msra.mxu1 %v11015_v15  ;;  %8079 = vmatprep.subr.bf16.mxu0 %v11020_v16  ;;  %v11099_v15 = vld [vmem:[%s11684_s30 + $0x1d30] ss:$8 sps:$4 sm:$0xff]   ;;  %v11104_v16 = vld [vmem:[%s11684_s30 + $0x1c24] ss:$8 sps:$4 sm:$0xff]  }
 0x3d6   : > { %8122 = vmatprep.subr.bf16.mxu1 %v11023_v20  ;;  %v11107_v20 = vld [vmem:[%s11684_s30 + $0x1d24] ss:$8 sps:$4 sm:$0xff]  }
 0x3d8   : > { %8080 = vmatpush1.bf16.msra.mxu0 %v11018_v21  ;;  %v11102_v21 = vld [vmem:[%s11684_s30 + $0x1c20] ss:$8 sps:$4 sm:$0xff]  }
 0x3d9   : > { %8123 = vmatpush1.bf16.msra.mxu1 %v11021_v58  ;;  %8081 = vmatprep.subr.bf16.mxu0 %v11026_v9  ;;  %v11105_v58 = vld [vmem:[%s11684_s30 + $0x1d20] ss:$8 sps:$4 sm:$0xff]   ;;  %v11110_v9 = vld [vmem:[%s11684_s30 + $0x1c14] ss:$8 sps:$4 sm:$0xff]  }
 0x3da   : > { %8124 = vmatprep.subr.bf16.mxu1 %v11029_v22  ;;  %v11113_v22 = vld [vmem:[%s11684_s30 + $0x1d14] ss:$8 sps:$4 sm:$0xff]  }
 0x3dc   : > { %8082 = vmatpush2.bf16.msra.mxu0 %v11024_v11  ;;  %v11108_v11 = vld [vmem:[%s11684_s30 + $0x1c10] ss:$8 sps:$4 sm:$0xff]  }
 0x3dd   : > { %8125 = vmatpush2.bf16.msra.mxu1 %v11027_v23  ;;  %8083 = vmatprep.subr.bf16.mxu0 %v11032_v33  ;;  %v11111_v23 = vld [vmem:[%s11684_s30 + $0x1d10] ss:$8 sps:$4 sm:$0xff]   ;;  %v11116_v33 = vld [vmem:[%s11684_s30 + $0x1c04] ss:$8 sps:$4 sm:$0xff]  }
 0x3de   : > { %8126 = vmatprep.subr.bf16.mxu1 %v11035_v34  ;;  %v11119_v34 = vld [vmem:[%s11684_s30 + $0x1d04] ss:$8 sps:$4 sm:$0xff]  }
 0x3e0   : > { %8084 = vmatpush2.bf16.msra.mxu0 %v11030_v2  ;;  %v11114_v2 = vld [vmem:[%s11684_s30 + $0x1c00] ss:$8 sps:$4 sm:$0xff]  }
 0x3e1   : > { %8127 = vmatpush2.bf16.msra.mxu1 %v11033_v17  ;;  %8085 = vmatprep.subr.bf16.mxu0 %v11038_v18  ;;  %v11117_v17 = vld [vmem:[%s11684_s30 + $0x1d00] ss:$8 sps:$4 sm:$0xff]   ;;  %v11122_v18 = vld [vmem:[%s11684_s30 + $0x1cf4] ss:$8 sps:$4 sm:$0xff]  }
 0x3e2   : > { %8128 = vmatprep.subr.bf16.mxu1 %v11041_v19  ;;  %v11125_v19 = vld [vmem:[%s11684_s30 + $0x1df4] ss:$8 sps:$4 sm:$0xff]  }
 0x3e4   : > { %8086 = vmatpush2.bf16.msra.mxu0 %v11036_v38  ;;  %v11120_v38 = vld [vmem:[%s11684_s30 + $0x1cf0] ss:$8 sps:$4 sm:$0xff]  }
 0x3e5   : > { %8129 = vmatpush2.bf16.msra.mxu1 %v11039_v25  ;;  %8087 = vmatprep.subr.bf16.mxu0 %v11044_v41  ;;  %v11123_v25 = vld [vmem:[%s11684_s30 + $0x1df0] ss:$8 sps:$4 sm:$0xff]   ;;  %v11128_v41 = vld [vmem:[%s11684_s30 + $0x1ce4] ss:$8 sps:$4 sm:$0xff]  }
 0x3e6   : > { %8130 = vmatprep.subr.bf16.mxu1 %v11047_v42  ;;  %v11131_v42 = vld [vmem:[%s11684_s30 + $0x1de4] ss:$8 sps:$4 sm:$0xff]  }
 0x3e8   : > { %8088 = vmatpush2.bf16.msra.mxu0 %v11042_v10  ;;  %v11126_v10 = vld [vmem:[%s11684_s30 + $0x1ce0] ss:$8 sps:$4 sm:$0xff]  }
 0x3e9   : > { %8131 = vmatpush2.bf16.msra.mxu1 %v11045_v24  ;;  %8089 = vmatprep.subr.bf16.mxu0 %v11050_v29  ;;  %v11129_v24 = vld [vmem:[%s11684_s30 + $0x1de0] ss:$8 sps:$4 sm:$0xff]   ;;  %v11134_v29 = vld [vmem:[%s11684_s30 + $0x1cd4] ss:$8 sps:$4 sm:$0xff]  }
 0x3ea   : > { %8132 = vmatprep.subr.bf16.mxu1 %v11053_v30  ;;  %v11137_v30 = vld [vmem:[%s11684_s30 + $0x1dd4] ss:$8 sps:$4 sm:$0xff]  }
 0x3ec   : > { %8090 = vmatpush2.bf16.msra.mxu0 %v11048_v46  ;;  %v11132_v46 = vld [vmem:[%s11684_s30 + $0x1cd0] ss:$8 sps:$4 sm:$0xff]  }
 0x3ed   : > { %8133 = vmatpush2.bf16.msra.mxu1 %v11051_v31  ;;  %8091 = vmatprep.subr.bf16.mxu0 %v11056_v48  ;;  %v11135_v31 = vld [vmem:[%s11684_s30 + $0x1dd0] ss:$8 sps:$4 sm:$0xff]   ;;  %v11140_v48 = vld [vmem:[%s11684_s30 + $0x1cc4] ss:$8 sps:$4 sm:$0xff]  }
 0x3ee   : > { %8134 = vmatprep.subr.bf16.mxu1 %v11059_v52  ;;  %v11143_v52 = vld [vmem:[%s11684_s30 + $0x1dc4] ss:$8 sps:$4 sm:$0xff]  }
 0x3f0   : > { %8092 = vmatpush2.bf16.msra.mxu0 %v11054_v37  ;;  %v11138_v37 = vld [vmem:[%s11684_s30 + $0x1cc0] ss:$8 sps:$4 sm:$0xff]  }
 0x3f1   : > { %8135 = vmatpush2.bf16.msra.mxu1 %v11057_v26  ;;  %8093 = vmatprep.subr.bf16.mxu0 %v11062_v27  ;;  %v11141_v26 = vld [vmem:[%s11684_s30 + $0x1dc0] ss:$8 sps:$4 sm:$0xff]   ;;  %v11146_v27 = vld [vmem:[%s11684_s30 + $0x1cb4] ss:$8 sps:$4 sm:$0xff]  }
 0x3f2   : > { %8136 = vmatprep.subr.bf16.mxu1 %v11065_v28  ;;  %v11149_v28 = vld [vmem:[%s11684_s30 + $0x1db4] ss:$8 sps:$4 sm:$0xff]  }
 0x3f4   : > { %8094 = vmatpush2.bf16.msra.mxu0 %v11060_v39  ;;  %v11144_v39 = vld [vmem:[%s11684_s30 + $0x1cb0] ss:$8 sps:$4 sm:$0xff]  }
 0x3f5   : > { %8137 = vmatpush2.bf16.msra.mxu1 %v11063_v40  ;;  %8095 = vmatprep.subr.bf16.mxu0 %v11068_v56  ;;  %v11147_v40 = vld [vmem:[%s11684_s30 + $0x1db0] ss:$8 sps:$4 sm:$0xff]   ;;  %v11152_v56 = vld [vmem:[%s11684_s30 + $0x1ca4] ss:$8 sps:$4 sm:$0xff]  }
 0x3f6   : > { %8138 = vmatprep.subr.bf16.mxu1 %v11071_v60  ;;  %v11155_v60 = vld [vmem:[%s11684_s30 + $0x1da4] ss:$8 sps:$4 sm:$0xff]  }
 0x3f8   : > { %8096 = vmatpush2.bf16.msra.mxu0 %v11066_v45  ;;  %v11150_v45 = vld [vmem:[%s11684_s30 + $0x1ca0] ss:$8 sps:$4 sm:$0xff]  }
 0x3f9   : > { %8139 = vmatpush2.bf16.msra.mxu1 %v11069_v32  ;;  %8151 = vmatprep.subr.bf16.mxu0 %v11074_v36  ;;  %v11153_v32 = vld [vmem:[%s11684_s30 + $0x1da0] ss:$8 sps:$4 sm:$0xff]   ;;  %v11158_v36 = vld [vmem:[%s11684_s30 + $0x1c94] ss:$8 sps:$4 sm:$0xff]  }
 0x3fa   : > { %8194 = vmatprep.subr.bf16.mxu1 %v11077_v47  ;;  %v11161_v47 = vld [vmem:[%s11684_s30 + $0x1d94] ss:$8 sps:$4 sm:$0xff]  }
 0x3fb   : > { %8098 = vmatmul.mubr.bf16.vlgmr.msra.gmra.mxu0 %v8581_v35  ;;  %v11156_v35 = vld [vmem:[%s11684_s30 + $0x1c90] ss:$8 sps:$4 sm:$0xff]  }
 0x3fc   : > { %8141 = vmatmul.mubr.bf16.vlgmr.msra.gmra.mxu1 %v8583_v49  ;;  %8152 = vmatpush1.bf16.msra.mxu0 %v11072_v0  ;;  %v11159_v49 = vld [vmem:[%s11684_s30 + $0x1d90] ss:$8 sps:$4 sm:$0xff]   ;;  %v11164_v0 = vld [vmem:[%s11684_s30 + $0x1c84] ss:$8 sps:$4 sm:$0xff]  }
 0x3fd   : > { %8195 = vmatpush1.bf16.msra.mxu1 %v11075_v4  ;;  %8153 = vmatprep.subr.bf16.mxu0 %v11080_v53  ;;  %v11167_v4 = vld [vmem:[%s11684_s30 + $0x1d84] ss:$8 sps:$4 sm:$0xff]   ;;  %v11162_v53 = vld [vmem:[%s11684_s30 + $0x1c80] ss:$8 sps:$4 sm:$0xff]  }
 0x3fe   : > { %8196 = vmatprep.subr.bf16.mxu1 %v11083_v54  ;;  %8183 = vmatprep.mubr.bf16.mxu0 %v8586_v44  ;;  %v11165_v54 = vld [vmem:[%s11684_s30 + $0x1d80] ss:$8 sps:$4 sm:$0xff]   ;;  %v11170_v44 = vld [vmem:[%s11684_s30 + $0x1e74] ss:$8 sps:$4 sm:$0xff]  }
 0x3ff   : > { %8226 = vmatprep.mubr.bf16.mxu1 %v8588_v55  ;;  %v11173_v55 = vld [vmem:[%s11684_s30 + $0x1f74] ss:$8 sps:$4 sm:$0xff]  }
 0x400   : > { %8154 = vmatpush1.bf16.msra.mxu0 %v11078_v5  ;;  %v12944_v5 = vld [vmem:[%s11682_s8 + $0xf0] sm:$0xff] }
 0x401   : > { %8197 = vmatpush1.bf16.msra.mxu1 %v11081_v43  ;;  %8155 = vmatprep.subr.bf16.mxu0 %v11086_v57  ;;  %v8585_v43 = vcombine.low %v12860_v61, %v12867_v62  ;;  %v8587_v57 = vcombine.low %v12870_v51, %v12873_v63  ;;  %v11176_v61 = vld [vmem:[%s11684_s30 + $0x1e64] ss:$8 sps:$4 sm:$0xff]  }
 0x402   : > { %8198 = vmatprep.subr.bf16.mxu1 %v11089_v6  ;;  %v12951_v6 = vld [vmem:[%s11682_s8 + $0x1f0] sm:$0xff]  ;;  %v11179_v62 = vld [vmem:[%s11684_s30 + $0x1f64] ss:$8 sps:$4 sm:$0xff]  }
 0x403   : > { %v8590_v51 = vcombine.high %v12944_v5, %v12951_v6 }
 0x404   : > { %8156 = vmatpush1.bf16.msra.mxu0 %v11084_v59  ;;  %v12954_v59 = vld [vmem:[%s11682_s8 + $0xf8] sm:$0xff] }
 0x405   : > { %8199 = vmatpush1.bf16.msra.mxu1 %v11087_v7  ;;  %8157 = vmatprep.subr.bf16.mxu0 %v11092_v8  ;;  %v12957_v7 = vld [vmem:[%s11682_s8 + $0x1f8] sm:$0xff] }
 0x406   : > { %8200 = vmatprep.subr.bf16.mxu1 %v11095_v12  ;;  %v11168_v8 = vld [vmem:[%s11684_s30 + $0x1e70] ss:$8 sps:$4 sm:$0xff]   ;;  %v8592_v63 = vcombine.high %v12954_v59, %v12957_v7 }
 0x407   : > { %v11171_v12 = vld [vmem:[%s11684_s30 + $0x1f70] ss:$8 sps:$4 sm:$0xff]  }
 0x408   : > { %8158 = vmatpush1.bf16.msra.mxu0 %v11090_v13  ;;  %v11174_v13 = vld [vmem:[%s11684_s30 + $0x1e60] ss:$8 sps:$4 sm:$0xff]  }
 0x409   : > { %8201 = vmatpush1.bf16.msra.mxu1 %v11093_v50  ;;  %8159 = vmatprep.subr.bf16.mxu0 %v11098_v1  ;;  %v11177_v50 = vld [vmem:[%s11684_s30 + $0x1f60] ss:$8 sps:$4 sm:$0xff]   ;;  %v11182_v1 = vld [vmem:[%s11684_s30 + $0x1e54] ss:$8 sps:$4 sm:$0xff]  }
 0x40a   : > { %8202 = vmatprep.subr.bf16.mxu1 %v11101_v14  ;;  %v11185_v14 = vld [vmem:[%s11684_s30 + $0x1f54] ss:$8 sps:$4 sm:$0xff]  }
 0x40c   : > { %8160 = vmatpush1.bf16.msra.mxu0 %v11096_v3  ;;  %v11180_v3 = vld [vmem:[%s11684_s30 + $0x1e50] ss:$8 sps:$4 sm:$0xff]  }
 0x40d   : > { %8203 = vmatpush1.bf16.msra.mxu1 %v11099_v15  ;;  %8161 = vmatprep.subr.bf16.mxu0 %v11104_v16  ;;  %v11183_v15 = vld [vmem:[%s11684_s30 + $0x1f50] ss:$8 sps:$4 sm:$0xff]   ;;  %v11188_v16 = vld [vmem:[%s11684_s30 + $0x1e44] ss:$8 sps:$4 sm:$0xff]  }
 0x40e   : > { %8204 = vmatprep.subr.bf16.mxu1 %v11107_v20  ;;  %v11191_v20 = vld [vmem:[%s11684_s30 + $0x1f44] ss:$8 sps:$4 sm:$0xff]  }
 0x410   : > { %8162 = vmatpush1.bf16.msra.mxu0 %v11102_v21  ;;  %v11186_v21 = vld [vmem:[%s11684_s30 + $0x1e40] ss:$8 sps:$4 sm:$0xff]  }
 0x411   : > { %8205 = vmatpush1.bf16.msra.mxu1 %v11105_v58  ;;  %8163 = vmatprep.subr.bf16.mxu0 %v11110_v9  ;;  %v11189_v58 = vld [vmem:[%s11684_s30 + $0x1f40] ss:$8 sps:$4 sm:$0xff]   ;;  %v11194_v9 = vld [vmem:[%s11684_s30 + $0x1e34] ss:$8 sps:$4 sm:$0xff]  }
 0x412   : > { %8206 = vmatprep.subr.bf16.mxu1 %v11113_v22  ;;  %v11197_v22 = vld [vmem:[%s11684_s30 + $0x1f34] ss:$8 sps:$4 sm:$0xff]  }
 0x414   : > { %8164 = vmatpush1.bf16.msra.mxu0 %v11108_v11  ;;  %v11192_v11 = vld [vmem:[%s11684_s30 + $0x1e30] ss:$8 sps:$4 sm:$0xff]  }
 0x415   : > { %8207 = vmatpush1.bf16.msra.mxu1 %v11111_v23  ;;  %8165 = vmatprep.subr.bf16.mxu0 %v11116_v33  ;;  %v11195_v23 = vld [vmem:[%s11684_s30 + $0x1f30] ss:$8 sps:$4 sm:$0xff]   ;;  %v11200_v33 = vld [vmem:[%s11684_s30 + $0x1e24] ss:$8 sps:$4 sm:$0xff]  }
 0x416   : > { %8208 = vmatprep.subr.bf16.mxu1 %v11119_v34  ;;  %v11203_v34 = vld [vmem:[%s11684_s30 + $0x1f24] ss:$8 sps:$4 sm:$0xff]  }
 0x418   : > { %8166 = vmatpush1.bf16.msra.mxu0 %v11114_v2  ;;  %v11198_v2 = vld [vmem:[%s11684_s30 + $0x1e20] ss:$8 sps:$4 sm:$0xff]  }
 0x419   : > { %8209 = vmatpush1.bf16.msra.mxu1 %v11117_v17  ;;  %8167 = vmatprep.subr.bf16.mxu0 %v11122_v18  ;;  %v11201_v17 = vld [vmem:[%s11684_s30 + $0x1f20] ss:$8 sps:$4 sm:$0xff]   ;;  %v11206_v18 = vld [vmem:[%s11684_s30 + $0x1e14] ss:$8 sps:$4 sm:$0xff]  }
 0x41a   : > { %8210 = vmatprep.subr.bf16.mxu1 %v11125_v19  ;;  %v11209_v19 = vld [vmem:[%s11684_s30 + $0x1f14] ss:$8 sps:$4 sm:$0xff]  }
 0x41c   : > { %8168 = vmatpush2.bf16.msra.mxu0 %v11120_v38  ;;  %v11204_v38 = vld [vmem:[%s11684_s30 + $0x1e10] ss:$8 sps:$4 sm:$0xff]  }
 0x41d   : > { %8211 = vmatpush2.bf16.msra.mxu1 %v11123_v25  ;;  %8169 = vmatprep.subr.bf16.mxu0 %v11128_v41  ;;  %v11207_v25 = vld [vmem:[%s11684_s30 + $0x1f10] ss:$8 sps:$4 sm:$0xff]   ;;  %v11212_v41 = vld [vmem:[%s11684_s30 + $0x1e04] ss:$8 sps:$4 sm:$0xff]  }
 0x41e   : > { %8212 = vmatprep.subr.bf16.mxu1 %v11131_v42  ;;  %v11215_v42 = vld [vmem:[%s11684_s30 + $0x1f04] ss:$8 sps:$4 sm:$0xff]  }
 0x420   : > { %8170 = vmatpush2.bf16.msra.mxu0 %v11126_v10  ;;  %v11210_v10 = vld [vmem:[%s11684_s30 + $0x1e00] ss:$8 sps:$4 sm:$0xff]  }
 0x421   : > { %8213 = vmatpush2.bf16.msra.mxu1 %v11129_v24  ;;  %8171 = vmatprep.subr.bf16.mxu0 %v11134_v29  ;;  %v11213_v24 = vld [vmem:[%s11684_s30 + $0x1f00] ss:$8 sps:$4 sm:$0xff]   ;;  %v11218_v29 = vld [vmem:[%s11684_s30 + $0x1ef4] ss:$8 sps:$4 sm:$0xff]  }
 0x422   : > { %8214 = vmatprep.subr.bf16.mxu1 %v11137_v30  ;;  %v11221_v30 = vld [vmem:[%s11684_s30 + $0x1ff4] ss:$8 sps:$4 sm:$0xff]  }
 0x424   : > { %8172 = vmatpush2.bf16.msra.mxu0 %v11132_v46  ;;  %v11216_v46 = vld [vmem:[%s11684_s30 + $0x1ef0] ss:$8 sps:$4 sm:$0xff]  }
 0x425   : > { %8215 = vmatpush2.bf16.msra.mxu1 %v11135_v31  ;;  %8173 = vmatprep.subr.bf16.mxu0 %v11140_v48  ;;  %v11219_v31 = vld [vmem:[%s11684_s30 + $0x1ff0] ss:$8 sps:$4 sm:$0xff]   ;;  %v11224_v48 = vld [vmem:[%s11684_s30 + $0x1ee4] ss:$8 sps:$4 sm:$0xff]  }
 0x426   : > { %8216 = vmatprep.subr.bf16.mxu1 %v11143_v52  ;;  %v11227_v52 = vld [vmem:[%s11684_s30 + $0x1fe4] ss:$8 sps:$4 sm:$0xff]  }
 0x428   : > { %8174 = vmatpush2.bf16.msra.mxu0 %v11138_v37  ;;  %v11222_v37 = vld [vmem:[%s11684_s30 + $0x1ee0] ss:$8 sps:$4 sm:$0xff]  }
 0x429   : > { %8217 = vmatpush2.bf16.msra.mxu1 %v11141_v26  ;;  %8175 = vmatprep.subr.bf16.mxu0 %v11146_v27  ;;  %v11225_v26 = vld [vmem:[%s11684_s30 + $0x1fe0] ss:$8 sps:$4 sm:$0xff]   ;;  %v11230_v27 = vld [vmem:[%s11684_s30 + $0x1ed4] ss:$8 sps:$4 sm:$0xff]  }
 0x42a   : > { %8218 = vmatprep.subr.bf16.mxu1 %v11149_v28  ;;  %v11233_v28 = vld [vmem:[%s11684_s30 + $0x1fd4] ss:$8 sps:$4 sm:$0xff]  }
 0x42c   : > { %8176 = vmatpush2.bf16.msra.mxu0 %v11144_v39  ;;  %v11228_v39 = vld [vmem:[%s11684_s30 + $0x1ed0] ss:$8 sps:$4 sm:$0xff]  }
 0x42d   : > { %8219 = vmatpush2.bf16.msra.mxu1 %v11147_v40  ;;  %8177 = vmatprep.subr.bf16.mxu0 %v11152_v56  ;;  %v11231_v40 = vld [vmem:[%s11684_s30 + $0x1fd0] ss:$8 sps:$4 sm:$0xff]   ;;  %v11236_v56 = vld [vmem:[%s11684_s30 + $0x1ec4] ss:$8 sps:$4 sm:$0xff]  }
 0x42e   : > { %8220 = vmatprep.subr.bf16.mxu1 %v11155_v60  ;;  %v11239_v60 = vld [vmem:[%s11684_s30 + $0x1fc4] ss:$8 sps:$4 sm:$0xff]  }
 0x430   : > { %8178 = vmatpush2.bf16.msra.mxu0 %v11150_v45  ;;  %v11234_v45 = vld [vmem:[%s11684_s30 + $0x1ec0] ss:$8 sps:$4 sm:$0xff]  }
 0x431   : > { %8221 = vmatpush2.bf16.msra.mxu1 %v11153_v32  ;;  %8179 = vmatprep.subr.bf16.mxu0 %v11158_v36  ;;  %v11237_v32 = vld [vmem:[%s11684_s30 + $0x1fc0] ss:$8 sps:$4 sm:$0xff]   ;;  %v11242_v36 = vld [vmem:[%s11684_s30 + $0x1eb4] ss:$8 sps:$4 sm:$0xff]  }
 0x432   : > { %8222 = vmatprep.subr.bf16.mxu1 %v11161_v47  ;;  %v11245_v47 = vld [vmem:[%s11684_s30 + $0x1fb4] ss:$8 sps:$4 sm:$0xff]  }
 0x434   : > { %8180 = vmatpush2.bf16.msra.mxu0 %v11156_v35  ;;  %v11240_v35 = vld [vmem:[%s11684_s30 + $0x1eb0] ss:$8 sps:$4 sm:$0xff]  }
 0x435   : > { %8223 = vmatpush2.bf16.msra.mxu1 %v11159_v49  ;;  %8181 = vmatprep.subr.bf16.mxu0 %v11164_v0  ;;  %v11243_v49 = vld [vmem:[%s11684_s30 + $0x1fb0] ss:$8 sps:$4 sm:$0xff]   ;;  %v13013_v0 = vpop.f32.mrf.mxu0 }
 0x436   : > { %8224 = vmatprep.subr.bf16.mxu1 %v11167_v4  ;;  %v13015_v4 = vpop.f32.mrf.mxu1 }
 0x438   : > { %8182 = vmatpush2.bf16.msra.mxu0 %v11162_v53  ;;  %v11248_v53 = vld [vmem:[%s11684_s30 + $0x1ea4] ss:$8 sps:$4 sm:$0xff]  }
 0x439   : > { %8225 = vmatpush2.bf16.msra.mxu1 %v11165_v54  ;;  %8237 = vmatprep.subr.bf16.mxu0 %v11170_v44  ;;  %v11251_v54 = vld [vmem:[%s11684_s30 + $0x1fa4] ss:$8 sps:$4 sm:$0xff]   ;;  %v11246_v44 = vld [vmem:[%s11684_s30 + $0x1ea0] ss:$8 sps:$4 sm:$0xff]  }
 0x43a   : > { %8280 = vmatprep.subr.bf16.mxu1 %v11173_v55  ;;  %v11249_v55 = vld [vmem:[%s11684_s30 + $0x1fa0] ss:$8 sps:$4 sm:$0xff]  }
 0x43b   : > { %8184 = vmatmul.mubr.bf16.vlgmr.msra.gmra.mxu0 %v8585_v43  ;;  %v13021_v43 = vpop.f32.mrf.mxu0 }
 0x43c   : > { %8227 = vmatmul.mubr.bf16.vlgmr.msra.gmra.mxu1 %v8587_v57  ;;  %8238 = vmatpush1.bf16.msra.mxu0 %v11168_v8  ;;  %v13023_v57 = vpop.f32.mrf.mxu1  ;;  %v11254_v8 = vld [vmem:[%s11684_s30 + $0x1e94] ss:$8 sps:$4 sm:$0xff]  }
 0x43d   : > { %8281 = vmatpush1.bf16.msra.mxu1 %v11171_v12  ;;  %8239 = vmatprep.subr.bf16.mxu0 %v11176_v61  ;;  %v11257_v12 = vld [vmem:[%s11684_s30 + $0x1f94] ss:$8 sps:$4 sm:$0xff]   ;;  %v11252_v61 = vld [vmem:[%s11684_s30 + $0x1e90] ss:$8 sps:$4 sm:$0xff]  }
 0x43e   : > { %8282 = vmatprep.subr.bf16.mxu1 %v11179_v62  ;;  %8269 = vmatprep.mubr.bf16.mxu0 %v8590_v51  ;;  %v11255_v62 = vld [vmem:[%s11684_s30 + $0x1f90] ss:$8 sps:$4 sm:$0xff]   ;;  %v13029_v51 = vpop.f32.mrf.mxu0 }
 0x43f   : > { %8312 = vmatprep.mubr.bf16.mxu1 %v8592_v63  ;;  %v13031_v63 = vpop.f32.mrf.mxu1 }
 0x440   : > { %8240 = vmatpush1.bf16.msra.mxu0 %v11174_v13  ;;  %v11260_v13 = vld [vmem:[%s11684_s30 + $0x1e84] ss:$8 sps:$4 sm:$0xff]  }
 0x441   : > { %8283 = vmatpush1.bf16.msra.mxu1 %v11177_v50  ;;  %8241 = vmatprep.subr.bf16.mxu0 %v11182_v1  ;;  %v11263_v50 = vld [vmem:[%s11684_s30 + $0x1f84] ss:$8 sps:$4 sm:$0xff]   ;;  %v11258_v1 = vld [vmem:[%s11684_s30 + $0x1e80] ss:$8 sps:$4 sm:$0xff]  }
 0x442   : > { %8284 = vmatprep.subr.bf16.mxu1 %v11185_v14  ;;  %v11261_v14 = vld [vmem:[%s11684_s30 + $0x1f80] ss:$8 sps:$4 sm:$0xff]  }
 0x444   : > { %8242 = vmatpush1.bf16.msra.mxu0 %v11180_v3  ;;  %v13037_v3 = vpop.f32.mrf.mxu0 }
 0x445   : > { %8285 = vmatpush1.bf16.msra.mxu1 %v11183_v15  ;;  %8243 = vmatprep.subr.bf16.mxu0 %v11188_v16  ;;  %v13039_v15 = vpop.f32.mrf.mxu1 }
 0x446   : > { %8286 = vmatprep.subr.bf16.mxu1 %v11191_v20  ;;  %v13041_v16 = vpop.f32.mrf.mxu0 }
 0x447   : > { %v13043_v20 = vpop.f32.mrf.mxu1 }
 0x448   : > { %8244 = vmatpush1.bf16.msra.mxu0 %v11186_v21  ;;  %v8589_v21 = vcombine.low %v12944_v5, %v12951_v6 }
 0x449   : > { %8287 = vmatpush1.bf16.msra.mxu1 %v11189_v58  ;;  %8245 = vmatprep.subr.bf16.mxu0 %v11194_v9  ;;  %v8591_v58 = vcombine.low %v12954_v59, %v12957_v7  ;;  %v13049_v9 = vpop.f32.mrf.mxu0 }
 0x44a   : > { %8288 = vmatprep.subr.bf16.mxu1 %v11197_v22  ;;  %v13051_v22 = vpop.f32.mrf.mxu1 }
 0x44c   : > { %8246 = vmatpush1.bf16.msra.mxu0 %v11192_v11  ;;  %v13053_v11 = vpop.f32.mrf.mxu0 }
 0x44d   : > { %8289 = vmatpush1.bf16.msra.mxu1 %v11195_v23  ;;  %8247 = vmatprep.subr.bf16.mxu0 %v11200_v33  ;;  %v13055_v23 = vpop.f32.mrf.mxu1 }
 0x44e   : > { %8290 = vmatprep.subr.bf16.mxu1 %v11203_v34  ;;  %v13057_v33 = vpop.f32.mrf.mxu0 }
 0x44f   : > { %v13059_v34 = vpop.f32.mrf.mxu1 }
 0x450   : > { %8248 = vmatpush1.bf16.msra.mxu0 %v11198_v2  ;;  %v13061_v5 = vpop.f32.mrf.mxu0 }
 0x451   : > { %8291 = vmatpush1.bf16.msra.mxu1 %v11201_v17  ;;  %8249 = vmatprep.subr.bf16.mxu0 %v11206_v18  ;;  %v13063_v6 = vpop.f32.mrf.mxu1 }
 0x452   : > { %8292 = vmatprep.subr.bf16.mxu1 %v11209_v19  ;;  %v13065_v59 = vpop.f32.mrf.mxu0 }
 0x453   : > { %v13067_v7 = vpop.f32.mrf.mxu1 }
 0x454   : > { %8250 = vmatpush1.bf16.msra.mxu0 %v11204_v38  ;;  %v13069_v2 = vpop.f32.mrf.mxu0 }
 0x455   : > { %8293 = vmatpush1.bf16.msra.mxu1 %v11207_v25  ;;  %8251 = vmatprep.subr.bf16.mxu0 %v11212_v41  ;;  %v13071_v17 = vpop.f32.mrf.mxu1 }
 0x456   : > { %8294 = vmatprep.subr.bf16.mxu1 %v11215_v42  ;;  %v13073_v18 = vpop.f32.mrf.mxu0 }
 0x457   : > { %v13075_v19 = vpop.f32.mrf.mxu1 }
 0x458   : > { %8252 = vmatpush1.bf16.msra.mxu0 %v11210_v10  ;;  %v13077_v38 = vpop.f32.mrf.mxu0 }
 0x459   : > { %8295 = vmatpush1.bf16.msra.mxu1 %v11213_v24  ;;  %8253 = vmatprep.subr.bf16.mxu0 %v11218_v29  ;;  %v13079_v25 = vpop.f32.mrf.mxu1 }
 0x45a   : > { %8296 = vmatprep.subr.bf16.mxu1 %v11221_v30  ;;  %v13081_v41 = vpop.f32.mrf.mxu0 }
 0x45b   : > { %v13083_v42 = vpop.f32.mrf.mxu1 }
 0x45c   : > { %8254 = vmatpush2.bf16.msra.mxu0 %v11216_v46  ;;  %v13085_v10 = vpop.f32.mrf.mxu0 }
 0x45d   : > { %8297 = vmatpush2.bf16.msra.mxu1 %v11219_v31  ;;  %8255 = vmatprep.subr.bf16.mxu0 %v11224_v48  ;;  %v13087_v24 = vpop.f32.mrf.mxu1 }
 0x45e   : > { %8298 = vmatprep.subr.bf16.mxu1 %v11227_v52  ;;  %v13089_v29 = vpop.f32.mrf.mxu0 }
 0x45f   : > { %v13091_v30 = vpop.f32.mrf.mxu1 }
 0x460   : > { %8256 = vmatpush2.bf16.msra.mxu0 %v11222_v37  ;;  %v13093_v46 = vpop.f32.mrf.mxu0 }
 0x461   : > { %8299 = vmatpush2.bf16.msra.mxu1 %v11225_v26  ;;  %8257 = vmatprep.subr.bf16.mxu0 %v11230_v27  ;;  %v13095_v31 = vpop.f32.mrf.mxu1 }
 0x462   : > { %8300 = vmatprep.subr.bf16.mxu1 %v11233_v28  ;;  %v13097_v48 = vpop.f32.mrf.mxu0 }
 0x463   : > { %v13099_v52 = vpop.f32.mrf.mxu1 }
 0x464   : > { %8258 = vmatpush2.bf16.msra.mxu0 %v11228_v39  ;;  %v13101_v37 = vpop.f32.mrf.mxu0 }
 0x465   : > { %8301 = vmatpush2.bf16.msra.mxu1 %v11231_v40  ;;  %8259 = vmatprep.subr.bf16.mxu0 %v11236_v56  ;;  %v13103_v26 = vpop.f32.mrf.mxu1 }
 0x466   : > { %8302 = vmatprep.subr.bf16.mxu1 %v11239_v60  ;;  %v13105_v27 = vpop.f32.mrf.mxu0 }
 0x467   : > { %v13107_v28 = vpop.f32.mrf.mxu1 }
 0x468   : > { %8260 = vmatpush2.bf16.msra.mxu0 %v11234_v45  ;;  %v13109_v39 = vpop.f32.mrf.mxu0 }
 0x469   : > { %8303 = vmatpush2.bf16.msra.mxu1 %v11237_v32  ;;  %8261 = vmatprep.subr.bf16.mxu0 %v11242_v36  ;;  %v13111_v40 = vpop.f32.mrf.mxu1 }
 0x46a   : > { %8304 = vmatprep.subr.bf16.mxu1 %v11245_v47  ;;  %v13113_v56 = vpop.f32.mrf.mxu0 }
 0x46b   : > { %v13115_v60 = vpop.f32.mrf.mxu1 }
 0x46c   : > { %8262 = vmatpush2.bf16.msra.mxu0 %v11240_v35  ;;  %v13117_v45 = vpop.f32.mrf.mxu0 }
 0x46d   : > { %8305 = vmatpush2.bf16.msra.mxu1 %v11243_v49  ;;  %8263 = vmatprep.subr.bf16.mxu0 %v11248_v53  ;;  %v13119_v32 = vpop.f32.mrf.mxu1 }
 0x46e   : > { %8306 = vmatprep.subr.bf16.mxu1 %v11251_v54  ;;  %v13121_v36 = vpop.f32.mrf.mxu0 }
 0x46f   : > { %v13123_v47 = vpop.f32.mrf.mxu1 }
 0x470   : > { %8264 = vmatpush2.bf16.msra.mxu0 %v11246_v44  ;;  %v13125_v35 = vpop.f32.mrf.mxu0 }
 0x471   : > { %8307 = vmatpush2.bf16.msra.mxu1 %v11249_v55  ;;  %8265 = vmatprep.subr.bf16.mxu0 %v11254_v8  ;;  %v13127_v49 = vpop.f32.mrf.mxu1 }
 0x472   : > { %8308 = vmatprep.subr.bf16.mxu1 %v11257_v12  ;;  %v13129_v53 = vpop.f32.mrf.mxu0 }
 0x473   : > { %v13131_v54 = vpop.f32.mrf.mxu1 }
 0x474   : > { %8266 = vmatpush2.bf16.msra.mxu0 %v11252_v61  ;;  %v13133_v44 = vpop.f32.mrf.mxu0 }
 0x475   : > { %8309 = vmatpush2.bf16.msra.mxu1 %v11255_v62  ;;  %8267 = vmatprep.subr.bf16.mxu0 %v11260_v13  ;;  %v13135_v55 = vpop.f32.mrf.mxu1 }
 0x476   : > { %8310 = vmatprep.subr.bf16.mxu1 %v11263_v50  ;;  %13380 = vst [vmem:[#allocation15_spill] sm:$0xff] %v13135_v55  ;;  %v13137_v8 = vpop.f32.mrf.mxu0 }
 0x477   : > { %13381 = vst [vmem:[#allocation16_spill] sm:$0xff] %v13137_v8  ;;  %v13139_v12 = vpop.f32.mrf.mxu1 }
 0x478   : > { %8268 = vmatpush2.bf16.msra.mxu0 %v11258_v1  ;;  %13382 = vst [vmem:[#allocation17_spill] sm:$0xff] %v13139_v12  ;;  %v13141_v61 = vpop.f32.mrf.mxu0 }
 0x479   : > { %8311 = vmatpush2.bf16.msra.mxu1 %v11261_v14  ;;  %13383 = vst [vmem:[#allocation18_spill] sm:$0xff] %v13141_v61  ;;  %v13143_v62 = vpop.f32.mrf.mxu1 }
 0x47a   : > { %13384 = vst [vmem:[#allocation19_spill] sm:$0xff] %v13143_v62  ;;  %v13145_v13 = vpop.f32.mrf.mxu0 }
 0x47b   : > { %8270 = vmatmul.mubr.bf16.vlgmr.msra.gmra.mxu0 %v8589_v21  ;;  %13385 = vst [vmem:[#allocation20_spill] sm:$0xff] %v13145_v13  ;;  %v13147_v50 = vpop.f32.mrf.mxu1 }
 0x47c   : > { %8313 = vmatmul.mubr.bf16.vlgmr.msra.gmra.mxu1 %v8591_v58  ;;  %13386 = vst [vmem:[#allocation21_spill] sm:$0xff] %v13147_v50  ;;  %v13149_v1 = vpop.f32.mrf.mxu0 }
 0x47d   : > { %13387 = vst [vmem:[#allocation22_spill] sm:$0xff] %v13149_v1  ;;  %v13151_v14 = vpop.f32.mrf.mxu1 }
 0x47e   : > { %13388 = vst [vmem:[#allocation23_spill] sm:$0xff] %v13151_v14  ;;  %v13153_v21 = vpop.f32.mrf.mxu0  ;;  %v7025_v14 = vadd.f32 %v13015_v4, %v13013_v0  ;;  %v7031_v0 = vadd.f32 %v13039_v15, %v13037_v3 }
 0x47f   : > { %v13155_v58 = vpop.f32.mrf.mxu1 }
 0x480   : > { %13389 = vst [vmem:[#allocation24_spill] sm:$0xff] %v13155_v58  ;;  %v13157_v55 = vpop.f32.mrf.mxu0 }
 0x481   : > { %13390 = vst [vmem:[#allocation25_spill] sm:$0xff] %v13157_v55  ;;  %v13159_v8 = vpop.f32.mrf.mxu1 }
 0x482   : > { %13391 = vst [vmem:[#allocation26_spill] sm:$0xff] %v13159_v8  ;;  %v13161_v12 = vpop.f32.mrf.mxu0  ;;  %v7027_v8 = vadd.f32 %v13023_v57, %v13021_v43  ;;  %v7074_v57 = vadd.f32 %v13057_v33, %v7031_v0 }
 0x483   : > { %v13163_v61 = vpop.f32.mrf.mxu1 }
 0x484   : > { %13392 = vst [vmem:[#allocation27_spill] sm:$0xff] %v13163_v61  ;;  %v13165_v62 = vpop.f32.mrf.mxu0  ;;  %v7068_v61 = vadd.f32 %v13041_v16, %v7025_v14  ;;  %v7117_v3 = vadd.f32 %v13059_v34, %v7074_v57 }
 0x485   : > { %13393 = vst [vmem:[#allocation28_spill] sm:$0xff] %v13165_v62  ;;  %v13167_v13 = vpop.f32.mrf.mxu1  ;;  %v7029_v62 = vadd.f32 %v13031_v63, %v13029_v51 }
 0x486   : > { %13394 = vst [vmem:[#allocation29_spill] sm:$0xff] %v13167_v13  ;;  %v13169_v50 = vpop.f32.mrf.mxu0  ;;  %v7070_v13 = vadd.f32 %v13049_v9, %v7027_v8  ;;  %v7111_v4 = vadd.f32 %v13043_v20, %v7068_v61 }
 0x487   : > { %13395 = vst [vmem:[#allocation30_spill] sm:$0xff] %v13169_v50  ;;  %v13171_v1 = vpop.f32.mrf.mxu1 }
 0x488   : > { %13396 = vst [vmem:[#allocation31_spill] sm:$0xff] %v13171_v1  ;;  %v13175_v58 = vpop.f32.mrf.mxu0  ;;  %v7113_v43 = vadd.f32 %v13051_v22, %v7070_v13  ;;  %v7154_v16 = vadd.f32 %v13061_v5, %v7111_v4  ;;  %v7160_v5 = vadd.f32 %v13073_v18, %v7117_v3 }
 0x489   : > { %v13177_v55 = vpop.f32.mrf.mxu1 }
 0x48a   : > { %13397 = vst [vmem:[#allocation32_spill] sm:$0xff] %v13177_v55  ;;  %v13185_v50 = vpop.f32.mrf.mxu0  ;;  %v7072_v55 = vadd.f32 %v13053_v11, %v7029_v62  ;;  %v7156_v8 = vadd.f32 %v13065_v59, %v7113_v43  ;;  %v7197_v15 = vadd.f32 %v13063_v6, %v7154_v16  ;;  %v7203_v59 = vadd.f32 %v13075_v19, %v7160_v5 }
 0x48b   : > { %v13187_v1 = vpop.f32.mrf.mxu1 }
 0x48c   : > { %v13196_v51 = vpop.f32.mrf.mxu0  ;;  %v7115_v9 = vadd.f32 %v13055_v23, %v7072_v55  ;;  %v7199_v33 = vadd.f32 %v13067_v7, %v7156_v8  ;;  %v7240_v61 = vadd.f32 %v13077_v38, %v7197_v15  ;;  %v7246_v38 = vadd.f32 %v13089_v29, %v7203_v59 }
 0x48d   : > { %v13198_v63 = vpop.f32.mrf.mxu1 }
 0x48e   : > { %v7158_v20 = vadd.f32 %v13069_v2, %v7115_v9  ;;  %v13205_v11 = vpop.f32.mrf.mxu0  ;;  %v7242_v6 = vadd.f32 %v13081_v41, %v7199_v33  ;;  %v7283_v2 = vadd.f32 %v13079_v25, %v7240_v61  ;;  %v7289_v25 = vadd.f32 %v13091_v30, %v7246_v38  ;;  %v13400_v61 = vld [vmem:[#allocation15_spill] sm:$0xff] }
 0x48f   : > { %v13207_v22 = vpop.f32.mrf.mxu1 }
 0x490   : > { %v13212_v62 = vpop.f32.mrf.mxu0  ;;  %v7201_v34 = vadd.f32 %v13071_v17, %v7158_v20  ;;  %v7285_v18 = vadd.f32 %v13083_v42, %v7242_v6  ;;  %v7326_v14 = vadd.f32 %v13093_v46, %v7283_v2  ;;  %v7332_v29 = vadd.f32 %v13105_v27, %v7289_v25  ;;  %v13401_v6 = vld [vmem:[#allocation20_spill] sm:$0xff]  ;;  %v13402_v2 = vld [vmem:[#allocation17_spill] sm:$0xff] }
 0x491   : > { %v13214_v23 = vpop.f32.mrf.mxu1  ;;  %v13406_v25 = vld [vmem:[#allocation25_spill] sm:$0xff] }
 0x492   : > { %v7244_v55 = vadd.f32 %v13085_v10, %v7201_v34  ;;  %v13221_v13 = vpop.f32.mrf.mxu0  ;;  %v7328_v41 = vadd.f32 %v13097_v48, %v7285_v18  ;;  %v7369_v10 = vadd.f32 %v13095_v31, %v7326_v14  ;;  %v7375_v31 = vadd.f32 %v13107_v28, %v7332_v29  ;;  %v13404_v18 = vld [vmem:[#allocation22_spill] sm:$0xff] }
 0x493   : > { %v13223_v7 = vpop.f32.mrf.mxu1 }
 0x494   : > { %v7287_v17 = vadd.f32 %v13087_v24, %v7244_v55  ;;  %v13230_v0 = vpop.f32.mrf.mxu0  ;;  %v7371_v42 = vadd.f32 %v13099_v52, %v7328_v41  ;;  %v7412_v46 = vadd.f32 %v13109_v39, %v7369_v10  ;;  %v7418_v39 = vadd.f32 %v13121_v36, %v7375_v31  ;;  %v13398_v36 = vld [vmem:[#allocation16_spill] sm:$0xff]  ;;  %v13403_v55 = vld [vmem:[#allocation19_spill] sm:$0xff] }
 0x495   : > { %v13232_v19 = vpop.f32.mrf.mxu1 }
 0x496   : > { %v7330_v4 = vadd.f32 %v13101_v37, %v7287_v17  ;;  %v13240_v43 = vpop.f32.mrf.mxu0  ;;  %v7414_v57 = vadd.f32 %v13113_v56, %v7371_v42  ;;  %v7455_v52 = vadd.f32 %v13111_v40, %v7412_v46  ;;  %v7461_v15 = vadd.f32 %v13123_v47, %v7418_v39  ;;  %v13405_v17 = vld [vmem:[#allocation21_spill] sm:$0xff] }
 0x497   : > { %v13242_v24 = vpop.f32.mrf.mxu1 }
 0x498   : > { %v7373_v48 = vadd.f32 %v13103_v26, %v7330_v4  ;;  %v13246_v16 = vpop.f32.mrf.mxu0  ;;  %v7457_v27 = vadd.f32 %v13115_v60, %v7414_v57  ;;  %v7498_v9 = vadd.f32 %v13125_v35, %v7455_v52  ;;  %v7504_v33 = vadd.f32 %v13398_v36, %v7461_v15  ;;  %v13399_v35 = vld [vmem:[#allocation18_spill] sm:$0xff]  ;;  %v13407_v4 = vld [vmem:[#allocation23_spill] sm:$0xff]  ;;  %v13408_v57 = vld [vmem:[#allocation24_spill] sm:$0xff] }
 0x499   : > { %v13248_v30 = vpop.f32.mrf.mxu1  ;;  %v13409_v52 = vld [vmem:[#allocation26_spill] sm:$0xff] }
 0x49a   : > { %v7416_v37 = vadd.f32 %v13117_v45, %v7373_v48  ;;  %v7929_v8 = vpop.f32.mrf.mxu0  ;;  %v7500_v3 = vadd.f32 %v13129_v53, %v7457_v27  ;;  %v7541_v28 = vadd.f32 %v13127_v49, %v7498_v9  ;;  %v7547_v47 = vadd.f32 %v13402_v2, %v7504_v33  ;;  %v13410_v27 = vld [vmem:[#allocation28_spill] sm:$0xff]  ;;  %v13411_v9 = vld [vmem:[#allocation27_spill] sm:$0xff] }
 0x49b   : > { %v13256_v26 = vpop.f32.mrf.mxu1  ;;  %v13414_v33 = vld [vmem:[#allocation31_spill] sm:$0xff] }
 0x49c   : > { %v7459_v56 = vadd.f32 %v13119_v32, %v7416_v37  ;;  %v7931_v45 = vpop.f32.mrf.mxu0  ;;  %v7543_v60 = vadd.f32 %v13131_v54, %v7500_v3  ;;  %v7584_v5 = vadd.f32 %v13399_v35, %v7541_v28  ;;  %v7590_v41 = vadd.f32 %v13153_v21, %v7547_v47  ;;  %v13412_v3 = vld [vmem:[#allocation30_spill] sm:$0xff] }
 0x49d   : > { %v7974_v20 = vpop.f32.mrf.mxu1 }
 0x49e   : > { %v7502_v40 = vadd.f32 %v13133_v44, %v7459_v56  ;;  %v7586_v32 = vadd.f32 %v13401_v6, %v7543_v60  ;;  %v7933_v59 = vpop.f32.mrf.mxu0  ;;  %v7627_v49 = vadd.f32 %v13403_v55, %v7584_v5  ;;  %v7633_v31 = vadd.f32 %v13408_v57, %v7590_v41  ;;  %v13413_v60 = vld [vmem:[#allocation29_spill] sm:$0xff]  ;;  %v13415_v5 = vld [vmem:[#allocation32_spill] sm:$0xff] }
 0x49f   : > { %v7976_v53 = vpop.f32.mrf.mxu1 }
 0x4a0   : > { %v7545_v34 = vadd.f32 %v13400_v61, %v7502_v40  ;;  %v8013_v38 = vpop.f32.mrf.mxu0  ;;  %v7629_v54 = vadd.f32 %v13405_v17, %v7586_v32  ;;  %v7670_v10 = vadd.f32 %v13406_v25, %v7627_v49  ;;  %v7676_v15 = vadd.f32 %v13412_v3, %v7633_v31 }
 0x4a1   : > { %v8056_v14 = vpop.f32.mrf.mxu1 }
 0x4a2   : > { %v7588_v44 = vadd.f32 %v13404_v18, %v7545_v34  ;;  %v7672_v29 = vadd.f32 %v13161_v12, %v7629_v54  ;;  %v8015_v46 = vpop.f32.mrf.mxu0  ;;  %v7713_v37 = vadd.f32 %v13409_v52, %v7670_v10  ;;  %v7719_v35 = vadd.f32 %v13414_v33, %v7676_v15 }
 0x4a3   : > { %v8058_v48 = vpop.f32.mrf.mxu1 }
 0x4a4   : > { %v7631_v42 = vadd.f32 %v13407_v4, %v7588_v44  ;;  %v7715_v56 = vadd.f32 %v13411_v9, %v7672_v29  ;;  %v7756_v21 = vadd.f32 %v13175_v58, %v7713_v37  ;;  %v8017_v28 = vpop.f32.mrf.mxu0  ;;  %v7762_v47 = vadd.f32 %v13205_v11, %v7719_v35 }
 0x4a5   : > { %v8060_v40 = vpop.f32.mrf.mxu1 }
 0x4a6   : > { %v7674_v39 = vadd.f32 %v13410_v27, %v7631_v42  ;;  %v7758_v12 = vadd.f32 %v13185_v50, %v7715_v56  ;;  %v7799_v61 = vadd.f32 %v13415_v5, %v7756_v21  ;;  %v8019_v6 = vpop.f32.mrf.mxu0  ;;  %v7805_v44 = vadd.f32 %v13207_v22, %v7762_v47 }
 0x4a7   : > { %v8062_v32 = vpop.f32.mrf.mxu1 }
 0x4a8   : > { %v7717_v36 = vadd.f32 %v13413_v60, %v7674_v39  ;;  %v7801_v2 = vadd.f32 %v13187_v1, %v7758_v12  ;;  %v7842_v58 = vadd.f32 %v13212_v62, %v7799_v61  ;;  %v7848_v11 = vadd.f32 %v13240_v43, %v7805_v44 }
 0x4aa   : > { %v7760_v34 = vadd.f32 %v13196_v51, %v7717_v36  ;;  %v7844_v50 = vadd.f32 %v13221_v13, %v7801_v2  ;;  %v7885_v17 = vadd.f32 %v13214_v23, %v7842_v58  ;;  %v7891_v13 = vadd.f32 %v13242_v24, %v7848_v11 }
 0x4ac   : > { %v7803_v18 = vadd.f32 %v13198_v63, %v7760_v34  ;;  %v7887_v1 = vadd.f32 %v13223_v7, %v7844_v50  ;;  %v7928_v62 = vadd.f32 %v13246_v16, %v7885_v17  ;;  %v7934_v42 = vadd.f32 %v7933_v59, %v7891_v13  ;;  %v415_v34 = vld [vmem:[#allocation2 + $0x10] sm:$0xff] }
 0x4ae   : > { %v7846_v51 = vadd.f32 %v13230_v0, %v7803_v18  ;;  %v7930_v10 = vadd.f32 %v7929_v8, %v7887_v1  ;;  %v7971_v22 = vadd.f32 %v13248_v30, %v7928_v62  ;;  %v7977_v37 = vadd.f32 %v7976_v53, %v7934_v42 }
 0x4b0   : > { %v7889_v25 = vadd.f32 %v13232_v19, %v7846_v51  ;;  %v7973_v0 = vadd.f32 %v13256_v26, %v7930_v10  ;;  %v8014_v29 = vadd.f32 %v8013_v38, %v7971_v22  ;;  %v8020_v39 = vadd.f32 %v8019_v6, %v7977_v37 }
 0x4b2   : > { %v7932_v23 = vadd.f32 %v7931_v45, %v7889_v25  ;;  %v8016_v43 = vadd.f32 %v8015_v46, %v7973_v0  ;;  %v8057_v19 = vadd.f32 %v8056_v14, %v8014_v29  ;;  %v8063_v3 = vadd.f32 %v8062_v32, %v8020_v39  ;;  %v418_v25 = vld [vmem:[#allocation2 + $0x8] sm:$0xff] }
 0x4b4   : > { %v7975_v31 = vadd.f32 %v7974_v20, %v7932_v23  ;;  %v8059_v27 = vadd.f32 %v8058_v48, %v8016_v43 }
 0x4b6   : > { %v8018_v8 = vadd.f32 %v8017_v28, %v7975_v31 }
 0x4b8   : > { %v8061_v30 = vadd.f32 %v8060_v40, %v8018_v8 }
 0x4bb   : > { %v8099_v55 = vpop.f32.mrf.mxu0 }
 0x4bc   : > { %v8142_v49 = vpop.f32.mrf.mxu1  ;;  %v8100_v9 = vadd.f32 %v8099_v55, %v8057_v19  ;;  %v416_v55 = vld [vmem:[#allocation2] sm:$0xff] }
 0x4bd   : > { %v8101_v54 = vpop.f32.mrf.mxu0 }
 0x4be   : > { %v8144_v41 = vpop.f32.mrf.mxu1  ;;  %v8102_v45 = vadd.f32 %v8101_v54, %v8059_v27  ;;  %v8143_v26 = vadd.f32 %v8142_v49, %v8100_v9  ;;  %v417_v54 = vld [vmem:[#allocation2 + $0x18] sm:$0xff] }
 0x4bf   : > { %v8103_v63 = vpop.f32.mrf.mxu0 }
 0x4c0   : > { %v8146_v4 = vpop.f32.mrf.mxu1  ;;  %v8104_v59 = vadd.f32 %v8103_v63, %v8061_v30  ;;  %v8145_v21 = vadd.f32 %v8144_v41, %v8102_v45 }
 0x4c1   : > { %v8105_v57 = vpop.f32.mrf.mxu0 }
 0x4c2   : > { %v8148_v7 = vpop.f32.mrf.mxu1  ;;  %v8106_v20 = vadd.f32 %v8105_v57, %v8063_v3  ;;  %v8147_v60 = vadd.f32 %v8146_v4, %v8104_v59 }
 0x4c4   : > { %v8149_v28 = vadd.f32 %v8148_v7, %v8106_v20 }
 0x4fb   : > { %v8185_v52 = vpop.f32.mrf.mxu0 }
 0x4fc   : > { %v8228_v16 = vpop.f32.mrf.mxu1  ;;  %v8186_v46 = vadd.f32 %v8185_v52, %v8143_v26 }
 0x4fd   : > { %v8187_v24 = vpop.f32.mrf.mxu0 }
 0x4fe   : > { %v8230_v56 = vpop.f32.mrf.mxu1  ;;  %v8188_v36 = vadd.f32 %v8187_v24, %v8145_v21  ;;  %v8229_v48 = vadd.f32 %v8228_v16, %v8186_v46 }
 0x4ff   : > { %v8189_v38 = vpop.f32.mrf.mxu0 }
 0x500   : > { %v8232_v15 = vpop.f32.mrf.mxu1  ;;  %v8190_v12 = vadd.f32 %v8189_v38, %v8147_v60  ;;  %v8231_v5 = vadd.f32 %v8230_v56, %v8188_v36 }
 0x501   : > { %v8191_v53 = vpop.f32.mrf.mxu0 }
 0x502   : > { %v8234_v14 = vpop.f32.mrf.mxu1  ;;  %v8192_v40 = vadd.f32 %v8191_v53, %v8149_v28  ;;  %v8233_v2 = vadd.f32 %v8232_v15, %v8190_v12 }
 0x504   : > { %v8235_v50 = vadd.f32 %v8234_v14, %v8192_v40 }
 0x53b   : > { %v8271_v33 = vpop.f32.mrf.mxu0 }
 0x53c   : > { %v8314_v35 = vpop.f32.mrf.mxu1  ;;  %v8272_v61 = vadd.f32 %v8271_v33, %v8229_v48 }
 0x53d   : > { %v8273_v6 = vpop.f32.mrf.mxu0 }
 0x53e   : > { %v8316_v32 = vpop.f32.mrf.mxu1  ;;  %v8315_v47 = vadd.f32 %v8314_v35, %v8272_v61  ;;  %v8274_v58 = vadd.f32 %v8273_v6, %v8231_v5 }
 0x53f   : > { %v8275_v49 = vpop.f32.mrf.mxu0 }
 0x540   : > { %v8318_v18 = vpop.f32.mrf.mxu1  ;;  %v8323_v44 = vadd.f32 %v8315_v47, %v415_v34  ;;  %v8317_v17 = vadd.f32 %v8316_v32, %v8274_v58  ;;  %v8276_v51 = vadd.f32 %v8275_v49, %v8233_v2 }
 0x541   : > { %v8277_v41 = vpop.f32.mrf.mxu0 }
 0x542   : > { %8327 = vst [vmem:[#allocation2 + $0x10] sm:$0xff] %v8323_v44  ;;  %v8324_v1 = vadd.f32 %v8317_v17, %v416_v55  ;;  %v8319_v11 = vadd.f32 %v8318_v18, %v8276_v51  ;;  %v8278_v62 = vadd.f32 %v8277_v41, %v8235_v50  ;;  %v8320_v10 = vpop.f32.mrf.mxu1 }
 0x544   : > { %8328 = vst [vmem:[#allocation2] sm:$0xff] %v8324_v1  ;;  %v8325_v63 = vadd.f32 %v8319_v11, %v417_v54  ;;  %v8321_v4 = vadd.f32 %v8320_v10, %v8278_v62  ;;  %8334 = sbr.rel (%p9617_p12) target bundleno = 1367 (0x557), region = 67 }
 0x546   : > { %8329 = vst [vmem:[#allocation2 + $0x18] sm:$0xff] %v8325_v63  ;;  %v8326_v13 = vadd.f32 %v8321_v4, %v418_v25 }
 0x548   : > { %8330 = vst [vmem:[#allocation2 + $0x8] sm:$0xff] %v8326_v13 }
 0x549   : > { %v8341_v22 = vlaneseq  ;;  %v8339_v0 = vld [vmem:[%s403_s6] sm:$0x3]  ;;  %v8335_v42 = vld [vmem:[#allocation2 + $0x10] sm:$0xff] }
 0x54b   : > { %v8342_v23 = vshrl.u32 %v8341_v22, 7  ;;  %v8336_v7 = vld [vmem:[#allocation2] sm:$0xff] }
 0x54d   : > { %v8343_v29 = vsub.s32 0, %v8342_v23  ;;  %v8347_v57 = vsub.s32 1, %v8342_v23  ;;  %v8337_v31 = vld [vmem:[#allocation2 + $0x18] sm:$0xff] }
 0x54f   : > { %v8338_v43 = vld [vmem:[#allocation2 + $0x8] sm:$0xff]  ;;  %v8344_v52 = vrot.slane %v8339_v0, %v8343_v29  ;;  %v8348_v16 = vrot.slane %v8339_v0, %v8347_v57 }
 0x551   : > { %v8351_v37 = vadd.f32 %v8344_v52, %v8335_v42  ;;  %v8352_v19 = vadd.f32 %v8348_v16, %v8336_v7  ;;  %v8353_v8 = vadd.f32 %v8344_v52, %v8337_v31  ;;  %v8354_v27 = vadd.f32 %v8348_v16, %v8338_v43 }
 0x553   : > { %v8355_v39 = vmax.f32 %v8351_v37, 0.0  ;;  %v8356_v9 = vmax.f32 %v8352_v19, 0.0  ;;  %v8357_v24 = vmax.f32 %v8353_v8, 0.0  ;;  %v8358_v56 = vmax.f32 %v8354_v27, 0.0 }
 0x555   : > { %8359 = vst [vmem:[%s11698_s10] sm:$0xff] %v8355_v39  ;;  %8360 = vst [vmem:[%s11698_s10 + $0x8] sm:$0xff] %v8356_v9 }
 0x556   : > { %8361 = vst [vmem:[%s11698_s10 + $0x10] sm:$0xff] %v8357_v24  ;;  %8362 = vst [vmem:[%s11698_s10 + $0x18] sm:$0xff] %v8358_v56 }
 0x557 PF: > { %8369 = sbr.rel (!%p11524_p1) target bundleno = 1375 (0x55f), region = 71  ;;  %s9625_s19 = sshll.u32 (%p11524_p1), %s11376_s20, 4 }
 0x558   : > { %s8375_s28 = scalar_lea.vmem (%p11524_p1), %s13361_s3, %s9625_s19 }
 0x55c   : > { %v8388_v30 = vld [vmem:[%s11698_s10] sm:$0xff]  ;;  %v8390_v45 = vld [vmem:[%s11698_s10 + $0x8] sm:$0xff] }
 0x55d   : > { %v8392_v3 = vld [vmem:[%s11698_s10 + $0x10] sm:$0xff]  ;;  %v8394_v26 = vld [vmem:[%s11698_s10 + $0x18] sm:$0xff]  ;;  %8389 = vst [vmem:[%s8375_s28] sm:$0xff] %v8388_v30  ;;  %8391 = vst [vmem:[%s8375_s28 + $0x8] sm:$0xff] %v8390_v45 }
 0x55e   : > { %8393 = vst [vmem:[%s8375_s28 + $0x20] sm:$0xff] %v8392_v3  ;;  %8395 = vst [vmem:[%s8375_s28 + $0x28] sm:$0xff] %v8394_v26 }
 0x55f PF: > { %s16_s23 = sadd.s32 1, %s11388_s23   ;;  %s13416_s20 = sld [smem:[#allocation8_spill]] }
 0x560   : > { %p13_p1 = scmp.ge.s32.totalorder %s16_s23, 10   ;;  %s13417_s16 = sld [smem:[#allocation14_spill]] }
 0x561   : > { %s13418_s17 = sld [smem:[#allocation9_spill]]  ;;  %s13423_s12 = smov %s11348_s13 }
 0x562   : > { %s13419_s18 = sld [smem:[#allocation13_spill]]  ;;  %s13424_s13 = smov %s11518_s11 }
 0x563   : > { %s13420_s25 = sld [smem:[#allocation10_spill]]  ;;  %s13425_s14 = smov %s11356_s15 }
 0x564   : > { %s13421_s22 = sld [smem:[#allocation11_spill]]  ;;  %s13427_s19 = smov %s11380_s21 }
 0x565   : > { %s13422_s26 = sld [smem:[#allocation12_spill]]  ;;  %s13426_s15 = smov %s13416_s20 }
 0x567   :  { %15 = sbr.rel (!%p13_p1) target bundleno = 9 (0x9), region = 137 }
 0x569   : > { %s13428_s20 = smov %s13420_s25 }
 0x56a   : > { %s13429_s21 = smov %s13421_s22 }
 0x56b   : > { %s13430_s22 = smov %s13422_s26 }
 0x56c   :  { %8411 = vsyncpa [#allocation5], 1 }
 0x56d   :  { %8413 = vsyncpa [#allocation5 + $0x1], 1 }

// kernel: forward.18
= control target key start
LH: loop header
LB: loop body
LE: loop exit
PB: predicated region body
PF: predicated region fallthrough
CT: control target
= control target key end

     0   :  { %s1672_s12 = smov 0   ;;  %s1674_s13 = smov 0   ;;  %s2003_s0 = inlined_call_operand.vmem [shape: bf16[2304,640], index: 0, kind: input, shape index: {}]   ;;  %s2004_s1 = inlined_call_operand.vmem [shape: bf16[640,128], index: 1, kind: input, shape index: {}]   ;;  %s2005_s2 = inlined_call_operand.vmem [shape: f32[1,128], index: 2, kind: input, shape index: {}]   ;;  %s2006_s3 = inlined_call_operand.vmem [shape: f32[2304,128], index: 3, kind: output, shape index: {}]  }
   0x1   :  { %s1676_s14 = smov 0  }
   0x2 LB: > { %s25_s15 = sadd.s32 1, %s1646_s13  ;;  %p1227_p0 = scmp.ge.s32.totalorder %s1650_s14, 1  ;;  %s1650_s14 = sphi %s1676_s14, %s13_s14   ;;  %s1646_s13 = sphi %s1674_s13, %s2016_s13   ;;  %s1642_s12 = sphi %s1672_s12, %s2015_s12  }
   0x3   : > { %p27_p1 = scmp.ge.s32.totalorder %s25_s15, 18  ;;  %p170_p2 = scmp.lt.s32.totalorder %s1650_s14, 19 }
   0x5   : > { %s2018_s15 = smov (%p27_p1, %s25_s15), 0  ;;  %p171_p3 = pnand %p1227_p0, %p170_p2 }
   0x7   : > { %174 = sbr.rel (%p171_p3) target bundleno = 321 (0x141), region = 32 }
   0xc   : > { %v1532_v0 = vld [vmem:[%s2004_s1 + $0x78] sm:$0xff]   ;;  %v1536_v4 = vld [vmem:[%s2004_s1 + $0x70] sm:$0xff]   ;;  %v1540_v8 = vld [vmem:[%s2004_s1 + $0x68] sm:$0xff]   ;;  %s1228_s23 = sshll.u32 %s1642_s12, 4 }
   0xd   : > { %v1533_v1 = vld [vmem:[%s2004_s1 + $0xf8] sm:$0xff]   ;;  %1315 = vmatprep.subr.bf16.mxu0 %v1532_v0  ;;  %v1537_v5 = vld [vmem:[%s2004_s1 + $0xf0] sm:$0xff]   ;;  %v1541_v9 = vld [vmem:[%s2004_s1 + $0xe8] sm:$0xff]   ;;  %p206_p4 = scmp.lt.s32.totalorder %s1228_s23, 287 }
   0xe   : > { %v1534_v2 = vld [vmem:[%s2004_s1 + $0x38] sm:$0xff]   ;;  %1379 = vmatprep.subr.bf16.mxu1 %v1533_v1  ;;  %v1538_v6 = vld [vmem:[%s2004_s1 + $0x30] sm:$0xff]   ;;  %v1542_v10 = vld [vmem:[%s2004_s1 + $0x28] sm:$0xff]  }
   0xf   : > { %v1535_v3 = vld [vmem:[%s2004_s1 + $0xb8] sm:$0xff]   ;;  %1316 = vmatpush3.bf16.msra.mxu0 %v1534_v2  ;;  %v1539_v7 = vld [vmem:[%s2004_s1 + $0xb0] sm:$0xff]   ;;  %v1543_v11 = vld [vmem:[%s2004_s1 + $0xa8] sm:$0xff]   ;;  %s2020_s23 = smov (!%p206_p4, %s1228_s23), 287 }
  0x10   : > { %1380 = vmatpush3.bf16.msra.mxu1 %v1535_v3  ;;  %1317 = vmatprep.subr.bf16.mxu0 %v1536_v4  ;;  %v1544_v12 = vld [vmem:[%s2004_s1 + $0x60] sm:$0xff]   ;;  %v1548_v16 = vld [vmem:[%s2004_s1 + $0x58] sm:$0xff]   ;;  %v1552_v20 = vld [vmem:[%s2004_s1 + $0x50] sm:$0xff]   ;;  %s1507_s22 = smul.u32 20, %s2020_s23 }
  0x11   : > { %1381 = vmatprep.subr.bf16.mxu1 %v1537_v5  ;;  %v1545_v13 = vld [vmem:[%s2004_s1 + $0xe0] sm:$0xff]   ;;  %v1549_v17 = vld [vmem:[%s2004_s1 + $0xd8] sm:$0xff]   ;;  %v1553_v21 = vld [vmem:[%s2004_s1 + $0xd0] sm:$0xff]  }
  0x12   : > { %v1546_v14 = vld [vmem:[%s2004_s1 + $0x20] sm:$0xff]   ;;  %v1550_v18 = vld [vmem:[%s2004_s1 + $0x18] sm:$0xff]   ;;  %v1554_v22 = vld [vmem:[%s2004_s1 + $0x10] sm:$0xff]   ;;  %s1789_s6 = scalar_lea.vmem %s2003_s0, %s1507_s22 }
  0x13   : > { %1318 = vmatpush3.bf16.msra.mxu0 %v1538_v6  ;;  %v1547_v15 = vld [vmem:[%s2004_s1 + $0xa0] sm:$0xff]   ;;  %v1551_v19 = vld [vmem:[%s2004_s1 + $0x98] sm:$0xff]   ;;  %v1555_v23 = vld [vmem:[%s2004_s1 + $0x90] sm:$0xff]  }
  0x14   : > { %1382 = vmatpush3.bf16.msra.mxu1 %v1539_v7  ;;  %1319 = vmatprep.subr.bf16.mxu0 %v1540_v8  ;;  %v1556_v24 = vld [vmem:[%s2004_s1 + $0x48] sm:$0xff]   ;;  %v1560_v28 = vld [vmem:[%s2004_s1 + $0x40] sm:$0xff]   ;;  %v1570_v36 = vld [vmem:[%s2004_s1 + $0x138] sm:$0xff]  }
  0x15   : > { %1383 = vmatprep.subr.bf16.mxu1 %v1541_v9  ;;  %v1557_v25 = vld [vmem:[%s2004_s1 + $0xc8] sm:$0xff]   ;;  %v1561_v29 = vld [vmem:[%s2004_s1 + $0xc0] sm:$0xff]   ;;  %v1577_v39 = vld [vmem:[%s2004_s1 + $0x130] sm:$0xff]  }
  0x16   : > { %v1558_v26 = vld [vmem:[%s2004_s1 + $0x8] sm:$0xff]   ;;  %v1562_v30 = vld [vmem:[%s2004_s1] sm:$0xff]   ;;  %v1580_v43 = vld [vmem:[%s1789_s6 + $0x5c] ss:$20 sps:$4 sm:$0xff]  }
  0x17   : > { %1320 = vmatpush3.bf16.msra.mxu0 %v1542_v10  ;;  %v1559_v27 = vld [vmem:[%s2004_s1 + $0x88] sm:$0xff]   ;;  %v1563_v31 = vld [vmem:[%s2004_s1 + $0x80] sm:$0xff]   ;;  %v1585_v48 = vld [vmem:[%s1789_s6 + $0x7c] ss:$20 sps:$4 sm:$0xff]  }
  0x18   : > { %1384 = vmatpush3.bf16.msra.mxu1 %v1543_v11  ;;  %1321 = vmatprep.subr.bf16.mxu0 %v1544_v12  ;;  %v1564_v32 = vld [vmem:[%s1789_s6] ss:$20 sps:$4 sm:$0xff]   ;;  %v1566_v33 = vld [vmem:[%s1789_s6 + $0x4] ss:$20 sps:$4 sm:$0xff]   ;;  %v1567_v34 = vld [vmem:[%s1789_s6 + $0x8] ss:$20 sps:$4 sm:$0xff]  }
  0x19   : > { %1385 = vmatprep.subr.bf16.mxu1 %v1545_v13  ;;  %v1569_v35 = vld [vmem:[%s1789_s6 + $0xc] ss:$20 sps:$4 sm:$0xff]   ;;  %844 = vmatprep.mubr.bf16.mxu0 %v1566_v33  ;;  %v1573_v38 = vld [vmem:[%s1789_s6 + $0x34] ss:$20 sps:$4 sm:$0xff]   ;;  %v1576_v41 = vld [vmem:[%s1789_s6 + $0x30] ss:$20 sps:$4 sm:$0xff]  }
  0x1a   : > { %941 = vmatprep.mubr.bf16.mxu1 %v1569_v35  ;;  %v1571_v37 = vld [vmem:[%s1789_s6 + $0x2c] ss:$20 sps:$4 sm:$0xff]   ;;  %v1575_v40 = vld [vmem:[%s1789_s6 + $0x28] ss:$20 sps:$4 sm:$0xff]   ;;  %v1582_v46 = vld [vmem:[%s1789_s6 + $0x50] ss:$20 sps:$4 sm:$0xff]  }
  0x1b   : > { %1322 = vmatpush3.bf16.msra.mxu0 %v1546_v14  ;;  %v1578_v42 = vld [vmem:[%s1789_s6 + $0x54] ss:$20 sps:$4 sm:$0xff]   ;;  %v1591_v45 = vld [vmem:[%s2004_s1 + $0x120] sm:$0xff]   ;;  %v1583_v47 = vld [vmem:[%s1789_s6 + $0x58] ss:$20 sps:$4 sm:$0xff]  }
  0x1c   : > { %1386 = vmatpush3.bf16.msra.mxu1 %v1547_v15  ;;  %1323 = vmatprep.subr.bf16.mxu0 %v1548_v16  ;;  %v1584_v44 = vld [vmem:[%s2004_s1 + $0x128] sm:$0xff]   ;;  %v1587_v49 = vld [vmem:[%s1789_s6 + $0x84] ss:$20 sps:$4 sm:$0xff]   ;;  %v1605_v51 = vld [vmem:[%s2004_s1 + $0x110] sm:$0xff]  }
  0x1d   : > { %1387 = vmatprep.subr.bf16.mxu1 %v1549_v17  ;;  %v1598_v50 = vld [vmem:[%s2004_s1 + $0x118] sm:$0xff]   ;;  %v1590_v53 = vld [vmem:[%s1789_s6 + $0x80] ss:$20 sps:$4 sm:$0xff]   ;;  %v1612_v55 = vld [vmem:[%s2004_s1 + $0x108] sm:$0xff]  }
  0x1e   : > { %v1589_v52 = vld [vmem:[%s1789_s6 + $0x78] ss:$20 sps:$4 sm:$0xff]   ;;  %v1619_v57 = vld [vmem:[%s2004_s1 + $0x100] sm:$0xff]   ;;  %v1597_v59 = vld [vmem:[%s1789_s6 + $0xa8] ss:$20 sps:$4 sm:$0xff]  }
  0x1f   : > { %1324 = vmatpush3.bf16.msra.mxu0 %v1550_v18  ;;  %v1592_v54 = vld [vmem:[%s1789_s6 + $0xa4] ss:$20 sps:$4 sm:$0xff]   ;;  %v1594_v56 = vld [vmem:[%s1789_s6 + $0xac] ss:$20 sps:$4 sm:$0xff]   ;;  %v1601_v61 = vld [vmem:[%s1789_s6 + $0xd4] ss:$20 sps:$4 sm:$0xff]  }
  0x20   : > { %1388 = vmatpush3.bf16.msra.mxu1 %v1551_v19  ;;  %1325 = vmatprep.subr.bf16.mxu0 %v1552_v20  ;;  %v1596_v58 = vld [vmem:[%s1789_s6 + $0xa0] ss:$20 sps:$4 sm:$0xff]   ;;  %v1603_v62 = vld [vmem:[%s1789_s6 + $0xc8] ss:$20 sps:$4 sm:$0xff]   ;;  %v1604_v63 = vld [vmem:[%s1789_s6 + $0xd0] ss:$20 sps:$4 sm:$0xff]  }
  0x21   : > { %1389 = vmatprep.subr.bf16.mxu1 %v1553_v21  ;;  %v1599_v60 = vld [vmem:[%s1789_s6 + $0xcc] ss:$20 sps:$4 sm:$0xff]   ;;  %v1606_v0 = vld [vmem:[%s1789_s6 + $0xf4] ss:$20 sps:$4 sm:$0xff]   ;;  %v1608_v1 = vld [vmem:[%s1789_s6 + $0xfc] ss:$20 sps:$4 sm:$0xff]  }
  0x22   : > { %v1610_v2 = vld [vmem:[%s1789_s6 + $0xf0] ss:$20 sps:$4 sm:$0xff]   ;;  %v1611_v3 = vld [vmem:[%s1789_s6 + $0xf8] ss:$20 sps:$4 sm:$0xff]   ;;  %v1618_v7 = vld [vmem:[%s1789_s6 + $0x120] ss:$20 sps:$4 sm:$0xff]  }
  0x23   : > { %1326 = vmatpush3.bf16.msra.mxu0 %v1554_v22  ;;  %v1613_v4 = vld [vmem:[%s1789_s6 + $0x11c] ss:$20 sps:$4 sm:$0xff]   ;;  %v1615_v5 = vld [vmem:[%s1789_s6 + $0x124] ss:$20 sps:$4 sm:$0xff]   ;;  %v1624_v12 = vld [vmem:[%s1789_s6 + $0x60] ss:$20 sps:$4 sm:$0xff]  }
  0x24   : > { %1390 = vmatpush3.bf16.msra.mxu1 %v1555_v23  ;;  %1327 = vmatprep.subr.bf16.mxu0 %v1556_v24  ;;  %v1617_v6 = vld [vmem:[%s1789_s6 + $0x118] ss:$20 sps:$4 sm:$0xff]   ;;  %v1620_v8 = vld [vmem:[%s1789_s6 + $0x10] ss:$20 sps:$4 sm:$0xff]   ;;  %v1625_v13 = vld [vmem:[%s1789_s6 + $0x100] ss:$20 sps:$4 sm:$0xff]  }
  0x25   : > { %1391 = vmatprep.subr.bf16.mxu1 %v1557_v25  ;;  %v1621_v9 = vld [vmem:[%s1789_s6 + $0xb0] ss:$20 sps:$4 sm:$0xff]   ;;  %v1622_v10 = vld [vmem:[%s1789_s6 + $0x38] ss:$20 sps:$4 sm:$0xff]   ;;  %v1626_v14 = vld [vmem:[%s1789_s6 + $0x88] ss:$20 sps:$4 sm:$0xff]  }
  0x26   : > { %v1623_v11 = vld [vmem:[%s1789_s6 + $0xd8] ss:$20 sps:$4 sm:$0xff]   ;;  %v1627_v15 = vld [vmem:[%s1789_s6 + $0x128] ss:$20 sps:$4 sm:$0xff]   ;;  %s1231_s6 = sshll.u32 %s2020_s23, 3 }
  0x27   : > { %1328 = vmatpush3.bf16.msra.mxu0 %v1558_v26  ;;  %s1945_s23 = scalar_lea.vmem %s2006_s3, %s1231_s6 }
  0x28   : > { %1392 = vmatpush3.bf16.msra.mxu1 %v1559_v27  ;;  %1329 = vmatprep.subr.bf16.mxu0 %v1560_v28 }
  0x29   : > { %1393 = vmatprep.subr.bf16.mxu1 %v1561_v29 }
  0x2b   : > { %1330 = vmatpush3.bf16.msra.mxu0 %v1562_v30 }
  0x2c   : > { %1394 = vmatpush3.bf16.msra.mxu1 %v1563_v31  ;;  %1459 = vmatprep.subr.bf16.mxu0 %v1570_v36 }
  0x2d   : > { %1491 = vmatprep.subr.bf16.mxu1 %v1570_v36 }
  0x2e   : > { %845 = vmatmul.mubr.bf16.vlgmr.msra.gmra.mxu0 %v1564_v32 }
  0x2f   : > { %942 = vmatmul.mubr.bf16.vlgmr.msra.gmra.mxu1 %v1567_v34  ;;  %1460 = vmatpush3.bf16.msra.mxu0 %v1570_v36 }
  0x30   : > { %1499 = vmatpush3.bf16.msra.mxu1 %v1570_v36  ;;  %852 = vmatprep.mubr.bf16.mxu0 %v1571_v37 }
  0x31   : > { %949 = vmatprep.mubr.bf16.mxu1 %v1573_v38  ;;  %1461 = vmatprep.subr.bf16.mxu0 %v1577_v39 }
  0x32   : > { %1492 = vmatprep.subr.bf16.mxu1 %v1577_v39 }
  0x33   : > { %1462 = vmatpush3.bf16.msra.mxu0 %v1577_v39 }
  0x34   : > { %1500 = vmatpush3.bf16.msra.mxu1 %v1577_v39  ;;  %1463 = vmatprep.subr.bf16.mxu0 %v1584_v44 }
  0x35   : > { %1493 = vmatprep.subr.bf16.mxu1 %v1584_v44 }
  0x36   : > { %853 = vmatmul.mubr.bf16.gmra.mxu0 %v1575_v40 }
  0x37   : > { %950 = vmatmul.mubr.bf16.gmra.mxu1 %v1576_v41  ;;  %860 = vmatprep.mubr.bf16.mxu0 %v1578_v42 }
  0x38   : > { %957 = vmatprep.mubr.bf16.mxu1 %v1580_v43  ;;  %1464 = vmatpush3.bf16.msra.mxu0 %v1584_v44 }
  0x39   : > { %1501 = vmatpush3.bf16.msra.mxu1 %v1584_v44  ;;  %1465 = vmatprep.subr.bf16.mxu0 %v1591_v45 }
  0x3a   : > { %1494 = vmatprep.subr.bf16.mxu1 %v1591_v45 }
  0x3c   : > { %1466 = vmatpush3.bf16.msra.mxu0 %v1591_v45 }
  0x3d   : > { %1502 = vmatpush3.bf16.msra.mxu1 %v1591_v45  ;;  %1467 = vmatprep.subr.bf16.mxu0 %v1598_v50 }
  0x3e   : > { %861 = vmatmul.mubr.bf16.gmra.mxu0 %v1582_v46  ;;  %1495 = vmatprep.subr.bf16.mxu1 %v1598_v50 }
  0x3f   : > { %958 = vmatmul.mubr.bf16.gmra.mxu1 %v1583_v47  ;;  %868 = vmatprep.mubr.bf16.mxu0 %v1585_v48 }
  0x40   : > { %965 = vmatprep.mubr.bf16.mxu1 %v1587_v49  ;;  %1468 = vmatpush3.bf16.msra.mxu0 %v1598_v50 }
  0x41   : > { %1503 = vmatpush3.bf16.msra.mxu1 %v1598_v50  ;;  %1469 = vmatprep.subr.bf16.mxu0 %v1605_v51 }
  0x42   : > { %1496 = vmatprep.subr.bf16.mxu1 %v1605_v51 }
  0x44   : > { %1470 = vmatpush3.bf16.msra.mxu0 %v1605_v51 }
  0x45   : > { %1504 = vmatpush3.bf16.msra.mxu1 %v1605_v51  ;;  %1471 = vmatprep.subr.bf16.mxu0 %v1612_v55 }
  0x46   : > { %869 = vmatmul.mubr.bf16.gmra.mxu0 %v1589_v52  ;;  %1497 = vmatprep.subr.bf16.mxu1 %v1612_v55 }
  0x47   : > { %966 = vmatmul.mubr.bf16.gmra.mxu1 %v1590_v53  ;;  %876 = vmatprep.mubr.bf16.mxu0 %v1592_v54 }
  0x48   : > { %973 = vmatprep.mubr.bf16.mxu1 %v1594_v56  ;;  %1472 = vmatpush3.bf16.msra.mxu0 %v1612_v55 }
  0x49   : > { %1505 = vmatpush3.bf16.msra.mxu1 %v1612_v55  ;;  %1473 = vmatprep.subr.bf16.mxu0 %v1619_v57 }
  0x4a   : > { %1498 = vmatprep.subr.bf16.mxu1 %v1619_v57 }
  0x4c   : > { %1474 = vmatpush3.bf16.msra.mxu0 %v1619_v57 }
  0x4d   : > { %1506 = vmatpush3.bf16.msra.mxu1 %v1619_v57 }
  0x4e   : > { %877 = vmatmul.mubr.bf16.gmra.mxu0 %v1596_v58 }
  0x4f   : > { %974 = vmatmul.mubr.bf16.gmra.mxu1 %v1597_v59  ;;  %884 = vmatprep.mubr.bf16.mxu0 %v1599_v60 }
  0x50   : > { %981 = vmatprep.mubr.bf16.mxu1 %v1601_v61 }
  0x56   : > { %885 = vmatmul.mubr.bf16.gmra.mxu0 %v1603_v62 }
  0x57   : > { %982 = vmatmul.mubr.bf16.gmra.mxu1 %v1604_v63  ;;  %892 = vmatprep.mubr.bf16.mxu0 %v1606_v0 }
  0x58   : > { %989 = vmatprep.mubr.bf16.mxu1 %v1608_v1 }
  0x5e   : > { %893 = vmatmul.mubr.bf16.gmra.mxu0 %v1610_v2 }
  0x5f   : > { %990 = vmatmul.mubr.bf16.gmra.mxu1 %v1611_v3  ;;  %900 = vmatprep.mubr.bf16.mxu0 %v1613_v4 }
  0x60   : > { %997 = vmatprep.mubr.bf16.mxu1 %v1615_v5 }
  0x66   : > { %901 = vmatmul.mubr.bf16.gmra.mxu0 %v1617_v6 }
  0x67   : > { %998 = vmatmul.mubr.bf16.gmra.mxu1 %v1618_v7  ;;  %1475 = vmatprep.mubr.bf16.mxu0 %v1620_v8  ;;  %v1918_v8 = vld [vmem:[%s2005_s2] ss:$0 sm:$0xff] }
  0x68   : > { %1483 = vmatprep.mubr.bf16.mxu1 %v1621_v9 }
  0x6e   : > { %1476 = vmatmul.mubr.bf16.vlgmr.msra.gmra.mxu0 %v1622_v10 }
  0x6f   : > { %1484 = vmatmul.mubr.bf16.vlgmr.msra.gmra.mxu1 %v1623_v11  ;;  %1479 = vmatprep.mubr.bf16.mxu0 %v1624_v12 }
  0x70   : > { %1487 = vmatprep.mubr.bf16.mxu1 %v1625_v13 }
  0x76   : > { %1480 = vmatmul.mubr.bf16.gmra.mxu0 %v1626_v14 }
  0x77   : > { %1488 = vmatmul.mubr.bf16.gmra.mxu1 %v1627_v15 }
  0xee   : > { %v1331_v16 = vpop.f32.mrf.mxu0 }
  0xef   : > { %v1861_v17 = vpop.f32.mrf.mxu1 }
  0xf0   : > { %v1332_v18 = vpop.f32.mrf.mxu0 }
  0xf1   : > { %v1863_v19 = vpop.f32.mrf.mxu1  ;;  %v1333_v6 = vadd.f32 %v1332_v18, %v1331_v16 }
  0xf2   : > { %v1334_v20 = vpop.f32.mrf.mxu0 }
  0xf3   : > { %v1865_v21 = vpop.f32.mrf.mxu1 }
  0xf4   : > { %v1335_v22 = vpop.f32.mrf.mxu0 }
  0xf5   : > { %v1867_v23 = vpop.f32.mrf.mxu1  ;;  %v1336_v9 = vadd.f32 %v1335_v22, %v1334_v20  ;;  %v1397_v20 = vadd.f32 %v1863_v19, %v1861_v17 }
  0xf6   : > { %v1337_v24 = vpop.f32.mrf.mxu0  ;;  %v1400_v22 = vadd.f32 %v1867_v23, %v1865_v21 }
  0xf7   : > { %v1869_v25 = vpop.f32.mrf.mxu1 }
  0xf8   : > { %v1338_v26 = vpop.f32.mrf.mxu0 }
  0xf9   : > { %v1871_v27 = vpop.f32.mrf.mxu1  ;;  %v1339_v10 = vadd.f32 %v1338_v26, %v1337_v24 }
  0xfa   : > { %v1340_v28 = vpop.f32.mrf.mxu0 }
  0xfb   : > { %v1873_v29 = vpop.f32.mrf.mxu1 }
  0xfc   : > { %v1341_v30 = vpop.f32.mrf.mxu0 }
  0xfd   : > { %v1875_v31 = vpop.f32.mrf.mxu1  ;;  %v1342_v14 = vadd.f32 %v1341_v30, %v1340_v28  ;;  %v1403_v30 = vadd.f32 %v1871_v27, %v1869_v25 }
  0xfe   : > { %v1343_v32 = vpop.f32.mrf.mxu0  ;;  %v1406_v21 = vadd.f32 %v1875_v31, %v1873_v29 }
  0xff   : > { %v1877_v33 = vpop.f32.mrf.mxu1 }
 0x100   : > { %v1344_v34 = vpop.f32.mrf.mxu0 }
 0x101   : > { %v1879_v35 = vpop.f32.mrf.mxu1 }
 0x102   : > { %v1881_v36 = vpop.f32.mrf.mxu0 }
 0x103   : > { %v1883_v37 = vpop.f32.mrf.mxu1 }
 0x104   : > { %2007 = vst [vmem:[#allocation2_spill] sm:$0xff] %v1883_v37  ;;  %v1885_v38 = vpop.f32.mrf.mxu0  ;;  %v855_v37 = vadd.f32 %v1339_v10, %v1918_v8 }
 0x105   : > { %v1887_v39 = vpop.f32.mrf.mxu1 }
 0x106   : > { %2008 = vst [vmem:[#allocation3_spill] sm:$0xff] %v1887_v39  ;;  %v1349_v40 = vpop.f32.mrf.mxu0  ;;  %v847_v39 = vadd.f32 %v1333_v6, %v1918_v8 }
 0x107   : > { %v1889_v41 = vpop.f32.mrf.mxu1 }
 0x108   : > { %v1350_v42 = vpop.f32.mrf.mxu0 }
 0x109   : > { %v1891_v43 = vpop.f32.mrf.mxu1  ;;  %v1351_v23 = vadd.f32 %v1350_v42, %v1349_v40 }
 0x10a   : > { %v1893_v44 = vpop.f32.mrf.mxu0 }
 0x10b   : > { %v1895_v45 = vpop.f32.mrf.mxu1 }
 0x10c   : > { %v1897_v46 = vpop.f32.mrf.mxu0 }
 0x10d   : > { %v1899_v47 = vpop.f32.mrf.mxu1 }
 0x10e   : > { %2009 = vst [vmem:[#allocation4_spill] sm:$0xff] %v1899_v47  ;;  %v1355_v48 = vpop.f32.mrf.mxu0 }
 0x10f   : > { %v1419_v49 = vpop.f32.mrf.mxu1 }
 0x110   : > { %v1356_v50 = vpop.f32.mrf.mxu0 }
 0x111   : > { %v1420_v51 = vpop.f32.mrf.mxu1  ;;  %v1357_v16 = vadd.f32 %v1356_v50, %v1355_v48  ;;  %v858_v48 = vadd.f32 %v1342_v14, %v1918_v8  ;;  %v1345_v50 = vadd.f32 %v1344_v34, %v1343_v32 }
 0x112   : > { %v1358_v52 = vpop.f32.mrf.mxu0  ;;  %v1421_v25 = vadd.f32 %v1420_v51, %v1419_v49 }
 0x113   : > { %v1901_v53 = vpop.f32.mrf.mxu1  ;;  %v879_v6 = vadd.f32 %v1357_v16, %v1918_v8  ;;  %v955_v40 = vadd.f32 %v1406_v21, %v858_v48 }
 0x114   : > { %v1359_v54 = vpop.f32.mrf.mxu0 }
 0x115   : > { %v1903_v55 = vpop.f32.mrf.mxu1 }
 0x116   : > { %v1361_v56 = vpop.f32.mrf.mxu0 }
 0x117   : > { %v1425_v57 = vpop.f32.mrf.mxu1 }
 0x118   : > { %v1362_v58 = vpop.f32.mrf.mxu0 }
 0x119   : > { %v1426_v59 = vpop.f32.mrf.mxu1  ;;  %v1363_v12 = vadd.f32 %v1362_v58, %v1361_v56  ;;  %v1360_v56 = vadd.f32 %v1359_v54, %v1358_v52 }
 0x11a   : > { %v1364_v60 = vpop.f32.mrf.mxu0  ;;  %v1427_v17 = vadd.f32 %v1426_v59, %v1425_v57  ;;  %v976_v57 = vadd.f32 %v1421_v25, %v879_v6  ;;  %v871_v59 = vadd.f32 %v1351_v23, %v1918_v8  ;;  %v2012_v23 = vld [vmem:[#allocation2_spill] sm:$0xff] }
 0x11b   : > { %v1428_v61 = vpop.f32.mrf.mxu1  ;;  %v887_v24 = vadd.f32 %v1363_v12, %v1918_v8  ;;  %v882_v29 = vadd.f32 %v1360_v56, %v1918_v8  ;;  %v1424_v12 = vadd.f32 %v1903_v55, %v1901_v53 }
 0x11c   : > { %v1365_v62 = vpop.f32.mrf.mxu0 }
 0x11d   : > { %v1429_v63 = vpop.f32.mrf.mxu1  ;;  %v1366_v26 = vadd.f32 %v1365_v62, %v1364_v60  ;;  %v952_v62 = vadd.f32 %v1403_v30, %v855_v37  ;;  %v984_v52 = vadd.f32 %v1427_v17, %v887_v24  ;;  %v979_v55 = vadd.f32 %v1424_v12, %v882_v29 }
 0x11e   : > { %v1367_v0 = vpop.f32.mrf.mxu0  ;;  %v1430_v42 = vadd.f32 %v1429_v63, %v1428_v61 }
 0x11f   : > { %v1905_v1 = vpop.f32.mrf.mxu1  ;;  %v890_v27 = vadd.f32 %v1366_v26, %v1918_v8 }
 0x120   : > { %v1368_v2 = vpop.f32.mrf.mxu0 }
 0x121   : > { %v1907_v3 = vpop.f32.mrf.mxu1  ;;  %v1369_v49 = vadd.f32 %v1368_v2, %v1367_v0  ;;  %v987_v2 = vadd.f32 %v1430_v42, %v890_v27 }
 0x122   : > { %v1909_v4 = vpop.f32.mrf.mxu0  ;;  %v1433_v48 = vadd.f32 %v1907_v3, %v1905_v1 }
 0x123   : > { %v1911_v5 = vpop.f32.mrf.mxu1 }
 0x124   : > { %2010 = vst [vmem:[#allocation5_spill] sm:$0xff] %v1911_v5  ;;  %v1913_v7 = vpop.f32.mrf.mxu0  ;;  %v850_v5 = vadd.f32 %v1336_v9, %v1918_v8  ;;  %v944_v9 = vadd.f32 %v1397_v20, %v847_v39  ;;  %v863_v39 = vadd.f32 %v1345_v50, %v1918_v8  ;;  %v895_v20 = vadd.f32 %v1369_v49, %v1918_v8 }
 0x125   : > { %v1920_v11 = vpop.f32.mrf.mxu1 }
 0x126   : > { %v1373_v13 = vpop.f32.mrf.mxu0  ;;  %v947_v10 = vadd.f32 %v1400_v22, %v850_v5  ;;  %v1354_v5 = vadd.f32 %v1897_v46, %v1893_v44  ;;  %v1415_v44 = vadd.f32 %v1891_v43, %v1889_v41  ;;  %v1372_v22 = vadd.f32 %v1913_v7, %v1909_v4 }
 0x127   : > { %v1922_v15 = vpop.f32.mrf.mxu1  ;;  %v992_v21 = vadd.f32 %v1433_v48, %v895_v20 }
 0x128   : > { %v1374_v18 = vpop.f32.mrf.mxu0  ;;  %v968_v30 = vadd.f32 %v1415_v44, %v871_v59 }
 0x129   : > { %v1438_v47 = vpop.f32.mrf.mxu1  ;;  %v1375_v32 = vadd.f32 %v1374_v18, %v1373_v13  ;;  %v1348_v18 = vadd.f32 %v1885_v38, %v1881_v36  ;;  %v1409_v36 = vadd.f32 %v1879_v35, %v1877_v33  ;;  %v874_v38 = vadd.f32 %v1354_v5, %v1918_v8  ;;  %v2011_v33 = vld [vmem:[#allocation4_spill] sm:$0xff] }
 0x12a   : > { %v1376_v28 = vpop.f32.mrf.mxu0  ;;  %v1439_v24 = vadd.f32 %v1438_v47, %v1922_v15  ;;  %v1418_v35 = vadd.f32 %v2011_v33, %v1895_v45 }
 0x12b   : > { %v1935_v58 = vpop.f32.mrf.mxu1  ;;  %v903_v16 = vadd.f32 %v1375_v32, %v1918_v8  ;;  %v866_v50 = vadd.f32 %v1348_v18, %v1918_v8  ;;  %v960_v17 = vadd.f32 %v1409_v36, %v863_v39  ;;  %v2014_v32 = vld [vmem:[#allocation5_spill] sm:$0xff] }
 0x12c   : > { %v1377_v19 = vpop.f32.mrf.mxu0  ;;  %v971_v27 = vadd.f32 %v1418_v35, %v874_v38 }
 0x12d   : > { %v1441_v60 = vpop.f32.mrf.mxu1  ;;  %v1378_v61 = vadd.f32 %v1377_v19, %v1376_v28  ;;  %v1000_v15 = vadd.f32 %v1439_v24, %v903_v16  ;;  %v898_v19 = vadd.f32 %v1372_v22, %v1918_v8 }
 0x12e   : > { %v1477_v34 = vpop.f32.mrf.mxu0  ;;  %v1442_v1 = vadd.f32 %v1441_v60, %v1935_v58 }
 0x12f   : > { %v1049_v31 = vadd.f32 %v1477_v34, %v952_v62  ;;  %v1485_v37 = vpop.f32.mrf.mxu1  ;;  %v906_v4 = vadd.f32 %v1378_v61, %v1918_v8  ;;  %v2013_v62 = vld [vmem:[#allocation3_spill] sm:$0xff]  ;;  %v1436_v34 = vadd.f32 %v1920_v11, %v2014_v32 }
 0x130   : > { %v1081_v51 = vadd.f32 %v1485_v37, %v984_v52  ;;  %v1040_v54 = vpop.f32.mrf.mxu0 }
 0x131   : > { %1105 = vst [vmem:[%s1945_s23 + $0x10] sm:$0xff] %v1049_v31  ;;  %v1041_v13 = vadd.f32 %v1040_v54, %v944_v9  ;;  %v1072_v14 = vpop.f32.mrf.mxu1  ;;  %v1003_v60 = vadd.f32 %v1442_v1, %v906_v4 }
 0x132   : > { %1113 = vst [vmem:[%s1945_s23 + $0x50] sm:$0xff] %v1081_v51  ;;  %v1073_v63 = vadd.f32 %v1072_v14, %v976_v57  ;;  %v1478_v0 = vpop.f32.mrf.mxu0 }
 0x133   : > { %1103 = vst [vmem:[%s1945_s23] sm:$0xff] %v1041_v13  ;;  %v1052_v46 = vadd.f32 %v1478_v0, %v955_v40  ;;  %v1486_v53 = vpop.f32.mrf.mxu1  ;;  %v995_v40 = vadd.f32 %v1436_v34, %v898_v19 }
 0x134   : > { %1111 = vst [vmem:[%s1945_s23 + $0x40] sm:$0xff] %v1073_v63  ;;  %v1084_v26 = vadd.f32 %v1486_v53, %v987_v2  ;;  %v1043_v28 = vpop.f32.mrf.mxu0 }
 0x135   : > { %1106 = vst [vmem:[%s1945_s23 + $0x18] sm:$0xff] %v1052_v46  ;;  %v1044_v41 = vadd.f32 %v1043_v28, %v947_v10  ;;  %v1075_v43 = vpop.f32.mrf.mxu1  ;;  %v1412_v10 = vadd.f32 %v2013_v62, %v2012_v23 }
 0x136   : > { %1114 = vst [vmem:[%s1945_s23 + $0x58] sm:$0xff] %v1084_v26  ;;  %v1076_v47 = vadd.f32 %v1075_v43, %v979_v55  ;;  %v1481_v7 = vpop.f32.mrf.mxu0 }
 0x137   : > { %1104 = vst [vmem:[%s1945_s23 + $0x8] sm:$0xff] %v1044_v41  ;;  %v1065_v56 = vadd.f32 %v1481_v7, %v968_v30  ;;  %v1489_v6 = vpop.f32.mrf.mxu1  ;;  %v963_v29 = vadd.f32 %v1412_v10, %v866_v50 }
 0x138   : > { %1112 = vst [vmem:[%s1945_s23 + $0x48] sm:$0xff] %v1076_v47  ;;  %v1097_v3 = vadd.f32 %v1489_v6, %v1000_v15  ;;  %v1056_v9 = vpop.f32.mrf.mxu0 }
 0x139   : > { %1109 = vst [vmem:[%s1945_s23 + $0x30] sm:$0xff] %v1065_v56  ;;  %v1057_v45 = vadd.f32 %v1056_v9, %v960_v17  ;;  %v1088_v25 = vpop.f32.mrf.mxu1 }
 0x13a   : > { %1117 = vst [vmem:[%s1945_s23 + $0x70] sm:$0xff] %v1097_v3  ;;  %v1089_v8 = vadd.f32 %v1088_v25, %v992_v21  ;;  %v1482_v58 = vpop.f32.mrf.mxu0 }
 0x13b   : > { %1107 = vst [vmem:[%s1945_s23 + $0x20] sm:$0xff] %v1057_v45  ;;  %v1068_v52 = vadd.f32 %v1482_v58, %v971_v27  ;;  %v1490_v39 = vpop.f32.mrf.mxu1 }
 0x13c   : > { %1115 = vst [vmem:[%s1945_s23 + $0x60] sm:$0xff] %v1089_v8  ;;  %v1100_v31 = vadd.f32 %v1490_v39, %v1003_v60  ;;  %v1059_v37 = vpop.f32.mrf.mxu0 }
 0x13d   : > { %1110 = vst [vmem:[%s1945_s23 + $0x38] sm:$0xff] %v1068_v52  ;;  %v1060_v42 = vadd.f32 %v1059_v37, %v963_v29  ;;  %v1091_v49 = vpop.f32.mrf.mxu1 }
 0x13e   : > { %1118 = vst [vmem:[%s1945_s23 + $0x78] sm:$0xff] %v1100_v31  ;;  %v1092_v11 = vadd.f32 %v1091_v49, %v995_v40 }
 0x13f   : > { %1108 = vst [vmem:[%s1945_s23 + $0x28] sm:$0xff] %v1060_v42 }
 0x140   : > { %1116 = vst [vmem:[%s1945_s23 + $0x68] sm:$0xff] %v1092_v11 }
 0x141 PF: > { %s13_s14 = sadd.s32 1, %s1650_s14   ;;  %s2015_s12 = smov %s1646_s13 }
 0x142   : > { %p10_p5 = scmp.ge.s32.totalorder %s13_s14, 20   ;;  %s2016_s13 = smov %s2018_s15 }
 0x144   :  { %12 = sbr.rel (!%p10_p5) target bundleno = 2 (0x2), region = 68 }

// kernel: forward.19
= control target key start
LH: loop header
LB: loop body
LE: loop exit
PB: predicated region body
PF: predicated region fallthrough
CT: control target
= control target key end

     0   :  { %s1375_s12 = smov 0   ;;  %s1377_s13 = smov 0   ;;  %s1552_s0 = inlined_call_operand.vmem [shape: bf16[2304,384], index: 0, kind: input, shape index: {}]   ;;  %s1553_s1 = inlined_call_operand.vmem [shape: bf16[384,128], index: 1, kind: input, shape index: {}]   ;;  %s1554_s2 = inlined_call_operand.vmem [shape: f32[1,128], index: 2, kind: input, shape index: {}]   ;;  %s1555_s3 = inlined_call_operand.vmem [shape: f32[2304,128], index: 3, kind: output, shape index: {}]  }
   0x1   :  { %s1379_s14 = smov 0  }
   0x2 LB: > { %s25_s15 = sadd.s32 1, %s1349_s13  ;;  %p1002_p0 = scmp.ge.s32.totalorder %s1353_s14, 1  ;;  %s1353_s14 = sphi %s1379_s14, %s13_s14   ;;  %s1349_s13 = sphi %s1377_s13, %s1557_s13   ;;  %s1345_s12 = sphi %s1375_s12, %s1556_s12  }
   0x3   : > { %p27_p1 = scmp.ge.s32.totalorder %s25_s15, 18  ;;  %p170_p2 = scmp.lt.s32.totalorder %s1353_s14, 19 }
   0x5   : > { %s1559_s15 = smov (%p27_p1, %s25_s15), 0  ;;  %p171_p3 = pnand %p1002_p0, %p170_p2 }
   0x6   : > { %s1003_s30 = sshll.u32 (!%p171_p3), %s1345_s12, 4 }
   0x7   : > { %174 = sbr.rel (%p171_p3) target bundleno = 340 (0x154), region = 32  ;;  %p206_p4 = scmp.lt.s32.totalorder (!%p171_p3), %s1003_s30, 287 }
   0xc   : > { %v1211_v0 = vld [vmem:[%s1553_s1 + $0x78] sm:$0xff]   ;;  %v1213_v2 = vld [vmem:[%s1553_s1 + $0x70] sm:$0xff]   ;;  %v1216_v5 = vld [vmem:[%s1553_s1 + $0x68] sm:$0xff]   ;;  %s1561_s30 = smov (!%p206_p4, %s1003_s30), 287 }
   0xd   : > { %v1212_v1 = vld [vmem:[%s1553_s1 + $0x38] sm:$0xff]   ;;  %1074 = vmatprep.subr.bf16.mxu0 %v1211_v0  ;;  %v1215_v4 = vld [vmem:[%s1553_s1 + $0x30] sm:$0xff]   ;;  %v1218_v7 = vld [vmem:[%s1553_s1 + $0x28] sm:$0xff]   ;;  %s1186_s25 = smul.u32 12, %s1561_s30  ;;  %s1006_s24 = sshll.u32 %s1561_s30, 3 }
   0xe   : > { %1075 = vmatpush3.bf16.msra.mxu0 %v1212_v1  ;;  %v1214_v3 = vld [vmem:[%s1553_s1 + $0xb8] sm:$0xff]   ;;  %v1217_v6 = vld [vmem:[%s1553_s1 + $0xb0] sm:$0xff]   ;;  %v1219_v8 = vld [vmem:[%s1553_s1 + $0x60] sm:$0xff]   ;;  %s1518_s27 = scalar_lea.vmem %s1555_s3, %s1006_s24 }
   0xf   : > { %1076 = vmatprep.subr.bf16.mxu0 %v1213_v2  ;;  %1154 = vmatprep.subr.bf16.mxu1 %v1214_v3  ;;  %v1220_v9 = vld [vmem:[%s1553_s1 + $0xa8] sm:$0xff]   ;;  %v1221_v10 = vld [vmem:[%s1553_s1 + $0x20] sm:$0xff]   ;;  %v1222_v11 = vld [vmem:[%s1553_s1 + $0x58] sm:$0xff]   ;;  %s1462_s10 = scalar_lea.vmem %s1552_s0, %s1186_s25 }
  0x10   : > { %1155 = vmatpush3.bf16.msra.mxu1 %v1214_v3  ;;  %v1223_v12 = vld [vmem:[%s1553_s1 + $0xa0] sm:$0xff]   ;;  %v1224_v13 = vld [vmem:[%s1553_s1 + $0x18] sm:$0xff]   ;;  %v1225_v15 = vld [vmem:[%s1553_s1 + $0x50] sm:$0xff]  }
  0x11   : > { %1156 = vmatprep.subr.bf16.mxu1 %v1217_v6  ;;  %v1226_v14 = vld [vmem:[%s1553_s1 + $0x98] sm:$0xff]   ;;  %v1227_v16 = vld [vmem:[%s1553_s1 + $0x10] sm:$0xff]   ;;  %v1228_v18 = vld [vmem:[%s1553_s1 + $0x48] sm:$0xff]  }
  0x12   : > { %1077 = vmatpush3.bf16.msra.mxu0 %v1215_v4  ;;  %v1229_v17 = vld [vmem:[%s1553_s1 + $0x90] sm:$0xff]   ;;  %v1230_v19 = vld [vmem:[%s1553_s1 + $0x8] sm:$0xff]   ;;  %v1231_v20 = vld [vmem:[%s1553_s1 + $0x40] sm:$0xff]  }
  0x13   : > { %1078 = vmatprep.subr.bf16.mxu0 %v1216_v5  ;;  %v1232_v21 = vld [vmem:[%s1553_s1 + $0x88] sm:$0xff]   ;;  %v1236_v22 = vld [vmem:[%s1462_s10 + $0x4] ss:$12 sps:$4 sm:$0xff]   ;;  %v1243_v31 = vld [vmem:[%s1462_s10 + $0x34] ss:$12 sps:$4 sm:$0xff]  }
  0x14   : > { %1157 = vmatpush3.bf16.msra.mxu1 %v1217_v6  ;;  %v1233_v23 = vld [vmem:[%s1553_s1] sm:$0xff]   ;;  %620 = vmatprep.mubr.bf16.mxu0 %v1236_v22  ;;  %v1238_v24 = vld [vmem:[%s1462_s10 + $0x8] ss:$12 sps:$4 sm:$0xff]   ;;  %v1247_v32 = vld [vmem:[%s1462_s10 + $0x50] ss:$12 sps:$4 sm:$0xff]  }
  0x15   : > { %1158 = vmatprep.subr.bf16.mxu1 %v1220_v9  ;;  %v1237_v25 = vld [vmem:[%s1553_s1 + $0x80] sm:$0xff]   ;;  %1170 = vmatprep.mubr.bf16.mxu1 %v1238_v24  ;;  %v1240_v27 = vld [vmem:[%s1462_s10 + $0x1c] ss:$12 sps:$4 sm:$0xff]   ;;  %v1248_v35 = vld [vmem:[%s1462_s10 + $0x4c] ss:$12 sps:$4 sm:$0xff]  }
  0x16   : > { %1079 = vmatpush3.bf16.msra.mxu0 %v1218_v7  ;;  %v1234_v26 = vld [vmem:[%s1462_s10] ss:$12 sps:$4 sm:$0xff]   ;;  %v1246_v29 = vld [vmem:[%s1462_s10 + $0x38] ss:$12 sps:$4 sm:$0xff]   ;;  %v1254_v33 = vld [vmem:[%s1462_s10 + $0x68] ss:$12 sps:$4 sm:$0xff]  }
  0x17   : > { %1080 = vmatprep.subr.bf16.mxu0 %v1219_v8  ;;  %v1239_v28 = vld [vmem:[%s1462_s10 + $0x20] ss:$12 sps:$4 sm:$0xff]   ;;  %v1242_v30 = vld [vmem:[%s1462_s10 + $0x18] ss:$12 sps:$4 sm:$0xff]   ;;  %v1245_v34 = vld [vmem:[%s1462_s10 + $0x30] ss:$12 sps:$4 sm:$0xff]  }
  0x18   : > { %1159 = vmatpush3.bf16.msra.mxu1 %v1220_v9  ;;  %v1255_v36 = vld [vmem:[%s1462_s10 + $0x80] ss:$12 sps:$4 sm:$0xff]   ;;  %v1262_v37 = vld [vmem:[%s1462_s10 + $0x98] ss:$12 sps:$4 sm:$0xff]   ;;  %v1250_v38 = vld [vmem:[%s1462_s10 + $0x48] ss:$12 sps:$4 sm:$0xff]  }
  0x19   : > { %1160 = vmatprep.subr.bf16.mxu1 %v1223_v12  ;;  %v1251_v39 = vld [vmem:[%s1462_s10 + $0x64] ss:$12 sps:$4 sm:$0xff]   ;;  %v1253_v41 = vld [vmem:[%s1462_s10 + $0x60] ss:$12 sps:$4 sm:$0xff]   ;;  %v1256_v42 = vld [vmem:[%s1462_s10 + $0x7c] ss:$12 sps:$4 sm:$0xff]  }
  0x1a   : > { %1081 = vmatpush3.bf16.msra.mxu0 %v1221_v10  ;;  %v1263_v40 = vld [vmem:[%s1462_s10 + $0xb0] ss:$12 sps:$4 sm:$0xff]   ;;  %v1258_v43 = vld [vmem:[%s1462_s10 + $0x78] ss:$12 sps:$4 sm:$0xff]   ;;  %v1259_v44 = vld [vmem:[%s1462_s10 + $0x94] ss:$12 sps:$4 sm:$0xff]  }
  0x1b   : > { %1082 = vmatprep.subr.bf16.mxu0 %v1222_v11  ;;  %v1261_v45 = vld [vmem:[%s1462_s10 + $0x90] ss:$12 sps:$4 sm:$0xff]   ;;  %v1264_v46 = vld [vmem:[%s1462_s10 + $0xac] ss:$12 sps:$4 sm:$0xff]   ;;  %v1266_v47 = vld [vmem:[%s1462_s10 + $0xa8] ss:$12 sps:$4 sm:$0xff]  }
  0x1c   : > { %1161 = vmatpush3.bf16.msra.mxu1 %v1223_v12  ;;  %v1503_v50 = vld [vmem:[%s1554_s2] ss:$0 sm:$0xff] }
  0x1d   : > { %1162 = vmatprep.subr.bf16.mxu1 %v1226_v14 }
  0x1e   : > { %1083 = vmatpush3.bf16.msra.mxu0 %v1224_v13 }
  0x1f   : > { %1084 = vmatprep.subr.bf16.mxu0 %v1225_v15 }
  0x20   : > { %1163 = vmatpush3.bf16.msra.mxu1 %v1226_v14 }
  0x21   : > { %1164 = vmatprep.subr.bf16.mxu1 %v1229_v17 }
  0x22   : > { %1085 = vmatpush3.bf16.msra.mxu0 %v1227_v16 }
  0x23   : > { %1086 = vmatprep.subr.bf16.mxu0 %v1228_v18 }
  0x24   : > { %1165 = vmatpush3.bf16.msra.mxu1 %v1229_v17 }
  0x25   : > { %1166 = vmatprep.subr.bf16.mxu1 %v1232_v21 }
  0x26   : > { %1087 = vmatpush3.bf16.msra.mxu0 %v1230_v19 }
  0x27   : > { %1088 = vmatprep.subr.bf16.mxu0 %v1231_v20 }
  0x28   : > { %1167 = vmatpush3.bf16.msra.mxu1 %v1232_v21 }
  0x29   : > { %1168 = vmatprep.subr.bf16.mxu1 %v1237_v25 }
  0x2a   : > { %1089 = vmatpush3.bf16.msra.mxu0 %v1233_v23 }
  0x2c   : > { %1169 = vmatpush3.bf16.msra.mxu1 %v1237_v25 }
  0x2d   : > { %621 = vmatmul.mubr.bf16.vlgmr.msra.gmra.mxu0 %v1234_v26 }
  0x2e   : > { %628 = vmatprep.mubr.bf16.mxu0 %v1240_v27 }
  0x2f   : > { %1171 = vmatmul.mubr.bf16.vlgmr.msra.gmra.mxu1 %v1239_v28 }
  0x30   : > { %1174 = vmatprep.mubr.bf16.mxu1 %v1246_v29 }
  0x35   : > { %629 = vmatmul.mubr.bf16.gmra.mxu0 %v1242_v30 }
  0x36   : > { %636 = vmatprep.mubr.bf16.mxu0 %v1243_v31 }
  0x37   : > { %1175 = vmatmul.mubr.bf16.gmra.mxu1 %v1247_v32 }
  0x38   : > { %1178 = vmatprep.mubr.bf16.mxu1 %v1254_v33 }
  0x3d   : > { %637 = vmatmul.mubr.bf16.gmra.mxu0 %v1245_v34 }
  0x3e   : > { %644 = vmatprep.mubr.bf16.mxu0 %v1248_v35 }
  0x3f   : > { %1179 = vmatmul.mubr.bf16.gmra.mxu1 %v1255_v36 }
  0x40   : > { %1182 = vmatprep.mubr.bf16.mxu1 %v1262_v37 }
  0x45   : > { %645 = vmatmul.mubr.bf16.gmra.mxu0 %v1250_v38 }
  0x46   : > { %652 = vmatprep.mubr.bf16.mxu0 %v1251_v39 }
  0x47   : > { %1183 = vmatmul.mubr.bf16.gmra.mxu1 %v1263_v40 }
  0x4d   : > { %653 = vmatmul.mubr.bf16.gmra.mxu0 %v1253_v41 }
  0x4e   : > { %660 = vmatprep.mubr.bf16.mxu0 %v1256_v42 }
  0x55   : > { %661 = vmatmul.mubr.bf16.gmra.mxu0 %v1258_v43 }
  0x56   : > { %668 = vmatprep.mubr.bf16.mxu0 %v1259_v44 }
  0x5d   : > { %669 = vmatmul.mubr.bf16.gmra.mxu0 %v1261_v45 }
  0x5e   : > { %676 = vmatprep.mubr.bf16.mxu0 %v1264_v46 }
  0x65   : > { %677 = vmatmul.mubr.bf16.gmra.mxu0 %v1266_v47 }
  0xed   : > { %v1090_v48 = vpop.f32.mrf.mxu0 }
  0xef   : > { %v1091_v49 = vpop.f32.mrf.mxu0  ;;  %v1172_v52 = vpop.f32.mrf.mxu1 }
  0xf0   : > { %v1092_v51 = vadd.f32 %v1091_v49, %v1090_v48 }
  0xf1   : > { %v1093_v53 = vpop.f32.mrf.mxu0  ;;  %v719_v55 = vpop.f32.mrf.mxu1 }
  0xf2   : > { %v623_v54 = vadd.f32 %v1092_v51, %v1503_v50 }
  0xf3   : > { %v1094_v56 = vpop.f32.mrf.mxu0  ;;  %v1173_v59 = vpop.f32.mrf.mxu1 }
  0xf4   : > { %v1095_v57 = vadd.f32 %v1094_v56, %v1093_v53  ;;  %v720_v58 = vadd.f32 %v719_v55, %v623_v54 }
  0xf5   : > { %v1096_v60 = vpop.f32.mrf.mxu0  ;;  %v722_v63 = vpop.f32.mrf.mxu1 }
  0xf6   : > { %v1056_v61 = vmul.f32 -1.442695, %v720_v58  ;;  %v626_v62 = vadd.f32 %v1095_v57, %v1503_v50 }
  0xf7   : > { %v1097_v0 = vpop.f32.mrf.mxu0  ;;  %v1176_v4 = vpop.f32.mrf.mxu1 }
  0xf8   : > { %1267 = vpow2.f32 %v1056_v61  ;;  %v1098_v1 = vadd.f32 %v1097_v0, %v1096_v60  ;;  %v723_v2 = vadd.f32 %v722_v63, %v626_v62 }
  0xf9   : > { %v1099_v3 = vpop.f32.mrf.mxu0  ;;  %v735_v11 = vpop.f32.mrf.mxu1 }
  0xfa   : > { %v631_v5 = vadd.f32 %v1098_v1, %v1503_v50  ;;  %v1057_v6 = vmul.f32 -1.442695, %v723_v2 }
  0xfb   : > { %v1100_v7 = vpop.f32.mrf.mxu0  ;;  %v1177_v18 = vpop.f32.mrf.mxu1 }
  0xfc   : > { %v728_v8 = vadd.f32 %v1172_v52, %v631_v5  ;;  %1269 = vpow2.f32 %v1057_v6  ;;  %v1101_v9 = vadd.f32 %v1100_v7, %v1099_v3 }
  0xfd   : > { %v1102_v10 = vpop.f32.mrf.mxu0  ;;  %v738_v26 = vpop.f32.mrf.mxu1 }
  0xfe   : > { %v1058_v12 = vmul.f32 -1.442695, %v728_v8  ;;  %v634_v13 = vadd.f32 %v1101_v9, %v1503_v50 }
  0xff   : > { %v1103_v14 = vpop.f32.mrf.mxu0  ;;  %v1180_v35 = vpop.f32.mrf.mxu1 }
 0x100   : > { %1271 = vpow2.f32 %v1058_v12  ;;  %v731_v15 = vadd.f32 %v1173_v59, %v634_v13  ;;  %v1104_v16 = vadd.f32 %v1103_v14, %v1102_v10 }
 0x101   : > { %v1105_v17 = vpop.f32.mrf.mxu0  ;;  %v751_v44 = vpop.f32.mrf.mxu1 }
 0x102   : > { %v1059_v19 = vmul.f32 -1.442695, %v731_v15  ;;  %v639_v20 = vadd.f32 %v1104_v16, %v1503_v50 }
 0x103   : > { %v1106_v21 = vpop.f32.mrf.mxu0  ;;  %v1181_v54 = vpop.f32.mrf.mxu1 }
 0x104   : > { %1273 = vpow2.f32 %v1059_v19  ;;  %v1107_v22 = vadd.f32 %v1106_v21, %v1105_v17  ;;  %v736_v23 = vadd.f32 %v735_v11, %v639_v20 }
 0x105   : > { %v1268_v24 = vpop.eup %1267  ;;  %v1108_v25 = vpop.f32.mrf.mxu0 }
 0x106   : > { %v830_v27 = vadd.f32 1.0, %v1268_v24  ;;  %v1060_v28 = vmul.f32 -1.442695, %v736_v23  ;;  %v642_v29 = vadd.f32 %v1107_v22, %v1503_v50  ;;  %v754_v63 = vpop.f32.mrf.mxu1 }
 0x107   : > { %v1109_v30 = vpop.f32.mrf.mxu0 }
 0x108   : > { %1275 = vrcp.f32 %v830_v27  ;;  %v1110_v31 = vadd.f32 %v1109_v30, %v1108_v25  ;;  %v739_v32 = vadd.f32 %v738_v26, %v642_v29  ;;  %v1184_v9 = vpop.f32.mrf.mxu1 }
 0x109   : > { %v1270_v33 = vpop.eup %1269  ;;  %1277 = vpow2.f32 %v1060_v28  ;;  %v1111_v34 = vpop.f32.mrf.mxu0 }
 0x10a   : > { %v831_v36 = vadd.f32 1.0, %v1270_v33  ;;  %v647_v37 = vadd.f32 %v1110_v31, %v1503_v50  ;;  %v1061_v38 = vmul.f32 -1.442695, %v739_v32  ;;  %v767_v19 = vpop.f32.mrf.mxu1 }
 0x10b   : > { %v1112_v39 = vpop.f32.mrf.mxu0 }
 0x10c   : > { %1279 = vrcp.f32 %v831_v36  ;;  %v744_v40 = vadd.f32 %v1176_v4, %v647_v37  ;;  %v1113_v41 = vadd.f32 %v1112_v39, %v1111_v34  ;;  %v1185_v29 = vpop.f32.mrf.mxu1 }
 0x10d   : > { %v1272_v42 = vpop.eup %1271  ;;  %1281 = vpow2.f32 %v1061_v38  ;;  %v1114_v43 = vpop.f32.mrf.mxu0 }
 0x10e   : > { %v832_v45 = vadd.f32 1.0, %v1272_v42  ;;  %v1062_v46 = vmul.f32 -1.442695, %v744_v40  ;;  %v650_v47 = vadd.f32 %v1113_v41, %v1503_v50  ;;  %v770_v39 = vpop.f32.mrf.mxu1 }
 0x10f   : > { %v1115_v48 = vpop.f32.mrf.mxu0 }
 0x110   : > { %1283 = vrcp.f32 %v832_v45  ;;  %v747_v49 = vadd.f32 %v1177_v18, %v650_v47  ;;  %v1116_v51 = vadd.f32 %v1115_v48, %v1114_v43 }
 0x111   : > { %v1274_v52 = vpop.eup %1273  ;;  %1285 = vpow2.f32 %v1062_v46  ;;  %v1117_v53 = vpop.f32.mrf.mxu0 }
 0x112   : > { %v833_v55 = vadd.f32 1.0, %v1274_v52  ;;  %v1063_v56 = vmul.f32 -1.442695, %v747_v49  ;;  %v655_v57 = vadd.f32 %v1116_v51, %v1503_v50 }
 0x113   : > { %v1118_v58 = vpop.f32.mrf.mxu0 }
 0x114   : > { %1287 = vrcp.f32 %v833_v55  ;;  %v1119_v59 = vadd.f32 %v1118_v58, %v1117_v53  ;;  %v752_v60 = vadd.f32 %v751_v44, %v655_v57 }
 0x115   : > { %v1276_v61 = vpop.eup %1275  ;;  %1289 = vpow2.f32 %v1063_v56  ;;  %v1120_v62 = vpop.f32.mrf.mxu0 }
 0x116   : > { %v1278_v0 = vpop.eup %1277  ;;  %878 = vst [vmem:[%s1518_s27] sm:$0xff] %v1276_v61  ;;  %v1064_v1 = vmul.f32 -1.442695, %v752_v60  ;;  %v658_v2 = vadd.f32 %v1119_v59, %v1503_v50 }
 0x117   : > { %v834_v3 = vadd.f32 1.0, %v1278_v0  ;;  %v1121_v4 = vpop.f32.mrf.mxu0 }
 0x118   : > { %1291 = vpow2.f32 %v1064_v1  ;;  %v1122_v5 = vadd.f32 %v1121_v4, %v1120_v62  ;;  %v755_v6 = vadd.f32 %v754_v63, %v658_v2 }
 0x119   : > { %v1280_v7 = vpop.eup %1279  ;;  %1293 = vrcp.f32 %v834_v3  ;;  %v1123_v8 = vpop.f32.mrf.mxu0 }
 0x11a   : > { %v1282_v10 = vpop.eup %1281  ;;  %879 = vst [vmem:[%s1518_s27 + $0x8] sm:$0xff] %v1280_v7  ;;  %v663_v11 = vadd.f32 %v1122_v5, %v1503_v50  ;;  %v1065_v12 = vmul.f32 -1.442695, %v755_v6 }
 0x11b   : > { %v835_v13 = vadd.f32 1.0, %v1282_v10  ;;  %v1124_v14 = vpop.f32.mrf.mxu0 }
 0x11c   : > { %v760_v15 = vadd.f32 %v1180_v35, %v663_v11  ;;  %1295 = vpow2.f32 %v1065_v12  ;;  %v1125_v16 = vadd.f32 %v1124_v14, %v1123_v8 }
 0x11d   : > { %v1284_v17 = vpop.eup %1283  ;;  %1297 = vrcp.f32 %v835_v13  ;;  %v1126_v18 = vpop.f32.mrf.mxu0 }
 0x11e   : > { %v1286_v20 = vpop.eup %1285  ;;  %880 = vst [vmem:[%s1518_s27 + $0x10] sm:$0xff] %v1284_v17  ;;  %v1066_v21 = vmul.f32 -1.442695, %v760_v15  ;;  %v666_v22 = vadd.f32 %v1125_v16, %v1503_v50 }
 0x11f   : > { %v836_v23 = vadd.f32 1.0, %v1286_v20  ;;  %v1127_v24 = vpop.f32.mrf.mxu0 }
 0x120   : > { %1299 = vpow2.f32 %v1066_v21  ;;  %v763_v25 = vadd.f32 %v1181_v54, %v666_v22  ;;  %v1128_v26 = vadd.f32 %v1127_v24, %v1126_v18 }
 0x121   : > { %v1288_v27 = vpop.eup %1287  ;;  %1301 = vrcp.f32 %v836_v23  ;;  %v1129_v28 = vpop.f32.mrf.mxu0 }
 0x122   : > { %v1290_v30 = vpop.eup %1289  ;;  %881 = vst [vmem:[%s1518_s27 + $0x18] sm:$0xff] %v1288_v27  ;;  %v1067_v31 = vmul.f32 -1.442695, %v763_v25  ;;  %v671_v32 = vadd.f32 %v1128_v26, %v1503_v50 }
 0x123   : > { %v837_v33 = vadd.f32 1.0, %v1290_v30  ;;  %v1130_v34 = vpop.f32.mrf.mxu0 }
 0x124   : > { %1303 = vpow2.f32 %v1067_v31  ;;  %v1131_v35 = vadd.f32 %v1130_v34, %v1129_v28  ;;  %v768_v36 = vadd.f32 %v767_v19, %v671_v32 }
 0x125   : > { %v1292_v37 = vpop.eup %1291  ;;  %1305 = vrcp.f32 %v837_v33  ;;  %v1132_v38 = vpop.f32.mrf.mxu0 }
 0x126   : > { %v1294_v40 = vpop.eup %1293  ;;  %v838_v41 = vadd.f32 1.0, %v1292_v37  ;;  %v1068_v42 = vmul.f32 -1.442695, %v768_v36  ;;  %v674_v43 = vadd.f32 %v1131_v35, %v1503_v50 }
 0x127   : > { %882 = vst [vmem:[%s1518_s27 + $0x20] sm:$0xff] %v1294_v40  ;;  %v1133_v44 = vpop.f32.mrf.mxu0 }
 0x128   : > { %1307 = vrcp.f32 %v838_v41  ;;  %v1134_v45 = vadd.f32 %v1133_v44, %v1132_v38  ;;  %v771_v46 = vadd.f32 %v770_v39, %v674_v43 }
 0x129   : > { %v1296_v47 = vpop.eup %1295  ;;  %1309 = vpow2.f32 %v1068_v42  ;;  %v1135_v48 = vpop.f32.mrf.mxu0 }
 0x12a   : > { %v1298_v49 = vpop.eup %1297  ;;  %v839_v51 = vadd.f32 1.0, %v1296_v47  ;;  %v679_v52 = vadd.f32 %v1134_v45, %v1503_v50  ;;  %v1069_v53 = vmul.f32 -1.442695, %v771_v46 }
 0x12b   : > { %883 = vst [vmem:[%s1518_s27 + $0x28] sm:$0xff] %v1298_v49  ;;  %v1136_v54 = vpop.f32.mrf.mxu0 }
 0x12c   : > { %1311 = vrcp.f32 %v839_v51  ;;  %v776_v55 = vadd.f32 %v1184_v9, %v679_v52  ;;  %v1137_v56 = vadd.f32 %v1136_v54, %v1135_v48 }
 0x12d   : > { %v1300_v57 = vpop.eup %1299  ;;  %1313 = vpow2.f32 %v1069_v53 }
 0x12e   : > { %v1302_v58 = vpop.eup %1301  ;;  %v840_v59 = vadd.f32 1.0, %v1300_v57  ;;  %v1070_v60 = vmul.f32 -1.442695, %v776_v55  ;;  %v682_v61 = vadd.f32 %v1137_v56, %v1503_v50 }
 0x12f   : > { %884 = vst [vmem:[%s1518_s27 + $0x30] sm:$0xff] %v1302_v58 }
 0x130   : > { %1315 = vrcp.f32 %v840_v59  ;;  %v779_v62 = vadd.f32 %v1185_v29, %v682_v61 }
 0x131   : > { %v1304_v63 = vpop.eup %1303  ;;  %1317 = vpow2.f32 %v1070_v60 }
 0x132   : > { %v1306_v0 = vpop.eup %1305  ;;  %v841_v1 = vadd.f32 1.0, %v1304_v63  ;;  %v1071_v2 = vmul.f32 -1.442695, %v779_v62 }
 0x133   : > { %885 = vst [vmem:[%s1518_s27 + $0x38] sm:$0xff] %v1306_v0 }
 0x134   : > { %1319 = vrcp.f32 %v841_v1 }
 0x135   : > { %v1308_v3 = vpop.eup %1307  ;;  %1321 = vpow2.f32 %v1071_v2 }
 0x136   : > { %v1310_v4 = vpop.eup %1309  ;;  %886 = vst [vmem:[%s1518_s27 + $0x40] sm:$0xff] %v1308_v3 }
 0x137   : > { %v842_v5 = vadd.f32 1.0, %v1310_v4 }
 0x139   : > { %v1312_v6 = vpop.eup %1311  ;;  %1323 = vrcp.f32 %v842_v5 }
 0x13a   : > { %v1314_v50 = vpop.eup %1313  ;;  %887 = vst [vmem:[%s1518_s27 + $0x48] sm:$0xff] %v1312_v6 }
 0x13b   : > { %v843_v7 = vadd.f32 1.0, %v1314_v50 }
 0x13d   : > { %v1316_v8 = vpop.eup %1315  ;;  %1325 = vrcp.f32 %v843_v7 }
 0x13e   : > { %v1318_v9 = vpop.eup %1317  ;;  %888 = vst [vmem:[%s1518_s27 + $0x50] sm:$0xff] %v1316_v8 }
 0x13f   : > { %v844_v10 = vadd.f32 1.0, %v1318_v9 }
 0x141   : > { %v1320_v11 = vpop.eup %1319  ;;  %1327 = vrcp.f32 %v844_v10 }
 0x142   : > { %v1322_v12 = vpop.eup %1321  ;;  %889 = vst [vmem:[%s1518_s27 + $0x58] sm:$0xff] %v1320_v11 }
 0x143   : > { %v845_v13 = vadd.f32 1.0, %v1322_v12 }
 0x145   : > { %1329 = vrcp.f32 %v845_v13 }
 0x146   : > { %v1324_v14 = vpop.eup %1323 }
 0x147   : > { %890 = vst [vmem:[%s1518_s27 + $0x60] sm:$0xff] %v1324_v14 }
 0x14a   : > { %v1326_v15 = vpop.eup %1325 }
 0x14b   : > { %891 = vst [vmem:[%s1518_s27 + $0x68] sm:$0xff] %v1326_v15 }
 0x14e   : > { %v1328_v16 = vpop.eup %1327 }
 0x14f   : > { %892 = vst [vmem:[%s1518_s27 + $0x70] sm:$0xff] %v1328_v16 }
 0x152   : > { %v1330_v17 = vpop.eup %1329 }
 0x153   : > { %893 = vst [vmem:[%s1518_s27 + $0x78] sm:$0xff] %v1330_v17 }
 0x154 PF: > { %s13_s14 = sadd.s32 1, %s1353_s14   ;;  %s1556_s12 = smov %s1349_s13 }
 0x155   : > { %p10_p5 = scmp.ge.s32.totalorder %s13_s14, 20   ;;  %s1557_s13 = smov %s1559_s15 }
 0x157   :  { %12 = sbr.rel (!%p10_p5) target bundleno = 2 (0x2), region = 68 }

</bundles_post_ra>
